<compile_context>
chip_gen: v7x
topology: tpu7x:2x2x1
jax: 0.10.0
libtpu: 0.0.40
codegen_flags: <defaults>
</compile_context>

<pallas_src>
import functools

import numpy as np

import jax
import jax.numpy as jnp
from jax import lax
from jax.experimental import pallas as pl
from jax.experimental.pallas import tpu as pltpu

NOUT_PAD = 128  # fc output columns padded 2 -> 128 for an unmasked, lane-dense store


def _lenet1_kernel(x_ref, m1_ref, b1_ref, m2_ref, b2_ref, mfc_ref, bfc_ref,
                   out_ref, z1_acc, p1_scr, z2_acc, s2_scr, fc_scr, *, bt):
    """One batch tile of `bt` images per grid step (8 sublane rows per image).

    x_ref  : (8, bt*8, 128) bf16  pre-shifted image slabs: slab a, row b*8+v is padded
                                  image row 4v+a of image b, (w,c)-flattened, lane-padded.
    m1_ref : (5, 128, 224) bf16   conv1 width-Toeplitz slabs (K padded 96->128).
    m2_ref : (5, 224, 320) bf16   conv2 slabs (pool1 width-avg and 0.25 folded in).
    mfc_ref: (5, 320, 128) bf16   fc1 slabs (pool2 width-avg, 0.25, flatten reorder folded).
    out_ref: (bt, 128) f32        row b, cols 0:2 hold image b's two logits.
    """
    f32 = jnp.float32
    bf16 = jnp.bfloat16
    bt8 = bt * 8

    # ---- conv1 (5x5, pad 2): output rows grouped by (row mod 4); rows v=7 per image are
    #      junk and never read back.  kh stays outer so each RHS slab is MXU-resident.
    for kh in range(5):
        m1k = m1_ref[kh]                                        # (128, 224) bf16
        for s in range(4):
            d = jnp.dot(x_ref[s + kh], m1k, preferred_element_type=f32)
            if kh == 0:
                z1_acc[s] = d
            else:
                z1_acc[s] += d

    # bias + ReLU, then the height half of avgpool1 (width half + 1/4 folded into m2).
    b1 = b1_ref[...]                                            # (1, 224) f32
    for par in range(2):
        p1 = (jnp.maximum(z1_acc[2 * par] + b1, 0.0) +
              jnp.maximum(z1_acc[2 * par + 1] + b1, 0.0))       # (bt8, 224) f32
        p1_scr[par, :bt8, :] = p1
        p1_scr[par, bt8:, :] = jnp.zeros((8, 224), f32)         # tail feeds only junk rows

    # ---- conv2 (5x5, valid) on the pooled map; output rows grouped by parity.  LHS is an
    #      aligned f32 offset-slice (offset 0..2 rows), cast to bf16 for the MXU.
    for kh in range(5):
        m2k = m2_ref[kh]                                        # (224, 320) bf16
        for par in range(2):
            a = par + kh
            ps = p1_scr[a % 2, (a // 2):(a // 2) + bt8, :].astype(bf16)
            d = jnp.dot(ps, m2k, preferred_element_type=f32)
            if kh == 0:
                z2_acc[par] = d
            else:
                z2_acc[par] += d

    b2 = b2_ref[...]                                            # (1, 320) f32
    s2 = (jnp.maximum(z2_acc[0] + b2, 0.0) +
          jnp.maximum(z2_acc[1] + b2, 0.0))                     # (bt8, 320) f32
    s2_scr[...] = s2.astype(bf16)

    # ---- fc1.  Per image: out = bfc + sum_u s2[row u] @ mfc[u].  We keep M = bt*8 filled
    #      and select the valid row per pooled-row index u with a (row % 8 == u) mask,
    #      then reduce the 8 rows of each image group.
    # TODO(synk): nn.Dropout(0.5) training-mode masking not implemented; eval/inference
    # semantics (identity) are used here.
    rmod = lax.broadcasted_iota(jnp.int32, (bt8, 1), 0) % 8
    s2b = s2_scr[...]
    for u in range(5):
        y = jnp.dot(s2b, mfc_ref[u], preferred_element_type=f32)     # (bt8, 128)
        ym = jnp.where(rmod == u, y, 0.0)
        if u == 0:
            fc_scr[...] = ym
        else:
            fc_scr[...] += ym
    out = fc_scr[...].reshape(bt, 8, 128).sum(axis=1) + bfc_ref[...]  # (bt, 128)
    out_ref[...] = out.astype(out_ref.dtype)


def prepare_params(params):
    """Host-side, one-time prep: expand conv weights into width-Toeplitz matmul slabs
    (bf16), fold pooling (width half + 0.25) into the consuming layer, tile biases."""
    w1, b1, w2, b2, wfc, bfc = [np.asarray(p, np.float32) for p in params]

    # conv1: M1[kh][q*3+c, j*8+o] = w1[o, c, kh, q-j]  (0 <= q-j <= 4); K padded 96 -> 128.
    q = np.arange(32)[:, None]
    j = np.arange(28)[None, :]
    kw = q - j
    valid = (kw >= 0) & (kw < 5)
    g = np.transpose(w1, (2, 3, 1, 0))[:, np.clip(kw, 0, 4), :, :]    # (5, 32, 28, 3, 8)
    g = g * valid[None, :, :, None, None]
    m1 = np.transpose(g, (0, 1, 3, 2, 4)).reshape(5, 96, 224)
    m1p = np.zeros((5, 128, 224), np.float32)
    m1p[:, :96, :] = m1

    # conv2 (+ avgpool1 width half, x0.25):
    # M2[kh][q*8+c, jc*32+o] = 0.25 * w2[o, c, kh, q//2 - jc]  (0 <= q//2 - jc <= 4).
    q2 = np.arange(28)[:, None]
    jc = np.arange(10)[None, :]
    kw2 = q2 // 2 - jc
    valid2 = (kw2 >= 0) & (kw2 < 5)
    g2 = np.transpose(w2, (2, 3, 1, 0))[:, np.clip(kw2, 0, 4), :, :]  # (5, 28, 10, 8, 32)
    g2 = g2 * valid2[None, :, :, None, None] * 0.25
    m2 = np.ascontiguousarray(np.transpose(g2, (0, 1, 3, 2, 4)).reshape(5, 224, 320))

    # fc1 (+ avgpool2 width half, x0.25, PyTorch (c, h, w) flatten order), padded to 128.
    wfc3 = wfc.reshape(2, 32, 5, 5)                                   # (k, o, i2, j2)
    q3 = np.arange(10)
    g3 = wfc3[:, :, :, q3 // 2]                                       # (k, o, i2, q)
    mfc = np.zeros((5, 320, NOUT_PAD), np.float32)
    mfc[:, :, :2] = 0.25 * np.transpose(g3, (2, 3, 1, 0)).reshape(5, 320, 2)

    b1r = np.tile(b1, 28)[None, :]                                    # (1, 224)
    b2r = np.tile(b2, 10)[None, :]                                    # (1, 320)
    bfcr = np.zeros((1, NOUT_PAD), np.float32)
    bfcr[0, :2] = bfc

    return (jnp.asarray(m1p, jnp.bfloat16), jnp.asarray(b1r),
            jnp.asarray(m2, jnp.bfloat16), jnp.asarray(b2r),
            jnp.asarray(mfc, jnp.bfloat16), jnp.asarray(bfcr))


def lenet1_forward(prep, x_nchw, block_batch=32):
    m1, b1r, m2, b2r, mfc, bfcr = prep
    B = x_nchw.shape[0]

    # Batch tile: 8 sublane rows per image -> M = Bt*8 (256 at Bt=32, filling v6e/v7x MXU;
    # use block_batch=16 on v5e).  Shrink for tiny batches to avoid pointless padding.
    Bt = min(block_batch, max(8, ((B + 7) // 8) * 8))
    G = (B + Bt - 1) // Bt
    Bpad = G * Bt
    BT8 = Bt * 8

    # Host-side layout (bf16): 8 pre-shifted row slabs per image so every conv1 LHS slice
    # is an aligned offset-0 (BT8, 128) block.  slab a, row b*8+v = padded row 4v+a.
    x = jnp.transpose(x_nchw, (0, 2, 3, 1)).astype(jnp.bfloat16)       # (B, 28, 28, 3)
    x = jnp.pad(x, ((0, Bpad - B), (2, 2), (2, 2), (0, 0)))            # (Bpad, 32, 32, 3)
    x = x.reshape(Bpad, 32, 96)
    x = jnp.pad(x, ((0, 0), (0, 4), (0, 32)))                          # (Bpad, 36, 128)
    idx = jnp.arange(8)[:, None] + 4 * jnp.arange(8)[None, :]          # idx[a, v] = 4v + a
    xs8 = x[:, idx, :]                                                 # (Bpad, 8, 8, 128)
    xs8 = xs8.reshape(G, Bt, 8, 8, 128)
    xs8 = jnp.transpose(xs8, (0, 2, 1, 3, 4)).reshape(G, 8, BT8, 128)  # (G, 8, BT8, 128)

    out = pl.pallas_call(
        functools.partial(_lenet1_kernel, bt=Bt),
        out_shape=jax.ShapeDtypeStruct((Bpad, NOUT_PAD), jnp.float32),
        grid=(G,),
        in_specs=[
            pl.BlockSpec((None, 8, BT8, 128), lambda g: (g, 0, 0, 0)),     # image slabs
            pl.BlockSpec((5, 128, 224), lambda g: (0, 0, 0),
                         pipeline_mode=pl.Buffered(1)),                    # conv1 slabs
            pl.BlockSpec((1, 224), lambda g: (0, 0),
                         pipeline_mode=pl.Buffered(1)),
            pl.BlockSpec((5, 224, 320), lambda g: (0, 0, 0),
                         pipeline_mode=pl.Buffered(1)),                    # conv2 slabs
            pl.BlockSpec((1, 320), lambda g: (0, 0),
                         pipeline_mode=pl.Buffered(1)),
            pl.BlockSpec((5, 320, NOUT_PAD), lambda g: (0, 0, 0),
                         pipeline_mode=pl.Buffered(1)),                    # fc slabs
            pl.BlockSpec((1, NOUT_PAD), lambda g: (0, 0),
                         pipeline_mode=pl.Buffered(1)),
        ],
        out_specs=pl.BlockSpec((Bt, NOUT_PAD), lambda g: (g, 0)),
        scratch_shapes=[
            pltpu.VMEM((4, BT8, 224), jnp.float32),       # conv1 accumulators (mod-4 rows)
            pltpu.VMEM((2, BT8 + 8, 224), jnp.float32),   # pooled conv1 rows (+8 tail rows)
            pltpu.VMEM((2, BT8, 320), jnp.float32),       # conv2 accumulators (parity rows)
            pltpu.VMEM((BT8, 320), jnp.bfloat16),         # pooled conv2 rows (fc LHS)
            pltpu.VMEM((BT8, 128), jnp.float32),          # masked fc accumulator
        ],
        compiler_params=pltpu.CompilerParams(
            dimension_semantics=("parallel",),
            vmem_limit_bytes=32 * 1024 * 1024,
        ),
    )(xs8, m1, b1r, m2, b2r, mfc, bfcr)

    return out[:B, :2]                                                 # (B, 2) logits


def lenet1_reference(params, x):
    """Plain-JAX reference matching the PyTorch forward (eval mode), NCHW throughout."""
    w1, b1, w2, b2, wfc, bfc = params
    dn = ("NCHW", "OIHW", "NCHW")
    hp = lax.Precision.HIGHEST
    y = lax.conv_general_dilated(x, w1, (1, 1), ((2, 2), (2, 2)),
                                 dimension_numbers=dn, precision=hp)
    y = jax.nn.relu(y + b1[None, :, None, None])
    y = y.reshape(y.shape[0], y.shape[1], 14, 2, 14, 2).mean(axis=(3, 5))
    y = lax.conv_general_dilated(y, w2, (1, 1), ((0, 0), (0, 0)),
                                 dimension_numbers=dn, precision=hp)
    y = jax.nn.relu(y + b2[None, :, None, None])
    y = y.reshape(y.shape[0], y.shape[1], 5, 2, 5, 2).mean(axis=(3, 5))
    y = y.reshape(y.shape[0], -1)
    return jnp.dot(y, wfc.T, precision=hp) + bfc


if __name__ == "__main__":
    key = jax.random.PRNGKey(0)
    ks = jax.random.split(key, 7)
    # Deterministic synthetic parameters (shapes from LeNet1.__init__).
    w1 = 0.05 * jax.random.normal(ks[0], (8, 3, 5, 5), jnp.float32)
    b1 = 0.05 * jax.random.normal(ks[1], (8,), jnp.float32)
    w2 = 0.05 * jax.random.normal(ks[2], (32, 8, 5, 5), jnp.float32)
    b2 = 0.05 * jax.random.normal(ks[3], (32,), jnp.float32)
    wfc = 0.05 * jax.random.normal(ks[4], (2, 32 * 5 * 5), jnp.float32)
    bfc = 0.05 * jax.random.normal(ks[5], (2,), jnp.float32)
    params = (w1, b1, w2, b2, wfc, bfc)

    # The forward implies 28x28 RGB inputs (28 -> pool 14 -> conv 10 -> pool 5 -> 32*5*5).
    x = jax.random.normal(ks[6], (2, 3, 28, 28), jnp.float32)

    prep = prepare_params(params)
    fwd = jax.jit(lenet1_forward)
    out = jax.block_until_ready(fwd(prep, x))
    ref = jax.block_until_ready(lenet1_reference(params, x))

    assert out.shape == (2, 2), out.shape
    assert jnp.allclose(out, ref, atol=5e-2, rtol=5e-2), (out, ref)
    print("KERNEL_OK")
</pallas_src>

<mosaic_0001>
module attributes {stable_mosaic.version = 11 : i64} {
  func.func @_lenet1_kernel(%arg0: i32, %arg1: memref<1x8x64x128xbf16, #tpu.memory_space<vmem>>, %arg2: memref<5x128x224xbf16, #tpu.memory_space<vmem>>, %arg3: memref<1x224xf32, #tpu.memory_space<vmem>>, %arg4: memref<5x224x320xbf16, #tpu.memory_space<vmem>>, %arg5: memref<1x320xf32, #tpu.memory_space<vmem>>, %arg6: memref<5x320x128xbf16, #tpu.memory_space<vmem>>, %arg7: memref<1x128xf32, #tpu.memory_space<vmem>>, %arg8: memref<8x128xf32, #tpu.memory_space<vmem>>, %arg9: memref<4x64x224xf32, #tpu.memory_space<vmem>>, %arg10: memref<2x72x224xf32, #tpu.memory_space<vmem>>, %arg11: memref<2x64x320xf32, #tpu.memory_space<vmem>>, %arg12: memref<64x320xbf16, #tpu.memory_space<vmem>>, %arg13: memref<64x128xf32, #tpu.memory_space<vmem>>) attributes {dimension_semantics = [#tpu.dimension_semantics<parallel>], iteration_bounds = array<i64: 1>, scalar_prefetch = 0 : i64, scratch_operands = 5 : i64, tpu.core_type = #tpu.core_type<tc>, window_params = [{transform_indices = @transform_0, window_bounds = array<i64: 1, 8, 64, 128>}, {pipeline_mode = #tpu.pipeline_mode<synchronous>, transform_indices = @transform_1, window_bounds = array<i64: 5, 128, 224>}, {pipeline_mode = #tpu.pipeline_mode<synchronous>, transform_indices = @transform_2, window_bounds = array<i64: 1, 224>}, {pipeline_mode = #tpu.pipeline_mode<synchronous>, transform_indices = @transform_3, window_bounds = array<i64: 5, 224, 320>}, {pipeline_mode = #tpu.pipeline_mode<synchronous>, transform_indices = @transform_4, window_bounds = array<i64: 1, 320>}, {pipeline_mode = #tpu.pipeline_mode<synchronous>, transform_indices = @transform_5, window_bounds = array<i64: 5, 320, 128>}, {pipeline_mode = #tpu.pipeline_mode<synchronous>, transform_indices = @transform_6, window_bounds = array<i64: 1, 128>}, {transform_indices = @transform_7, window_bounds = array<i64: 8, 128>}]} {
    %c0 = arith.constant 0 : index
    %c0_0 = arith.constant 0 : index
    %c0_1 = arith.constant 0 : index
    %0 = vector.load %arg2[%c0, %c0_0, %c0_1] : memref<5x128x224xbf16, #tpu.memory_space<vmem>>, vector<1x128x224xbf16>
    %1 = vector.shape_cast %0 : vector<1x128x224xbf16> to vector<128x224xbf16>
    %c0_2 = arith.constant 0 : index
    %c0_3 = arith.constant 0 : index
    %c0_4 = arith.constant 0 : index
    %c0_5 = arith.constant 0 : index
    %2 = vector.load %arg1[%c0_2, %c0_3, %c0_4, %c0_5] : memref<1x8x64x128xbf16, #tpu.memory_space<vmem>>, vector<1x1x64x128xbf16>
    %3 = vector.shape_cast %2 : vector<1x1x64x128xbf16> to vector<64x128xbf16>
    %cst = arith.constant dense<0.000000e+00> : vector<64x224xf32>
    %4 = tpu.matmul %3, %1, %cst {dimension_numbers = #tpu.dot_dimension_numbers<[1], [0], [0], [1], [0, 0, 1, 1], [], []>} : vector<64x128xbf16>, vector<128x224xbf16>, vector<64x224xf32> -> vector<64x224xf32>
    %c0_6 = arith.constant 0 : index
    %c0_7 = arith.constant 0 : index
    %c0_8 = arith.constant 0 : index
    %5 = vector.load %arg9[%c0_6, %c0_7, %c0_8] : memref<4x64x224xf32, #tpu.memory_space<vmem>>, vector<1x64x224xf32>
    %6 = vector.shape_cast %5 : vector<1x64x224xf32> to vector<64x224xf32>
    %7 = vector.shape_cast %4 : vector<64x224xf32> to vector<1x64x224xf32>
    tpu.vector_store %arg9[%c0_6, %c0_7, %c0_8], %7 {strides = array<i32>} : memref<4x64x224xf32, #tpu.memory_space<vmem>>, vector<1x64x224xf32>,
    %c0_9 = arith.constant 0 : index
    %c1 = arith.constant 1 : index
    %c0_10 = arith.constant 0 : index
    %c0_11 = arith.constant 0 : index
    %8 = vector.load %arg1[%c0_9, %c1, %c0_10, %c0_11] : memref<1x8x64x128xbf16, #tpu.memory_space<vmem>>, vector<1x1x64x128xbf16>
    %9 = vector.shape_cast %8 : vector<1x1x64x128xbf16> to vector<64x128xbf16>
    %cst_12 = arith.constant dense<0.000000e+00> : vector<64x224xf32>
    %10 = tpu.matmul %9, %1, %cst_12 {dimension_numbers = #tpu.dot_dimension_numbers<[1], [0], [0], [1], [0, 0, 1, 1], [], []>} : vector<64x128xbf16>, vector<128x224xbf16>, vector<64x224xf32> -> vector<64x224xf32>
    %c1_13 = arith.constant 1 : index
    %c0_14 = arith.constant 0 : index
    %c0_15 = arith.constant 0 : index
    %11 = vector.load %arg9[%c1_13, %c0_14, %c0_15] : memref<4x64x224xf32, #tpu.memory_space<vmem>>, vector<1x64x224xf32>
    %12 = vector.shape_cast %11 : vector<1x64x224xf32> to vector<64x224xf32>
    %13 = vector.shape_cast %10 : vector<64x224xf32> to vector<1x64x224xf32>
    tpu.vector_store %arg9[%c1_13, %c0_14, %c0_15], %13 {strides = array<i32>} : memref<4x64x224xf32, #tpu.memory_space<vmem>>, vector<1x64x224xf32>,
    %c0_16 = arith.constant 0 : index
    %c2 = arith.constant 2 : index
    %c0_17 = arith.constant 0 : index
    %c0_18 = arith.constant 0 : index
    %14 = vector.load %arg1[%c0_16, %c2, %c0_17, %c0_18] : memref<1x8x64x128xbf16, #tpu.memory_space<vmem>>, vector<1x1x64x128xbf16>
    %15 = vector.shape_cast %14 : vector<1x1x64x128xbf16> to vector<64x128xbf16>
    %cst_19 = arith.constant dense<0.000000e+00> : vector<64x224xf32>
    %16 = tpu.matmul %15, %1, %cst_19 {dimension_numbers = #tpu.dot_dimension_numbers<[1], [0], [0], [1], [0, 0, 1, 1], [], []>} : vector<64x128xbf16>, vector<128x224xbf16>, vector<64x224xf32> -> vector<64x224xf32>
    %c2_20 = arith.constant 2 : index
    %c0_21 = arith.constant 0 : index
    %c0_22 = arith.constant 0 : index
    %17 = vector.load %arg9[%c2_20, %c0_21, %c0_22] : memref<4x64x224xf32, #tpu.memory_space<vmem>>, vector<1x64x224xf32>
    %18 = vector.shape_cast %17 : vector<1x64x224xf32> to vector<64x224xf32>
    %19 = vector.shape_cast %16 : vector<64x224xf32> to vector<1x64x224xf32>
    tpu.vector_store %arg9[%c2_20, %c0_21, %c0_22], %19 {strides = array<i32>} : memref<4x64x224xf32, #tpu.memory_space<vmem>>, vector<1x64x224xf32>,
    %c0_23 = arith.constant 0 : index
    %c3 = arith.constant 3 : index
    %c0_24 = arith.constant 0 : index
    %c0_25 = arith.constant 0 : index
    %20 = vector.load %arg1[%c0_23, %c3, %c0_24, %c0_25] : memref<1x8x64x128xbf16, #tpu.memory_space<vmem>>, vector<1x1x64x128xbf16>
    %21 = vector.shape_cast %20 : vector<1x1x64x128xbf16> to vector<64x128xbf16>
    %cst_26 = arith.constant dense<0.000000e+00> : vector<64x224xf32>
    %22 = tpu.matmul %21, %1, %cst_26 {dimension_numbers = #tpu.dot_dimension_numbers<[1], [0], [0], [1], [0, 0, 1, 1], [], []>} : vector<64x128xbf16>, vector<128x224xbf16>, vector<64x224xf32> -> vector<64x224xf32>
    %c3_27 = arith.constant 3 : index
    %c0_28 = arith.constant 0 : index
    %c0_29 = arith.constant 0 : index
    %23 = vector.load %arg9[%c3_27, %c0_28, %c0_29] : memref<4x64x224xf32, #tpu.memory_space<vmem>>, vector<1x64x224xf32>
    %24 = vector.shape_cast %23 : vector<1x64x224xf32> to vector<64x224xf32>
    %25 = vector.shape_cast %22 : vector<64x224xf32> to vector<1x64x224xf32>
    tpu.vector_store %arg9[%c3_27, %c0_28, %c0_29], %25 {strides = array<i32>} : memref<4x64x224xf32, #tpu.memory_space<vmem>>, vector<1x64x224xf32>,
    %c1_30 = arith.constant 1 : index
    %c0_31 = arith.constant 0 : index
    %c0_32 = arith.constant 0 : index
    %26 = vector.load %arg2[%c1_30, %c0_31, %c0_32] : memref<5x128x224xbf16, #tpu.memory_space<vmem>>, vector<1x128x224xbf16>
    %27 = vector.shape_cast %26 : vector<1x128x224xbf16> to vector<128x224xbf16>
    %c0_33 = arith.constant 0 : index
    %c1_34 = arith.constant 1 : index
    %c0_35 = arith.constant 0 : index
    %c0_36 = arith.constant 0 : index
    %28 = vector.load %arg1[%c0_33, %c1_34, %c0_35, %c0_36] : memref<1x8x64x128xbf16, #tpu.memory_space<vmem>>, vector<1x1x64x128xbf16>
    %29 = vector.shape_cast %28 : vector<1x1x64x128xbf16> to vector<64x128xbf16>
    %cst_37 = arith.constant dense<0.000000e+00> : vector<64x224xf32>
    %30 = tpu.matmul %29, %27, %cst_37 {dimension_numbers = #tpu.dot_dimension_numbers<[1], [0], [0], [1], [0, 0, 1, 1], [], []>} : vector<64x128xbf16>, vector<128x224xbf16>, vector<64x224xf32> -> vector<64x224xf32>
    %c0_38 = arith.constant 0 : index
    %c0_39 = arith.constant 0 : index
    %c0_40 = arith.constant 0 : index
    %31 = vector.load %arg9[%c0_38, %c0_39, %c0_40] : memref<4x64x224xf32, #tpu.memory_space<vmem>>, vector<1x64x224xf32>
    %32 = vector.shape_cast %31 : vector<1x64x224xf32> to vector<64x224xf32>
    %33 = arith.addf %32, %30 : vector<64x224xf32>
    %c0_41 = arith.constant 0 : index
    %c0_42 = arith.constant 0 : index
    %c0_43 = arith.constant 0 : index
    %34 = vector.load %arg9[%c0_41, %c0_42, %c0_43] : memref<4x64x224xf32, #tpu.memory_space<vmem>>, vector<1x64x224xf32>
    %35 = vector.shape_cast %34 : vector<1x64x224xf32> to vector<64x224xf32>
    %36 = vector.shape_cast %33 : vector<64x224xf32> to vector<1x64x224xf32>
    tpu.vector_store %arg9[%c0_41, %c0_42, %c0_43], %36 {strides = array<i32>} : memref<4x64x224xf32, #tpu.memory_space<vmem>>, vector<1x64x224xf32>,
    %c0_44 = arith.constant 0 : index
    %c2_45 = arith.constant 2 : index
    %c0_46 = arith.constant 0 : index
    %c0_47 = arith.constant 0 : index
    %37 = vector.load %arg1[%c0_44, %c2_45, %c0_46, %c0_47] : memref<1x8x64x128xbf16, #tpu.memory_space<vmem>>, vector<1x1x64x128xbf16>
    %38 = vector.shape_cast %37 : vector<1x1x64x128xbf16> to vector<64x128xbf16>
    %cst_48 = arith.constant dense<0.000000e+00> : vector<64x224xf32>
    %39 = tpu.matmul %38, %27, %cst_48 {dimension_numbers = #tpu.dot_dimension_numbers<[1], [0], [0], [1], [0, 0, 1, 1], [], []>} : vector<64x128xbf16>, vector<128x224xbf16>, vector<64x224xf32> -> vector<64x224xf32>
    %c1_49 = arith.constant 1 : index
    %c0_50 = arith.constant 0 : index
    %c0_51 = arith.constant 0 : index
    %40 = vector.load %arg9[%c1_49, %c0_50, %c0_51] : memref<4x64x224xf32, #tpu.memory_space<vmem>>, vector<1x64x224xf32>
    %41 = vector.shape_cast %40 : vector<1x64x224xf32> to vector<64x224xf32>
    %42 = arith.addf %41, %39 : vector<64x224xf32>
    %c1_52 = arith.constant 1 : index
    %c0_53 = arith.constant 0 : index
    %c0_54 = arith.constant 0 : index
    %43 = vector.load %arg9[%c1_52, %c0_53, %c0_54] : memref<4x64x224xf32, #tpu.memory_space<vmem>>, vector<1x64x224xf32>
    %44 = vector.shape_cast %43 : vector<1x64x224xf32> to vector<64x224xf32>
    %45 = vector.shape_cast %42 : vector<64x224xf32> to vector<1x64x224xf32>
    tpu.vector_store %arg9[%c1_52, %c0_53, %c0_54], %45 {strides = array<i32>} : memref<4x64x224xf32, #tpu.memory_space<vmem>>, vector<1x64x224xf32>,
    %c0_55 = arith.constant 0 : index
    %c3_56 = arith.constant 3 : index
    %c0_57 = arith.constant 0 : index
    %c0_58 = arith.constant 0 : index
    %46 = vector.load %arg1[%c0_55, %c3_56, %c0_57, %c0_58] : memref<1x8x64x128xbf16, #tpu.memory_space<vmem>>, vector<1x1x64x128xbf16>
    %47 = vector.shape_cast %46 : vector<1x1x64x128xbf16> to vector<64x128xbf16>
    %cst_59 = arith.constant dense<0.000000e+00> : vector<64x224xf32>
    %48 = tpu.matmul %47, %27, %cst_59 {dimension_numbers = #tpu.dot_dimension_numbers<[1], [0], [0], [1], [0, 0, 1, 1], [], []>} : vector<64x128xbf16>, vector<128x224xbf16>, vector<64x224xf32> -> vector<64x224xf32>
    %c2_60 = arith.constant 2 : index
    %c0_61 = arith.constant 0 : index
    %c0_62 = arith.constant 0 : index
    %49 = vector.load %arg9[%c2_60, %c0_61, %c0_62] : memref<4x64x224xf32, #tpu.memory_space<vmem>>, vector<1x64x224xf32>
    %50 = vector.shape_cast %49 : vector<1x64x224xf32> to vector<64x224xf32>
    %51 = arith.addf %50, %48 : vector<64x224xf32>
    %c2_63 = arith.constant 2 : index
    %c0_64 = arith.constant 0 : index
    %c0_65 = arith.constant 0 : index
    %52 = vector.load %arg9[%c2_63, %c0_64, %c0_65] : memref<4x64x224xf32, #tpu.memory_space<vmem>>, vector<1x64x224xf32>
    %53 = vector.shape_cast %52 : vector<1x64x224xf32> to vector<64x224xf32>
    %54 = vector.shape_cast %51 : vector<64x224xf32> to vector<1x64x224xf32>
    tpu.vector_store %arg9[%c2_63, %c0_64, %c0_65], %54 {strides = array<i32>} : memref<4x64x224xf32, #tpu.memory_space<vmem>>, vector<1x64x224xf32>,
    %c0_66 = arith.constant 0 : index
    %c4 = arith.constant 4 : index
    %c0_67 = arith.constant 0 : index
    %c0_68 = arith.constant 0 : index
    %55 = vector.load %arg1[%c0_66, %c4, %c0_67, %c0_68] : memref<1x8x64x128xbf16, #tpu.memory_space<vmem>>, vector<1x1x64x128xbf16>
    %56 = vector.shape_cast %55 : vector<1x1x64x128xbf16> to vector<64x128xbf16>
    %cst_69 = arith.constant dense<0.000000e+00> : vector<64x224xf32>
    %57 = tpu.matmul %56, %27, %cst_69 {dimension_numbers = #tpu.dot_dimension_numbers<[1], [0], [0], [1], [0, 0, 1, 1], [], []>} : vector<64x128xbf16>, vector<128x224xbf16>, vector<64x224xf32> -> vector<64x224xf32>
    %c3_70 = arith.constant 3 : index
    %c0_71 = arith.constant 0 : index
    %c0_72 = arith.constant 0 : index
    %58 = vector.load %arg9[%c3_70, %c0_71, %c0_72] : memref<4x64x224xf32, #tpu.memory_space<vmem>>, vector<1x64x224xf32>
    %59 = vector.shape_cast %58 : vector<1x64x224xf32> to vector<64x224xf32>
    %60 = arith.addf %59, %57 : vector<64x224xf32>
    %c3_73 = arith.constant 3 : index
    %c0_74 = arith.constant 0 : index
    %c0_75 = arith.constant 0 : index
    %61 = vector.load %arg9[%c3_73, %c0_74, %c0_75] : memref<4x64x224xf32, #tpu.memory_space<vmem>>, vector<1x64x224xf32>
    %62 = vector.shape_cast %61 : vector<1x64x224xf32> to vector<64x224xf32>
    %63 = vector.shape_cast %60 : vector<64x224xf32> to vector<1x64x224xf32>
    tpu.vector_store %arg9[%c3_73, %c0_74, %c0_75], %63 {strides = array<i32>} : memref<4x64x224xf32, #tpu.memory_space<vmem>>, vector<1x64x224xf32>,
    %c2_76 = arith.constant 2 : index
    %c0_77 = arith.constant 0 : index
    %c0_78 = arith.constant 0 : index
    %64 = vector.load %arg2[%c2_76, %c0_77, %c0_78] : memref<5x128x224xbf16, #tpu.memory_space<vmem>>, vector<1x128x224xbf16>
    %65 = vector.shape_cast %64 : vector<1x128x224xbf16> to vector<128x224xbf16>
    %c0_79 = arith.constant 0 : index
    %c2_80 = arith.constant 2 : index
    %c0_81 = arith.constant 0 : index
    %c0_82 = arith.constant 0 : index
    %66 = vector.load %arg1[%c0_79, %c2_80, %c0_81, %c0_82] : memref<1x8x64x128xbf16, #tpu.memory_space<vmem>>, vector<1x1x64x128xbf16>
    %67 = vector.shape_cast %66 : vector<1x1x64x128xbf16> to vector<64x128xbf16>
    %cst_83 = arith.constant dense<0.000000e+00> : vector<64x224xf32>
    %68 = tpu.matmul %67, %65, %cst_83 {dimension_numbers = #tpu.dot_dimension_numbers<[1], [0], [0], [1], [0, 0, 1, 1], [], []>} : vector<64x128xbf16>, vector<128x224xbf16>, vector<64x224xf32> -> vector<64x224xf32>
    %c0_84 = arith.constant 0 : index
    %c0_85 = arith.constant 0 : index
    %c0_86 = arith.constant 0 : index
    %69 = vector.load %arg9[%c0_84, %c0_85, %c0_86] : memref<4x64x224xf32, #tpu.memory_space<vmem>>, vector<1x64x224xf32>
    %70 = vector.shape_cast %69 : vector<1x64x224xf32> to vector<64x224xf32>
    %71 = arith.addf %70, %68 : vector<64x224xf32>
    %c0_87 = arith.constant 0 : index
    %c0_88 = arith.constant 0 : index
    %c0_89 = arith.constant 0 : index
    %72 = vector.load %arg9[%c0_87, %c0_88, %c0_89] : memref<4x64x224xf32, #tpu.memory_space<vmem>>, vector<1x64x224xf32>
    %73 = vector.shape_cast %72 : vector<1x64x224xf32> to vector<64x224xf32>
    %74 = vector.shape_cast %71 : vector<64x224xf32> to vector<1x64x224xf32>
    tpu.vector_store %arg9[%c0_87, %c0_88, %c0_89], %74 {strides = array<i32>} : memref<4x64x224xf32, #tpu.memory_space<vmem>>, vector<1x64x224xf32>,
    %c0_90 = arith.constant 0 : index
    %c3_91 = arith.constant 3 : index
    %c0_92 = arith.constant 0 : index
    %c0_93 = arith.constant 0 : index
    %75 = vector.load %arg1[%c0_90, %c3_91, %c0_92, %c0_93] : memref<1x8x64x128xbf16, #tpu.memory_space<vmem>>, vector<1x1x64x128xbf16>
    %76 = vector.shape_cast %75 : vector<1x1x64x128xbf16> to vector<64x128xbf16>
    %cst_94 = arith.constant dense<0.000000e+00> : vector<64x224xf32>
    %77 = tpu.matmul %76, %65, %cst_94 {dimension_numbers = #tpu.dot_dimension_numbers<[1], [0], [0], [1], [0, 0, 1, 1], [], []>} : vector<64x128xbf16>, vector<128x224xbf16>, vector<64x224xf32> -> vector<64x224xf32>
    %c1_95 = arith.constant 1 : index
    %c0_96 = arith.constant 0 : index
    %c0_97 = arith.constant 0 : index
    %78 = vector.load %arg9[%c1_95, %c0_96, %c0_97] : memref<4x64x224xf32, #tpu.memory_space<vmem>>, vector<1x64x224xf32>
    %79 = vector.shape_cast %78 : vector<1x64x224xf32> to vector<64x224xf32>
    %80 = arith.addf %79, %77 : vector<64x224xf32>
    %c1_98 = arith.constant 1 : index
    %c0_99 = arith.constant 0 : index
    %c0_100 = arith.constant 0 : index
    %81 = vector.load %arg9[%c1_98, %c0_99, %c0_100] : memref<4x64x224xf32, #tpu.memory_space<vmem>>, vector<1x64x224xf32>
    %82 = vector.shape_cast %81 : vector<1x64x224xf32> to vector<64x224xf32>
    %83 = vector.shape_cast %80 : vector<64x224xf32> to vector<1x64x224xf32>
    tpu.vector_store %arg9[%c1_98, %c0_99, %c0_100], %83 {strides = array<i32>} : memref<4x64x224xf32, #tpu.memory_space<vmem>>, vector<1x64x224xf32>,
    %c0_101 = arith.constant 0 : index
    %c4_102 = arith.constant 4 : index
    %c0_103 = arith.constant 0 : index
    %c0_104 = arith.constant 0 : index
    %84 = vector.load %arg1[%c0_101, %c4_102, %c0_103, %c0_104] : memref<1x8x64x128xbf16, #tpu.memory_space<vmem>>, vector<1x1x64x128xbf16>
    %85 = vector.shape_cast %84 : vector<1x1x64x128xbf16> to vector<64x128xbf16>
    %cst_105 = arith.constant dense<0.000000e+00> : vector<64x224xf32>
    %86 = tpu.matmul %85, %65, %cst_105 {dimension_numbers = #tpu.dot_dimension_numbers<[1], [0], [0], [1], [0, 0, 1, 1], [], []>} : vector<64x128xbf16>, vector<128x224xbf16>, vector<64x224xf32> -> vector<64x224xf32>
    %c2_106 = arith.constant 2 : index
    %c0_107 = arith.constant 0 : index
    %c0_108 = arith.constant 0 : index
    %87 = vector.load %arg9[%c2_106, %c0_107, %c0_108] : memref<4x64x224xf32, #tpu.memory_space<vmem>>, vector<1x64x224xf32>
    %88 = vector.shape_cast %87 : vector<1x64x224xf32> to vector<64x224xf32>
    %89 = arith.addf %88, %86 : vector<64x224xf32>
    %c2_109 = arith.constant 2 : index
    %c0_110 = arith.constant 0 : index
    %c0_111 = arith.constant 0 : index
    %90 = vector.load %arg9[%c2_109, %c0_110, %c0_111] : memref<4x64x224xf32, #tpu.memory_space<vmem>>, vector<1x64x224xf32>
    %91 = vector.shape_cast %90 : vector<1x64x224xf32> to vector<64x224xf32>
    %92 = vector.shape_cast %89 : vector<64x224xf32> to vector<1x64x224xf32>
    tpu.vector_store %arg9[%c2_109, %c0_110, %c0_111], %92 {strides = array<i32>} : memref<4x64x224xf32, #tpu.memory_space<vmem>>, vector<1x64x224xf32>,
    %c0_112 = arith.constant 0 : index
    %c5 = arith.constant 5 : index
    %c0_113 = arith.constant 0 : index
    %c0_114 = arith.constant 0 : index
    %93 = vector.load %arg1[%c0_112, %c5, %c0_113, %c0_114] : memref<1x8x64x128xbf16, #tpu.memory_space<vmem>>, vector<1x1x64x128xbf16>
    %94 = vector.shape_cast %93 : vector<1x1x64x128xbf16> to vector<64x128xbf16>
    %cst_115 = arith.constant dense<0.000000e+00> : vector<64x224xf32>
    %95 = tpu.matmul %94, %65, %cst_115 {dimension_numbers = #tpu.dot_dimension_numbers<[1], [0], [0], [1], [0, 0, 1, 1], [], []>} : vector<64x128xbf16>, vector<128x224xbf16>, vector<64x224xf32> -> vector<64x224xf32>
    %c3_116 = arith.constant 3 : index
    %c0_117 = arith.constant 0 : index
    %c0_118 = arith.constant 0 : index
    %96 = vector.load %arg9[%c3_116, %c0_117, %c0_118] : memref<4x64x224xf32, #tpu.memory_space<vmem>>, vector<1x64x224xf32>
    %97 = vector.shape_cast %96 : vector<1x64x224xf32> to vector<64x224xf32>
    %98 = arith.addf %97, %95 : vector<64x224xf32>
    %c3_119 = arith.constant 3 : index
    %c0_120 = arith.constant 0 : index
    %c0_121 = arith.constant 0 : index
    %99 = vector.load %arg9[%c3_119, %c0_120, %c0_121] : memref<4x64x224xf32, #tpu.memory_space<vmem>>, vector<1x64x224xf32>
    %100 = vector.shape_cast %99 : vector<1x64x224xf32> to vector<64x224xf32>
    %101 = vector.shape_cast %98 : vector<64x224xf32> to vector<1x64x224xf32>
    tpu.vector_store %arg9[%c3_119, %c0_120, %c0_121], %101 {strides = array<i32>} : memref<4x64x224xf32, #tpu.memory_space<vmem>>, vector<1x64x224xf32>,
    %c3_122 = arith.constant 3 : index
    %c0_123 = arith.constant 0 : index
    %c0_124 = arith.constant 0 : index
    %102 = vector.load %arg2[%c3_122, %c0_123, %c0_124] : memref<5x128x224xbf16, #tpu.memory_space<vmem>>, vector<1x128x224xbf16>
    %103 = vector.shape_cast %102 : vector<1x128x224xbf16> to vector<128x224xbf16>
    %c0_125 = arith.constant 0 : index
    %c3_126 = arith.constant 3 : index
    %c0_127 = arith.constant 0 : index
    %c0_128 = arith.constant 0 : index
    %104 = vector.load %arg1[%c0_125, %c3_126, %c0_127, %c0_128] : memref<1x8x64x128xbf16, #tpu.memory_space<vmem>>, vector<1x1x64x128xbf16>
    %105 = vector.shape_cast %104 : vector<1x1x64x128xbf16> to vector<64x128xbf16>
    %cst_129 = arith.constant dense<0.000000e+00> : vector<64x224xf32>
    %106 = tpu.matmul %105, %103, %cst_129 {dimension_numbers = #tpu.dot_dimension_numbers<[1], [0], [0], [1], [0, 0, 1, 1], [], []>} : vector<64x128xbf16>, vector<128x224xbf16>, vector<64x224xf32> -> vector<64x224xf32>
    %c0_130 = arith.constant 0 : index
    %c0_131 = arith.constant 0 : index
    %c0_132 = arith.constant 0 : index
    %107 = vector.load %arg9[%c0_130, %c0_131, %c0_132] : memref<4x64x224xf32, #tpu.memory_space<vmem>>, vector<1x64x224xf32>
    %108 = vector.shape_cast %107 : vector<1x64x224xf32> to vector<64x224xf32>
    %109 = arith.addf %108, %106 : vector<64x224xf32>
    %c0_133 = arith.constant 0 : index
    %c0_134 = arith.constant 0 : index
    %c0_135 = arith.constant 0 : index
    %110 = vector.load %arg9[%c0_133, %c0_134, %c0_135] : memref<4x64x224xf32, #tpu.memory_space<vmem>>, vector<1x64x224xf32>
    %111 = vector.shape_cast %110 : vector<1x64x224xf32> to vector<64x224xf32>
    %112 = vector.shape_cast %109 : vector<64x224xf32> to vector<1x64x224xf32>
    tpu.vector_store %arg9[%c0_133, %c0_134, %c0_135], %112 {strides = array<i32>} : memref<4x64x224xf32, #tpu.memory_space<vmem>>, vector<1x64x224xf32>,
    %c0_136 = arith.constant 0 : index
    %c4_137 = arith.constant 4 : index
    %c0_138 = arith.constant 0 : index
    %c0_139 = arith.constant 0 : index
    %113 = vector.load %arg1[%c0_136, %c4_137, %c0_138, %c0_139] : memref<1x8x64x128xbf16, #tpu.memory_space<vmem>>, vector<1x1x64x128xbf16>
    %114 = vector.shape_cast %113 : vector<1x1x64x128xbf16> to vector<64x128xbf16>
    %cst_140 = arith.constant dense<0.000000e+00> : vector<64x224xf32>
    %115 = tpu.matmul %114, %103, %cst_140 {dimension_numbers = #tpu.dot_dimension_numbers<[1], [0], [0], [1], [0, 0, 1, 1], [], []>} : vector<64x128xbf16>, vector<128x224xbf16>, vector<64x224xf32> -> vector<64x224xf32>
    %c1_141 = arith.constant 1 : index
    %c0_142 = arith.constant 0 : index
    %c0_143 = arith.constant 0 : index
    %116 = vector.load %arg9[%c1_141, %c0_142, %c0_143] : memref<4x64x224xf32, #tpu.memory_space<vmem>>, vector<1x64x224xf32>
    %117 = vector.shape_cast %116 : vector<1x64x224xf32> to vector<64x224xf32>
    %118 = arith.addf %117, %115 : vector<64x224xf32>
    %c1_144 = arith.constant 1 : index
    %c0_145 = arith.constant 0 : index
    %c0_146 = arith.constant 0 : index
    %119 = vector.load %arg9[%c1_144, %c0_145, %c0_146] : memref<4x64x224xf32, #tpu.memory_space<vmem>>, vector<1x64x224xf32>
    %120 = vector.shape_cast %119 : vector<1x64x224xf32> to vector<64x224xf32>
    %121 = vector.shape_cast %118 : vector<64x224xf32> to vector<1x64x224xf32>
    tpu.vector_store %arg9[%c1_144, %c0_145, %c0_146], %121 {strides = array<i32>} : memref<4x64x224xf32, #tpu.memory_space<vmem>>, vector<1x64x224xf32>,
    %c0_147 = arith.constant 0 : index
    %c5_148 = arith.constant 5 : index
    %c0_149 = arith.constant 0 : index
    %c0_150 = arith.constant 0 : index
    %122 = vector.load %arg1[%c0_147, %c5_148, %c0_149, %c0_150] : memref<1x8x64x128xbf16, #tpu.memory_space<vmem>>, vector<1x1x64x128xbf16>
    %123 = vector.shape_cast %122 : vector<1x1x64x128xbf16> to vector<64x128xbf16>
    %cst_151 = arith.constant dense<0.000000e+00> : vector<64x224xf32>
    %124 = tpu.matmul %123, %103, %cst_151 {dimension_numbers = #tpu.dot_dimension_numbers<[1], [0], [0], [1], [0, 0, 1, 1], [], []>} : vector<64x128xbf16>, vector<128x224xbf16>, vector<64x224xf32> -> vector<64x224xf32>
    %c2_152 = arith.constant 2 : index
    %c0_153 = arith.constant 0 : index
    %c0_154 = arith.constant 0 : index
    %125 = vector.load %arg9[%c2_152, %c0_153, %c0_154] : memref<4x64x224xf32, #tpu.memory_space<vmem>>, vector<1x64x224xf32>
    %126 = vector.shape_cast %125 : vector<1x64x224xf32> to vector<64x224xf32>
    %127 = arith.addf %126, %124 : vector<64x224xf32>
    %c2_155 = arith.constant 2 : index
    %c0_156 = arith.constant 0 : index
    %c0_157 = arith.constant 0 : index
    %128 = vector.load %arg9[%c2_155, %c0_156, %c0_157] : memref<4x64x224xf32, #tpu.memory_space<vmem>>, vector<1x64x224xf32>
    %129 = vector.shape_cast %128 : vector<1x64x224xf32> to vector<64x224xf32>
    %130 = vector.shape_cast %127 : vector<64x224xf32> to vector<1x64x224xf32>
    tpu.vector_store %arg9[%c2_155, %c0_156, %c0_157], %130 {strides = array<i32>} : memref<4x64x224xf32, #tpu.memory_space<vmem>>, vector<1x64x224xf32>,
    %c0_158 = arith.constant 0 : index
    %c6 = arith.constant 6 : index
    %c0_159 = arith.constant 0 : index
    %c0_160 = arith.constant 0 : index
    %131 = vector.load %arg1[%c0_158, %c6, %c0_159, %c0_160] : memref<1x8x64x128xbf16, #tpu.memory_space<vmem>>, vector<1x1x64x128xbf16>
    %132 = vector.shape_cast %131 : vector<1x1x64x128xbf16> to vector<64x128xbf16>
    %cst_161 = arith.constant dense<0.000000e+00> : vector<64x224xf32>
    %133 = tpu.matmul %132, %103, %cst_161 {dimension_numbers = #tpu.dot_dimension_numbers<[1], [0], [0], [1], [0, 0, 1, 1], [], []>} : vector<64x128xbf16>, vector<128x224xbf16>, vector<64x224xf32> -> vector<64x224xf32>
    %c3_162 = arith.constant 3 : index
    %c0_163 = arith.constant 0 : index
    %c0_164 = arith.constant 0 : index
    %134 = vector.load %arg9[%c3_162, %c0_163, %c0_164] : memref<4x64x224xf32, #tpu.memory_space<vmem>>, vector<1x64x224xf32>
    %135 = vector.shape_cast %134 : vector<1x64x224xf32> to vector<64x224xf32>
    %136 = arith.addf %135, %133 : vector<64x224xf32>
    %c3_165 = arith.constant 3 : index
    %c0_166 = arith.constant 0 : index
    %c0_167 = arith.constant 0 : index
    %137 = vector.load %arg9[%c3_165, %c0_166, %c0_167] : memref<4x64x224xf32, #tpu.memory_space<vmem>>, vector<1x64x224xf32>
    %138 = vector.shape_cast %137 : vector<1x64x224xf32> to vector<64x224xf32>
    %139 = vector.shape_cast %136 : vector<64x224xf32> to vector<1x64x224xf32>
    tpu.vector_store %arg9[%c3_165, %c0_166, %c0_167], %139 {strides = array<i32>} : memref<4x64x224xf32, #tpu.memory_space<vmem>>, vector<1x64x224xf32>,
    %c4_168 = arith.constant 4 : index
    %c0_169 = arith.constant 0 : index
    %c0_170 = arith.constant 0 : index
    %140 = vector.load %arg2[%c4_168, %c0_169, %c0_170] : memref<5x128x224xbf16, #tpu.memory_space<vmem>>, vector<1x128x224xbf16>
    %141 = vector.shape_cast %140 : vector<1x128x224xbf16> to vector<128x224xbf16>
    %c0_171 = arith.constant 0 : index
    %c4_172 = arith.constant 4 : index
    %c0_173 = arith.constant 0 : index
    %c0_174 = arith.constant 0 : index
    %142 = vector.load %arg1[%c0_171, %c4_172, %c0_173, %c0_174] : memref<1x8x64x128xbf16, #tpu.memory_space<vmem>>, vector<1x1x64x128xbf16>
    %143 = vector.shape_cast %142 : vector<1x1x64x128xbf16> to vector<64x128xbf16>
    %cst_175 = arith.constant dense<0.000000e+00> : vector<64x224xf32>
    %144 = tpu.matmul %143, %141, %cst_175 {dimension_numbers = #tpu.dot_dimension_numbers<[1], [0], [0], [1], [0, 0, 1, 1], [], []>} : vector<64x128xbf16>, vector<128x224xbf16>, vector<64x224xf32> -> vector<64x224xf32>
    %c0_176 = arith.constant 0 : index
    %c0_177 = arith.constant 0 : index
    %c0_178 = arith.constant 0 : index
    %145 = vector.load %arg9[%c0_176, %c0_177, %c0_178] : memref<4x64x224xf32, #tpu.memory_space<vmem>>, vector<1x64x224xf32>
    %146 = vector.shape_cast %145 : vector<1x64x224xf32> to vector<64x224xf32>
    %147 = arith.addf %146, %144 : vector<64x224xf32>
    %c0_179 = arith.constant 0 : index
    %c0_180 = arith.constant 0 : index
    %c0_181 = arith.constant 0 : index
    %148 = vector.load %arg9[%c0_179, %c0_180, %c0_181] : memref<4x64x224xf32, #tpu.memory_space<vmem>>, vector<1x64x224xf32>
    %149 = vector.shape_cast %148 : vector<1x64x224xf32> to vector<64x224xf32>
    %150 = vector.shape_cast %147 : vector<64x224xf32> to vector<1x64x224xf32>
    tpu.vector_store %arg9[%c0_179, %c0_180, %c0_181], %150 {strides = array<i32>} : memref<4x64x224xf32, #tpu.memory_space<vmem>>, vector<1x64x224xf32>,
    %c0_182 = arith.constant 0 : index
    %c5_183 = arith.constant 5 : index
    %c0_184 = arith.constant 0 : index
    %c0_185 = arith.constant 0 : index
    %151 = vector.load %arg1[%c0_182, %c5_183, %c0_184, %c0_185] : memref<1x8x64x128xbf16, #tpu.memory_space<vmem>>, vector<1x1x64x128xbf16>
    %152 = vector.shape_cast %151 : vector<1x1x64x128xbf16> to vector<64x128xbf16>
    %cst_186 = arith.constant dense<0.000000e+00> : vector<64x224xf32>
    %153 = tpu.matmul %152, %141, %cst_186 {dimension_numbers = #tpu.dot_dimension_numbers<[1], [0], [0], [1], [0, 0, 1, 1], [], []>} : vector<64x128xbf16>, vector<128x224xbf16>, vector<64x224xf32> -> vector<64x224xf32>
    %c1_187 = arith.constant 1 : index
    %c0_188 = arith.constant 0 : index
    %c0_189 = arith.constant 0 : index
    %154 = vector.load %arg9[%c1_187, %c0_188, %c0_189] : memref<4x64x224xf32, #tpu.memory_space<vmem>>, vector<1x64x224xf32>
    %155 = vector.shape_cast %154 : vector<1x64x224xf32> to vector<64x224xf32>
    %156 = arith.addf %155, %153 : vector<64x224xf32>
    %c1_190 = arith.constant 1 : index
    %c0_191 = arith.constant 0 : index
    %c0_192 = arith.constant 0 : index
    %157 = vector.load %arg9[%c1_190, %c0_191, %c0_192] : memref<4x64x224xf32, #tpu.memory_space<vmem>>, vector<1x64x224xf32>
    %158 = vector.shape_cast %157 : vector<1x64x224xf32> to vector<64x224xf32>
    %159 = vector.shape_cast %156 : vector<64x224xf32> to vector<1x64x224xf32>
    tpu.vector_store %arg9[%c1_190, %c0_191, %c0_192], %159 {strides = array<i32>} : memref<4x64x224xf32, #tpu.memory_space<vmem>>, vector<1x64x224xf32>,
    %c0_193 = arith.constant 0 : index
    %c6_194 = arith.constant 6 : index
    %c0_195 = arith.constant 0 : index
    %c0_196 = arith.constant 0 : index
    %160 = vector.load %arg1[%c0_193, %c6_194, %c0_195, %c0_196] : memref<1x8x64x128xbf16, #tpu.memory_space<vmem>>, vector<1x1x64x128xbf16>
    %161 = vector.shape_cast %160 : vector<1x1x64x128xbf16> to vector<64x128xbf16>
    %cst_197 = arith.constant dense<0.000000e+00> : vector<64x224xf32>
    %162 = tpu.matmul %161, %141, %cst_197 {dimension_numbers = #tpu.dot_dimension_numbers<[1], [0], [0], [1], [0, 0, 1, 1], [], []>} : vector<64x128xbf16>, vector<128x224xbf16>, vector<64x224xf32> -> vector<64x224xf32>
    %c2_198 = arith.constant 2 : index
    %c0_199 = arith.constant 0 : index
    %c0_200 = arith.constant 0 : index
    %163 = vector.load %arg9[%c2_198, %c0_199, %c0_200] : memref<4x64x224xf32, #tpu.memory_space<vmem>>, vector<1x64x224xf32>
    %164 = vector.shape_cast %163 : vector<1x64x224xf32> to vector<64x224xf32>
    %165 = arith.addf %164, %162 : vector<64x224xf32>
    %c2_201 = arith.constant 2 : index
    %c0_202 = arith.constant 0 : index
    %c0_203 = arith.constant 0 : index
    %166 = vector.load %arg9[%c2_201, %c0_202, %c0_203] : memref<4x64x224xf32, #tpu.memory_space<vmem>>, vector<1x64x224xf32>
    %167 = vector.shape_cast %166 : vector<1x64x224xf32> to vector<64x224xf32>
    %168 = vector.shape_cast %165 : vector<64x224xf32> to vector<1x64x224xf32>
    tpu.vector_store %arg9[%c2_201, %c0_202, %c0_203], %168 {strides = array<i32>} : memref<4x64x224xf32, #tpu.memory_space<vmem>>, vector<1x64x224xf32>,
    %c0_204 = arith.constant 0 : index
    %c7 = arith.constant 7 : index
    %c0_205 = arith.constant 0 : index
    %c0_206 = arith.constant 0 : index
    %169 = vector.load %arg1[%c0_204, %c7, %c0_205, %c0_206] : memref<1x8x64x128xbf16, #tpu.memory_space<vmem>>, vector<1x1x64x128xbf16>
    %170 = vector.shape_cast %169 : vector<1x1x64x128xbf16> to vector<64x128xbf16>
    %cst_207 = arith.constant dense<0.000000e+00> : vector<64x224xf32>
    %171 = tpu.matmul %170, %141, %cst_207 {dimension_numbers = #tpu.dot_dimension_numbers<[1], [0], [0], [1], [0, 0, 1, 1], [], []>} : vector<64x128xbf16>, vector<128x224xbf16>, vector<64x224xf32> -> vector<64x224xf32>
    %c3_208 = arith.constant 3 : index
    %c0_209 = arith.constant 0 : index
    %c0_210 = arith.constant 0 : index
    %172 = vector.load %arg9[%c3_208, %c0_209, %c0_210] : memref<4x64x224xf32, #tpu.memory_space<vmem>>, vector<1x64x224xf32>
    %173 = vector.shape_cast %172 : vector<1x64x224xf32> to vector<64x224xf32>
    %174 = arith.addf %173, %171 : vector<64x224xf32>
    %c3_211 = arith.constant 3 : index
    %c0_212 = arith.constant 0 : index
    %c0_213 = arith.constant 0 : index
    %175 = vector.load %arg9[%c3_211, %c0_212, %c0_213] : memref<4x64x224xf32, #tpu.memory_space<vmem>>, vector<1x64x224xf32>
    %176 = vector.shape_cast %175 : vector<1x64x224xf32> to vector<64x224xf32>
    %177 = vector.shape_cast %174 : vector<64x224xf32> to vector<1x64x224xf32>
    tpu.vector_store %arg9[%c3_211, %c0_212, %c0_213], %177 {strides = array<i32>} : memref<4x64x224xf32, #tpu.memory_space<vmem>>, vector<1x64x224xf32>,
    %c0_214 = arith.constant 0 : index
    %c0_215 = arith.constant 0 : index
    %178 = vector.load %arg3[%c0_214, %c0_215] : memref<1x224xf32, #tpu.memory_space<vmem>>, vector<1x224xf32>
    %c0_216 = arith.constant 0 : index
    %c0_217 = arith.constant 0 : index
    %c0_218 = arith.constant 0 : index
    %179 = vector.load %arg9[%c0_216, %c0_217, %c0_218] : memref<4x64x224xf32, #tpu.memory_space<vmem>>, vector<1x64x224xf32>
    %180 = vector.shape_cast %179 : vector<1x64x224xf32> to vector<64x224xf32>
    %181 = vector.broadcast %178 : vector<1x224xf32> to vector<64x224xf32>
    %182 = arith.addf %180, %181 : vector<64x224xf32>
    %cst_219 = arith.constant 0.000000e+00 : f32
    %183 = vector.broadcast %cst_219 : f32 to vector<64x224xf32>
    %184 = arith.maximumf %182, %183 : vector<64x224xf32>
    %c1_220 = arith.constant 1 : index
    %c0_221 = arith.constant 0 : index
    %c0_222 = arith.constant 0 : index
    %185 = vector.load %arg9[%c1_220, %c0_221, %c0_222] : memref<4x64x224xf32, #tpu.memory_space<vmem>>, vector<1x64x224xf32>
    %186 = vector.shape_cast %185 : vector<1x64x224xf32> to vector<64x224xf32>
    %187 = vector.broadcast %178 : vector<1x224xf32> to vector<64x224xf32>
    %188 = arith.addf %186, %187 : vector<64x224xf32>
    %cst_223 = arith.constant 0.000000e+00 : f32
    %189 = vector.broadcast %cst_223 : f32 to vector<64x224xf32>
    %190 = arith.maximumf %188, %189 : vector<64x224xf32>
    %191 = arith.addf %184, %190 : vector<64x224xf32>
    %c0_224 = arith.constant 0 : index
    %c0_225 = arith.constant 0 : index
    %c0_226 = arith.constant 0 : index
    %192 = vector.load %arg10[%c0_224, %c0_225, %c0_226] : memref<2x72x224xf32, #tpu.memory_space<vmem>>, vector<1x64x224xf32>
    %193 = vector.shape_cast %192 : vector<1x64x224xf32> to vector<64x224xf32>
    %194 = vector.shape_cast %191 : vector<64x224xf32> to vector<1x64x224xf32>
    tpu.vector_store %arg10[%c0_224, %c0_225, %c0_226], %194 {strides = array<i32>} : memref<2x72x224xf32, #tpu.memory_space<vmem>>, vector<1x64x224xf32>,
    %cst_227 = arith.constant 0.000000e+00 : f32
    %195 = vector.broadcast %cst_227 : f32 to vector<8x224xf32>
    %c0_228 = arith.constant 0 : index
    %c64 = arith.constant 64 : index
    %c0_229 = arith.constant 0 : index
    %196 = vector.load %arg10[%c0_228, %c64, %c0_229] : memref<2x72x224xf32, #tpu.memory_space<vmem>>, vector<1x8x224xf32>
    %197 = vector.shape_cast %196 : vector<1x8x224xf32> to vector<8x224xf32>
    %198 = vector.shape_cast %195 : vector<8x224xf32> to vector<1x8x224xf32>
    tpu.vector_store %arg10[%c0_228, %c64, %c0_229], %198 {strides = array<i32>} : memref<2x72x224xf32, #tpu.memory_space<vmem>>, vector<1x8x224xf32>,
    %c2_230 = arith.constant 2 : index
    %c0_231 = arith.constant 0 : index
    %c0_232 = arith.constant 0 : index
    %199 = vector.load %arg9[%c2_230, %c0_231, %c0_232] : memref<4x64x224xf32, #tpu.memory_space<vmem>>, vector<1x64x224xf32>
    %200 = vector.shape_cast %199 : vector<1x64x224xf32> to vector<64x224xf32>
    %201 = vector.broadcast %178 : vector<1x224xf32> to vector<64x224xf32>
    %202 = arith.addf %200, %201 : vector<64x224xf32>
    %cst_233 = arith.constant 0.000000e+00 : f32
    %203 = vector.broadcast %cst_233 : f32 to vector<64x224xf32>
    %204 = arith.maximumf %202, %203 : vector<64x224xf32>
    %c3_234 = arith.constant 3 : index
    %c0_235 = arith.constant 0 : index
    %c0_236 = arith.constant 0 : index
    %205 = vector.load %arg9[%c3_234, %c0_235, %c0_236] : memref<4x64x224xf32, #tpu.memory_space<vmem>>, vector<1x64x224xf32>
    %206 = vector.shape_cast %205 : vector<1x64x224xf32> to vector<64x224xf32>
    %207 = vector.broadcast %178 : vector<1x224xf32> to vector<64x224xf32>
    %208 = arith.addf %206, %207 : vector<64x224xf32>
    %cst_237 = arith.constant 0.000000e+00 : f32
    %209 = vector.broadcast %cst_237 : f32 to vector<64x224xf32>
    %210 = arith.maximumf %208, %209 : vector<64x224xf32>
    %211 = arith.addf %204, %210 : vector<64x224xf32>
    %c1_238 = arith.constant 1 : index
    %c0_239 = arith.constant 0 : index
    %c0_240 = arith.constant 0 : index
    %212 = vector.load %arg10[%c1_238, %c0_239, %c0_240] : memref<2x72x224xf32, #tpu.memory_space<vmem>>, vector<1x64x224xf32>
    %213 = vector.shape_cast %212 : vector<1x64x224xf32> to vector<64x224xf32>
    %214 = vector.shape_cast %211 : vector<64x224xf32> to vector<1x64x224xf32>
    tpu.vector_store %arg10[%c1_238, %c0_239, %c0_240], %214 {strides = array<i32>} : memref<2x72x224xf32, #tpu.memory_space<vmem>>, vector<1x64x224xf32>,
    %cst_241 = arith.constant 0.000000e+00 : f32
    %215 = vector.broadcast %cst_241 : f32 to vector<8x224xf32>
    %c1_242 = arith.constant 1 : index
    %c64_243 = arith.constant 64 : index
    %c0_244 = arith.constant 0 : index
    %216 = vector.load %arg10[%c1_242, %c64_243, %c0_244] : memref<2x72x224xf32, #tpu.memory_space<vmem>>, vector<1x8x224xf32>
    %217 = vector.shape_cast %216 : vector<1x8x224xf32> to vector<8x224xf32>
    %218 = vector.shape_cast %215 : vector<8x224xf32> to vector<1x8x224xf32>
    tpu.vector_store %arg10[%c1_242, %c64_243, %c0_244], %218 {strides = array<i32>} : memref<2x72x224xf32, #tpu.memory_space<vmem>>, vector<1x8x224xf32>,
    %c0_245 = arith.constant 0 : index
    %c0_246 = arith.constant 0 : index
    %c0_247 = arith.constant 0 : index
    %219 = vector.load %arg4[%c0_245, %c0_246, %c0_247] : memref<5x224x320xbf16, #tpu.memory_space<vmem>>, vector<1x224x320xbf16>
    %220 = vector.shape_cast %219 : vector<1x224x320xbf16> to vector<224x320xbf16>
    %c0_248 = arith.constant 0 : index
    %c0_249 = arith.constant 0 : index
    %c0_250 = arith.constant 0 : index
    %221 = vector.load %arg10[%c0_248, %c0_249, %c0_250] : memref<2x72x224xf32, #tpu.memory_space<vmem>>, vector<1x64x224xf32>
    %222 = vector.shape_cast %221 : vector<1x64x224xf32> to vector<64x224xf32>
    %223 = arith.truncf %222 : vector<64x224xf32> to vector<64x224xbf16>
    %cst_251 = arith.constant dense<0.000000e+00> : vector<64x320xf32>
    %224 = tpu.matmul %223, %220, %cst_251 {dimension_numbers = #tpu.dot_dimension_numbers<[1], [0], [0], [1], [0, 0, 1, 1], [], []>} : vector<64x224xbf16>, vector<224x320xbf16>, vector<64x320xf32> -> vector<64x320xf32>
    %c0_252 = arith.constant 0 : index
    %c0_253 = arith.constant 0 : index
    %c0_254 = arith.constant 0 : index
    %225 = vector.load %arg11[%c0_252, %c0_253, %c0_254] : memref<2x64x320xf32, #tpu.memory_space<vmem>>, vector<1x64x320xf32>
    %226 = vector.shape_cast %225 : vector<1x64x320xf32> to vector<64x320xf32>
    %227 = vector.shape_cast %224 : vector<64x320xf32> to vector<1x64x320xf32>
    tpu.vector_store %arg11[%c0_252, %c0_253, %c0_254], %227 {strides = array<i32>} : memref<2x64x320xf32, #tpu.memory_space<vmem>>, vector<1x64x320xf32>,
    %c1_255 = arith.constant 1 : index
    %c0_256 = arith.constant 0 : index
    %c0_257 = arith.constant 0 : index
    %228 = vector.load %arg10[%c1_255, %c0_256, %c0_257] : memref<2x72x224xf32, #tpu.memory_space<vmem>>, vector<1x64x224xf32>
    %229 = vector.shape_cast %228 : vector<1x64x224xf32> to vector<64x224xf32>
    %230 = arith.truncf %229 : vector<64x224xf32> to vector<64x224xbf16>
    %cst_258 = arith.constant dense<0.000000e+00> : vector<64x320xf32>
    %231 = tpu.matmul %230, %220, %cst_258 {dimension_numbers = #tpu.dot_dimension_numbers<[1], [0], [0], [1], [0, 0, 1, 1], [], []>} : vector<64x224xbf16>, vector<224x320xbf16>, vector<64x320xf32> -> vector<64x320xf32>
    %c1_259 = arith.constant 1 : index
    %c0_260 = arith.constant 0 : index
    %c0_261 = arith.constant 0 : index
    %232 = vector.load %arg11[%c1_259, %c0_260, %c0_261] : memref<2x64x320xf32, #tpu.memory_space<vmem>>, vector<1x64x320xf32>
    %233 = vector.shape_cast %232 : vector<1x64x320xf32> to vector<64x320xf32>
    %234 = vector.shape_cast %231 : vector<64x320xf32> to vector<1x64x320xf32>
    tpu.vector_store %arg11[%c1_259, %c0_260, %c0_261], %234 {strides = array<i32>} : memref<2x64x320xf32, #tpu.memory_space<vmem>>, vector<1x64x320xf32>,
    %c1_262 = arith.constant 1 : index
    %c0_263 = arith.constant 0 : index
    %c0_264 = arith.constant 0 : index
    %235 = vector.load %arg4[%c1_262, %c0_263, %c0_264] : memref<5x224x320xbf16, #tpu.memory_space<vmem>>, vector<1x224x320xbf16>
    %236 = vector.shape_cast %235 : vector<1x224x320xbf16> to vector<224x320xbf16>
    %c1_265 = arith.constant 1 : index
    %c0_266 = arith.constant 0 : index
    %c0_267 = arith.constant 0 : index
    %237 = vector.load %arg10[%c1_265, %c0_266, %c0_267] : memref<2x72x224xf32, #tpu.memory_space<vmem>>, vector<1x64x224xf32>
    %238 = vector.shape_cast %237 : vector<1x64x224xf32> to vector<64x224xf32>
    %239 = arith.truncf %238 : vector<64x224xf32> to vector<64x224xbf16>
    %cst_268 = arith.constant dense<0.000000e+00> : vector<64x320xf32>
    %240 = tpu.matmul %239, %236, %cst_268 {dimension_numbers = #tpu.dot_dimension_numbers<[1], [0], [0], [1], [0, 0, 1, 1], [], []>} : vector<64x224xbf16>, vector<224x320xbf16>, vector<64x320xf32> -> vector<64x320xf32>
    %c0_269 = arith.constant 0 : index
    %c0_270 = arith.constant 0 : index
    %c0_271 = arith.constant 0 : index
    %241 = vector.load %arg11[%c0_269, %c0_270, %c0_271] : memref<2x64x320xf32, #tpu.memory_space<vmem>>, vector<1x64x320xf32>
    %242 = vector.shape_cast %241 : vector<1x64x320xf32> to vector<64x320xf32>
    %243 = arith.addf %242, %240 : vector<64x320xf32>
    %c0_272 = arith.constant 0 : index
    %c0_273 = arith.constant 0 : index
    %c0_274 = arith.constant 0 : index
    %244 = vector.load %arg11[%c0_272, %c0_273, %c0_274] : memref<2x64x320xf32, #tpu.memory_space<vmem>>, vector<1x64x320xf32>
    %245 = vector.shape_cast %244 : vector<1x64x320xf32> to vector<64x320xf32>
    %246 = vector.shape_cast %243 : vector<64x320xf32> to vector<1x64x320xf32>
    tpu.vector_store %arg11[%c0_272, %c0_273, %c0_274], %246 {strides = array<i32>} : memref<2x64x320xf32, #tpu.memory_space<vmem>>, vector<1x64x320xf32>,
    %c0_275 = arith.constant 0 : index
    %c1_276 = arith.constant 1 : index
    %c0_277 = arith.constant 0 : index
    %247 = vector.load %arg10[%c0_275, %c1_276, %c0_277] : memref<2x72x224xf32, #tpu.memory_space<vmem>>, vector<1x64x224xf32>
    %248 = vector.shape_cast %247 : vector<1x64x224xf32> to vector<64x224xf32>
    %249 = arith.truncf %248 : vector<64x224xf32> to vector<64x224xbf16>
    %cst_278 = arith.constant dense<0.000000e+00> : vector<64x320xf32>
    %250 = tpu.matmul %249, %236, %cst_278 {dimension_numbers = #tpu.dot_dimension_numbers<[1], [0], [0], [1], [0, 0, 1, 1], [], []>} : vector<64x224xbf16>, vector<224x320xbf16>, vector<64x320xf32> -> vector<64x320xf32>
    %c1_279 = arith.constant 1 : index
    %c0_280 = arith.constant 0 : index
    %c0_281 = arith.constant 0 : index
    %251 = vector.load %arg11[%c1_279, %c0_280, %c0_281] : memref<2x64x320xf32, #tpu.memory_space<vmem>>, vector<1x64x320xf32>
    %252 = vector.shape_cast %251 : vector<1x64x320xf32> to vector<64x320xf32>
    %253 = arith.addf %252, %250 : vector<64x320xf32>
    %c1_282 = arith.constant 1 : index
    %c0_283 = arith.constant 0 : index
    %c0_284 = arith.constant 0 : index
    %254 = vector.load %arg11[%c1_282, %c0_283, %c0_284] : memref<2x64x320xf32, #tpu.memory_space<vmem>>, vector<1x64x320xf32>
    %255 = vector.shape_cast %254 : vector<1x64x320xf32> to vector<64x320xf32>
    %256 = vector.shape_cast %253 : vector<64x320xf32> to vector<1x64x320xf32>
    tpu.vector_store %arg11[%c1_282, %c0_283, %c0_284], %256 {strides = array<i32>} : memref<2x64x320xf32, #tpu.memory_space<vmem>>, vector<1x64x320xf32>,
    %c2_285 = arith.constant 2 : index
    %c0_286 = arith.constant 0 : index
    %c0_287 = arith.constant 0 : index
    %257 = vector.load %arg4[%c2_285, %c0_286, %c0_287] : memref<5x224x320xbf16, #tpu.memory_space<vmem>>, vector<1x224x320xbf16>
    %258 = vector.shape_cast %257 : vector<1x224x320xbf16> to vector<224x320xbf16>
    %c0_288 = arith.constant 0 : index
    %c1_289 = arith.constant 1 : index
    %c0_290 = arith.constant 0 : index
    %259 = vector.load %arg10[%c0_288, %c1_289, %c0_290] : memref<2x72x224xf32, #tpu.memory_space<vmem>>, vector<1x64x224xf32>
    %260 = vector.shape_cast %259 : vector<1x64x224xf32> to vector<64x224xf32>
    %261 = arith.truncf %260 : vector<64x224xf32> to vector<64x224xbf16>
    %cst_291 = arith.constant dense<0.000000e+00> : vector<64x320xf32>
    %262 = tpu.matmul %261, %258, %cst_291 {dimension_numbers = #tpu.dot_dimension_numbers<[1], [0], [0], [1], [0, 0, 1, 1], [], []>} : vector<64x224xbf16>, vector<224x320xbf16>, vector<64x320xf32> -> vector<64x320xf32>
    %c0_292 = arith.constant 0 : index
    %c0_293 = arith.constant 0 : index
    %c0_294 = arith.constant 0 : index
    %263 = vector.load %arg11[%c0_292, %c0_293, %c0_294] : memref<2x64x320xf32, #tpu.memory_space<vmem>>, vector<1x64x320xf32>
    %264 = vector.shape_cast %263 : vector<1x64x320xf32> to vector<64x320xf32>
    %265 = arith.addf %264, %262 : vector<64x320xf32>
    %c0_295 = arith.constant 0 : index
    %c0_296 = arith.constant 0 : index
    %c0_297 = arith.constant 0 : index
    %266 = vector.load %arg11[%c0_295, %c0_296, %c0_297] : memref<2x64x320xf32, #tpu.memory_space<vmem>>, vector<1x64x320xf32>
    %267 = vector.shape_cast %266 : vector<1x64x320xf32> to vector<64x320xf32>
    %268 = vector.shape_cast %265 : vector<64x320xf32> to vector<1x64x320xf32>
    tpu.vector_store %arg11[%c0_295, %c0_296, %c0_297], %268 {strides = array<i32>} : memref<2x64x320xf32, #tpu.memory_space<vmem>>, vector<1x64x320xf32>,
    %c1_298 = arith.constant 1 : index
    %c1_299 = arith.constant 1 : index
    %c0_300 = arith.constant 0 : index
    %269 = vector.load %arg10[%c1_298, %c1_299, %c0_300] : memref<2x72x224xf32, #tpu.memory_space<vmem>>, vector<1x64x224xf32>
    %270 = vector.shape_cast %269 : vector<1x64x224xf32> to vector<64x224xf32>
    %271 = arith.truncf %270 : vector<64x224xf32> to vector<64x224xbf16>
    %cst_301 = arith.constant dense<0.000000e+00> : vector<64x320xf32>
    %272 = tpu.matmul %271, %258, %cst_301 {dimension_numbers = #tpu.dot_dimension_numbers<[1], [0], [0], [1], [0, 0, 1, 1], [], []>} : vector<64x224xbf16>, vector<224x320xbf16>, vector<64x320xf32> -> vector<64x320xf32>
    %c1_302 = arith.constant 1 : index
    %c0_303 = arith.constant 0 : index
    %c0_304 = arith.constant 0 : index
    %273 = vector.load %arg11[%c1_302, %c0_303, %c0_304] : memref<2x64x320xf32, #tpu.memory_space<vmem>>, vector<1x64x320xf32>
    %274 = vector.shape_cast %273 : vector<1x64x320xf32> to vector<64x320xf32>
    %275 = arith.addf %274, %272 : vector<64x320xf32>
    %c1_305 = arith.constant 1 : index
    %c0_306 = arith.constant 0 : index
    %c0_307 = arith.constant 0 : index
    %276 = vector.load %arg11[%c1_305, %c0_306, %c0_307] : memref<2x64x320xf32, #tpu.memory_space<vmem>>, vector<1x64x320xf32>
    %277 = vector.shape_cast %276 : vector<1x64x320xf32> to vector<64x320xf32>
    %278 = vector.shape_cast %275 : vector<64x320xf32> to vector<1x64x320xf32>
    tpu.vector_store %arg11[%c1_305, %c0_306, %c0_307], %278 {strides = array<i32>} : memref<2x64x320xf32, #tpu.memory_space<vmem>>, vector<1x64x320xf32>,
    %c3_308 = arith.constant 3 : index
    %c0_309 = arith.constant 0 : index
    %c0_310 = arith.constant 0 : index
    %279 = vector.load %arg4[%c3_308, %c0_309, %c0_310] : memref<5x224x320xbf16, #tpu.memory_space<vmem>>, vector<1x224x320xbf16>
    %280 = vector.shape_cast %279 : vector<1x224x320xbf16> to vector<224x320xbf16>
    %c1_311 = arith.constant 1 : index
    %c1_312 = arith.constant 1 : index
    %c0_313 = arith.constant 0 : index
    %281 = vector.load %arg10[%c1_311, %c1_312, %c0_313] : memref<2x72x224xf32, #tpu.memory_space<vmem>>, vector<1x64x224xf32>
    %282 = vector.shape_cast %281 : vector<1x64x224xf32> to vector<64x224xf32>
    %283 = arith.truncf %282 : vector<64x224xf32> to vector<64x224xbf16>
    %cst_314 = arith.constant dense<0.000000e+00> : vector<64x320xf32>
    %284 = tpu.matmul %283, %280, %cst_314 {dimension_numbers = #tpu.dot_dimension_numbers<[1], [0], [0], [1], [0, 0, 1, 1], [], []>} : vector<64x224xbf16>, vector<224x320xbf16>, vector<64x320xf32> -> vector<64x320xf32>
    %c0_315 = arith.constant 0 : index
    %c0_316 = arith.constant 0 : index
    %c0_317 = arith.constant 0 : index
    %285 = vector.load %arg11[%c0_315, %c0_316, %c0_317] : memref<2x64x320xf32, #tpu.memory_space<vmem>>, vector<1x64x320xf32>
    %286 = vector.shape_cast %285 : vector<1x64x320xf32> to vector<64x320xf32>
    %287 = arith.addf %286, %284 : vector<64x320xf32>
    %c0_318 = arith.constant 0 : index
    %c0_319 = arith.constant 0 : index
    %c0_320 = arith.constant 0 : index
    %288 = vector.load %arg11[%c0_318, %c0_319, %c0_320] : memref<2x64x320xf32, #tpu.memory_space<vmem>>, vector<1x64x320xf32>
    %289 = vector.shape_cast %288 : vector<1x64x320xf32> to vector<64x320xf32>
    %290 = vector.shape_cast %287 : vector<64x320xf32> to vector<1x64x320xf32>
    tpu.vector_store %arg11[%c0_318, %c0_319, %c0_320], %290 {strides = array<i32>} : memref<2x64x320xf32, #tpu.memory_space<vmem>>, vector<1x64x320xf32>,
    %c0_321 = arith.constant 0 : index
    %c2_322 = arith.constant 2 : index
    %c0_323 = arith.constant 0 : index
    %291 = vector.load %arg10[%c0_321, %c2_322, %c0_323] : memref<2x72x224xf32, #tpu.memory_space<vmem>>, vector<1x64x224xf32>
    %292 = vector.shape_cast %291 : vector<1x64x224xf32> to vector<64x224xf32>
    %293 = arith.truncf %292 : vector<64x224xf32> to vector<64x224xbf16>
    %cst_324 = arith.constant dense<0.000000e+00> : vector<64x320xf32>
    %294 = tpu.matmul %293, %280, %cst_324 {dimension_numbers = #tpu.dot_dimension_numbers<[1], [0], [0], [1], [0, 0, 1, 1], [], []>} : vector<64x224xbf16>, vector<224x320xbf16>, vector<64x320xf32> -> vector<64x320xf32>
    %c1_325 = arith.constant 1 : index
    %c0_326 = arith.constant 0 : index
    %c0_327 = arith.constant 0 : index
    %295 = vector.load %arg11[%c1_325, %c0_326, %c0_327] : memref<2x64x320xf32, #tpu.memory_space<vmem>>, vector<1x64x320xf32>
    %296 = vector.shape_cast %295 : vector<1x64x320xf32> to vector<64x320xf32>
    %297 = arith.addf %296, %294 : vector<64x320xf32>
    %c1_328 = arith.constant 1 : index
    %c0_329 = arith.constant 0 : index
    %c0_330 = arith.constant 0 : index
    %298 = vector.load %arg11[%c1_328, %c0_329, %c0_330] : memref<2x64x320xf32, #tpu.memory_space<vmem>>, vector<1x64x320xf32>
    %299 = vector.shape_cast %298 : vector<1x64x320xf32> to vector<64x320xf32>
    %300 = vector.shape_cast %297 : vector<64x320xf32> to vector<1x64x320xf32>
    tpu.vector_store %arg11[%c1_328, %c0_329, %c0_330], %300 {strides = array<i32>} : memref<2x64x320xf32, #tpu.memory_space<vmem>>, vector<1x64x320xf32>,
    %c4_331 = arith.constant 4 : index
    %c0_332 = arith.constant 0 : index
    %c0_333 = arith.constant 0 : index
    %301 = vector.load %arg4[%c4_331, %c0_332, %c0_333] : memref<5x224x320xbf16, #tpu.memory_space<vmem>>, vector<1x224x320xbf16>
    %302 = vector.shape_cast %301 : vector<1x224x320xbf16> to vector<224x320xbf16>
    %c0_334 = arith.constant 0 : index
    %c2_335 = arith.constant 2 : index
    %c0_336 = arith.constant 0 : index
    %303 = vector.load %arg10[%c0_334, %c2_335, %c0_336] : memref<2x72x224xf32, #tpu.memory_space<vmem>>, vector<1x64x224xf32>
    %304 = vector.shape_cast %303 : vector<1x64x224xf32> to vector<64x224xf32>
    %305 = arith.truncf %304 : vector<64x224xf32> to vector<64x224xbf16>
    %cst_337 = arith.constant dense<0.000000e+00> : vector<64x320xf32>
    %306 = tpu.matmul %305, %302, %cst_337 {dimension_numbers = #tpu.dot_dimension_numbers<[1], [0], [0], [1], [0, 0, 1, 1], [], []>} : vector<64x224xbf16>, vector<224x320xbf16>, vector<64x320xf32> -> vector<64x320xf32>
    %c0_338 = arith.constant 0 : index
    %c0_339 = arith.constant 0 : index
    %c0_340 = arith.constant 0 : index
    %307 = vector.load %arg11[%c0_338, %c0_339, %c0_340] : memref<2x64x320xf32, #tpu.memory_space<vmem>>, vector<1x64x320xf32>
    %308 = vector.shape_cast %307 : vector<1x64x320xf32> to vector<64x320xf32>
    %309 = arith.addf %308, %306 : vector<64x320xf32>
    %c0_341 = arith.constant 0 : index
    %c0_342 = arith.constant 0 : index
    %c0_343 = arith.constant 0 : index
    %310 = vector.load %arg11[%c0_341, %c0_342, %c0_343] : memref<2x64x320xf32, #tpu.memory_space<vmem>>, vector<1x64x320xf32>
    %311 = vector.shape_cast %310 : vector<1x64x320xf32> to vector<64x320xf32>
    %312 = vector.shape_cast %309 : vector<64x320xf32> to vector<1x64x320xf32>
    tpu.vector_store %arg11[%c0_341, %c0_342, %c0_343], %312 {strides = array<i32>} : memref<2x64x320xf32, #tpu.memory_space<vmem>>, vector<1x64x320xf32>,
    %c1_344 = arith.constant 1 : index
    %c2_345 = arith.constant 2 : index
    %c0_346 = arith.constant 0 : index
    %313 = vector.load %arg10[%c1_344, %c2_345, %c0_346] : memref<2x72x224xf32, #tpu.memory_space<vmem>>, vector<1x64x224xf32>
    %314 = vector.shape_cast %313 : vector<1x64x224xf32> to vector<64x224xf32>
    %315 = arith.truncf %314 : vector<64x224xf32> to vector<64x224xbf16>
    %cst_347 = arith.constant dense<0.000000e+00> : vector<64x320xf32>
    %316 = tpu.matmul %315, %302, %cst_347 {dimension_numbers = #tpu.dot_dimension_numbers<[1], [0], [0], [1], [0, 0, 1, 1], [], []>} : vector<64x224xbf16>, vector<224x320xbf16>, vector<64x320xf32> -> vector<64x320xf32>
    %c1_348 = arith.constant 1 : index
    %c0_349 = arith.constant 0 : index
    %c0_350 = arith.constant 0 : index
    %317 = vector.load %arg11[%c1_348, %c0_349, %c0_350] : memref<2x64x320xf32, #tpu.memory_space<vmem>>, vector<1x64x320xf32>
    %318 = vector.shape_cast %317 : vector<1x64x320xf32> to vector<64x320xf32>
    %319 = arith.addf %318, %316 : vector<64x320xf32>
    %c1_351 = arith.constant 1 : index
    %c0_352 = arith.constant 0 : index
    %c0_353 = arith.constant 0 : index
    %320 = vector.load %arg11[%c1_351, %c0_352, %c0_353] : memref<2x64x320xf32, #tpu.memory_space<vmem>>, vector<1x64x320xf32>
    %321 = vector.shape_cast %320 : vector<1x64x320xf32> to vector<64x320xf32>
    %322 = vector.shape_cast %319 : vector<64x320xf32> to vector<1x64x320xf32>
    tpu.vector_store %arg11[%c1_351, %c0_352, %c0_353], %322 {strides = array<i32>} : memref<2x64x320xf32, #tpu.memory_space<vmem>>, vector<1x64x320xf32>,
    %c0_354 = arith.constant 0 : index
    %c0_355 = arith.constant 0 : index
    %323 = vector.load %arg5[%c0_354, %c0_355] : memref<1x320xf32, #tpu.memory_space<vmem>>, vector<1x320xf32>
    %c0_356 = arith.constant 0 : index
    %c0_357 = arith.constant 0 : index
    %c0_358 = arith.constant 0 : index
    %324 = vector.load %arg11[%c0_356, %c0_357, %c0_358] : memref<2x64x320xf32, #tpu.memory_space<vmem>>, vector<1x64x320xf32>
    %325 = vector.shape_cast %324 : vector<1x64x320xf32> to vector<64x320xf32>
    %326 = vector.broadcast %323 : vector<1x320xf32> to vector<64x320xf32>
    %327 = arith.addf %325, %326 : vector<64x320xf32>
    %cst_359 = arith.constant 0.000000e+00 : f32
    %328 = vector.broadcast %cst_359 : f32 to vector<64x320xf32>
    %329 = arith.maximumf %327, %328 : vector<64x320xf32>
    %c1_360 = arith.constant 1 : index
    %c0_361 = arith.constant 0 : index
    %c0_362 = arith.constant 0 : index
    %330 = vector.load %arg11[%c1_360, %c0_361, %c0_362] : memref<2x64x320xf32, #tpu.memory_space<vmem>>, vector<1x64x320xf32>
    %331 = vector.shape_cast %330 : vector<1x64x320xf32> to vector<64x320xf32>
    %332 = vector.broadcast %323 : vector<1x320xf32> to vector<64x320xf32>
    %333 = arith.addf %331, %332 : vector<64x320xf32>
    %cst_363 = arith.constant 0.000000e+00 : f32
    %334 = vector.broadcast %cst_363 : f32 to vector<64x320xf32>
    %335 = arith.maximumf %333, %334 : vector<64x320xf32>
    %336 = arith.addf %329, %335 : vector<64x320xf32>
    %337 = arith.truncf %336 : vector<64x320xf32> to vector<64x320xbf16>
    %c0_364 = arith.constant 0 : index
    %c0_365 = arith.constant 0 : index
    %338 = vector.load %arg12[%c0_364, %c0_365] : memref<64x320xbf16, #tpu.memory_space<vmem>>, vector<64x320xbf16>
    tpu.vector_store %arg12[%c0_364, %c0_365], %337 {strides = array<i32>} : memref<64x320xbf16, #tpu.memory_space<vmem>>, vector<64x320xbf16>,
    %339 = tpu.iota {dimensions = array<i32: 0>} : vector<64x1xi32>
    %c8_i32 = arith.constant 8 : i32
    %c0_i32 = arith.constant 0 : i32
    %340 = arith.cmpi eq, %c8_i32, %c0_i32 : i32
    %c1_i32 = arith.constant 1 : i32
    %341 = arith.select %340, %c1_i32, %c8_i32 : i32
    %342 = vector.broadcast %341 : i32 to vector<64x1xi32>
    %343 = arith.remsi %339, %342 : vector<64x1xi32>
    %c0_i32_366 = arith.constant 0 : i32
    %344 = vector.broadcast %c0_i32_366 : i32 to vector<64x1xi32>
    %345 = arith.cmpi ne, %343, %344 : vector<64x1xi32>
    %c0_i32_367 = arith.constant 0 : i32
    %346 = vector.broadcast %c0_i32_367 : i32 to vector<64x1xi32>
    %347 = arith.cmpi slt, %343, %346 : vector<64x1xi32>
    %c0_i32_368 = arith.constant 0 : i32
    %348 = arith.cmpi slt, %341, %c0_i32_368 : i32
    %349 = vector.broadcast %348 : i1 to vector<64x1xi1>
    %350 = vector.broadcast %349 : vector<64x1xi1> to vector<64x1xi1>
    %351 = arith.xori %347, %350 : vector<64x1xi1>
    %352 = arith.andi %351, %345 : vector<64x1xi1>
    %353 = vector.broadcast %341 : i32 to vector<64x1xi32>
    %354 = arith.addi %343, %353 : vector<64x1xi32>
    %355 = arith.select %352, %354, %343 : vector<64x1xi1>, vector<64x1xi32>
    %c0_369 = arith.constant 0 : index
    %c0_370 = arith.constant 0 : index
    %356 = vector.load %arg12[%c0_369, %c0_370] : memref<64x320xbf16, #tpu.memory_space<vmem>>, vector<64x320xbf16>
    %c0_371 = arith.constant 0 : index
    %c0_372 = arith.constant 0 : index
    %c0_373 = arith.constant 0 : index
    %357 = vector.load %arg6[%c0_371, %c0_372, %c0_373] : memref<5x320x128xbf16, #tpu.memory_space<vmem>>, vector<1x320x128xbf16>
    %358 = vector.shape_cast %357 : vector<1x320x128xbf16> to vector<320x128xbf16>
    %cst_374 = arith.constant dense<0.000000e+00> : vector<64x128xf32>
    %359 = tpu.matmul %356, %358, %cst_374 {dimension_numbers = #tpu.dot_dimension_numbers<[1], [0], [0], [1], [0, 0, 1, 1], [], []>} : vector<64x320xbf16>, vector<320x128xbf16>, vector<64x128xf32> -> vector<64x128xf32>
    %c0_i32_375 = arith.constant 0 : i32
    %360 = vector.broadcast %c0_i32_375 : i32 to vector<64x1xi32>
    %361 = arith.cmpi eq, %355, %360 : vector<64x1xi32>
    %cst_376 = arith.constant 0.000000e+00 : f32
    %362 = vector.shape_cast %361 : vector<64x1xi1> to vector<64x1xi1>
    %363 = vector.broadcast %362 : vector<64x1xi1> to vector<64x128xi1>
    %364 = vector.broadcast %cst_376 : f32 to vector<64x128xf32>
    %365 = arith.select %363, %359, %364 : vector<64x128xi1>, vector<64x128xf32>
    %c0_377 = arith.constant 0 : index
    %c0_378 = arith.constant 0 : index
    %366 = vector.load %arg13[%c0_377, %c0_378] : memref<64x128xf32, #tpu.memory_space<vmem>>, vector<64x128xf32>
    tpu.vector_store %arg13[%c0_377, %c0_378], %365 {strides = array<i32>} : memref<64x128xf32, #tpu.memory_space<vmem>>, vector<64x128xf32>,
    %c1_379 = arith.constant 1 : index
    %c0_380 = arith.constant 0 : index
    %c0_381 = arith.constant 0 : index
    %367 = vector.load %arg6[%c1_379, %c0_380, %c0_381] : memref<5x320x128xbf16, #tpu.memory_space<vmem>>, vector<1x320x128xbf16>
    %368 = vector.shape_cast %367 : vector<1x320x128xbf16> to vector<320x128xbf16>
    %cst_382 = arith.constant dense<0.000000e+00> : vector<64x128xf32>
    %369 = tpu.matmul %356, %368, %cst_382 {dimension_numbers = #tpu.dot_dimension_numbers<[1], [0], [0], [1], [0, 0, 1, 1], [], []>} : vector<64x320xbf16>, vector<320x128xbf16>, vector<64x128xf32> -> vector<64x128xf32>
    %c1_i32_383 = arith.constant 1 : i32
    %370 = vector.broadcast %c1_i32_383 : i32 to vector<64x1xi32>
    %371 = arith.cmpi eq, %355, %370 : vector<64x1xi32>
    %cst_384 = arith.constant 0.000000e+00 : f32
    %372 = vector.shape_cast %371 : vector<64x1xi1> to vector<64x1xi1>
    %373 = vector.broadcast %372 : vector<64x1xi1> to vector<64x128xi1>
    %374 = vector.broadcast %cst_384 : f32 to vector<64x128xf32>
    %375 = arith.select %373, %369, %374 : vector<64x128xi1>, vector<64x128xf32>
    %c0_385 = arith.constant 0 : index
    %c0_386 = arith.constant 0 : index
    %376 = vector.load %arg13[%c0_385, %c0_386] : memref<64x128xf32, #tpu.memory_space<vmem>>, vector<64x128xf32>
    %377 = arith.addf %376, %375 : vector<64x128xf32>
    %c0_387 = arith.constant 0 : index
    %c0_388 = arith.constant 0 : index
    %378 = vector.load %arg13[%c0_387, %c0_388] : memref<64x128xf32, #tpu.memory_space<vmem>>, vector<64x128xf32>
    tpu.vector_store %arg13[%c0_387, %c0_388], %377 {strides = array<i32>} : memref<64x128xf32, #tpu.memory_space<vmem>>, vector<64x128xf32>,
    %c2_389 = arith.constant 2 : index
    %c0_390 = arith.constant 0 : index
    %c0_391 = arith.constant 0 : index
    %379 = vector.load %arg6[%c2_389, %c0_390, %c0_391] : memref<5x320x128xbf16, #tpu.memory_space<vmem>>, vector<1x320x128xbf16>
    %380 = vector.shape_cast %379 : vector<1x320x128xbf16> to vector<320x128xbf16>
    %cst_392 = arith.constant dense<0.000000e+00> : vector<64x128xf32>
    %381 = tpu.matmul %356, %380, %cst_392 {dimension_numbers = #tpu.dot_dimension_numbers<[1], [0], [0], [1], [0, 0, 1, 1], [], []>} : vector<64x320xbf16>, vector<320x128xbf16>, vector<64x128xf32> -> vector<64x128xf32>
    %c2_i32 = arith.constant 2 : i32
    %382 = vector.broadcast %c2_i32 : i32 to vector<64x1xi32>
    %383 = arith.cmpi eq, %355, %382 : vector<64x1xi32>
    %cst_393 = arith.constant 0.000000e+00 : f32
    %384 = vector.shape_cast %383 : vector<64x1xi1> to vector<64x1xi1>
    %385 = vector.broadcast %384 : vector<64x1xi1> to vector<64x128xi1>
    %386 = vector.broadcast %cst_393 : f32 to vector<64x128xf32>
    %387 = arith.select %385, %381, %386 : vector<64x128xi1>, vector<64x128xf32>
    %c0_394 = arith.constant 0 : index
    %c0_395 = arith.constant 0 : index
    %388 = vector.load %arg13[%c0_394, %c0_395] : memref<64x128xf32, #tpu.memory_space<vmem>>, vector<64x128xf32>
    %389 = arith.addf %388, %387 : vector<64x128xf32>
    %c0_396 = arith.constant 0 : index
    %c0_397 = arith.constant 0 : index
    %390 = vector.load %arg13[%c0_396, %c0_397] : memref<64x128xf32, #tpu.memory_space<vmem>>, vector<64x128xf32>
    tpu.vector_store %arg13[%c0_396, %c0_397], %389 {strides = array<i32>} : memref<64x128xf32, #tpu.memory_space<vmem>>, vector<64x128xf32>,
    %c3_398 = arith.constant 3 : index
    %c0_399 = arith.constant 0 : index
    %c0_400 = arith.constant 0 : index
    %391 = vector.load %arg6[%c3_398, %c0_399, %c0_400] : memref<5x320x128xbf16, #tpu.memory_space<vmem>>, vector<1x320x128xbf16>
    %392 = vector.shape_cast %391 : vector<1x320x128xbf16> to vector<320x128xbf16>
    %cst_401 = arith.constant dense<0.000000e+00> : vector<64x128xf32>
    %393 = tpu.matmul %356, %392, %cst_401 {dimension_numbers = #tpu.dot_dimension_numbers<[1], [0], [0], [1], [0, 0, 1, 1], [], []>} : vector<64x320xbf16>, vector<320x128xbf16>, vector<64x128xf32> -> vector<64x128xf32>
    %c3_i32 = arith.constant 3 : i32
    %394 = vector.broadcast %c3_i32 : i32 to vector<64x1xi32>
    %395 = arith.cmpi eq, %355, %394 : vector<64x1xi32>
    %cst_402 = arith.constant 0.000000e+00 : f32
    %396 = vector.shape_cast %395 : vector<64x1xi1> to vector<64x1xi1>
    %397 = vector.broadcast %396 : vector<64x1xi1> to vector<64x128xi1>
    %398 = vector.broadcast %cst_402 : f32 to vector<64x128xf32>
    %399 = arith.select %397, %393, %398 : vector<64x128xi1>, vector<64x128xf32>
    %c0_403 = arith.constant 0 : index
    %c0_404 = arith.constant 0 : index
    %400 = vector.load %arg13[%c0_403, %c0_404] : memref<64x128xf32, #tpu.memory_space<vmem>>, vector<64x128xf32>
    %401 = arith.addf %400, %399 : vector<64x128xf32>
    %c0_405 = arith.constant 0 : index
    %c0_406 = arith.constant 0 : index
    %402 = vector.load %arg13[%c0_405, %c0_406] : memref<64x128xf32, #tpu.memory_space<vmem>>, vector<64x128xf32>
    tpu.vector_store %arg13[%c0_405, %c0_406], %401 {strides = array<i32>} : memref<64x128xf32, #tpu.memory_space<vmem>>, vector<64x128xf32>,
    %c4_407 = arith.constant 4 : index
    %c0_408 = arith.constant 0 : index
    %c0_409 = arith.constant 0 : index
    %403 = vector.load %arg6[%c4_407, %c0_408, %c0_409] : memref<5x320x128xbf16, #tpu.memory_space<vmem>>, vector<1x320x128xbf16>
    %404 = vector.shape_cast %403 : vector<1x320x128xbf16> to vector<320x128xbf16>
    %cst_410 = arith.constant dense<0.000000e+00> : vector<64x128xf32>
    %405 = tpu.matmul %356, %404, %cst_410 {dimension_numbers = #tpu.dot_dimension_numbers<[1], [0], [0], [1], [0, 0, 1, 1], [], []>} : vector<64x320xbf16>, vector<320x128xbf16>, vector<64x128xf32> -> vector<64x128xf32>
    %c4_i32 = arith.constant 4 : i32
    %406 = vector.broadcast %c4_i32 : i32 to vector<64x1xi32>
    %407 = arith.cmpi eq, %355, %406 : vector<64x1xi32>
    %cst_411 = arith.constant 0.000000e+00 : f32
    %408 = vector.shape_cast %407 : vector<64x1xi1> to vector<64x1xi1>
    %409 = vector.broadcast %408 : vector<64x1xi1> to vector<64x128xi1>
    %410 = vector.broadcast %cst_411 : f32 to vector<64x128xf32>
    %411 = arith.select %409, %405, %410 : vector<64x128xi1>, vector<64x128xf32>
    %c0_412 = arith.constant 0 : index
    %c0_413 = arith.constant 0 : index
    %412 = vector.load %arg13[%c0_412, %c0_413] : memref<64x128xf32, #tpu.memory_space<vmem>>, vector<64x128xf32>
    %413 = arith.addf %412, %411 : vector<64x128xf32>
    %c0_414 = arith.constant 0 : index
    %c0_415 = arith.constant 0 : index
    %414 = vector.load %arg13[%c0_414, %c0_415] : memref<64x128xf32, #tpu.memory_space<vmem>>, vector<64x128xf32>
    tpu.vector_store %arg13[%c0_414, %c0_415], %413 {strides = array<i32>} : memref<64x128xf32, #tpu.memory_space<vmem>>, vector<64x128xf32>,
    %c0_416 = arith.constant 0 : index
    %c0_417 = arith.constant 0 : index
    %415 = vector.load %arg13[%c0_416, %c0_417] : memref<64x128xf32, #tpu.memory_space<vmem>>, vector<64x128xf32>
    %416 = vector.shape_cast %415 : vector<64x128xf32> to vector<8x8x128xf32>
    %cst_418 = arith.constant dense<0.000000e+00> : vector<8x128xf32>
    %417 = vector.multi_reduction <add>, %416, %cst_418 [1] : vector<8x8x128xf32> to vector<8x128xf32>
    %c0_419 = arith.constant 0 : index
    %c0_420 = arith.constant 0 : index
    %418 = vector.load %arg7[%c0_419, %c0_420] : memref<1x128xf32, #tpu.memory_space<vmem>>, vector<1x128xf32>
    %419 = vector.broadcast %418 : vector<1x128xf32> to vector<8x128xf32>
    %420 = arith.addf %417, %419 : vector<8x128xf32>
    %c0_421 = arith.constant 0 : index
    %c0_422 = arith.constant 0 : index
    %421 = vector.load %arg8[%c0_421, %c0_422] : memref<8x128xf32, #tpu.memory_space<vmem>>, vector<8x128xf32>
    tpu.vector_store %arg8[%c0_421, %c0_422], %420 {strides = array<i32>} : memref<8x128xf32, #tpu.memory_space<vmem>>, vector<8x128xf32>,
    return
  }
  func.func @transform_0(%arg0: i32) -> (i32, i32, i32, i32) {
    %c0_i32 = arith.constant 0 : i32
    %c0_i32_0 = arith.constant 0 : i32
    %c0_i32_1 = arith.constant 0 : i32
    %c0_i32_2 = arith.constant 0 : i32
    return %arg0, %c0_i32, %c0_i32_0, %c0_i32_1 : i32, i32, i32, i32
  }
  func.func @transform_1(%arg0: i32) -> (i32, i32, i32) {
    %c0_i32 = arith.constant 0 : i32
    %c0_i32_0 = arith.constant 0 : i32
    %c0_i32_1 = arith.constant 0 : i32
    %c0_i32_2 = arith.constant 0 : i32
    return %c0_i32, %c0_i32_0, %c0_i32_1 : i32, i32, i32
  }
  func.func @transform_2(%arg0: i32) -> (i32, i32) {
    %c0_i32 = arith.constant 0 : i32
    %c0_i32_0 = arith.constant 0 : i32
    %c0_i32_1 = arith.constant 0 : i32
    return %c0_i32, %c0_i32_0 : i32, i32
  }
  func.func @transform_3(%arg0: i32) -> (i32, i32, i32) {
    %c0_i32 = arith.constant 0 : i32
    %c0_i32_0 = arith.constant 0 : i32
    %c0_i32_1 = arith.constant 0 : i32
    %c0_i32_2 = arith.constant 0 : i32
    return %c0_i32, %c0_i32_0, %c0_i32_1 : i32, i32, i32
  }
  func.func @transform_4(%arg0: i32) -> (i32, i32) {
    %c0_i32 = arith.constant 0 : i32
    %c0_i32_0 = arith.constant 0 : i32
    %c0_i32_1 = arith.constant 0 : i32
    return %c0_i32, %c0_i32_0 : i32, i32
  }
  func.func @transform_5(%arg0: i32) -> (i32, i32, i32) {
    %c0_i32 = arith.constant 0 : i32
    %c0_i32_0 = arith.constant 0 : i32
    %c0_i32_1 = arith.constant 0 : i32
    %c0_i32_2 = arith.constant 0 : i32
    return %c0_i32, %c0_i32_0, %c0_i32_1 : i32, i32, i32
  }
  func.func @transform_6(%arg0: i32) -> (i32, i32) {
    %c0_i32 = arith.constant 0 : i32
    %c0_i32_0 = arith.constant 0 : i32
    %c0_i32_1 = arith.constant 0 : i32
    return %c0_i32, %c0_i32_0 : i32, i32
  }
  func.func @transform_7(%arg0: i32) -> (i32, i32) {
    %c0_i32 = arith.constant 0 : i32
    %c0_i32_0 = arith.constant 0 : i32
    return %arg0, %c0_i32 : i32, i32
  }
}

</mosaic_0001>

<bundles_post_ra>
// kernel: lenet1_forward.1
= control target key start
LH: loop header
LB: loop body
LE: loop exit
PB: predicated region body
PF: predicated region fallthrough
CT: control target
= control target key end

     0   :  { %v16910_v1 = vmov 0   ;;  %vm229_vm0 = vcmask 785408   ;;  %vm6837_vm1 = vcmask 1046528   ;;  %vm4960_vm2 = vsmask.f32 7424  ;;  %s16900_s1 = inlined_call_operand.vmem [shape: bf16[5,128,224], index: 1, kind: input, shape index: {}]   ;;  %s16901_s0 = inlined_call_operand.vmem [shape: bf16[1,8,64,128], index: 0, kind: input, shape index: {}]   ;;  %s16902_s3 = inlined_call_operand.vmem [shape: bf16[5,224,320], index: 3, kind: input, shape index: {}]   ;;  %s16903_s2 = inlined_call_operand.vmem [shape: f32[1,224], index: 2, kind: input, shape index: {}]   ;;  %s16904_s5 = inlined_call_operand.vmem [shape: bf16[5,320,128], index: 5, kind: input, shape index: {}]   ;;  %s16905_s4 = inlined_call_operand.vmem [shape: f32[1,320], index: 4, kind: input, shape index: {}]   ;;  %s16906_s6 = inlined_call_operand.vmem [shape: f32[1,128], index: 6, kind: input, shape index: {}]   ;;  %s16907_s7 = inlined_call_operand.vmem [shape: f32[8,128], index: 7, kind: output, shape index: {}]  }
   0x1   :  { %v11582_v0 = vld [vmem:[%s16900_s1 + $0x4] ss:$8 sps:$4 sm:$0xff]   ;;  %187 = vmatprep.mubr.bf16.mxu0 %v16910_v1  ;;  %310 = vmatprep.mubr.bf16.mxu1 %v16910_v1  ;;  %v11584_v2 = vld [vmem:[%s16900_s1] ss:$8 sps:$4 sm:$0xff]   ;;  %v11585_v3 = vld [vmem:[%s16900_s1 + $0x14] ss:$8 sps:$4 sm:$0xff]  }
   0x2   :  { %155 = vmatprep.subr.bf16.mxu0 %v11582_v0  ;;  %278 = vmatprep.subr.bf16.mxu1 %v11582_v0  ;;  %v11587_v4 = vld [vmem:[%s16900_s1 + $0x10] ss:$8 sps:$4 sm:$0xff]   ;;  %v11588_v5 = vld [vmem:[%s16900_s1 + $0x24] ss:$8 sps:$4 sm:$0xff]   ;;  %v11590_v6 = vld [vmem:[%s16900_s1 + $0x20] ss:$8 sps:$4 sm:$0xff]  }
   0x3   :  { %156 = vmatpush1.bf16.msra.mxu0 %v11584_v2  ;;  %279 = vmatpush1.bf16.msra.mxu1 %v11584_v2  ;;  %v11591_v7 = vld [vmem:[%s16900_s1 + $0x34] ss:$8 sps:$4 sm:$0xff]   ;;  %v11593_v8 = vld [vmem:[%s16900_s1 + $0x30] ss:$8 sps:$4 sm:$0xff]   ;;  %v11594_v9 = vld [vmem:[%s16900_s1 + $0x44] ss:$8 sps:$4 sm:$0xff]  }
   0x4   :  { %157 = vmatprep.subr.bf16.mxu0 %v11585_v3  ;;  %280 = vmatprep.subr.bf16.mxu1 %v11585_v3  ;;  %v11596_v10 = vld [vmem:[%s16900_s1 + $0x40] ss:$8 sps:$4 sm:$0xff]   ;;  %v11597_v11 = vld [vmem:[%s16900_s1 + $0x54] ss:$8 sps:$4 sm:$0xff]   ;;  %v11599_v12 = vld [vmem:[%s16900_s1 + $0x50] ss:$8 sps:$4 sm:$0xff]  }
   0x5   :  { %v11600_v13 = vld [vmem:[%s16900_s1 + $0x64] ss:$8 sps:$4 sm:$0xff]   ;;  %v11602_v14 = vld [vmem:[%s16900_s1 + $0x60] ss:$8 sps:$4 sm:$0xff]   ;;  %v11603_v15 = vld [vmem:[%s16900_s1 + $0x74] ss:$8 sps:$4 sm:$0xff]  }
   0x6   :  { %v11605_v16 = vld [vmem:[%s16900_s1 + $0x70] ss:$8 sps:$4 sm:$0xff]   ;;  %v11606_v17 = vld [vmem:[%s16901_s0] sm:$0xff]   ;;  %v11608_v19 = vld [vmem:[%s16901_s0 + $0x8] sm:$0xff]   ;;  %vm4183_vm3 = vcmask 523264  }
   0x7   :  { %158 = vmatpush1.bf16.msra.mxu0 %v11587_v4  ;;  %281 = vmatpush1.bf16.msra.mxu1 %v11587_v4  ;;  %v11607_v18 = vld [vmem:[%s16901_s0 + $0x20] sm:$0xff]   ;;  %v11609_v20 = vld [vmem:[%s16901_s0 + $0x28] sm:$0xff]   ;;  %v11610_v21 = vld [vmem:[%s16901_s0 + $0x10] sm:$0xff]  }
   0x8   :  { %159 = vmatprep.subr.bf16.mxu0 %v11588_v5  ;;  %282 = vmatprep.subr.bf16.mxu1 %v11588_v5  ;;  %v11611_v22 = vld [vmem:[%s16901_s0 + $0x30] sm:$0xff]   ;;  %v11612_v23 = vld [vmem:[%s16901_s0 + $0x18] sm:$0xff]   ;;  %v12328_v25 = vld [vmem:[%s16900_s1 + $0x84] ss:$8 sps:$4 sm:$0xff]  }
   0x9   :  { %v11613_v24 = vld [vmem:[%s16901_s0 + $0x38] sm:$0xff]   ;;  %v11614_v26 = vld [vmem:[%s16901_s0 + $0x40] sm:$0xff]   ;;  %v11622_v32 = vld [vmem:[%s16901_s0 + $0x48] sm:$0xff]  }
   0xa   :  { %v11615_v27 = vld [vmem:[%s16901_s0 + $0x60] sm:$0xff]   ;;  %v12348_v29 = vld [vmem:[%s16900_s1 + $0x94] ss:$8 sps:$4 sm:$0xff]   ;;  %v12355_v30 = vld [vmem:[%s16900_s1 + $0x90] ss:$8 sps:$4 sm:$0xff]  }
   0xb   :  { %160 = vmatpush1.bf16.msra.mxu0 %v11590_v6  ;;  %283 = vmatpush1.bf16.msra.mxu1 %v11590_v6  ;;  %v12341_v28 = vld [vmem:[%s16900_s1 + $0x80] ss:$8 sps:$4 sm:$0xff]   ;;  %v12362_v31 = vld [vmem:[%s16900_s1 + $0xa4] ss:$8 sps:$4 sm:$0xff]   ;;  %v12384_v35 = vld [vmem:[%s16900_s1 + $0xb4] ss:$8 sps:$4 sm:$0xff]  }
   0xc   :  { %161 = vmatprep.subr.bf16.mxu0 %v11591_v7  ;;  %284 = vmatprep.subr.bf16.mxu1 %v11591_v7  ;;  %v11623_v33 = vld [vmem:[%s16901_s0 + $0x68] sm:$0xff]   ;;  %v12391_v36 = vld [vmem:[%s16900_s1 + $0xb0] ss:$8 sps:$4 sm:$0xff]   ;;  %v12420_v41 = vld [vmem:[%s16900_s1 + $0xd4] ss:$8 sps:$4 sm:$0xff]  }
   0xd   :  { %v12377_v34 = vld [vmem:[%s16900_s1 + $0xa0] ss:$8 sps:$4 sm:$0xff]   ;;  %v12398_v37 = vld [vmem:[%s16900_s1 + $0xc4] ss:$8 sps:$4 sm:$0xff]   ;;  %v11630_v38 = vld [vmem:[%s16901_s0 + $0x50] sm:$0xff]  }
   0xe   :  { %v11631_v39 = vld [vmem:[%s16901_s0 + $0x70] sm:$0xff]   ;;  %v12413_v40 = vld [vmem:[%s16900_s1 + $0xc0] ss:$8 sps:$4 sm:$0xff]   ;;  %v12434_v43 = vld [vmem:[%s16900_s1 + $0xe4] ss:$8 sps:$4 sm:$0xff]  }
   0xf   :  { %162 = vmatpush1.bf16.msra.mxu0 %v11593_v8  ;;  %285 = vmatpush1.bf16.msra.mxu1 %v11593_v8  ;;  %v12427_v42 = vld [vmem:[%s16900_s1 + $0xd0] ss:$8 sps:$4 sm:$0xff]   ;;  %v12449_v46 = vld [vmem:[%s16900_s1 + $0xe0] ss:$8 sps:$4 sm:$0xff]   ;;  %v11643_v47 = vld [vmem:[%s16900_s1 + $0xf4] ss:$8 sps:$4 sm:$0xff]  }
  0x10   :  { %163 = vmatprep.subr.bf16.mxu0 %v11594_v9  ;;  %286 = vmatprep.subr.bf16.mxu1 %v11594_v9  ;;  %v11638_v44 = vld [vmem:[%s16901_s0 + $0x58] sm:$0xff]   ;;  %v11646_v49 = vld [vmem:[%s16901_s0 + $0x20] sm:$0xff]   ;;  %v11648_v51 = vld [vmem:[%s16901_s0 + $0x28] sm:$0xff]  }
  0x11   :  { %v11639_v45 = vld [vmem:[%s16901_s0 + $0x78] sm:$0xff]   ;;  %v11647_v50 = vld [vmem:[%s16901_s0 + $0x40] sm:$0xff]   ;;  %v11649_v52 = vld [vmem:[%s16901_s0 + $0x48] sm:$0xff]  }
  0x12   :  { %v12461_v48 = vld [vmem:[%s16900_s1 + $0xf0] ss:$8 sps:$4 sm:$0xff]   ;;  %v12528_v57 = vld [vmem:[%s16900_s1 + $0x104] ss:$8 sps:$4 sm:$0xff]   ;;  %v12543_v60 = vld [vmem:[%s16900_s1 + $0x100] ss:$8 sps:$4 sm:$0xff]  }
  0x13   :  { %164 = vmatpush1.bf16.msra.mxu0 %v11596_v10  ;;  %287 = vmatpush1.bf16.msra.mxu1 %v11596_v10  ;;  %v11650_v53 = vld [vmem:[%s16901_s0 + $0x30] sm:$0xff]   ;;  %v11652_v55 = vld [vmem:[%s16901_s0 + $0x38] sm:$0xff]   ;;  %v11654_v58 = vld [vmem:[%s16901_s0 + $0x60] sm:$0xff]  }
  0x14   :  { %165 = vmatprep.subr.bf16.mxu0 %v11597_v11  ;;  %288 = vmatprep.subr.bf16.mxu1 %v11597_v11  ;;  %v11651_v54 = vld [vmem:[%s16901_s0 + $0x50] sm:$0xff]   ;;  %v11653_v56 = vld [vmem:[%s16901_s0 + $0x58] sm:$0xff]   ;;  %v11655_v59 = vld [vmem:[%s16901_s0 + $0x80] sm:$0xff]  }
  0x15   :  { %v12550_v61 = vld [vmem:[%s16900_s1 + $0x114] ss:$8 sps:$4 sm:$0xff]   ;;  %v12557_v62 = vld [vmem:[%s16900_s1 + $0x110] ss:$8 sps:$4 sm:$0xff]   ;;  %v12564_v63 = vld [vmem:[%s16900_s1 + $0x124] ss:$8 sps:$4 sm:$0xff]  }
  0x17   :  { %166 = vmatpush1.bf16.msra.mxu0 %v11599_v12  ;;  %289 = vmatpush1.bf16.msra.mxu1 %v11599_v12 }
  0x18   :  { %167 = vmatprep.subr.bf16.mxu0 %v11600_v13  ;;  %290 = vmatprep.subr.bf16.mxu1 %v11600_v13 }
  0x1b   :  { %168 = vmatpush1.bf16.msra.mxu0 %v11602_v14  ;;  %291 = vmatpush1.bf16.msra.mxu1 %v11602_v14 }
  0x1c   :  { %169 = vmatprep.subr.bf16.mxu0 %v11603_v15  ;;  %292 = vmatprep.subr.bf16.mxu1 %v11603_v15 }
  0x1f   :  { %170 = vmatpush1.bf16.msra.mxu0 %v11605_v16  ;;  %293 = vmatpush1.bf16.msra.mxu1 %v11605_v16 }
  0x20   :  { %401 = vmatprep.subr.bf16.mxu0 %v11582_v0  ;;  %524 = vmatprep.subr.bf16.mxu1 %v11582_v0  ;;  %v11662_v0 = vld [vmem:[%s16901_s0 + $0x68] sm:$0xff]  }
  0x22   :  { %188 = vmatmul.mubr.bf16.vlgmr.msra.gmra.mrb[0].mxu0 %v11606_v17  ;;  %311 = vmatmul.mubr.bf16.vlgmr.msra.gmra.mrb[0].mxu1 %v11607_v18  ;;  %v12663_v17 = vld [vmem:[%s16900_s1 + $0x170] ss:$8 sps:$4 sm:$0xff]   ;;  %v11686_v18 = vld [vmem:[%s16901_s0 + $0x40] sm:$0xff]  }
  0x23   :  { %402 = vmatpush1.bf16.msra.mxu0 %v11584_v2  ;;  %525 = vmatpush1.bf16.msra.mxu1 %v11584_v2  ;;  %v11663_v2 = vld [vmem:[%s16901_s0 + $0x88] sm:$0xff]  }
  0x24   :  { %403 = vmatprep.subr.bf16.mxu0 %v11585_v3  ;;  %526 = vmatprep.subr.bf16.mxu1 %v11585_v3  ;;  %v12579_v3 = vld [vmem:[%s16900_s1 + $0x120] ss:$8 sps:$4 sm:$0xff]  }
  0x25   :  { %197 = vmatprep.mubr.bf16.mxu0 %v16910_v1  ;;  %320 = vmatprep.mubr.bf16.mxu1 %v16910_v1 }
  0x27   :  { %404 = vmatpush1.bf16.msra.mxu0 %v11587_v4  ;;  %527 = vmatpush1.bf16.msra.mxu1 %v11587_v4  ;;  %v12586_v4 = vld [vmem:[%s16900_s1 + $0x134] ss:$8 sps:$4 sm:$0xff]  }
  0x28   :  { %405 = vmatprep.subr.bf16.mxu0 %v11588_v5  ;;  %528 = vmatprep.subr.bf16.mxu1 %v11588_v5  ;;  %v12593_v5 = vld [vmem:[%s16900_s1 + $0x130] ss:$8 sps:$4 sm:$0xff]  }
  0x2a   :  { %198 = vmatmul.mubr.bf16.gmra.mrb[4].mxu0 %v11608_v19  ;;  %321 = vmatmul.mubr.bf16.gmra.mrb[4].mxu1 %v11609_v20  ;;  %v11687_v19 = vld [vmem:[%s16901_s0 + $0x60] sm:$0xff]   ;;  %v11688_v20 = vld [vmem:[%s16901_s0 + $0x48] sm:$0xff]  }
  0x2b   :  { %406 = vmatpush1.bf16.msra.mxu0 %v11590_v6  ;;  %529 = vmatpush1.bf16.msra.mxu1 %v11590_v6  ;;  %v12600_v6 = vld [vmem:[%s16900_s1 + $0x144] ss:$8 sps:$4 sm:$0xff]  }
  0x2c   :  { %407 = vmatprep.subr.bf16.mxu0 %v11591_v7  ;;  %530 = vmatprep.subr.bf16.mxu1 %v11591_v7  ;;  %v11670_v7 = vld [vmem:[%s16901_s0 + $0x70] sm:$0xff]  }
  0x2d   :  { %207 = vmatprep.mubr.bf16.mxu0 %v16910_v1  ;;  %330 = vmatprep.mubr.bf16.mxu1 %v16910_v1 }
  0x2f   :  { %408 = vmatpush1.bf16.msra.mxu0 %v11593_v8  ;;  %531 = vmatpush1.bf16.msra.mxu1 %v11593_v8  ;;  %v11671_v8 = vld [vmem:[%s16901_s0 + $0x90] sm:$0xff]  }
  0x30   :  { %409 = vmatprep.subr.bf16.mxu0 %v11594_v9  ;;  %532 = vmatprep.subr.bf16.mxu1 %v11594_v9  ;;  %v12615_v9 = vld [vmem:[%s16900_s1 + $0x140] ss:$8 sps:$4 sm:$0xff]  }
  0x32   :  { %208 = vmatmul.mubr.bf16.gmra.mrb[8].mxu0 %v11610_v21  ;;  %331 = vmatmul.mubr.bf16.gmra.mrb[8].mxu1 %v11611_v22  ;;  %v11689_v21 = vld [vmem:[%s16901_s0 + $0x68] sm:$0xff]   ;;  %v11690_v22 = vld [vmem:[%s16901_s0 + $0x50] sm:$0xff]  }
  0x33   :  { %410 = vmatpush1.bf16.msra.mxu0 %v11596_v10  ;;  %533 = vmatpush1.bf16.msra.mxu1 %v11596_v10  ;;  %v12622_v10 = vld [vmem:[%s16900_s1 + $0x154] ss:$8 sps:$4 sm:$0xff]  }
  0x34   :  { %411 = vmatprep.subr.bf16.mxu0 %v11597_v11  ;;  %534 = vmatprep.subr.bf16.mxu1 %v11597_v11  ;;  %v12629_v11 = vld [vmem:[%s16900_s1 + $0x150] ss:$8 sps:$4 sm:$0xff]  }
  0x35   :  { %217 = vmatprep.mubr.bf16.mxu0 %v16910_v1  ;;  %340 = vmatprep.mubr.bf16.mxu1 %v16910_v1 }
  0x37   :  { %412 = vmatpush1.bf16.msra.mxu0 %v11599_v12  ;;  %535 = vmatpush1.bf16.msra.mxu1 %v11599_v12  ;;  %v12636_v12 = vld [vmem:[%s16900_s1 + $0x164] ss:$8 sps:$4 sm:$0xff]  }
  0x38   :  { %413 = vmatprep.subr.bf16.mxu0 %v11600_v13  ;;  %536 = vmatprep.subr.bf16.mxu1 %v11600_v13  ;;  %v11678_v13 = vld [vmem:[%s16901_s0 + $0x78] sm:$0xff]  }
  0x3a   :  { %218 = vmatmul.mubr.bf16.gmra.mrb[12].mxu0 %v11612_v23  ;;  %341 = vmatmul.mubr.bf16.gmra.mrb[12].mxu1 %v11613_v24  ;;  %v11691_v23 = vld [vmem:[%s16901_s0 + $0x70] sm:$0xff]   ;;  %v11692_v24 = vld [vmem:[%s16901_s0 + $0x58] sm:$0xff]  }
  0x3b   :  { %414 = vmatpush1.bf16.msra.mxu0 %v11602_v14  ;;  %537 = vmatpush1.bf16.msra.mxu1 %v11602_v14  ;;  %v11679_v14 = vld [vmem:[%s16901_s0 + $0x98] sm:$0xff]  }
  0x3c   :  { %415 = vmatprep.subr.bf16.mxu0 %v11603_v15  ;;  %538 = vmatprep.subr.bf16.mxu1 %v11603_v15  ;;  %v12651_v15 = vld [vmem:[%s16900_s1 + $0x160] ss:$8 sps:$4 sm:$0xff]  }
  0x3d   :  { %433 = vmatprep.mubr.bf16.mxu0 %v16910_v1  ;;  %556 = vmatprep.mubr.bf16.mxu1 %v16910_v1 }
  0x3f   :  { %416 = vmatpush1.bf16.msra.mxu0 %v11605_v16  ;;  %539 = vmatpush1.bf16.msra.mxu1 %v11605_v16  ;;  %v11683_v16 = vld [vmem:[%s16900_s1 + $0x174] ss:$8 sps:$4 sm:$0xff]  }
  0x40   :  { %743 = vmatprep.subr.bf16.mxu0 %v12328_v25  ;;  %896 = vmatprep.subr.bf16.mxu1 %v12328_v25 }
  0x42   :  { %434 = vmatmul.mubr.bf16.vlgmr.msra.gmra.mrb[16].mxu0 %v11614_v26  ;;  %557 = vmatmul.mubr.bf16.vlgmr.msra.gmra.mrb[16].mxu1 %v11615_v27  ;;  %v12730_v26 = vld [vmem:[%s16900_s1 + $0x184] ss:$8 sps:$4 sm:$0xff]  }
  0x43   :  { %744 = vmatpush1.bf16.msra.mxu0 %v12341_v28  ;;  %897 = vmatpush1.bf16.msra.mxu1 %v12341_v28  ;;  %v11694_v27 = vld [vmem:[%s16901_s0 + $0x80] sm:$0xff]  }
  0x44   :  { %745 = vmatprep.subr.bf16.mxu0 %v12348_v29  ;;  %898 = vmatprep.subr.bf16.mxu1 %v12348_v29 }
  0x45   :  { %443 = vmatprep.mubr.bf16.mxu0 %v16910_v1  ;;  %566 = vmatprep.mubr.bf16.mxu1 %v16910_v1 }
  0x47   :  { %746 = vmatpush1.bf16.msra.mxu0 %v12355_v30  ;;  %899 = vmatpush1.bf16.msra.mxu1 %v12355_v30 }
  0x48   :  { %747 = vmatprep.subr.bf16.mxu0 %v12362_v31  ;;  %900 = vmatprep.subr.bf16.mxu1 %v12362_v31 }
  0x4a   :  { %444 = vmatmul.mubr.bf16.gmra.mrb[20].mxu0 %v11622_v32  ;;  %567 = vmatmul.mubr.bf16.gmra.mrb[20].mxu1 %v11623_v33  ;;  %v12766_v32 = vld [vmem:[%s16900_s1 + $0x1a4] ss:$8 sps:$4 sm:$0xff]  }
  0x4b   :  { %748 = vmatpush1.bf16.msra.mxu0 %v12377_v34  ;;  %901 = vmatpush1.bf16.msra.mxu1 %v12377_v34  ;;  %v11702_v33 = vld [vmem:[%s16901_s0 + $0x88] sm:$0xff]  }
  0x4c   :  { %749 = vmatprep.subr.bf16.mxu0 %v12384_v35  ;;  %902 = vmatprep.subr.bf16.mxu1 %v12384_v35 }
  0x4d   :  { %453 = vmatprep.mubr.bf16.mxu0 %v16910_v1  ;;  %576 = vmatprep.mubr.bf16.mxu1 %v16910_v1 }
  0x4f   :  { %750 = vmatpush1.bf16.msra.mxu0 %v12391_v36  ;;  %903 = vmatpush1.bf16.msra.mxu1 %v12391_v36 }
  0x50   :  { %751 = vmatprep.subr.bf16.mxu0 %v12398_v37  ;;  %904 = vmatprep.subr.bf16.mxu1 %v12398_v37 }
  0x52   :  { %454 = vmatmul.mubr.bf16.gmra.mrb[24].mxu0 %v11630_v38  ;;  %577 = vmatmul.mubr.bf16.gmra.mrb[24].mxu1 %v11631_v39  ;;  %v12802_v38 = vld [vmem:[%s16900_s1 + $0x1c4] ss:$8 sps:$4 sm:$0xff]   ;;  %v11710_v39 = vld [vmem:[%s16901_s0 + $0x90] sm:$0xff]  }
  0x53   :  { %752 = vmatpush1.bf16.msra.mxu0 %v12413_v40  ;;  %905 = vmatpush1.bf16.msra.mxu1 %v12413_v40 }
  0x54   :  { %753 = vmatprep.subr.bf16.mxu0 %v12420_v41  ;;  %906 = vmatprep.subr.bf16.mxu1 %v12420_v41 }
  0x55   :  { %463 = vmatprep.mubr.bf16.mxu0 %v16910_v1  ;;  %586 = vmatprep.mubr.bf16.mxu1 %v16910_v1 }
  0x57   :  { %754 = vmatpush1.bf16.msra.mxu0 %v12427_v42  ;;  %907 = vmatpush1.bf16.msra.mxu1 %v12427_v42 }
  0x58   :  { %755 = vmatprep.subr.bf16.mxu0 %v12434_v43  ;;  %908 = vmatprep.subr.bf16.mxu1 %v12434_v43 }
  0x5a   :  { %464 = vmatmul.mubr.bf16.gmra.mrb[28].mxu0 %v11638_v44  ;;  %587 = vmatmul.mubr.bf16.gmra.mrb[28].mxu1 %v11639_v45  ;;  %v12838_v44 = vld [vmem:[%s16900_s1 + $0x1e4] ss:$8 sps:$4 sm:$0xff]   ;;  %v11718_v45 = vld [vmem:[%s16901_s0 + $0x98] sm:$0xff]  }
  0x5b   :  { %756 = vmatpush1.bf16.msra.mxu0 %v12449_v46  ;;  %909 = vmatpush1.bf16.msra.mxu1 %v12449_v46 }
  0x5c   :  { %757 = vmatprep.subr.bf16.mxu0 %v11643_v47  ;;  %910 = vmatprep.subr.bf16.mxu1 %v11643_v47 }
  0x5d   :  { %775 = vmatprep.mubr.bf16.mxu0 %v16910_v1  ;;  %928 = vmatprep.mubr.bf16.mxu1 %v16910_v1 }
  0x5f   :  { %758 = vmatpush1.bf16.msra.mxu0 %v12461_v48  ;;  %911 = vmatpush1.bf16.msra.mxu1 %v12461_v48 }
  0x60   :  { %1049 = vmatprep.subr.bf16.mxu0 %v12328_v25  ;;  %1203 = vmatprep.subr.bf16.mxu1 %v12328_v25  ;;  %v11693_v25 = vld [vmem:[%s16901_s0 + $0x78] sm:$0xff]  }
  0x62   :  { %776 = vmatmul.mubr.bf16.vlgmr.msra.gmra.mrb[32].mxu0 %v11646_v49  ;;  %929 = vmatmul.mubr.bf16.vlgmr.msra.gmra.mrb[32].mxu1 %v11647_v50  ;;  %v12867_v49 = vld [vmem:[%s16900_s1 + $0x1f0] ss:$8 sps:$4 sm:$0xff]   ;;  %v11726_v50 = vld [vmem:[%s16901_s0 + $0x60] sm:$0xff]  }
  0x63   :  { %1050 = vmatpush1.bf16.msra.mxu0 %v12341_v28  ;;  %1204 = vmatpush1.bf16.msra.mxu1 %v12341_v28  ;;  %v11695_v28 = vld [vmem:[%s16901_s0 + $0xa0] sm:$0xff]  }
  0x64   :  { %1051 = vmatprep.subr.bf16.mxu0 %v12348_v29  ;;  %1205 = vmatprep.subr.bf16.mxu1 %v12348_v29  ;;  %v12745_v29 = vld [vmem:[%s16900_s1 + $0x180] ss:$8 sps:$4 sm:$0xff]  }
  0x65   :  { %785 = vmatprep.mubr.bf16.mxu0 %v16910_v1  ;;  %938 = vmatprep.mubr.bf16.mxu1 %v16910_v1 }
  0x67   :  { %1052 = vmatpush1.bf16.msra.mxu0 %v12355_v30  ;;  %1206 = vmatpush1.bf16.msra.mxu1 %v12355_v30  ;;  %v12752_v30 = vld [vmem:[%s16900_s1 + $0x194] ss:$8 sps:$4 sm:$0xff]  }
  0x68   :  { %1053 = vmatprep.subr.bf16.mxu0 %v12362_v31  ;;  %1207 = vmatprep.subr.bf16.mxu1 %v12362_v31  ;;  %v12759_v31 = vld [vmem:[%s16900_s1 + $0x190] ss:$8 sps:$4 sm:$0xff]  }
  0x6a   :  { %786 = vmatmul.mubr.bf16.gmra.mrb[36].mxu0 %v11648_v51  ;;  %939 = vmatmul.mubr.bf16.gmra.mrb[36].mxu1 %v11649_v52  ;;  %v11727_v51 = vld [vmem:[%s16901_s0 + $0x80] sm:$0xff]   ;;  %v11728_v52 = vld [vmem:[%s16901_s0 + $0x68] sm:$0xff]  }
  0x6b   :  { %1054 = vmatpush1.bf16.msra.mxu0 %v12377_v34  ;;  %1208 = vmatpush1.bf16.msra.mxu1 %v12377_v34  ;;  %v11703_v34 = vld [vmem:[%s16901_s0 + $0xa8] sm:$0xff]  }
  0x6c   :  { %1055 = vmatprep.subr.bf16.mxu0 %v12384_v35  ;;  %1209 = vmatprep.subr.bf16.mxu1 %v12384_v35  ;;  %v12781_v35 = vld [vmem:[%s16900_s1 + $0x1a0] ss:$8 sps:$4 sm:$0xff]  }
  0x6d   :  { %795 = vmatprep.mubr.bf16.mxu0 %v16910_v1  ;;  %948 = vmatprep.mubr.bf16.mxu1 %v16910_v1 }
  0x6f   :  { %1056 = vmatpush1.bf16.msra.mxu0 %v12391_v36  ;;  %1210 = vmatpush1.bf16.msra.mxu1 %v12391_v36  ;;  %v12788_v36 = vld [vmem:[%s16900_s1 + $0x1b4] ss:$8 sps:$4 sm:$0xff]  }
  0x70   :  { %1057 = vmatprep.subr.bf16.mxu0 %v12398_v37  ;;  %1211 = vmatprep.subr.bf16.mxu1 %v12398_v37  ;;  %v12795_v37 = vld [vmem:[%s16900_s1 + $0x1b0] ss:$8 sps:$4 sm:$0xff]  }
  0x72   :  { %796 = vmatmul.mubr.bf16.gmra.mrb[40].mxu0 %v11650_v53  ;;  %949 = vmatmul.mubr.bf16.gmra.mrb[40].mxu1 %v11651_v54  ;;  %v11729_v53 = vld [vmem:[%s16901_s0 + $0x88] sm:$0xff]   ;;  %v11730_v54 = vld [vmem:[%s16901_s0 + $0x70] sm:$0xff]  }
  0x73   :  { %1058 = vmatpush1.bf16.msra.mxu0 %v12413_v40  ;;  %1212 = vmatpush1.bf16.msra.mxu1 %v12413_v40  ;;  %v11711_v40 = vld [vmem:[%s16901_s0 + $0xb0] sm:$0xff]  }
  0x74   :  { %1059 = vmatprep.subr.bf16.mxu0 %v12420_v41  ;;  %1213 = vmatprep.subr.bf16.mxu1 %v12420_v41  ;;  %v12817_v41 = vld [vmem:[%s16900_s1 + $0x1c0] ss:$8 sps:$4 sm:$0xff]  }
  0x75   :  { %805 = vmatprep.mubr.bf16.mxu0 %v16910_v1  ;;  %958 = vmatprep.mubr.bf16.mxu1 %v16910_v1 }
  0x77   :  { %1060 = vmatpush1.bf16.msra.mxu0 %v12427_v42  ;;  %1214 = vmatpush1.bf16.msra.mxu1 %v12427_v42  ;;  %v12824_v42 = vld [vmem:[%s16900_s1 + $0x1d4] ss:$8 sps:$4 sm:$0xff]  }
  0x78   :  { %1061 = vmatprep.subr.bf16.mxu0 %v12434_v43  ;;  %1215 = vmatprep.subr.bf16.mxu1 %v12434_v43  ;;  %v12831_v43 = vld [vmem:[%s16900_s1 + $0x1d0] ss:$8 sps:$4 sm:$0xff]  }
  0x7a   :  { %806 = vmatmul.mubr.bf16.gmra.mrb[44].mxu0 %v11652_v55  ;;  %959 = vmatmul.mubr.bf16.gmra.mrb[44].mxu1 %v11653_v56  ;;  %v11731_v55 = vld [vmem:[%s16901_s0 + $0x90] sm:$0xff]  }
  0x7b   :  { %1062 = vmatpush1.bf16.msra.mxu0 %v12449_v46  ;;  %1216 = vmatpush1.bf16.msra.mxu1 %v12449_v46  ;;  %v11719_v46 = vld [vmem:[%s16901_s0 + $0xb8] sm:$0xff]  }
  0x7c   :  { %1063 = vmatprep.subr.bf16.mxu0 %v11643_v47  ;;  %1217 = vmatprep.subr.bf16.mxu1 %v11643_v47  ;;  %v12853_v47 = vld [vmem:[%s16900_s1 + $0x1e0] ss:$8 sps:$4 sm:$0xff]  }
  0x7d   :  { %1081 = vmatprep.mubr.bf16.mxu0 %v16910_v1  ;;  %1235 = vmatprep.mubr.bf16.mxu1 %v16910_v1 }
  0x7f   :  { %1064 = vmatpush1.bf16.msra.mxu0 %v12461_v48  ;;  %1218 = vmatpush1.bf16.msra.mxu1 %v12461_v48  ;;  %v12860_v48 = vld [vmem:[%s16900_s1 + $0x1f4] ss:$8 sps:$4 sm:$0xff]  }
  0x80   :  { %1453 = vmatprep.subr.bf16.mxu0 %v12528_v57  ;;  %1606 = vmatprep.subr.bf16.mxu1 %v12528_v57 }
  0x82   :  { %1082 = vmatmul.mubr.bf16.vlgmr.msra.gmra.mrb[48].mxu0 %v11654_v58  ;;  %1236 = vmatmul.mubr.bf16.vlgmr.msra.gmra.mrb[48].mxu1 %v11655_v59 }
  0x83   :  { %1454 = vmatpush1.bf16.msra.mxu0 %v12543_v60  ;;  %1607 = vmatpush1.bf16.msra.mxu1 %v12543_v60 }
  0x84   :  { %1455 = vmatprep.subr.bf16.mxu0 %v12550_v61  ;;  %1608 = vmatprep.subr.bf16.mxu1 %v12550_v61 }
  0x85   :  { %1091 = vmatprep.mubr.bf16.mxu0 %v16910_v1  ;;  %1245 = vmatprep.mubr.bf16.mxu1 %v16910_v1 }
  0x87   :  { %1456 = vmatpush1.bf16.msra.mxu0 %v12557_v62  ;;  %1609 = vmatpush1.bf16.msra.mxu1 %v12557_v62 }
  0x88   :  { %1457 = vmatprep.subr.bf16.mxu0 %v12564_v63  ;;  %1610 = vmatprep.subr.bf16.mxu1 %v12564_v63 }
  0x8a   :  { %1092 = vmatmul.mubr.bf16.gmra.mrb[52].mxu0 %v11662_v0  ;;  %1246 = vmatmul.mubr.bf16.gmra.mrb[52].mxu1 %v11663_v2 }
  0x8b   :  { %1458 = vmatpush1.bf16.msra.mxu0 %v12579_v3  ;;  %1611 = vmatpush1.bf16.msra.mxu1 %v12579_v3 }
  0x8c   :  { %1459 = vmatprep.subr.bf16.mxu0 %v12586_v4  ;;  %1612 = vmatprep.subr.bf16.mxu1 %v12586_v4 }
  0x8d   :  { %1101 = vmatprep.mubr.bf16.mxu0 %v16910_v1  ;;  %1255 = vmatprep.mubr.bf16.mxu1 %v16910_v1 }
  0x8f   :  { %1460 = vmatpush1.bf16.msra.mxu0 %v12593_v5  ;;  %1613 = vmatpush1.bf16.msra.mxu1 %v12593_v5 }
  0x90   :  { %1461 = vmatprep.subr.bf16.mxu0 %v12600_v6  ;;  %1614 = vmatprep.subr.bf16.mxu1 %v12600_v6 }
  0x92   :  { %1102 = vmatmul.mubr.bf16.gmra.mrb[56].mxu0 %v11670_v7  ;;  %1256 = vmatmul.mubr.bf16.gmra.mrb[56].mxu1 %v11671_v8  ;;  %v11734_v8 = vld [vmem:[%s16901_s0 + $0xa0] sm:$0xff]  }
  0x93   :  { %1462 = vmatpush1.bf16.msra.mxu0 %v12615_v9  ;;  %1615 = vmatpush1.bf16.msra.mxu1 %v12615_v9 }
  0x94   :  { %1463 = vmatprep.subr.bf16.mxu0 %v12622_v10  ;;  %1616 = vmatprep.subr.bf16.mxu1 %v12622_v10 }
  0x95   :  { %1111 = vmatprep.mubr.bf16.mxu0 %v16910_v1  ;;  %1265 = vmatprep.mubr.bf16.mxu1 %v16910_v1 }
  0x97   :  { %1464 = vmatpush1.bf16.msra.mxu0 %v12629_v11  ;;  %1617 = vmatpush1.bf16.msra.mxu1 %v12629_v11 }
  0x98   :  { %1465 = vmatprep.subr.bf16.mxu0 %v12636_v12  ;;  %1618 = vmatprep.subr.bf16.mxu1 %v12636_v12 }
  0x9a   :  { %1112 = vmatmul.mubr.bf16.gmra.mrb[60].mxu0 %v11678_v13  ;;  %1266 = vmatmul.mubr.bf16.gmra.mrb[60].mxu1 %v11679_v14 }
  0x9b   :  { %1466 = vmatpush1.bf16.msra.mxu0 %v12651_v15  ;;  %1619 = vmatpush1.bf16.msra.mxu1 %v12651_v15 }
  0x9c   :  { %1467 = vmatprep.subr.bf16.mxu0 %v11683_v16  ;;  %1620 = vmatprep.subr.bf16.mxu1 %v11683_v16 }
  0x9d   :  { %1485 = vmatprep.mubr.bf16.mxu0 %v16910_v1  ;;  %1638 = vmatprep.mubr.bf16.mxu1 %v16910_v1 }
  0x9f   :  { %1468 = vmatpush1.bf16.msra.mxu0 %v12663_v17  ;;  %1621 = vmatpush1.bf16.msra.mxu1 %v12663_v17 }
  0xa0   :  { %1759 = vmatprep.subr.bf16.mxu0 %v12528_v57  ;;  %1913 = vmatprep.subr.bf16.mxu1 %v12528_v57 }
  0xa2   :  { %1486 = vmatmul.mubr.bf16.vlgmr.msra.gmra.mrb[64].mxu0 %v11686_v18  ;;  %1639 = vmatmul.mubr.bf16.vlgmr.msra.gmra.mrb[64].mxu1 %v11687_v19 }
  0xa3   :  { %1760 = vmatpush1.bf16.msra.mxu0 %v12543_v60  ;;  %1914 = vmatpush1.bf16.msra.mxu1 %v12543_v60  ;;  %v11732_v60 = vld [vmem:[%s16901_s0 + $0x78] sm:$0xff]  }
  0xa4   :  { %1761 = vmatprep.subr.bf16.mxu0 %v12550_v61  ;;  %1915 = vmatprep.subr.bf16.mxu1 %v12550_v61  ;;  %v11733_v61 = vld [vmem:[%s16901_s0 + $0x98] sm:$0xff]  }
  0xa5   :  { %1495 = vmatprep.mubr.bf16.mxu0 %v16910_v1  ;;  %1648 = vmatprep.mubr.bf16.mxu1 %v16910_v1 }
  0xa7   :  { %1762 = vmatpush1.bf16.msra.mxu0 %v12557_v62  ;;  %1916 = vmatpush1.bf16.msra.mxu1 %v12557_v62 }
  0xa8   :  { %1763 = vmatprep.subr.bf16.mxu0 %v12564_v63  ;;  %1917 = vmatprep.subr.bf16.mxu1 %v12564_v63 }
  0xaa   :  { %1496 = vmatmul.mubr.bf16.gmra.mrb[68].mxu0 %v11688_v20  ;;  %1649 = vmatmul.mubr.bf16.gmra.mrb[68].mxu1 %v11689_v21 }
  0xab   :  { %1764 = vmatpush1.bf16.msra.mxu0 %v12579_v3  ;;  %1918 = vmatpush1.bf16.msra.mxu1 %v12579_v3  ;;  %v12950_v3 = vld [vmem:[%s16900_s1 + $0x204] ss:$8 sps:$4 sm:$0xff]  }
  0xac   :  { %1765 = vmatprep.subr.bf16.mxu0 %v12586_v4  ;;  %1919 = vmatprep.subr.bf16.mxu1 %v12586_v4 }
  0xad   :  { %1505 = vmatprep.mubr.bf16.mxu0 %v16910_v1  ;;  %1658 = vmatprep.mubr.bf16.mxu1 %v16910_v1 }
  0xaf   :  { %1766 = vmatpush1.bf16.msra.mxu0 %v12593_v5  ;;  %1920 = vmatpush1.bf16.msra.mxu1 %v12593_v5 }
  0xb0   :  { %1767 = vmatprep.subr.bf16.mxu0 %v12600_v6  ;;  %1921 = vmatprep.subr.bf16.mxu1 %v12600_v6 }
  0xb2   :  { %1506 = vmatmul.mubr.bf16.gmra.mrb[72].mxu0 %v11690_v22  ;;  %1659 = vmatmul.mubr.bf16.gmra.mrb[72].mxu1 %v11691_v23  ;;  %v11742_v22 = vld [vmem:[%s16901_s0 + $0xa8] sm:$0xff]  }
  0xb3   :  { %1768 = vmatpush1.bf16.msra.mxu0 %v12615_v9  ;;  %1922 = vmatpush1.bf16.msra.mxu1 %v12615_v9  ;;  %v11735_v9 = vld [vmem:[%s16901_s0 + $0xc0] sm:$0xff]   ;;  %v11743_v23 = vld [vmem:[%s16901_s0 + $0xc8] sm:$0xff]  }
  0xb4   :  { %1769 = vmatprep.subr.bf16.mxu0 %v12622_v10  ;;  %1923 = vmatprep.subr.bf16.mxu1 %v12622_v10 }
  0xb5   :  { %1515 = vmatprep.mubr.bf16.mxu0 %v16910_v1  ;;  %1668 = vmatprep.mubr.bf16.mxu1 %v16910_v1 }
  0xb7   :  { %1770 = vmatpush1.bf16.msra.mxu0 %v12629_v11  ;;  %1924 = vmatpush1.bf16.msra.mxu1 %v12629_v11 }
  0xb8   :  { %1771 = vmatprep.subr.bf16.mxu0 %v12636_v12  ;;  %1925 = vmatprep.subr.bf16.mxu1 %v12636_v12  ;;  %v12975_v12 = vld [vmem:[%s16900_s1 + $0x200] ss:$8 sps:$4 sm:$0xff]  }
  0xba   :  { %1516 = vmatmul.mubr.bf16.gmra.mrb[76].mxu0 %v11692_v24  ;;  %1669 = vmatmul.mubr.bf16.gmra.mrb[76].mxu1 %v11693_v25 }
  0xbb   :  { %1772 = vmatpush1.bf16.msra.mxu0 %v12651_v15  ;;  %1926 = vmatpush1.bf16.msra.mxu1 %v12651_v15  ;;  %v12982_v15 = vld [vmem:[%s16900_s1 + $0x214] ss:$8 sps:$4 sm:$0xff]  }
  0xbc   :  { %1773 = vmatprep.subr.bf16.mxu0 %v11683_v16  ;;  %1927 = vmatprep.subr.bf16.mxu1 %v11683_v16  ;;  %v12991_v16 = vld [vmem:[%s16900_s1 + $0x210] ss:$8 sps:$4 sm:$0xff]  }
  0xbd   :  { %1791 = vmatprep.mubr.bf16.mxu0 %v16910_v1  ;;  %1945 = vmatprep.mubr.bf16.mxu1 %v16910_v1 }
  0xbf   :  { %1774 = vmatpush1.bf16.msra.mxu0 %v12663_v17  ;;  %1928 = vmatpush1.bf16.msra.mxu1 %v12663_v17  ;;  %v12998_v17 = vld [vmem:[%s16900_s1 + $0x224] ss:$8 sps:$4 sm:$0xff]  }
  0xc0   :  { %2163 = vmatprep.subr.bf16.mxu0 %v12730_v26  ;;  %2316 = vmatprep.subr.bf16.mxu1 %v12730_v26 }
  0xc2   :  { %1792 = vmatmul.mubr.bf16.vlgmr.msra.gmra.mrb[80].mxu0 %v11694_v27  ;;  %1946 = vmatmul.mubr.bf16.vlgmr.msra.gmra.mrb[80].mxu1 %v11695_v28 }
  0xc3   :  { %2164 = vmatpush1.bf16.msra.mxu0 %v12745_v29  ;;  %2317 = vmatpush1.bf16.msra.mxu1 %v12745_v29 }
  0xc4   :  { %2165 = vmatprep.subr.bf16.mxu0 %v12752_v30  ;;  %2318 = vmatprep.subr.bf16.mxu1 %v12752_v30 }
  0xc5   :  { %1801 = vmatprep.mubr.bf16.mxu0 %v16910_v1  ;;  %1955 = vmatprep.mubr.bf16.mxu1 %v16910_v1 }
  0xc7   :  { %2166 = vmatpush1.bf16.msra.mxu0 %v12759_v31  ;;  %2319 = vmatpush1.bf16.msra.mxu1 %v12759_v31 }
  0xc8   :  { %2167 = vmatprep.subr.bf16.mxu0 %v12766_v32  ;;  %2320 = vmatprep.subr.bf16.mxu1 %v12766_v32 }
  0xca   :  { %1802 = vmatmul.mubr.bf16.gmra.mrb[84].mxu0 %v11702_v33  ;;  %1956 = vmatmul.mubr.bf16.gmra.mrb[84].mxu1 %v11703_v34 }
  0xcb   :  { %2168 = vmatpush1.bf16.msra.mxu0 %v12781_v35  ;;  %2321 = vmatpush1.bf16.msra.mxu1 %v12781_v35 }
  0xcc   :  { %2169 = vmatprep.subr.bf16.mxu0 %v12788_v36  ;;  %2322 = vmatprep.subr.bf16.mxu1 %v12788_v36 }
  0xcd   :  { %1811 = vmatprep.mubr.bf16.mxu0 %v16910_v1  ;;  %1965 = vmatprep.mubr.bf16.mxu1 %v16910_v1 }
  0xcf   :  { %2170 = vmatpush1.bf16.msra.mxu0 %v12795_v37  ;;  %2323 = vmatpush1.bf16.msra.mxu1 %v12795_v37 }
  0xd0   :  { %2171 = vmatprep.subr.bf16.mxu0 %v12802_v38  ;;  %2324 = vmatprep.subr.bf16.mxu1 %v12802_v38 }
  0xd2   :  { %1812 = vmatmul.mubr.bf16.gmra.mrb[88].mxu0 %v11710_v39  ;;  %1966 = vmatmul.mubr.bf16.gmra.mrb[88].mxu1 %v11711_v40  ;;  %v13071_v40 = vld [vmem:[%s16900_s1 + $0x240] ss:$8 sps:$4 sm:$0xff]  }
  0xd3   :  { %2172 = vmatpush1.bf16.msra.mxu0 %v12817_v41  ;;  %2325 = vmatpush1.bf16.msra.mxu1 %v12817_v41 }
  0xd4   :  { %2173 = vmatprep.subr.bf16.mxu0 %v12824_v42  ;;  %2326 = vmatprep.subr.bf16.mxu1 %v12824_v42 }
  0xd5   :  { %1821 = vmatprep.mubr.bf16.mxu0 %v16910_v1  ;;  %1975 = vmatprep.mubr.bf16.mxu1 %v16910_v1 }
  0xd7   :  { %2174 = vmatpush1.bf16.msra.mxu0 %v12831_v43  ;;  %2327 = vmatpush1.bf16.msra.mxu1 %v12831_v43 }
  0xd8   :  { %2175 = vmatprep.subr.bf16.mxu0 %v12838_v44  ;;  %2328 = vmatprep.subr.bf16.mxu1 %v12838_v44 }
  0xda   :  { %1822 = vmatmul.mubr.bf16.gmra.mrb[92].mxu0 %v11718_v45  ;;  %1976 = vmatmul.mubr.bf16.gmra.mrb[92].mxu1 %v11719_v46  ;;  %v13094_v45 = vld [vmem:[%s16900_s1 + $0x264] ss:$8 sps:$4 sm:$0xff]  }
  0xdb   :  { %2176 = vmatpush1.bf16.msra.mxu0 %v12853_v47  ;;  %2329 = vmatpush1.bf16.msra.mxu1 %v12853_v47 }
  0xdc   :  { %2177 = vmatprep.subr.bf16.mxu0 %v12860_v48  ;;  %2330 = vmatprep.subr.bf16.mxu1 %v12860_v48 }
  0xdd   :  { %2195 = vmatprep.mubr.bf16.mxu0 %v16910_v1  ;;  %2348 = vmatprep.mubr.bf16.mxu1 %v16910_v1 }
  0xdf   :  { %2178 = vmatpush1.bf16.msra.mxu0 %v12867_v49  ;;  %2331 = vmatpush1.bf16.msra.mxu1 %v12867_v49 }
  0xe0   :  { %2469 = vmatprep.subr.bf16.mxu0 %v12730_v26  ;;  %2623 = vmatprep.subr.bf16.mxu1 %v12730_v26  ;;  %v13023_v26 = vld [vmem:[%s16900_s1 + $0x220] ss:$8 sps:$4 sm:$0xff]  }
  0xe2   :  { %2196 = vmatmul.mubr.bf16.vlgmr.msra.gmra.mrb[96].mxu0 %v11726_v50  ;;  %2349 = vmatmul.mubr.bf16.vlgmr.msra.gmra.mrb[96].mxu1 %v11727_v51  ;;  %v11758_v50 = vld [vmem:[%s16901_s0 + $0xb8] sm:$0xff]  }
  0xe3   :  { %2470 = vmatpush1.bf16.msra.mxu0 %v12745_v29  ;;  %2624 = vmatpush1.bf16.msra.mxu1 %v12745_v29  ;;  %v13030_v29 = vld [vmem:[%s16900_s1 + $0x234] ss:$8 sps:$4 sm:$0xff]  }
  0xe4   :  { %2471 = vmatprep.subr.bf16.mxu0 %v12752_v30  ;;  %2625 = vmatprep.subr.bf16.mxu1 %v12752_v30  ;;  %v13039_v30 = vld [vmem:[%s16900_s1 + $0x230] ss:$8 sps:$4 sm:$0xff]  }
  0xe5   :  { %2205 = vmatprep.mubr.bf16.mxu0 %v16910_v1  ;;  %2358 = vmatprep.mubr.bf16.mxu1 %v16910_v1  ;;  %v11759_v51 = vld [vmem:[%s16901_s0 + $0xd8] sm:$0xff]  }
  0xe7   :  { %2472 = vmatpush1.bf16.msra.mxu0 %v12759_v31  ;;  %2626 = vmatpush1.bf16.msra.mxu1 %v12759_v31  ;;  %v13046_v31 = vld [vmem:[%s16900_s1 + $0x244] ss:$8 sps:$4 sm:$0xff]  }
  0xe8   :  { %2473 = vmatprep.subr.bf16.mxu0 %v12766_v32  ;;  %2627 = vmatprep.subr.bf16.mxu1 %v12766_v32 }
  0xea   :  { %2206 = vmatmul.mubr.bf16.gmra.mrb[100].mxu0 %v11728_v52  ;;  %2359 = vmatmul.mubr.bf16.gmra.mrb[100].mxu1 %v11729_v53 }
  0xeb   :  { %2474 = vmatpush1.bf16.msra.mxu0 %v12781_v35  ;;  %2628 = vmatpush1.bf16.msra.mxu1 %v12781_v35 }
  0xec   :  { %2475 = vmatprep.subr.bf16.mxu0 %v12788_v36  ;;  %2629 = vmatprep.subr.bf16.mxu1 %v12788_v36  ;;  %v11750_v36 = vld [vmem:[%s16901_s0 + $0xb0] sm:$0xff]  }
  0xed   :  { %2215 = vmatprep.mubr.bf16.mxu0 %v16910_v1  ;;  %2368 = vmatprep.mubr.bf16.mxu1 %v16910_v1 }
  0xef   :  { %2476 = vmatpush1.bf16.msra.mxu0 %v12795_v37  ;;  %2630 = vmatpush1.bf16.msra.mxu1 %v12795_v37  ;;  %v11751_v37 = vld [vmem:[%s16901_s0 + $0xd0] sm:$0xff]  }
  0xf0   :  { %2477 = vmatprep.subr.bf16.mxu0 %v12802_v38  ;;  %2631 = vmatprep.subr.bf16.mxu1 %v12802_v38 }
  0xf2   :  { %2216 = vmatmul.mubr.bf16.gmra.mrb[104].mxu0 %v11730_v54  ;;  %2369 = vmatmul.mubr.bf16.gmra.mrb[104].mxu1 %v11731_v55  ;;  %v13119_v54 = vld [vmem:[%s16900_s1 + $0x260] ss:$8 sps:$4 sm:$0xff]  }
  0xf3   :  { %2478 = vmatpush1.bf16.msra.mxu0 %v12817_v41  ;;  %2632 = vmatpush1.bf16.msra.mxu1 %v12817_v41 }
  0xf4   :  { %2479 = vmatprep.subr.bf16.mxu0 %v12824_v42  ;;  %2633 = vmatprep.subr.bf16.mxu1 %v12824_v42 }
  0xf5   :  { %v12919_v56 = vpop.f32.mrb[0].mxu0  ;;  %v12921_v57 = vpop.f32.mrb[0].mxu1  ;;  %2225 = vmatprep.mubr.bf16.mxu0 %v16910_v1  ;;  %2378 = vmatprep.mubr.bf16.mxu1 %v16910_v1 }
  0xf6   :  { %v191_v58 = vpop.f32.mrb[1].mxu0  ;;  %v314_v59 = vpop.f32.mrb[1].mxu1 }
  0xf7   :  { %230 = vst.msk [vmem:[#allocation2 + $0x8] sm:$0xff] %vm229_vm0, %v191_v58  ;;  %353 = vst.msk [vmem:[#allocation2 + $0x88] sm:$0xff] %vm229_vm0, %v314_v59  ;;  %v12933_v62 = vpop.f32.mrb[2].mxu0  ;;  %v12935_v63 = vpop.f32.mrb[2].mxu1  ;;  %2480 = vmatpush1.bf16.msra.mxu0 %v12831_v43  ;;  %2634 = vmatpush1.bf16.msra.mxu1 %v12831_v43  ;;  %v13078_v43 = vld [vmem:[%s16900_s1 + $0x254] ss:$8 sps:$4 sm:$0xff]  }
  0xf8   :  { %v195_v0 = vpop.f32.mrb[3].mxu0  ;;  %v318_v2 = vpop.f32.mrb[3].mxu1  ;;  %2481 = vmatprep.subr.bf16.mxu0 %v12838_v44  ;;  %2635 = vmatprep.subr.bf16.mxu1 %v12838_v44  ;;  %v13087_v44 = vld [vmem:[%s16900_s1 + $0x250] ss:$8 sps:$4 sm:$0xff]   ;;  %v13126_v59 = vld [vmem:[%s16900_s1 + $0x274] ss:$8 sps:$4 sm:$0xff]  }
  0xf9   :  { %232 = vst.msk [vmem:[#allocation2 + $0x18] sm:$0xff] %vm229_vm0, %v195_v0  ;;  %355 = vst.msk [vmem:[#allocation2 + $0x98] sm:$0xff] %vm229_vm0, %v318_v2 }
  0xfa   :  { %2226 = vmatmul.mubr.bf16.gmra.mrb[108].mxu0 %v11732_v60  ;;  %2379 = vmatmul.mubr.bf16.gmra.mrb[108].mxu1 %v11733_v61  ;;  %v13135_v60 = vld [vmem:[%s16900_s1 + $0x270] ss:$8 sps:$4 sm:$0xff]  }
  0xfb   :  { %2482 = vmatpush1.bf16.msra.mxu0 %v12853_v47  ;;  %2636 = vmatpush1.bf16.msra.mxu1 %v12853_v47 }
  0xfc   :  { %2483 = vmatprep.subr.bf16.mxu0 %v12860_v48  ;;  %2637 = vmatprep.subr.bf16.mxu1 %v12860_v48 }
  0xfd   :  { %v12952_v4 = vpop.f32.mrb[4].mxu0  ;;  %v12954_v5 = vpop.f32.mrb[4].mxu1  ;;  %2501 = vmatprep.mubr.bf16.mxu0 %v16910_v1  ;;  %2655 = vmatprep.mubr.bf16.mxu1 %v16910_v1 }
  0xfe   :  { %v201_v6 = vpop.f32.mrb[5].mxu0  ;;  %v324_v7 = vpop.f32.mrb[5].mxu1 }
  0xff   :  { %234 = vst.msk [vmem:[#allocation2 + $0x28] sm:$0xff] %vm229_vm0, %v201_v6  ;;  %357 = vst.msk [vmem:[#allocation2 + $0xa8] sm:$0xff] %vm229_vm0, %v324_v7  ;;  %v12966_v10 = vpop.f32.mrb[6].mxu0  ;;  %v12968_v11 = vpop.f32.mrb[6].mxu1  ;;  %2484 = vmatpush1.bf16.msra.mxu0 %v12867_v49  ;;  %2638 = vmatpush1.bf16.msra.mxu1 %v12867_v49  ;;  %v11766_v7 = vld [vmem:[%s16901_s0 + $0x80] sm:$0xff]  }
 0x100   :  { %v205_v13 = vpop.f32.mrb[7].mxu0  ;;  %v328_v14 = vpop.f32.mrb[7].mxu1  ;;  %2873 = vmatprep.subr.bf16.mxu0 %v12950_v3  ;;  %3026 = vmatprep.subr.bf16.mxu1 %v12950_v3 }
 0x101   :  { %236 = vst.msk [vmem:[#allocation2 + $0x38] sm:$0xff] %vm229_vm0, %v205_v13  ;;  %359 = vst.msk [vmem:[#allocation2 + $0xb8] sm:$0xff] %vm229_vm0, %v328_v14 }
 0x102   :  { %2502 = vmatmul.mubr.bf16.vlgmr.msra.gmra.mrb[112].mxu0 %v11734_v8  ;;  %2656 = vmatmul.mubr.bf16.vlgmr.msra.gmra.mrb[112].mxu1 %v11735_v9  ;;  %v11767_v8 = vld [vmem:[%s16901_s0 + $0xa0] sm:$0xff]  }
 0x103   :  { %2874 = vmatpush1.bf16.msra.mxu0 %v12975_v12  ;;  %3027 = vmatpush1.bf16.msra.mxu1 %v12975_v12 }
 0x104   :  { %2875 = vmatprep.subr.bf16.mxu0 %v12982_v15  ;;  %3028 = vmatprep.subr.bf16.mxu1 %v12982_v15 }
 0x105   :  { %v13000_v18 = vpop.f32.mrb[8].mxu0  ;;  %v13002_v19 = vpop.f32.mrb[8].mxu1  ;;  %2511 = vmatprep.mubr.bf16.mxu0 %v16910_v1  ;;  %2665 = vmatprep.mubr.bf16.mxu1 %v16910_v1 }
 0x106   :  { %v211_v20 = vpop.f32.mrb[9].mxu0  ;;  %v334_v21 = vpop.f32.mrb[9].mxu1 }
 0x107   :  { %238 = vst.msk [vmem:[#allocation2 + $0x48] sm:$0xff] %vm229_vm0, %v211_v20  ;;  %361 = vst.msk [vmem:[#allocation2 + $0xc8] sm:$0xff] %vm229_vm0, %v334_v21  ;;  %v13014_v24 = vpop.f32.mrb[10].mxu0  ;;  %v13016_v25 = vpop.f32.mrb[10].mxu1  ;;  %2876 = vmatpush1.bf16.msra.mxu0 %v12991_v16  ;;  %3029 = vmatpush1.bf16.msra.mxu1 %v12991_v16 }
 0x108   :  { %v215_v27 = vpop.f32.mrb[11].mxu0  ;;  %v338_v28 = vpop.f32.mrb[11].mxu1  ;;  %2877 = vmatprep.subr.bf16.mxu0 %v12998_v17  ;;  %3030 = vmatprep.subr.bf16.mxu1 %v12998_v17 }
 0x109   :  { %240 = vst.msk [vmem:[#allocation2 + $0x58] sm:$0xff] %vm229_vm0, %v215_v27  ;;  %363 = vst.msk [vmem:[#allocation2 + $0xd8] sm:$0xff] %vm229_vm0, %v338_v28  ;;  %v11768_v27 = vld [vmem:[%s16901_s0 + $0x88] sm:$0xff]  }
 0x10a   :  { %2512 = vmatmul.mubr.bf16.gmra.mrb[116].mxu0 %v11742_v22  ;;  %2666 = vmatmul.mubr.bf16.gmra.mrb[116].mxu1 %v11743_v23 }
 0x10b   :  { %2878 = vmatpush1.bf16.msra.mxu0 %v13023_v26  ;;  %3031 = vmatpush1.bf16.msra.mxu1 %v13023_v26 }
 0x10c   :  { %2879 = vmatprep.subr.bf16.mxu0 %v13030_v29  ;;  %3032 = vmatprep.subr.bf16.mxu1 %v13030_v29 }
 0x10d   :  { %v13048_v32 = vpop.f32.mrb[12].mxu0  ;;  %v13050_v33 = vpop.f32.mrb[12].mxu1  ;;  %2521 = vmatprep.mubr.bf16.mxu0 %v16910_v1  ;;  %2675 = vmatprep.mubr.bf16.mxu1 %v16910_v1 }
 0x10e   :  { %v221_v34 = vpop.f32.mrb[13].mxu0  ;;  %v344_v35 = vpop.f32.mrb[13].mxu1 }
 0x10f   :  { %242 = vst.msk [vmem:[#allocation2 + $0x68] sm:$0xff] %vm229_vm0, %v221_v34  ;;  %365 = vst.msk [vmem:[#allocation2 + $0xe8] sm:$0xff] %vm229_vm0, %v344_v35  ;;  %v13062_v38 = vpop.f32.mrb[14].mxu0  ;;  %v13064_v39 = vpop.f32.mrb[14].mxu1  ;;  %2880 = vmatpush1.bf16.msra.mxu0 %v13039_v30  ;;  %3033 = vmatpush1.bf16.msra.mxu1 %v13039_v30 }
 0x110   :  { %v225_v41 = vpop.f32.mrb[15].mxu0  ;;  %v348_v42 = vpop.f32.mrb[15].mxu1  ;;  %2881 = vmatprep.subr.bf16.mxu0 %v13046_v31  ;;  %3034 = vmatprep.subr.bf16.mxu1 %v13046_v31 }
 0x111   :  { %244 = vst.msk [vmem:[#allocation2 + $0x78] sm:$0xff] %vm229_vm0, %v225_v41  ;;  %367 = vst.msk [vmem:[#allocation2 + $0xf8] sm:$0xff] %vm229_vm0, %v348_v42  ;;  %v11770_v41 = vld [vmem:[%s16901_s0 + $0x90] sm:$0xff]  }
 0x112   :  { %2522 = vmatmul.mubr.bf16.gmra.mrb[120].mxu0 %v11750_v36  ;;  %2676 = vmatmul.mubr.bf16.gmra.mrb[120].mxu1 %v11751_v37 }
 0x113   :  { %2882 = vmatpush1.bf16.msra.mxu0 %v13071_v40  ;;  %3035 = vmatpush1.bf16.msra.mxu1 %v13071_v40 }
 0x114   :  { %2883 = vmatprep.subr.bf16.mxu0 %v13078_v43  ;;  %3036 = vmatprep.subr.bf16.mxu1 %v13078_v43 }
 0x115   :  { %v13096_v46 = vpop.f32.mrb[16].mxu0  ;;  %v13098_v47 = vpop.f32.mrb[16].mxu1  ;;  %2531 = vmatprep.mubr.bf16.mxu0 %v16910_v1  ;;  %2685 = vmatprep.mubr.bf16.mxu1 %v16910_v1 }
 0x116   :  { %v437_v48 = vpop.f32.mrb[17].mxu0  ;;  %v560_v49 = vpop.f32.mrb[17].mxu1 }
 0x117   :  { %476 = vst.msk [vmem:[#allocation2 + $0x108] sm:$0xff] %vm229_vm0, %v437_v48  ;;  %599 = vst.msk [vmem:[#allocation2 + $0x188] sm:$0xff] %vm229_vm0, %v560_v49  ;;  %v13110_v52 = vpop.f32.mrb[18].mxu0  ;;  %v13112_v53 = vpop.f32.mrb[18].mxu1  ;;  %2884 = vmatpush1.bf16.msra.mxu0 %v13087_v44  ;;  %3037 = vmatpush1.bf16.msra.mxu1 %v13087_v44 }
 0x118   :  { %v441_v55 = vpop.f32.mrb[19].mxu0  ;;  %v564_v58 = vpop.f32.mrb[19].mxu1  ;;  %2885 = vmatprep.subr.bf16.mxu0 %v13094_v45  ;;  %3038 = vmatprep.subr.bf16.mxu1 %v13094_v45 }
 0x119   :  { %478 = vst.msk [vmem:[#allocation2 + $0x118] sm:$0xff] %vm229_vm0, %v441_v55  ;;  %601 = vst.msk [vmem:[#allocation2 + $0x198] sm:$0xff] %vm229_vm0, %v564_v58  ;;  %v817_v58 = vld [vmem:[#allocation2 + $0x8] sm:$0xff] }
 0x11a   :  { %2532 = vmatmul.mubr.bf16.gmra.mrb[124].mxu0 %v11758_v50  ;;  %2686 = vmatmul.mubr.bf16.gmra.mrb[124].mxu1 %v11759_v51 }
 0x11b   :  { %2886 = vmatpush1.bf16.msra.mxu0 %v13119_v54  ;;  %3039 = vmatpush1.bf16.msra.mxu1 %v13119_v54 }
 0x11c   :  { %2887 = vmatprep.subr.bf16.mxu0 %v13126_v59  ;;  %3040 = vmatprep.subr.bf16.mxu1 %v13126_v59 }
 0x11d   :  { %v13139_v61 = vpop.f32.mrb[20].mxu0  ;;  %v13141_v0 = vpop.f32.mrb[20].mxu1  ;;  %2905 = vmatprep.mubr.bf16.mxu0 %v16910_v1  ;;  %3058 = vmatprep.mubr.bf16.mxu1 %v16910_v1 }
 0x11e   :  { %v447_v2 = vpop.f32.mrb[21].mxu0  ;;  %v570_v6 = vpop.f32.mrb[21].mxu1 }
 0x11f   :  { %480 = vst.msk [vmem:[#allocation2 + $0x128] sm:$0xff] %vm229_vm0, %v447_v2  ;;  %603 = vst.msk [vmem:[#allocation2 + $0x1a8] sm:$0xff] %vm229_vm0, %v570_v6  ;;  %v13153_v9 = vpop.f32.mrb[22].mxu0  ;;  %v13155_v13 = vpop.f32.mrb[22].mxu1  ;;  %2888 = vmatpush1.bf16.msra.mxu0 %v13135_v60  ;;  %3041 = vmatpush1.bf16.msra.mxu1 %v13135_v60  ;;  %v11773_v6 = vld [vmem:[%s16901_s0 + $0xb8] sm:$0xff]  }
 0x120   :  { %v451_v14 = vpop.f32.mrb[23].mxu0  ;;  %v574_v20 = vpop.f32.mrb[23].mxu1  ;;  %3179 = vmatprep.subr.bf16.mxu0 %v12950_v3  ;;  %3333 = vmatprep.subr.bf16.mxu1 %v12950_v3 }
 0x121   :  { %482 = vst.msk [vmem:[#allocation2 + $0x138] sm:$0xff] %vm229_vm0, %v451_v14  ;;  %605 = vst.msk [vmem:[#allocation2 + $0x1b8] sm:$0xff] %vm229_vm0, %v574_v20 }
 0x122   :  { %2906 = vmatmul.mubr.bf16.vlgmr.msra.gmra.mrb[128].mxu0 %v11766_v7  ;;  %3059 = vmatmul.mubr.bf16.vlgmr.msra.gmra.mrb[128].mxu1 %v11767_v8 }
 0x123   :  { %3180 = vmatpush1.bf16.msra.mxu0 %v12975_v12  ;;  %3334 = vmatpush1.bf16.msra.mxu1 %v12975_v12  ;;  %v11769_v12 = vld [vmem:[%s16901_s0 + $0xa8] sm:$0xff]  }
 0x124   :  { %3181 = vmatprep.subr.bf16.mxu0 %v12982_v15  ;;  %3335 = vmatprep.subr.bf16.mxu1 %v12982_v15 }
 0x125   :  { %v13167_v21 = vpop.f32.mrb[24].mxu0  ;;  %v13169_v22 = vpop.f32.mrb[24].mxu1  ;;  %2915 = vmatprep.mubr.bf16.mxu0 %v16910_v1  ;;  %3068 = vmatprep.mubr.bf16.mxu1 %v16910_v1 }
 0x126   :  { %v457_v3 = vpop.f32.mrb[25].mxu0  ;;  %v580_v23 = vpop.f32.mrb[25].mxu1 }
 0x127   :  { %484 = vst.msk [vmem:[#allocation2 + $0x148] sm:$0xff] %vm229_vm0, %v457_v3  ;;  %607 = vst.msk [vmem:[#allocation2 + $0x1c8] sm:$0xff] %vm229_vm0, %v580_v23  ;;  %v13181_v15 = vpop.f32.mrb[26].mxu0  ;;  %v13183_v28 = vpop.f32.mrb[26].mxu1  ;;  %3182 = vmatpush1.bf16.msra.mxu0 %v12991_v16  ;;  %3336 = vmatpush1.bf16.msra.mxu1 %v12991_v16  ;;  %v819_v23 = vld [vmem:[#allocation2 + $0x18] sm:$0xff] }
 0x128   :  { %v461_v34 = vpop.f32.mrb[27].mxu0  ;;  %v584_v35 = vpop.f32.mrb[27].mxu1  ;;  %3183 = vmatprep.subr.bf16.mxu0 %v12998_v17  ;;  %3337 = vmatprep.subr.bf16.mxu1 %v12998_v17 }
 0x129   :  { %486 = vst.msk [vmem:[#allocation2 + $0x158] sm:$0xff] %vm229_vm0, %v461_v34  ;;  %609 = vst.msk [vmem:[#allocation2 + $0x1d8] sm:$0xff] %vm229_vm0, %v584_v35 }
 0x12a   :  { %2916 = vmatmul.mubr.bf16.gmra.mrb[132].mxu0 %v11768_v27  ;;  %3069 = vmatmul.mubr.bf16.gmra.mrb[132].mxu1 %v11769_v12  ;;  %v972_v12 = vld [vmem:[#allocation2 + $0x98] sm:$0xff] }
 0x12b   :  { %3184 = vmatpush1.bf16.msra.mxu0 %v13023_v26  ;;  %3338 = vmatpush1.bf16.msra.mxu1 %v13023_v26  ;;  %v11771_v26 = vld [vmem:[%s16901_s0 + $0xb0] sm:$0xff]  }
 0x12c   :  { %3185 = vmatprep.subr.bf16.mxu0 %v13030_v29  ;;  %3339 = vmatprep.subr.bf16.mxu1 %v13030_v29 }
 0x12d   :  { %v13195_v16 = vpop.f32.mrb[28].mxu0  ;;  %v13197_v36 = vpop.f32.mrb[28].mxu1  ;;  %2925 = vmatprep.mubr.bf16.mxu0 %v16910_v1  ;;  %3078 = vmatprep.mubr.bf16.mxu1 %v16910_v1 }
 0x12e   :  { %v467_v17 = vpop.f32.mrb[29].mxu0  ;;  %v590_v37 = vpop.f32.mrb[29].mxu1 }
 0x12f   :  { %488 = vst.msk [vmem:[#allocation2 + $0x168] sm:$0xff] %vm229_vm0, %v467_v17  ;;  %611 = vst.msk [vmem:[#allocation2 + $0x1e8] sm:$0xff] %vm229_vm0, %v590_v37  ;;  %v13209_v29 = vpop.f32.mrb[30].mxu0  ;;  %v13211_v42 = vpop.f32.mrb[30].mxu1  ;;  %3186 = vmatpush1.bf16.msra.mxu0 %v13039_v30  ;;  %3340 = vmatpush1.bf16.msra.mxu1 %v13039_v30  ;;  %v821_v37 = vld [vmem:[#allocation2 + $0x28] sm:$0xff] }
 0x130   :  { %v471_v48 = vpop.f32.mrb[31].mxu0  ;;  %v594_v49 = vpop.f32.mrb[31].mxu1  ;;  %3187 = vmatprep.subr.bf16.mxu0 %v13046_v31  ;;  %3341 = vmatprep.subr.bf16.mxu1 %v13046_v31  ;;  %v11772_v31 = vld [vmem:[%s16901_s0 + $0x98] sm:$0xff]  }
 0x131   :  { %490 = vst.msk [vmem:[#allocation2 + $0x178] sm:$0xff] %vm229_vm0, %v471_v48  ;;  %613 = vst.msk [vmem:[#allocation2 + $0x1f8] sm:$0xff] %vm229_vm0, %v594_v49 }
 0x132   :  { %2926 = vmatmul.mubr.bf16.gmra.mrb[136].mxu0 %v11770_v41  ;;  %3079 = vmatmul.mubr.bf16.gmra.mrb[136].mxu1 %v11771_v26  ;;  %v11775_v26 = vld [vmem:[%s16901_s0 + $0xe0] sm:$0xff]  }
 0x133   :  { %3188 = vmatpush1.bf16.msra.mxu0 %v13071_v40  ;;  %3342 = vmatpush1.bf16.msra.mxu1 %v13071_v40 }
 0x134   :  { %3189 = vmatprep.subr.bf16.mxu0 %v13078_v43  ;;  %3343 = vmatprep.subr.bf16.mxu1 %v13078_v43  ;;  %v970_v43 = vld [vmem:[#allocation2 + $0x88] sm:$0xff] }
 0x135   :  { %v777_v30 = vpop.f32.mrb[32].mxu0  ;;  %v930_v50 = vpop.f32.mrb[32].mxu1  ;;  %2935 = vmatprep.mubr.bf16.mxu0 %v16910_v1  ;;  %3088 = vmatprep.mubr.bf16.mxu1 %v16910_v1 }
 0x136   :  { %v13229_v51 = vadd.f32 %v777_v30, %v12919_v56  ;;  %v13232_v55 = vadd.f32 %v930_v50, %v12921_v57  ;;  %v779_v40 = vpop.f32.mrb[33].mxu0  ;;  %v932_v2 = vpop.f32.mrb[33].mxu1 }
 0x137   :  { %v833_v7 = vadd.f32 %v817_v58, %v779_v40  ;;  %v986_v8 = vadd.f32 %v970_v43, %v932_v2  ;;  %v781_v14 = vpop.f32.mrb[34].mxu0  ;;  %v934_v20 = vpop.f32.mrb[34].mxu1  ;;  %3190 = vmatpush1.bf16.msra.mxu0 %v13087_v44  ;;  %3344 = vmatpush1.bf16.msra.mxu1 %v13087_v44  ;;  %v823_v40 = vld [vmem:[#allocation2 + $0x38] sm:$0xff] }
 0x138   :  { %v13240_v56 = vadd.f32 %v781_v14, %v12933_v62  ;;  %v13243_v57 = vadd.f32 %v934_v20, %v12935_v63  ;;  %v783_v3 = vpop.f32.mrb[35].mxu0  ;;  %v936_v27 = vpop.f32.mrb[35].mxu1  ;;  %3191 = vmatprep.subr.bf16.mxu0 %v13094_v45  ;;  %3345 = vmatprep.subr.bf16.mxu1 %v13094_v45  ;;  %v11774_v45 = vld [vmem:[%s16901_s0 + $0xc0] sm:$0xff]   ;;  %v976_v2 = vld [vmem:[#allocation2 + $0xb8] sm:$0xff]  ;;  %v825_v20 = vld [vmem:[#allocation2 + $0x48] sm:$0xff] }
 0x139   :  { %849 = vst.msk [vmem:[#allocation2 + $0x8] sm:$0xff] %vm229_vm0, %v833_v7  ;;  %1002 = vst.msk [vmem:[#allocation2 + $0x88] sm:$0xff] %vm229_vm0, %v986_v8  ;;  %v835_v34 = vadd.f32 %v819_v23, %v783_v3  ;;  %v988_v44 = vadd.f32 %v972_v12, %v936_v27  ;;  %v978_v23 = vld [vmem:[#allocation2 + $0xc8] sm:$0xff] }
 0x13a   :  { %2936 = vmatmul.mubr.bf16.gmra.mrb[140].mxu0 %v11772_v31  ;;  %3089 = vmatmul.mubr.bf16.gmra.mrb[140].mxu1 %v11773_v6  ;;  %v11777_v27 = vld [vmem:[%s16901_s0 + $0xe8] sm:$0xff]  }
 0x13b   :  { %851 = vst.msk [vmem:[#allocation2 + $0x18] sm:$0xff] %vm229_vm0, %v835_v34  ;;  %1004 = vst.msk [vmem:[#allocation2 + $0x98] sm:$0xff] %vm229_vm0, %v988_v44  ;;  %3192 = vmatpush1.bf16.msra.mxu0 %v13119_v54  ;;  %3346 = vmatpush1.bf16.msra.mxu1 %v13119_v54 }
 0x13c   :  { %3193 = vmatprep.subr.bf16.mxu0 %v13126_v59  ;;  %3347 = vmatprep.subr.bf16.mxu1 %v13126_v59  ;;  %v974_v59 = vld [vmem:[#allocation2 + $0xa8] sm:$0xff] }
 0x13d   :  { %v787_v62 = vpop.f32.mrb[36].mxu0  ;;  %v940_v63 = vpop.f32.mrb[36].mxu1  ;;  %3211 = vmatprep.mubr.bf16.mxu0 %v16910_v1  ;;  %3365 = vmatprep.mubr.bf16.mxu1 %v16910_v1 }
 0x13e   :  { %v13261_v35 = vadd.f32 %v787_v62, %v12952_v4  ;;  %v13264_v17 = vadd.f32 %v940_v63, %v12954_v5  ;;  %v789_v54 = vpop.f32.mrb[37].mxu0  ;;  %v942_v41 = vpop.f32.mrb[37].mxu1 }
 0x13f   :  { %v837_v48 = vadd.f32 %v821_v37, %v789_v54  ;;  %v990_v49 = vadd.f32 %v974_v59, %v942_v41  ;;  %v791_v30 = vpop.f32.mrb[38].mxu0  ;;  %v944_v50 = vpop.f32.mrb[38].mxu1  ;;  %3194 = vmatpush1.bf16.msra.mxu0 %v13135_v60  ;;  %3348 = vmatpush1.bf16.msra.mxu1 %v13135_v60  ;;  %v11776_v60 = vld [vmem:[%s16901_s0 + $0xc8] sm:$0xff]   ;;  %v980_v37 = vld [vmem:[#allocation2 + $0xd8] sm:$0xff] }
 0x140   :  { %v13272_v4 = vadd.f32 %v791_v30, %v12966_v10  ;;  %v13275_v5 = vadd.f32 %v944_v50, %v12968_v11  ;;  %v793_v31 = vpop.f32.mrb[39].mxu0  ;;  %v946_v58 = vpop.f32.mrb[39].mxu1  ;;  %4116 = vmatprep.subr.bf16.mxu1 %v16910_v1  ;;  %v829_v50 = vld [vmem:[#allocation2 + $0x68] sm:$0xff] }
 0x141   :  { %853 = vst.msk [vmem:[#allocation2 + $0x28] sm:$0xff] %vm229_vm0, %v837_v48  ;;  %1006 = vst.msk [vmem:[#allocation2 + $0xa8] sm:$0xff] %vm229_vm0, %v990_v49  ;;  %v839_v43 = vadd.f32 %v823_v40, %v793_v31  ;;  %v992_v6 = vadd.f32 %v976_v2, %v946_v58  ;;  %v982_v40 = vld [vmem:[#allocation2 + $0xe8] sm:$0xff]  ;;  %v11779_v58 = vld [vmem:[%s16901_s0 + $0xf0] sm:$0xff]  }
 0x142   :  { %3212 = vmatmul.mubr.bf16.vlgmr.msra.gmra.mrb[144].mxu0 %v11774_v45  ;;  %3366 = vmatmul.mubr.bf16.vlgmr.msra.gmra.mrb[144].mxu1 %v11775_v26  ;;  %v827_v45 = vld [vmem:[#allocation2 + $0x58] sm:$0xff]  ;;  %v11778_v26 = vld [vmem:[%s16901_s0 + $0xd0] sm:$0xff]  }
 0x143   :  { %855 = vst.msk [vmem:[#allocation2 + $0x38] sm:$0xff] %vm229_vm0, %v839_v43  ;;  %1008 = vst.msk [vmem:[#allocation2 + $0xb8] sm:$0xff] %vm229_vm0, %v992_v6  ;;  %3221 = vmatprep.mubr.bf16.mxu0 %v16910_v1  ;;  %3375 = vmatprep.mubr.bf16.mxu1 %v16910_v1 }
 0x145   :  { %v797_v10 = vpop.f32.mrb[40].mxu0  ;;  %v950_v11 = vpop.f32.mrb[40].mxu1 }
 0x146   :  { %v13288_v7 = vadd.f32 %v797_v10, %v13000_v18  ;;  %v13291_v8 = vadd.f32 %v950_v11, %v13002_v19  ;;  %v799_v14 = vpop.f32.mrb[41].mxu0  ;;  %v952_v3 = vpop.f32.mrb[41].mxu1 }
 0x147   :  { %v841_v12 = vadd.f32 %v825_v20, %v799_v14  ;;  %v994_v34 = vadd.f32 %v978_v23, %v952_v3  ;;  %v801_v44 = vpop.f32.mrb[42].mxu0  ;;  %v954_v62 = vpop.f32.mrb[42].mxu1  ;;  %v984_v20 = vld [vmem:[#allocation2 + $0xf8] sm:$0xff] }
 0x148   :  { %v13297_v63 = vadd.f32 %v801_v44, %v13014_v24  ;;  %v13300_v18 = vadd.f32 %v954_v62, %v13016_v25  ;;  %v803_v19 = vpop.f32.mrb[43].mxu0  ;;  %v956_v54 = vpop.f32.mrb[43].mxu1  ;;  %v1123_v62 = vld [vmem:[#allocation2 + $0x108] sm:$0xff] }
 0x149   :  { %857 = vst.msk [vmem:[#allocation2 + $0x48] sm:$0xff] %vm229_vm0, %v841_v12  ;;  %1010 = vst.msk [vmem:[#allocation2 + $0xc8] sm:$0xff] %vm229_vm0, %v994_v34  ;;  %v843_v41 = vadd.f32 %v827_v45, %v803_v19  ;;  %v996_v59 = vadd.f32 %v980_v37, %v956_v54  ;;  %v1277_v45 = vld [vmem:[#allocation2 + $0x188] sm:$0xff]  ;;  %v11781_v54 = vld [vmem:[%s16901_s0 + $0xf8] sm:$0xff]  }
 0x14a   :  { %3222 = vmatmul.mubr.bf16.gmra.mrb[148].mxu0 %v11776_v60  ;;  %3376 = vmatmul.mubr.bf16.gmra.mrb[148].mxu1 %v11777_v27  ;;  %v831_v60 = vld [vmem:[#allocation2 + $0x78] sm:$0xff] }
 0x14b   :  { %859 = vst.msk [vmem:[#allocation2 + $0x58] sm:$0xff] %vm229_vm0, %v843_v41  ;;  %1012 = vst.msk [vmem:[#allocation2 + $0xd8] sm:$0xff] %vm229_vm0, %v996_v59  ;;  %3231 = vmatprep.mubr.bf16.mxu0 %v16910_v1  ;;  %3385 = vmatprep.mubr.bf16.mxu1 %v16910_v1  ;;  %v11780_v27 = vld [vmem:[%s16901_s0 + $0xd8] sm:$0xff]  }
 0x14d   :  { %v807_v24 = vpop.f32.mrb[44].mxu0  ;;  %v960_v25 = vpop.f32.mrb[44].mxu1 }
 0x14e   :  { %v13312_v48 = vadd.f32 %v807_v24, %v13048_v32  ;;  %v13315_v49 = vadd.f32 %v960_v25, %v13050_v33  ;;  %v809_v30 = vpop.f32.mrb[45].mxu0  ;;  %v962_v31 = vpop.f32.mrb[45].mxu1 }
 0x14f   :  { %v845_v2 = vadd.f32 %v829_v50, %v809_v30  ;;  %v998_v43 = vadd.f32 %v982_v40, %v962_v31  ;;  %v811_v6 = vpop.f32.mrb[46].mxu0  ;;  %v964_v10 = vpop.f32.mrb[46].mxu1  ;;  %v1279_v50 = vld [vmem:[#allocation2 + $0x198] sm:$0xff] }
 0x150   :  { %v13321_v11 = vadd.f32 %v811_v6, %v13062_v38  ;;  %v13324_v32 = vadd.f32 %v964_v10, %v13064_v39  ;;  %v813_v33 = vpop.f32.mrb[47].mxu0  ;;  %v966_v14 = vpop.f32.mrb[47].mxu1 }
 0x151   :  { %861 = vst.msk [vmem:[#allocation2 + $0x68] sm:$0xff] %vm229_vm0, %v845_v2  ;;  %1014 = vst.msk [vmem:[#allocation2 + $0xe8] sm:$0xff] %vm229_vm0, %v998_v43  ;;  %v847_v3 = vadd.f32 %v831_v60, %v813_v33  ;;  %v1000_v23 = vadd.f32 %v984_v20, %v966_v14  ;;  %v1127_v2 = vld [vmem:[#allocation2 + $0x128] sm:$0xff] }
 0x152   :  { %3232 = vmatmul.mubr.bf16.gmra.mrb[152].mxu0 %v11778_v26  ;;  %3386 = vmatmul.mubr.bf16.gmra.mrb[152].mxu1 %v11779_v58  ;;  %v1125_v26 = vld [vmem:[#allocation2 + $0x118] sm:$0xff]  ;;  %v13355_v58 = vld [vmem:[%s16902_s3 + $0x4] ss:$12 sps:$4 sm:$0xff]   ;;  %v1281_v43 = vld [vmem:[#allocation2 + $0x1a8] sm:$0xff] }
 0x153   :  { %863 = vst.msk [vmem:[#allocation2 + $0x78] sm:$0xff] %vm229_vm0, %v847_v3  ;;  %1016 = vst.msk [vmem:[#allocation2 + $0xf8] sm:$0xff] %vm229_vm0, %v1000_v23  ;;  %3241 = vmatprep.mubr.bf16.mxu0 %v16910_v1  ;;  %3395 = vmatprep.mubr.bf16.mxu1 %v16910_v1  ;;  %v11788_v33 = vld [vmem:[%s16902_s3 + $0x1c] ss:$12 sps:$4 sm:$0xff]   ;;  %v11786_v23 = vld [vmem:[%s16902_s3 + $0x18] ss:$12 sps:$4 sm:$0xff]  }
 0x154   :  { %4043 = vmatprep.subr.bf16.mxu0 %v13355_v58 }
 0x155   :  { %v1083_v38 = vpop.f32.mrb[48].mxu0  ;;  %v1237_v39 = vpop.f32.mrb[48].mxu1 }
 0x156   :  { %v13336_v12 = vadd.f32 %v1083_v38, %v13096_v46  ;;  %v13339_v34 = vadd.f32 %v1237_v39, %v13098_v47  ;;  %v1085_v44 = vpop.f32.mrb[49].mxu0  ;;  %v1239_v19 = vpop.f32.mrb[49].mxu1  ;;  %v11789_v38 = vld [vmem:[%s16902_s3 + $0x20] ss:$12 sps:$4 sm:$0xff]  }
 0x157   :  { %v1139_v37 = vadd.f32 %v1123_v62, %v1085_v44  ;;  %v1293_v41 = vadd.f32 %v1277_v45, %v1239_v19  ;;  %v1087_v59 = vpop.f32.mrb[50].mxu0  ;;  %v1241_v24 = vpop.f32.mrb[50].mxu1  ;;  %v1129_v45 = vld [vmem:[#allocation2 + $0x138] sm:$0xff] }
 0x158   :  { %v13345_v25 = vadd.f32 %v1087_v59, %v13110_v52  ;;  %v13348_v46 = vadd.f32 %v1241_v24, %v13112_v53  ;;  %v1089_v47 = vpop.f32.mrb[51].mxu0  ;;  %v1243_v30 = vpop.f32.mrb[51].mxu1  ;;  %v11782_v52 = vld [vmem:[%s16902_s3] ss:$12 sps:$4 sm:$0xff]   ;;  %v11785_v53 = vld [vmem:[%s16902_s3 + $0x8] ss:$12 sps:$4 sm:$0xff]  }
 0x159   :  { %1155 = vst.msk [vmem:[#allocation2 + $0x108] sm:$0xff] %vm229_vm0, %v1139_v37  ;;  %1309 = vst.msk [vmem:[#allocation2 + $0x188] sm:$0xff] %vm229_vm0, %v1293_v41  ;;  %v1141_v31 = vadd.f32 %v1125_v26, %v1089_v47  ;;  %v1295_v40 = vadd.f32 %v1279_v50, %v1243_v30  ;;  %4044 = vmatpush1.bf16.msra.mxu0 %v11782_v52  ;;  %4117 = vmatpush1.bf16.msra.mxu1 %v11785_v53  ;;  %v1283_v37 = vld [vmem:[#allocation2 + $0x1b8] sm:$0xff]  ;;  %v1131_v47 = vld [vmem:[#allocation2 + $0x148] sm:$0xff] }
 0x15a   :  { %3242 = vmatmul.mubr.bf16.gmra.mrb[156].mxu0 %v11780_v27  ;;  %3396 = vmatmul.mubr.bf16.gmra.mrb[156].mxu1 %v11781_v54  ;;  %v11793_v24 = vld [vmem:[%s16902_s3 + $0x38] ss:$12 sps:$4 sm:$0xff]   ;;  %v1285_v26 = vld [vmem:[#allocation2 + $0x1c8] sm:$0xff] }
 0x15b   :  { %1157 = vst.msk [vmem:[#allocation2 + $0x118] sm:$0xff] %vm229_vm0, %v1141_v31  ;;  %1311 = vst.msk [vmem:[#allocation2 + $0x198] sm:$0xff] %vm229_vm0, %v1295_v40  ;;  %4118 = vmatprep.subr.bf16.mxu1 %v16910_v1  ;;  %4045 = vmatprep.subr.bf16.mxu0 %v11788_v33  ;;  %v11796_v31 = vld [vmem:[%s16902_s3 + $0x4c] ss:$12 sps:$4 sm:$0xff]  }
 0x15d   :  { %v1093_v6 = vpop.f32.mrb[52].mxu0  ;;  %v1247_v10 = vpop.f32.mrb[52].mxu1  ;;  %4046 = vmatpush1.bf16.msra.mxu0 %v11786_v23  ;;  %4119 = vmatpush1.bf16.msra.mxu1 %v11789_v38  ;;  %v1133_v38 = vld [vmem:[#allocation2 + $0x158] sm:$0xff] }
 0x15e   :  { %v13370_v60 = vadd.f32 %v1093_v6, %v13139_v61  ;;  %v13373_v14 = vadd.f32 %v1247_v10, %v13141_v0  ;;  %v1095_v20 = vpop.f32.mrb[53].mxu0  ;;  %v1249_v3 = vpop.f32.mrb[53].mxu1  ;;  %4120 = vmatprep.subr.bf16.mxu1 %v16910_v1  ;;  %v11797_v6 = vld [vmem:[%s16902_s3 + $0x50] ss:$12 sps:$4 sm:$0xff]  }
 0x15f   :  { %v1143_v39 = vadd.f32 %v1127_v2, %v1095_v20  ;;  %v1297_v27 = vadd.f32 %v1281_v43, %v1249_v3  ;;  %v1097_v44 = vpop.f32.mrb[54].mxu0  ;;  %v1251_v61 = vpop.f32.mrb[54].mxu1  ;;  %v11794_v43 = vld [vmem:[%s16902_s3 + $0x48] ss:$12 sps:$4 sm:$0xff]  }
 0x160   :  { %v13383_v0 = vadd.f32 %v1097_v44, %v13153_v9  ;;  %v13386_v62 = vadd.f32 %v1251_v61, %v13155_v13  ;;  %v1099_v19 = vpop.f32.mrb[55].mxu0  ;;  %v1253_v54 = vpop.f32.mrb[55].mxu1  ;;  %v11792_v9 = vld [vmem:[%s16902_s3 + $0x34] ss:$12 sps:$4 sm:$0xff]   ;;  %v11790_v13 = vld [vmem:[%s16902_s3 + $0x30] ss:$12 sps:$4 sm:$0xff]  }
 0x161   :  { %1159 = vst.msk [vmem:[#allocation2 + $0x128] sm:$0xff] %vm229_vm0, %v1143_v39  ;;  %1313 = vst.msk [vmem:[#allocation2 + $0x1a8] sm:$0xff] %vm229_vm0, %v1297_v27  ;;  %v1145_v41 = vadd.f32 %v1129_v45, %v1099_v19  ;;  %v1299_v59 = vadd.f32 %v1283_v37, %v1253_v54  ;;  %4047 = vmatprep.subr.bf16.mxu0 %v11792_v9  ;;  %4121 = vmatpush1.bf16.msra.mxu1 %v11793_v24  ;;  %v1287_v27 = vld [vmem:[#allocation2 + $0x1d8] sm:$0xff]  ;;  %v11801_v19 = vld [vmem:[%s16902_s3 + $0x68] ss:$12 sps:$4 sm:$0xff]  }
 0x162   :  { %4048 = vmatpush1.bf16.msra.mxu0 %v11790_v13  ;;  %4122 = vmatprep.subr.bf16.mxu1 %v16910_v1  ;;  %v1135_v45 = vld [vmem:[#allocation2 + $0x168] sm:$0xff] }
 0x163   :  { %1161 = vst.msk [vmem:[#allocation2 + $0x138] sm:$0xff] %vm229_vm0, %v1145_v41  ;;  %1315 = vst.msk [vmem:[#allocation2 + $0x1b8] sm:$0xff] %vm229_vm0, %v1299_v59  ;;  %4049 = vmatprep.subr.bf16.mxu0 %v11796_v31  ;;  %v1289_v54 = vld [vmem:[#allocation2 + $0x1e8] sm:$0xff] }
 0x164   :  { %v11804_v59 = vld [vmem:[%s16902_s3 + $0x7c] ss:$12 sps:$4 sm:$0xff]  }
 0x165   :  { %v1103_v30 = vpop.f32.mrb[56].mxu0  ;;  %v1257_v50 = vpop.f32.mrb[56].mxu1  ;;  %4123 = vmatpush1.bf16.msra.mxu1 %v11797_v6  ;;  %v1137_v6 = vld [vmem:[#allocation2 + $0x178] sm:$0xff] }
 0x166   :  { %v13406_v40 = vadd.f32 %v1103_v30, %v13167_v21  ;;  %v13409_v52 = vadd.f32 %v1257_v50, %v13169_v22  ;;  %v1105_v53 = vpop.f32.mrb[57].mxu0  ;;  %v1259_v2 = vpop.f32.mrb[57].mxu1  ;;  %4050 = vmatpush1.bf16.msra.mxu0 %v11794_v43  ;;  %4124 = vmatprep.subr.bf16.mxu1 %v16910_v1  ;;  %v11805_v30 = vld [vmem:[%s16902_s3 + $0x80] ss:$12 sps:$4 sm:$0xff]  }
 0x167   :  { %v1147_v10 = vadd.f32 %v1131_v47, %v1105_v53  ;;  %v1301_v33 = vadd.f32 %v1285_v26, %v1259_v2  ;;  %v1107_v20 = vpop.f32.mrb[58].mxu0  ;;  %v1261_v21 = vpop.f32.mrb[58].mxu1  ;;  %v11802_v26 = vld [vmem:[%s16902_s3 + $0x78] ss:$12 sps:$4 sm:$0xff]  }
 0x168   :  { %v13419_v22 = vadd.f32 %v1107_v20, %v13181_v15  ;;  %v13422_v3 = vadd.f32 %v1261_v21, %v13183_v28  ;;  %v1109_v23 = vpop.f32.mrb[59].mxu0  ;;  %v1263_v39 = vpop.f32.mrb[59].mxu1  ;;  %v11800_v15 = vld [vmem:[%s16902_s3 + $0x64] ss:$12 sps:$4 sm:$0xff]   ;;  %v11798_v28 = vld [vmem:[%s16902_s3 + $0x60] ss:$12 sps:$4 sm:$0xff]  }
 0x169   :  { %1163 = vst.msk [vmem:[#allocation2 + $0x148] sm:$0xff] %vm229_vm0, %v1147_v10  ;;  %1317 = vst.msk [vmem:[#allocation2 + $0x1c8] sm:$0xff] %vm229_vm0, %v1301_v33  ;;  %v1149_v44 = vadd.f32 %v1133_v38, %v1109_v23  ;;  %v1303_v61 = vadd.f32 %v1287_v27, %v1263_v39  ;;  %4051 = vmatprep.subr.bf16.mxu0 %v11800_v15  ;;  %4125 = vmatpush1.bf16.msra.mxu1 %v11801_v19  ;;  %v1291_v33 = vld [vmem:[#allocation2 + $0x1f8] sm:$0xff]  ;;  %v1527_v27 = vld [vmem:[#allocation2 + $0x8] sm:$0xff] }
 0x16a   :  { %4052 = vmatpush1.bf16.msra.mxu0 %v11798_v28  ;;  %4126 = vmatprep.subr.bf16.mxu1 %v16910_v1  ;;  %v11809_v23 = vld [vmem:[%s16902_s3 + $0x98] ss:$12 sps:$4 sm:$0xff]  }
 0x16b   :  { %1165 = vst.msk [vmem:[#allocation2 + $0x158] sm:$0xff] %vm229_vm0, %v1149_v44  ;;  %1319 = vst.msk [vmem:[#allocation2 + $0x1d8] sm:$0xff] %vm229_vm0, %v1303_v61  ;;  %4053 = vmatprep.subr.bf16.mxu0 %v11804_v59  ;;  %v1680_v44 = vld [vmem:[#allocation2 + $0x88] sm:$0xff] }
 0x16c   :  { %v11812_v61 = vld [vmem:[%s16902_s3 + $0xac] ss:$12 sps:$4 sm:$0xff]  }
 0x16d   :  { %v1113_v37 = vpop.f32.mrb[60].mxu0  ;;  %v1267_v41 = vpop.f32.mrb[60].mxu1  ;;  %4127 = vmatpush1.bf16.msra.mxu1 %v11805_v30  ;;  %v1529_v30 = vld [vmem:[#allocation2 + $0x18] sm:$0xff] }
 0x16e   :  { %v13442_v9 = vadd.f32 %v1113_v37, %v13195_v16  ;;  %v13445_v13 = vadd.f32 %v1267_v41, %v13197_v36  ;;  %v1115_v24 = vpop.f32.mrb[61].mxu0  ;;  %v1269_v47 = vpop.f32.mrb[61].mxu1  ;;  %4054 = vmatpush1.bf16.msra.mxu0 %v11802_v26  ;;  %4128 = vmatprep.subr.bf16.mxu1 %v16910_v1  ;;  %v11813_v37 = vld [vmem:[%s16902_s3 + $0xb0] ss:$12 sps:$4 sm:$0xff]  }
 0x16f   :  { %v1151_v50 = vadd.f32 %v1135_v45, %v1115_v24  ;;  %v1305_v31 = vadd.f32 %v1289_v54, %v1269_v47  ;;  %v1117_v53 = vpop.f32.mrb[62].mxu0  ;;  %v1271_v16 = vpop.f32.mrb[62].mxu1  ;;  %v11810_v54 = vld [vmem:[%s16902_s3 + $0xa8] ss:$12 sps:$4 sm:$0xff]  }
 0x170   :  { %v13455_v36 = vadd.f32 %v1117_v53, %v13209_v29  ;;  %v13458_v2 = vadd.f32 %v1271_v16, %v13211_v42  ;;  %v1119_v43 = vpop.f32.mrb[63].mxu0  ;;  %v1273_v10 = vpop.f32.mrb[63].mxu1  ;;  %v11808_v29 = vld [vmem:[%s16902_s3 + $0x94] ss:$12 sps:$4 sm:$0xff]   ;;  %v11806_v42 = vld [vmem:[%s16902_s3 + $0x90] ss:$12 sps:$4 sm:$0xff]  }
 0x171   :  { %1167 = vst.msk [vmem:[#allocation2 + $0x168] sm:$0xff] %vm229_vm0, %v1151_v50  ;;  %1321 = vst.msk [vmem:[#allocation2 + $0x1e8] sm:$0xff] %vm229_vm0, %v1305_v31  ;;  %v1153_v20 = vadd.f32 %v1137_v6, %v1119_v43  ;;  %v1307_v21 = vadd.f32 %v1291_v33, %v1273_v10  ;;  %4055 = vmatprep.subr.bf16.mxu0 %v11808_v29  ;;  %4129 = vmatpush1.bf16.msra.mxu1 %v11809_v23  ;;  %v1682_v31 = vld [vmem:[#allocation2 + $0x98] sm:$0xff]  ;;  %v11817_v43 = vld [vmem:[%s16902_s3 + $0xc8] ss:$12 sps:$4 sm:$0xff]  }
 0x172   :  { %4056 = vmatpush1.bf16.msra.mxu0 %v11806_v42  ;;  %4130 = vmatprep.subr.bf16.mxu1 %v16910_v1  ;;  %v1531_v6 = vld [vmem:[#allocation2 + $0x28] sm:$0xff] }
 0x173   :  { %1169 = vst.msk [vmem:[#allocation2 + $0x178] sm:$0xff] %vm229_vm0, %v1153_v20  ;;  %1323 = vst.msk [vmem:[#allocation2 + $0x1f8] sm:$0xff] %vm229_vm0, %v1307_v21  ;;  %4057 = vmatprep.subr.bf16.mxu0 %v11812_v61  ;;  %v1684_v20 = vld [vmem:[#allocation2 + $0xa8] sm:$0xff] }
 0x174   :  { %v11820_v21 = vld [vmem:[%s16902_s3 + $0xdc] ss:$12 sps:$4 sm:$0xff]  }
 0x175   :  { %v1487_v38 = vpop.f32.mrb[64].mxu0  ;;  %v1640_v39 = vpop.f32.mrb[64].mxu1  ;;  %4131 = vmatpush1.bf16.msra.mxu1 %v11813_v37  ;;  %v1533_v37 = vld [vmem:[#allocation2 + $0x38] sm:$0xff] }
 0x176   :  { %v13478_v15 = vadd.f32 %v1487_v38, %v13229_v51  ;;  %v13481_v28 = vadd.f32 %v1640_v39, %v13232_v55  ;;  %v1489_v19 = vpop.f32.mrb[65].mxu0  ;;  %v1642_v45 = vpop.f32.mrb[65].mxu1  ;;  %4058 = vmatpush1.bf16.msra.mxu0 %v11810_v54  ;;  %4132 = vmatprep.subr.bf16.mxu1 %v16910_v1  ;;  %v11818_v39 = vld [vmem:[%s16902_s3 + $0xd8] ss:$12 sps:$4 sm:$0xff]  }
 0x177   :  { %v1543_v41 = vadd.f32 %v1527_v27, %v1489_v19  ;;  %v1696_v59 = vadd.f32 %v1680_v44, %v1642_v45  ;;  %v1491_v24 = vpop.f32.mrb[66].mxu0  ;;  %v1644_v51 = vpop.f32.mrb[66].mxu1  ;;  %v11821_v27 = vld [vmem:[%s16902_s3 + $0xe0] ss:$12 sps:$4 sm:$0xff]  }
 0x178   :  { %v13491_v55 = vadd.f32 %v1491_v24, %v13240_v56  ;;  %v13494_v47 = vadd.f32 %v1644_v51, %v13243_v57  ;;  %v1493_v26 = vpop.f32.mrb[67].mxu0  ;;  %v1646_v50 = vpop.f32.mrb[67].mxu1  ;;  %v11816_v56 = vld [vmem:[%s16902_s3 + $0xc4] ss:$12 sps:$4 sm:$0xff]   ;;  %v11814_v57 = vld [vmem:[%s16902_s3 + $0xc0] ss:$12 sps:$4 sm:$0xff]  }
 0x179   :  { %1559 = vst.msk [vmem:[#allocation2 + $0x8] sm:$0xff] %vm229_vm0, %v1543_v41  ;;  %1712 = vst.msk [vmem:[#allocation2 + $0x88] sm:$0xff] %vm229_vm0, %v1696_v59  ;;  %v1545_v53 = vadd.f32 %v1529_v30, %v1493_v26  ;;  %v1698_v16 = vadd.f32 %v1682_v31, %v1646_v50  ;;  %4059 = vmatprep.subr.bf16.mxu0 %v11816_v56  ;;  %4133 = vmatpush1.bf16.msra.mxu1 %v11817_v43  ;;  %v1686_v59 = vld [vmem:[#allocation2 + $0xb8] sm:$0xff]  ;;  %v1535_v30 = vld [vmem:[#allocation2 + $0x48] sm:$0xff] }
 0x17a   :  { %4060 = vmatpush1.bf16.msra.mxu0 %v11814_v57  ;;  %4134 = vmatprep.subr.bf16.mxu1 %v16910_v1  ;;  %v11825_v26 = vld [vmem:[%s16902_s3 + $0xf8] ss:$12 sps:$4 sm:$0xff]   ;;  %v1688_v50 = vld [vmem:[#allocation2 + $0xc8] sm:$0xff] }
 0x17b   :  { %1561 = vst.msk [vmem:[#allocation2 + $0x18] sm:$0xff] %vm229_vm0, %v1545_v53  ;;  %1714 = vst.msk [vmem:[#allocation2 + $0x98] sm:$0xff] %vm229_vm0, %v1698_v16  ;;  %4061 = vmatprep.subr.bf16.mxu0 %v11820_v21  ;;  %v11828_v16 = vld [vmem:[%s16902_s3 + $0x10c] ss:$12 sps:$4 sm:$0xff]  }
 0x17d   :  { %v1497_v10 = vpop.f32.mrb[68].mxu0  ;;  %v1650_v33 = vpop.f32.mrb[68].mxu1  ;;  %4135 = vmatpush1.bf16.msra.mxu1 %v11821_v27  ;;  %v1537_v27 = vld [vmem:[#allocation2 + $0x58] sm:$0xff] }
 0x17e   :  { %v13514_v29 = vadd.f32 %v1497_v10, %v13261_v35  ;;  %v13517_v42 = vadd.f32 %v1650_v33, %v13264_v17  ;;  %v1499_v23 = vpop.f32.mrb[69].mxu0  ;;  %v1652_v38 = vpop.f32.mrb[69].mxu1  ;;  %4062 = vmatpush1.bf16.msra.mxu0 %v11818_v39  ;;  %4136 = vmatprep.subr.bf16.mxu1 %v16910_v1  ;;  %v11826_v10 = vld [vmem:[%s16902_s3 + $0x108] ss:$12 sps:$4 sm:$0xff]   ;;  %v11829_v33 = vld [vmem:[%s16902_s3 + $0x110] ss:$12 sps:$4 sm:$0xff]  }
 0x17f   :  { %v1547_v44 = vadd.f32 %v1531_v6, %v1499_v23  ;;  %v1700_v61 = vadd.f32 %v1684_v20, %v1652_v38  ;;  %v1501_v19 = vpop.f32.mrb[70].mxu0  ;;  %v1654_v35 = vpop.f32.mrb[70].mxu1 }
 0x180   :  { %v13527_v17 = vadd.f32 %v1501_v19, %v13272_v4  ;;  %v13530_v45 = vadd.f32 %v1654_v35, %v13275_v5  ;;  %v1503_v54 = vpop.f32.mrb[71].mxu0  ;;  %v1656_v41 = vpop.f32.mrb[71].mxu1  ;;  %v11824_v4 = vld [vmem:[%s16902_s3 + $0xf4] ss:$12 sps:$4 sm:$0xff]   ;;  %v11822_v5 = vld [vmem:[%s16902_s3 + $0xf0] ss:$12 sps:$4 sm:$0xff]  }
 0x181   :  { %1563 = vst.msk [vmem:[#allocation2 + $0x28] sm:$0xff] %vm229_vm0, %v1547_v44  ;;  %1716 = vst.msk [vmem:[#allocation2 + $0xa8] sm:$0xff] %vm229_vm0, %v1700_v61  ;;  %v1549_v24 = vadd.f32 %v1533_v37, %v1503_v54  ;;  %v1702_v51 = vadd.f32 %v1686_v59, %v1656_v41  ;;  %4063 = vmatprep.subr.bf16.mxu0 %v11824_v4  ;;  %4137 = vmatpush1.bf16.msra.mxu1 %v11825_v26  ;;  %v1690_v61 = vld [vmem:[#allocation2 + $0xd8] sm:$0xff]  ;;  %v11833_v54 = vld [vmem:[%s16902_s3 + $0x128] ss:$12 sps:$4 sm:$0xff]  }
 0x182   :  { %4064 = vmatpush1.bf16.msra.mxu0 %v11822_v5  ;;  %4138 = vmatprep.subr.bf16.mxu1 %v16910_v1  ;;  %v1539_v37 = vld [vmem:[#allocation2 + $0x68] sm:$0xff] }
 0x183   :  { %1565 = vst.msk [vmem:[#allocation2 + $0x38] sm:$0xff] %vm229_vm0, %v1549_v24  ;;  %1718 = vst.msk [vmem:[#allocation2 + $0xb8] sm:$0xff] %vm229_vm0, %v1702_v51  ;;  %4065 = vmatprep.subr.bf16.mxu0 %v11828_v16  ;;  %v1692_v41 = vld [vmem:[#allocation2 + $0xe8] sm:$0xff] }
 0x184   :  { %v11836_v51 = vld [vmem:[%s16902_s3 + $0x13c] ss:$12 sps:$4 sm:$0xff]  }
 0x185   :  { %v1507_v31 = vpop.f32.mrb[72].mxu0  ;;  %v1660_v53 = vpop.f32.mrb[72].mxu1  ;;  %4139 = vmatpush1.bf16.msra.mxu1 %v11829_v33  ;;  %v1541_v33 = vld [vmem:[#allocation2 + $0x78] sm:$0xff] }
 0x186   :  { %v13550_v56 = vadd.f32 %v1507_v31, %v13288_v7  ;;  %v13553_v57 = vadd.f32 %v1660_v53, %v13291_v8  ;;  %v1509_v43 = vpop.f32.mrb[73].mxu0  ;;  %v1662_v6 = vpop.f32.mrb[73].mxu1  ;;  %4066 = vmatpush1.bf16.msra.mxu0 %v11826_v10  ;;  %4140 = vmatprep.subr.bf16.mxu1 %v16910_v1  ;;  %v11837_v31 = vld [vmem:[%s16902_s3 + $0x140] ss:$12 sps:$4 sm:$0xff]  }
 0x187   :  { %v1551_v20 = vadd.f32 %v1535_v30, %v1509_v43  ;;  %v1704_v21 = vadd.f32 %v1688_v50, %v1662_v6  ;;  %v1511_v23 = vpop.f32.mrb[74].mxu0  ;;  %v1664_v7 = vpop.f32.mrb[74].mxu1  ;;  %v11834_v50 = vld [vmem:[%s16902_s3 + $0x138] ss:$12 sps:$4 sm:$0xff]  }
 0x188   :  { %v13563_v8 = vadd.f32 %v1511_v23, %v13297_v63  ;;  %v13566_v38 = vadd.f32 %v1664_v7, %v13300_v18  ;;  %v1513_v39 = vpop.f32.mrb[75].mxu0  ;;  %v1666_v44 = vpop.f32.mrb[75].mxu1  ;;  %v11832_v63 = vld [vmem:[%s16902_s3 + $0x124] ss:$12 sps:$4 sm:$0xff]   ;;  %v11830_v18 = vld [vmem:[%s16902_s3 + $0x120] ss:$12 sps:$4 sm:$0xff]  }
 0x189   :  { %1567 = vst.msk [vmem:[#allocation2 + $0x48] sm:$0xff] %vm229_vm0, %v1551_v20  ;;  %1720 = vst.msk [vmem:[#allocation2 + $0xc8] sm:$0xff] %vm229_vm0, %v1704_v21  ;;  %v1553_v19 = vadd.f32 %v1537_v27, %v1513_v39  ;;  %v1706_v35 = vadd.f32 %v1690_v61, %v1666_v44  ;;  %4067 = vmatprep.subr.bf16.mxu0 %v11832_v63  ;;  %4141 = vmatpush1.bf16.msra.mxu1 %v11833_v54  ;;  %v1694_v21 = vld [vmem:[#allocation2 + $0xf8] sm:$0xff] }
 0x18a   :  { %4068 = vmatpush1.bf16.msra.mxu0 %v11830_v18  ;;  %4142 = vmatprep.subr.bf16.mxu1 %v16910_v1 }
 0x18b   :  { %1569 = vst.msk [vmem:[#allocation2 + $0x58] sm:$0xff] %vm229_vm0, %v1553_v19  ;;  %1722 = vst.msk [vmem:[#allocation2 + $0xd8] sm:$0xff] %vm229_vm0, %v1706_v35  ;;  %4069 = vmatprep.subr.bf16.mxu0 %v11836_v51 }
 0x18d   :  { %v1517_v59 = vpop.f32.mrb[76].mxu0  ;;  %v1670_v24 = vpop.f32.mrb[76].mxu1  ;;  %4143 = vmatpush1.bf16.msra.mxu1 %v11837_v31 }
 0x18e   :  { %v13586_v4 = vadd.f32 %v1517_v59, %v13312_v48  ;;  %v13589_v5 = vadd.f32 %v1670_v24, %v13315_v49  ;;  %v1519_v26 = vpop.f32.mrb[77].mxu0  ;;  %v1672_v30 = vpop.f32.mrb[77].mxu1  ;;  %4070 = vmatpush1.bf16.msra.mxu0 %v11834_v50  ;;  %4315 = vmatprep.subr.bf16.mxu1 %v16910_v1  ;;  %v1835_v24 = vld [vmem:[#allocation2 + $0x118] sm:$0xff] }
 0x18f   :  { %v1555_v53 = vadd.f32 %v1539_v37, %v1519_v26  ;;  %v1708_v16 = vadd.f32 %v1692_v41, %v1672_v30  ;;  %v1521_v43 = vpop.f32.mrb[78].mxu0  ;;  %v1674_v48 = vpop.f32.mrb[78].mxu1  ;;  %4242 = vmatprep.subr.bf16.mxu0 %v13355_v58  ;;  %v1837_v30 = vld [vmem:[#allocation2 + $0x128] sm:$0xff] }
 0x190   :  { %v13599_v49 = vadd.f32 %v1521_v43, %v13321_v11  ;;  %v13602_v6 = vadd.f32 %v1674_v48, %v13324_v32  ;;  %v1523_v10 = vpop.f32.mrb[79].mxu0  ;;  %v1676_v20 = vpop.f32.mrb[79].mxu1  ;;  %v1833_v11 = vld [vmem:[#allocation2 + $0x108] sm:$0xff] }
 0x191   :  { %1571 = vst.msk [vmem:[#allocation2 + $0x68] sm:$0xff] %vm229_vm0, %v1555_v53  ;;  %1724 = vst.msk [vmem:[#allocation2 + $0xe8] sm:$0xff] %vm229_vm0, %v1708_v16  ;;  %v1557_v23 = vadd.f32 %v1541_v33, %v1523_v10  ;;  %v1710_v7 = vadd.f32 %v1694_v21, %v1676_v20  ;;  %v1987_v32 = vld [vmem:[#allocation2 + $0x188] sm:$0xff] }
 0x193   :  { %1573 = vst.msk [vmem:[#allocation2 + $0x78] sm:$0xff] %vm229_vm0, %v1557_v23  ;;  %1726 = vst.msk [vmem:[#allocation2 + $0xf8] sm:$0xff] %vm229_vm0, %v1710_v7 }
 0x195   :  { %v1793_v39 = vpop.f32.mrb[80].mxu0  ;;  %v1947_v27 = vpop.f32.mrb[80].mxu1 }
 0x196   :  { %v13611_v44 = vadd.f32 %v1793_v39, %v13336_v12  ;;  %v13614_v61 = vadd.f32 %v1947_v27, %v13339_v34  ;;  %v1795_v19 = vpop.f32.mrb[81].mxu0  ;;  %v1949_v35 = vpop.f32.mrb[81].mxu1  ;;  %v1989_v12 = vld [vmem:[#allocation2 + $0x198] sm:$0xff]  ;;  %v1841_v27 = vld [vmem:[#allocation2 + $0x148] sm:$0xff] }
 0x197   :  { %v1849_v63 = vadd.f32 %v1833_v11, %v1795_v19  ;;  %v2003_v58 = vadd.f32 %v1987_v32, %v1949_v35  ;;  %v1797_v18 = vpop.f32.mrb[82].mxu0  ;;  %v1951_v54 = vpop.f32.mrb[82].mxu1  ;;  %v1839_v11 = vld [vmem:[#allocation2 + $0x138] sm:$0xff] }
 0x198   :  { %v13617_v37 = vadd.f32 %v1797_v18, %v13345_v25  ;;  %v13620_v41 = vadd.f32 %v1951_v54, %v13348_v46  ;;  %v1799_v59 = vpop.f32.mrb[83].mxu0  ;;  %v1953_v51 = vpop.f32.mrb[83].mxu1  ;;  %v1991_v25 = vld [vmem:[#allocation2 + $0x1a8] sm:$0xff] }
 0x199   :  { %1865 = vst.msk [vmem:[#allocation2 + $0x108] sm:$0xff] %vm229_vm0, %v1849_v63  ;;  %2019 = vst.msk [vmem:[#allocation2 + $0x188] sm:$0xff] %vm229_vm0, %v2003_v58  ;;  %v1851_v34 = vadd.f32 %v1835_v24, %v1799_v59  ;;  %v2005_v26 = vadd.f32 %v1989_v12, %v1953_v51 }
 0x19b   :  { %1867 = vst.msk [vmem:[#allocation2 + $0x118] sm:$0xff] %vm229_vm0, %v1851_v34  ;;  %2021 = vst.msk [vmem:[#allocation2 + $0x198] sm:$0xff] %vm229_vm0, %v2005_v26 }
 0x19d   :  { %v1803_v50 = vpop.f32.mrb[84].mxu0  ;;  %v1957_v31 = vpop.f32.mrb[84].mxu1 }
 0x19e   :  { %v13627_v46 = vadd.f32 %v1803_v50, %v13370_v60  ;;  %v13630_v53 = vadd.f32 %v1957_v31, %v13373_v14  ;;  %v1805_v16 = vpop.f32.mrb[85].mxu0  ;;  %v1959_v43 = vpop.f32.mrb[85].mxu1  ;;  %v1993_v60 = vld [vmem:[#allocation2 + $0x1b8] sm:$0xff]  ;;  %v1845_v31 = vld [vmem:[#allocation2 + $0x168] sm:$0xff] }
 0x19f   :  { %v1853_v48 = vadd.f32 %v1837_v30, %v1805_v16  ;;  %v2007_v10 = vadd.f32 %v1991_v25, %v1959_v43  ;;  %v1807_v33 = vpop.f32.mrb[86].mxu0  ;;  %v1961_v20 = vpop.f32.mrb[86].mxu1  ;;  %v1843_v30 = vld [vmem:[#allocation2 + $0x158] sm:$0xff] }
 0x1a0   :  { %v13633_v21 = vadd.f32 %v1807_v33, %v13383_v0  ;;  %v13636_v23 = vadd.f32 %v1961_v20, %v13386_v62  ;;  %v1809_v7 = vpop.f32.mrb[87].mxu0  ;;  %v1963_v32 = vpop.f32.mrb[87].mxu1  ;;  %v1995_v0 = vld [vmem:[#allocation2 + $0x1c8] sm:$0xff] }
 0x1a1   :  { %1869 = vst.msk [vmem:[#allocation2 + $0x128] sm:$0xff] %vm229_vm0, %v1853_v48  ;;  %2023 = vst.msk [vmem:[#allocation2 + $0x1a8] sm:$0xff] %vm229_vm0, %v2007_v10  ;;  %v1855_v14 = vadd.f32 %v1839_v11, %v1809_v7  ;;  %v2009_v39 = vadd.f32 %v1993_v60, %v1963_v32 }
 0x1a3   :  { %1871 = vst.msk [vmem:[#allocation2 + $0x138] sm:$0xff] %vm229_vm0, %v1855_v14  ;;  %2025 = vst.msk [vmem:[#allocation2 + $0x1b8] sm:$0xff] %vm229_vm0, %v2009_v39 }
 0x1a5   :  { %v1813_v19 = vpop.f32.mrb[88].mxu0  ;;  %v1967_v35 = vpop.f32.mrb[88].mxu1 }
 0x1a6   :  { %v13643_v62 = vadd.f32 %v1813_v19, %v13406_v40  ;;  %v13646_v63 = vadd.f32 %v1967_v35, %v13409_v52  ;;  %v1815_v58 = vpop.f32.mrb[89].mxu0  ;;  %v1969_v18 = vpop.f32.mrb[89].mxu1  ;;  %v1997_v40 = vld [vmem:[#allocation2 + $0x1d8] sm:$0xff]  ;;  %v2237_v35 = vld [vmem:[#allocation2 + $0x8] sm:$0xff] }
 0x1a7   :  { %v1857_v54 = vadd.f32 %v1841_v27, %v1815_v58  ;;  %v2011_v59 = vadd.f32 %v1995_v0, %v1969_v18  ;;  %v1817_v24 = vpop.f32.mrb[90].mxu0  ;;  %v1971_v51 = vpop.f32.mrb[90].mxu1  ;;  %v1847_v27 = vld [vmem:[#allocation2 + $0x178] sm:$0xff] }
 0x1a8   :  { %v13649_v12 = vadd.f32 %v1817_v24, %v13419_v22  ;;  %v13652_v34 = vadd.f32 %v1971_v51, %v13422_v3  ;;  %v1819_v26 = vpop.f32.mrb[91].mxu0  ;;  %v1973_v25 = vpop.f32.mrb[91].mxu1  ;;  %v1999_v22 = vld [vmem:[#allocation2 + $0x1e8] sm:$0xff] }
 0x1a9   :  { %1873 = vst.msk [vmem:[#allocation2 + $0x148] sm:$0xff] %vm229_vm0, %v1857_v54  ;;  %2027 = vst.msk [vmem:[#allocation2 + $0x1c8] sm:$0xff] %vm229_vm0, %v2011_v59  ;;  %v1859_v52 = vadd.f32 %v1843_v30, %v1819_v26  ;;  %v2013_v50 = vadd.f32 %v1997_v40, %v1973_v25 }
 0x1ab   :  { %1875 = vst.msk [vmem:[#allocation2 + $0x158] sm:$0xff] %vm229_vm0, %v1859_v52  ;;  %2029 = vst.msk [vmem:[#allocation2 + $0x1d8] sm:$0xff] %vm229_vm0, %v2013_v50 }
 0x1ad   :  { %v1823_v16 = vpop.f32.mrb[92].mxu0  ;;  %v1977_v43 = vpop.f32.mrb[92].mxu1 }
 0x1ae   :  { %v13659_v3 = vadd.f32 %v1823_v16, %v13442_v9  ;;  %v13662_v48 = vadd.f32 %v1977_v43, %v13445_v13  ;;  %v1825_v10 = vpop.f32.mrb[93].mxu0  ;;  %v1979_v33 = vpop.f32.mrb[93].mxu1  ;;  %v2001_v9 = vld [vmem:[#allocation2 + $0x1f8] sm:$0xff]  ;;  %v2241_v43 = vld [vmem:[#allocation2 + $0x28] sm:$0xff] }
 0x1af   :  { %v1861_v20 = vadd.f32 %v1845_v31, %v1825_v10  ;;  %v2015_v7 = vadd.f32 %v1999_v22, %v1979_v33  ;;  %v1827_v11 = vpop.f32.mrb[94].mxu0  ;;  %v1981_v32 = vpop.f32.mrb[94].mxu1  ;;  %v2239_v31 = vld [vmem:[#allocation2 + $0x18] sm:$0xff]  ;;  %v12204_v10 = vmov 0.0  }
 0x1b0   :  { %v13665_v60 = vadd.f32 %v1827_v11, %v13455_v36  ;;  %v13668_v14 = vadd.f32 %v1981_v32, %v13458_v2  ;;  %v1829_v39 = vpop.f32.mrb[95].mxu0  ;;  %v1983_v0 = vpop.f32.mrb[95].mxu1  ;;  %v2390_v36 = vld [vmem:[#allocation2 + $0x88] sm:$0xff]  ;;  %3595 = vst.msk [vmem:[#allocation3 + $0x88] sm:$0xff] %vm229_vm0, %v12204_v10  ;;  %3594 = vst [vmem:[#allocation3 + $0x80] sm:$0xff] %v12204_v10 }
 0x1b1   :  { %1877 = vst.msk [vmem:[#allocation2 + $0x168] sm:$0xff] %vm229_vm0, %v1861_v20  ;;  %2031 = vst.msk [vmem:[#allocation2 + $0x1e8] sm:$0xff] %vm229_vm0, %v2015_v7  ;;  %v1863_v13 = vadd.f32 %v1847_v27, %v1829_v39  ;;  %v2017_v19 = vadd.f32 %v2001_v9, %v1983_v0 }
 0x1b2   :  { %3725 = vst [vmem:[#allocation3 + $0x110] sm:$0xff] %v12204_v10  ;;  %3726 = vst.msk [vmem:[#allocation3 + $0x118] sm:$0xff] %vm229_vm0, %v12204_v10  ;;  %v2400_v10 = vld [vmem:[#allocation2 + $0xd8] sm:$0xff] }
 0x1b3   :  { %1879 = vst.msk [vmem:[#allocation2 + $0x178] sm:$0xff] %vm229_vm0, %v1863_v13  ;;  %2033 = vst.msk [vmem:[#allocation2 + $0x1f8] sm:$0xff] %vm229_vm0, %v2017_v19 }
 0x1b5   :  { %v2197_v58 = vpop.f32.mrb[96].mxu0  ;;  %v2350_v18 = vpop.f32.mrb[96].mxu1 }
 0x1b6   :  { %v13675_v2 = vadd.f32 %v2197_v58, %v13478_v15  ;;  %v13678_v54 = vadd.f32 %v2350_v18, %v13481_v28  ;;  %v2199_v59 = vpop.f32.mrb[97].mxu0  ;;  %v2352_v24 = vpop.f32.mrb[97].mxu1  ;;  %v2392_v15 = vld [vmem:[#allocation2 + $0x98] sm:$0xff] }
 0x1b7   :  { %v2253_v51 = vadd.f32 %v2237_v35, %v2199_v59  ;;  %v2406_v26 = vadd.f32 %v2390_v36, %v2352_v24  ;;  %v2201_v30 = vpop.f32.mrb[98].mxu0  ;;  %v2354_v25 = vpop.f32.mrb[98].mxu1  ;;  %v2243_v36 = vld [vmem:[#allocation2 + $0x38] sm:$0xff]  ;;  %v2245_v59 = vld [vmem:[#allocation2 + $0x48] sm:$0xff] }
 0x1b8   :  { %v13681_v40 = vadd.f32 %v2201_v30, %v13491_v55  ;;  %v13684_v52 = vadd.f32 %v2354_v25, %v13494_v47  ;;  %v2203_v50 = vpop.f32.mrb[99].mxu0  ;;  %v2356_v22 = vpop.f32.mrb[99].mxu1  ;;  %v2394_v55 = vld [vmem:[#allocation2 + $0xa8] sm:$0xff] }
 0x1b9   :  { %2269 = vst.msk [vmem:[#allocation2 + $0x8] sm:$0xff] %vm229_vm0, %v2253_v51  ;;  %2422 = vst.msk [vmem:[#allocation2 + $0x88] sm:$0xff] %vm229_vm0, %v2406_v26  ;;  %v2255_v28 = vadd.f32 %v2239_v31, %v2203_v50  ;;  %v2408_v16 = vadd.f32 %v2392_v15, %v2356_v22  ;;  %v2398_v25 = vld [vmem:[#allocation2 + $0xc8] sm:$0xff] }
 0x1bb   :  { %2271 = vst.msk [vmem:[#allocation2 + $0x18] sm:$0xff] %vm229_vm0, %v2255_v28  ;;  %2424 = vst.msk [vmem:[#allocation2 + $0x98] sm:$0xff] %vm229_vm0, %v2408_v16 }
 0x1bd   :  { %v2207_v47 = vpop.f32.mrb[100].mxu0  ;;  %v2360_v33 = vpop.f32.mrb[100].mxu1 }
 0x1be   :  { %v13693_v20 = vadd.f32 %v2207_v47, %v13514_v29  ;;  %v13696_v7 = vadd.f32 %v2360_v33, %v13517_v42  ;;  %v2209_v11 = vpop.f32.mrb[101].mxu0  ;;  %v2362_v32 = vpop.f32.mrb[101].mxu1  ;;  %v2396_v29 = vld [vmem:[#allocation2 + $0xb8] sm:$0xff]  ;;  %v2249_v33 = vld [vmem:[#allocation2 + $0x68] sm:$0xff] }
 0x1bf   :  { %v2257_v39 = vadd.f32 %v2241_v43, %v2209_v11  ;;  %v2410_v27 = vadd.f32 %v2394_v55, %v2362_v32  ;;  %v2211_v0 = vpop.f32.mrb[102].mxu0  ;;  %v2364_v9 = vpop.f32.mrb[102].mxu1  ;;  %v2247_v55 = vld [vmem:[#allocation2 + $0x58] sm:$0xff] }
 0x1c0   :  { %v13699_v13 = vadd.f32 %v2211_v0, %v13527_v17  ;;  %v13702_v19 = vadd.f32 %v2364_v9, %v13530_v45  ;;  %v2213_v35 = vpop.f32.mrb[103].mxu0  ;;  %v2366_v58 = vpop.f32.mrb[103].mxu1 }
 0x1c1   :  { %2273 = vst.msk [vmem:[#allocation2 + $0x28] sm:$0xff] %vm229_vm0, %v2257_v39  ;;  %2426 = vst.msk [vmem:[#allocation2 + $0xa8] sm:$0xff] %vm229_vm0, %v2410_v27  ;;  %v2259_v42 = vadd.f32 %v2243_v36, %v2213_v35  ;;  %v2412_v18 = vadd.f32 %v2396_v29, %v2366_v58 }
 0x1c3   :  { %2275 = vst.msk [vmem:[#allocation2 + $0x38] sm:$0xff] %vm229_vm0, %v2259_v42  ;;  %2428 = vst.msk [vmem:[#allocation2 + $0xb8] sm:$0xff] %vm229_vm0, %v2412_v18 }
 0x1c5   :  { %v2217_v17 = vpop.f32.mrb[104].mxu0  ;;  %v2370_v24 = vpop.f32.mrb[104].mxu1 }
 0x1c6   :  { %v13709_v45 = vadd.f32 %v2217_v17, %v13550_v56  ;;  %v13712_v51 = vadd.f32 %v2370_v24, %v13553_v57  ;;  %v2219_v26 = vpop.f32.mrb[105].mxu0  ;;  %v2372_v30 = vpop.f32.mrb[105].mxu1 }
 0x1c7   :  { %v2261_v50 = vadd.f32 %v2245_v59, %v2219_v26  ;;  %v2414_v31 = vadd.f32 %v2398_v25, %v2372_v30  ;;  %v2221_v22 = vpop.f32.mrb[106].mxu0  ;;  %v2374_v15 = vpop.f32.mrb[106].mxu1  ;;  %v2251_v59 = vld [vmem:[#allocation2 + $0x78] sm:$0xff]  ;;  %v2543_v30 = vld [vmem:[#allocation2 + $0x108] sm:$0xff] }
 0x1c8   :  { %v13715_v28 = vadd.f32 %v2221_v22, %v13563_v8  ;;  %v13718_v16 = vadd.f32 %v2374_v15, %v13566_v38  ;;  %v2223_v43 = vpop.f32.mrb[107].mxu0  ;;  %v2376_v56 = vpop.f32.mrb[107].mxu1  ;;  %v2402_v8 = vld [vmem:[#allocation2 + $0xe8] sm:$0xff] }
 0x1c9   :  { %2277 = vst.msk [vmem:[#allocation2 + $0x48] sm:$0xff] %vm229_vm0, %v2261_v50  ;;  %2430 = vst.msk [vmem:[#allocation2 + $0xc8] sm:$0xff] %vm229_vm0, %v2414_v31  ;;  %v2263_v57 = vadd.f32 %v2247_v55, %v2223_v43  ;;  %v2416_v47 = vadd.f32 %v2400_v10, %v2376_v56  ;;  %v2697_v25 = vld [vmem:[#allocation2 + $0x188] sm:$0xff] }
 0x1cb   :  { %2279 = vst.msk [vmem:[#allocation2 + $0x58] sm:$0xff] %vm229_vm0, %v2263_v57  ;;  %2432 = vst.msk [vmem:[#allocation2 + $0xd8] sm:$0xff] %vm229_vm0, %v2416_v47 }
 0x1cd   :  { %v2227_v11 = vpop.f32.mrb[108].mxu0  ;;  %v2380_v32 = vpop.f32.mrb[108].mxu1 }
 0x1ce   :  { %v13725_v38 = vadd.f32 %v2227_v11, %v13586_v4  ;;  %v13728_v39 = vadd.f32 %v2380_v32, %v13589_v5  ;;  %v2229_v27 = vpop.f32.mrb[109].mxu0  ;;  %v2382_v0 = vpop.f32.mrb[109].mxu1  ;;  %v2404_v4 = vld [vmem:[#allocation2 + $0xf8] sm:$0xff] }
 0x1cf   :  { %v2265_v9 = vadd.f32 %v2249_v33, %v2229_v27  ;;  %v2418_v35 = vadd.f32 %v2402_v8, %v2382_v0  ;;  %v2231_v36 = vpop.f32.mrb[110].mxu0  ;;  %v2384_v58 = vpop.f32.mrb[110].mxu1  ;;  %v2545_v33 = vld [vmem:[#allocation2 + $0x118] sm:$0xff] }
 0x1d0   :  { %v13731_v29 = vadd.f32 %v2231_v36, %v13599_v49  ;;  %v13734_v42 = vadd.f32 %v2384_v58, %v13602_v6  ;;  %v2233_v18 = vpop.f32.mrb[111].mxu0  ;;  %v2386_v17 = vpop.f32.mrb[111].mxu1  ;;  %v2699_v11 = vld [vmem:[#allocation2 + $0x198] sm:$0xff]  ;;  %v2701_v36 = vld [vmem:[#allocation2 + $0x1a8] sm:$0xff] }
 0x1d1   :  { %2281 = vst.msk [vmem:[#allocation2 + $0x68] sm:$0xff] %vm229_vm0, %v2265_v9  ;;  %2434 = vst.msk [vmem:[#allocation2 + $0xe8] sm:$0xff] %vm229_vm0, %v2418_v35  ;;  %v2267_v5 = vadd.f32 %v2251_v59, %v2233_v18  ;;  %v2420_v24 = vadd.f32 %v2404_v4, %v2386_v17  ;;  %v2547_v9 = vld [vmem:[#allocation2 + $0x128] sm:$0xff] }
 0x1d3   :  { %2283 = vst.msk [vmem:[#allocation2 + $0x78] sm:$0xff] %vm229_vm0, %v2267_v5  ;;  %2436 = vst.msk [vmem:[#allocation2 + $0xf8] sm:$0xff] %vm229_vm0, %v2420_v24 }
 0x1d5   :  { %v2503_v26 = vpop.f32.mrb[112].mxu0  ;;  %v2657_v49 = vpop.f32.mrb[112].mxu1 }
 0x1d6   :  { %v2558_v6 = vadd.f32 %v2503_v26, %v13611_v44  ;;  %v2712_v50 = vadd.f32 %v2657_v49, %v13614_v61  ;;  %v2505_v31 = vpop.f32.mrb[113].mxu0  ;;  %v2659_v22 = vpop.f32.mrb[113].mxu1  ;;  %v2549_v26 = vld [vmem:[#allocation2 + $0x138] sm:$0xff] }
 0x1d7   :  { %v2559_v15 = vadd.f32 %v2543_v30, %v2505_v31  ;;  %v2713_v43 = vadd.f32 %v2697_v25, %v2659_v22  ;;  %v2507_v55 = vpop.f32.mrb[114].mxu0  ;;  %v2661_v56 = vpop.f32.mrb[114].mxu1  ;;  %v2551_v31 = vld [vmem:[#allocation2 + $0x148] sm:$0xff] }
 0x1d8   :  { %2574 = vst [vmem:[#allocation2 + $0x100] sm:$0xff] %v2558_v6  ;;  %2728 = vst [vmem:[#allocation2 + $0x180] sm:$0xff] %v2712_v50  ;;  %v2560_v10 = vadd.f32 %v2507_v55, %v13617_v37  ;;  %v2714_v57 = vadd.f32 %v2661_v56, %v13620_v41  ;;  %v2509_v47 = vpop.f32.mrb[115].mxu0  ;;  %v2663_v8 = vpop.f32.mrb[115].mxu1 }
 0x1d9   :  { %2575 = vst.msk [vmem:[#allocation2 + $0x108] sm:$0xff] %vm229_vm0, %v2559_v15  ;;  %2729 = vst.msk [vmem:[#allocation2 + $0x188] sm:$0xff] %vm229_vm0, %v2713_v43  ;;  %v2561_v44 = vadd.f32 %v2545_v33, %v2509_v47  ;;  %v2715_v61 = vadd.f32 %v2699_v11, %v2663_v8  ;;  %v2705_v15 = vld [vmem:[#allocation2 + $0x1c8] sm:$0xff]  ;;  %v2553_v8 = vld [vmem:[#allocation2 + $0x158] sm:$0xff] }
 0x1da   :  { %2576 = vst [vmem:[#allocation2 + $0x110] sm:$0xff] %v2560_v10  ;;  %2730 = vst [vmem:[#allocation2 + $0x190] sm:$0xff] %v2714_v57 }
 0x1db   :  { %2577 = vst.msk [vmem:[#allocation2 + $0x118] sm:$0xff] %vm229_vm0, %v2561_v44  ;;  %2731 = vst.msk [vmem:[#allocation2 + $0x198] sm:$0xff] %vm229_vm0, %v2715_v61  ;;  %v3472_v44 = vlaneseq }
 0x1dd   :  { %v2513_v32 = vpop.f32.mrb[116].mxu0  ;;  %v2667_v37 = vpop.f32.mrb[116].mxu1 }
 0x1de   :  { %v2562_v41 = vadd.f32 %v2513_v32, %v13627_v46  ;;  %v2716_v27 = vadd.f32 %v2667_v37, %v13630_v53  ;;  %v2515_v0 = vpop.f32.mrb[117].mxu0  ;;  %v2669_v35 = vpop.f32.mrb[117].mxu1  ;;  %v2703_v46 = vld [vmem:[#allocation2 + $0x1b8] sm:$0xff] }
 0x1df   :  { %v2563_v58 = vadd.f32 %v2547_v9, %v2515_v0  ;;  %v2717_v18 = vadd.f32 %v2701_v36, %v2669_v35  ;;  %v2517_v59 = vpop.f32.mrb[118].mxu0  ;;  %v2671_v17 = vpop.f32.mrb[118].mxu1  ;;  %v2555_v0 = vld [vmem:[#allocation2 + $0x168] sm:$0xff] }
 0x1e0   :  { %2578 = vst [vmem:[#allocation2 + $0x120] sm:$0xff] %v2562_v41  ;;  %2732 = vst [vmem:[#allocation2 + $0x1a0] sm:$0xff] %v2716_v27  ;;  %v2564_v4 = vadd.f32 %v2517_v59, %v13633_v21  ;;  %v2718_v5 = vadd.f32 %v2671_v17, %v13636_v23  ;;  %v2519_v24 = vpop.f32.mrb[119].mxu0  ;;  %v2673_v49 = vpop.f32.mrb[119].mxu1  ;;  %v2709_v35 = vld [vmem:[#allocation2 + $0x1e8] sm:$0xff] }
 0x1e1   :  { %2579 = vst.msk [vmem:[#allocation2 + $0x128] sm:$0xff] %vm229_vm0, %v2563_v58  ;;  %2733 = vst.msk [vmem:[#allocation2 + $0x1a8] sm:$0xff] %vm229_vm0, %v2717_v18  ;;  %v2565_v53 = vadd.f32 %v2549_v26, %v2519_v24  ;;  %v2719_v30 = vadd.f32 %v2703_v46, %v2673_v49  ;;  %v2557_v24 = vld [vmem:[#allocation2 + $0x178] sm:$0xff] }
 0x1e2   :  { %2580 = vst [vmem:[#allocation2 + $0x130] sm:$0xff] %v2564_v4  ;;  %2734 = vst [vmem:[#allocation2 + $0x1b0] sm:$0xff] %v2718_v5 }
 0x1e3   :  { %2581 = vst.msk [vmem:[#allocation2 + $0x138] sm:$0xff] %vm229_vm0, %v2565_v53  ;;  %2735 = vst.msk [vmem:[#allocation2 + $0x1b8] sm:$0xff] %vm229_vm0, %v2719_v30  ;;  %v3454_v53 = vld [vmem:[%s16903_s2] sm:$0x3] }
 0x1e5   :  { %v2523_v25 = vpop.f32.mrb[120].mxu0  ;;  %v2677_v21 = vpop.f32.mrb[120].mxu1 }
 0x1e6   :  { %v2566_v23 = vadd.f32 %v2523_v25, %v13643_v62  ;;  %v2720_v6 = vadd.f32 %v2677_v21, %v13646_v63  ;;  %v2525_v50 = vpop.f32.mrb[121].mxu0  ;;  %v2679_v22 = vpop.f32.mrb[121].mxu1  ;;  %v2707_v62 = vld [vmem:[#allocation2 + $0x1d8] sm:$0xff] }
 0x1e7   :  { %v2567_v43 = vadd.f32 %v2551_v31, %v2525_v50  ;;  %v2721_v55 = vadd.f32 %v2705_v15, %v2679_v22  ;;  %v2527_v56 = vpop.f32.mrb[122].mxu0  ;;  %v2681_v10 = vpop.f32.mrb[122].mxu1  ;;  %v3100_v31 = vld [vmem:[#allocation2 + $0x88] sm:$0xff] }
 0x1e8   :  { %2582 = vst [vmem:[#allocation2 + $0x140] sm:$0xff] %v2566_v23  ;;  %2736 = vst [vmem:[#allocation2 + $0x1c0] sm:$0xff] %v2720_v6  ;;  %v2568_v57 = vadd.f32 %v2527_v56, %v13649_v12  ;;  %v2722_v47 = vadd.f32 %v2681_v10, %v13652_v34  ;;  %v2529_v33 = vpop.f32.mrb[123].mxu0  ;;  %v2683_v11 = vpop.f32.mrb[123].mxu1  ;;  %v13764_v12 = vshrl.u32 %v3472_v44, 7  ;;  %v2947_v6 = vld [vmem:[#allocation2 + $0x8] sm:$0xff] }
 0x1e9   :  { %2583 = vst.msk [vmem:[#allocation2 + $0x148] sm:$0xff] %vm229_vm0, %v2567_v43  ;;  %2737 = vst.msk [vmem:[#allocation2 + $0x1c8] sm:$0xff] %vm229_vm0, %v2721_v55  ;;  %v2569_v63 = vadd.f32 %v2553_v8, %v2529_v33  ;;  %v2723_v61 = vadd.f32 %v2707_v62, %v2683_v11 }
 0x1ea   :  { %2584 = vst [vmem:[#allocation2 + $0x150] sm:$0xff] %v2568_v57  ;;  %2738 = vst [vmem:[#allocation2 + $0x1d0] sm:$0xff] %v2722_v47  ;;  %v16908_v11 = vsub.s32 1, %v13764_v12 }
 0x1eb   :  { %2585 = vst.msk [vmem:[#allocation2 + $0x158] sm:$0xff] %vm229_vm0, %v2569_v63  ;;  %2739 = vst.msk [vmem:[#allocation2 + $0x1d8] sm:$0xff] %vm229_vm0, %v2723_v61 }
 0x1ec   :  { %16923 = vst [vmem:[#allocation7_spill] sm:$0xff] %v13764_v12 }
 0x1ed   :  { %v2533_v34 = vpop.f32.mrb[124].mxu0  ;;  %v2687_v32 = vpop.f32.mrb[124].mxu1 }
 0x1ee   :  { %v2570_v37 = vadd.f32 %v2533_v34, %v13659_v3  ;;  %v2724_v41 = vadd.f32 %v2687_v32, %v13662_v48  ;;  %v2535_v27 = vpop.f32.mrb[125].mxu0  ;;  %v2689_v9 = vpop.f32.mrb[125].mxu1  ;;  %v2711_v3 = vld [vmem:[#allocation2 + $0x1f8] sm:$0xff]  ;;  %v16909_v48 = vsub.s32 0, %v13764_v12 }
 0x1ef   :  { %v2571_v36 = vadd.f32 %v2555_v0, %v2535_v27  ;;  %v2725_v58 = vadd.f32 %v2709_v35, %v2689_v9  ;;  %v2537_v18 = vpop.f32.mrb[126].mxu0  ;;  %v2691_v59 = vpop.f32.mrb[126].mxu1 }
 0x1f0   :  { %2586 = vst [vmem:[#allocation2 + $0x160] sm:$0xff] %v2570_v37  ;;  %2740 = vst [vmem:[#allocation2 + $0x1e0] sm:$0xff] %v2724_v41  ;;  %v2572_v17 = vadd.f32 %v2537_v18, %v13665_v60  ;;  %v2726_v4 = vadd.f32 %v2691_v59, %v13668_v14  ;;  %v2539_v5 = vpop.f32.mrb[127].mxu0  ;;  %v2693_v26 = vpop.f32.mrb[127].mxu1  ;;  %v13780_v60 = vrot.slane %v3454_v53, %v16909_v48  ;;  %v2951_v18 = vld [vmem:[#allocation2 + $0x28] sm:$0xff] }
 0x1f1   :  { %2587 = vst.msk [vmem:[#allocation2 + $0x168] sm:$0xff] %vm229_vm0, %v2571_v36  ;;  %2741 = vst.msk [vmem:[#allocation2 + $0x1e8] sm:$0xff] %vm229_vm0, %v2725_v58  ;;  %v2573_v49 = vadd.f32 %v2557_v24, %v2539_v5  ;;  %v2727_v46 = vadd.f32 %v2711_v3, %v2693_v26  ;;  %v13797_v41 = vrot.slane %v3454_v53, %v16908_v11  ;;  %v2953_v3 = vld [vmem:[#allocation2 + $0x38] sm:$0xff] }
 0x1f2   :  { %2588 = vst [vmem:[#allocation2 + $0x170] sm:$0xff] %v2572_v17  ;;  %2742 = vst [vmem:[#allocation2 + $0x1f0] sm:$0xff] %v2726_v4  ;;  %v3104_v17 = vld [vmem:[#allocation2 + $0xa8] sm:$0xff] }
 0x1f3   :  { %2589 = vst.msk [vmem:[#allocation2 + $0x178] sm:$0xff] %vm229_vm0, %v2573_v49  ;;  %2743 = vst.msk [vmem:[#allocation2 + $0x1f8] sm:$0xff] %vm229_vm0, %v2727_v46 }
 0x1f5   :  { %v2907_v14 = vpop.f32.mrb[128].mxu0  ;;  %v3060_v30 = vpop.f32.mrb[128].mxu1 }
 0x1f6   :  { %v2962_v25 = vadd.f32 %v2907_v14, %v13675_v2  ;;  %v3115_v21 = vadd.f32 %v3060_v30, %v13678_v54  ;;  %v2909_v23 = vpop.f32.mrb[129].mxu0  ;;  %v3062_v50 = vpop.f32.mrb[129].mxu1  ;;  %v2949_v2 = vld [vmem:[#allocation2 + $0x18] sm:$0xff] }
 0x1f7   :  { %v2963_v22 = vadd.f32 %v2947_v6, %v2909_v23  ;;  %v3116_v15 = vadd.f32 %v3100_v31, %v3062_v50  ;;  %v2911_v43 = vpop.f32.mrb[130].mxu0  ;;  %v3064_v55 = vpop.f32.mrb[130].mxu1  ;;  %v3102_v54 = vld [vmem:[#allocation2 + $0x98] sm:$0xff] }
 0x1f8   :  { %v3482_v56 = vadd.f32 %v13780_v60, %v2962_v25  ;;  %v3530_v10 = vadd.f32 %v13780_v60, %v3115_v21  ;;  %v2964_v57 = vadd.f32 %v2911_v43, %v13681_v40  ;;  %v3117_v47 = vadd.f32 %v3064_v55, %v13684_v52  ;;  %v2913_v33 = vpop.f32.mrb[131].mxu0  ;;  %v3066_v8 = vpop.f32.mrb[131].mxu1  ;;  %v3106_v21 = vld [vmem:[#allocation2 + $0xb8] sm:$0xff] }
 0x1f9   :  { %2979 = vst.msk [vmem:[#allocation2 + $0x8] sm:$0xff] %vm229_vm0, %v2963_v22  ;;  %3132 = vst.msk [vmem:[#allocation2 + $0x88] sm:$0xff] %vm229_vm0, %v3116_v15  ;;  %v2965_v62 = vadd.f32 %v2949_v2, %v2913_v33  ;;  %v3118_v44 = vadd.f32 %v3102_v54, %v3066_v8 }
 0x1fa   :  { %v3498_v63 = vmax.f32 %v3482_v56, 0.0  ;;  %v3546_v61 = vmax.f32 %v3530_v10, 0.0  ;;  %v3484_v34 = vadd.f32 %v13780_v60, %v2964_v57  ;;  %v3532_v40 = vadd.f32 %v13780_v60, %v3117_v47 }
 0x1fb   :  { %2981 = vst.msk [vmem:[#allocation2 + $0x18] sm:$0xff] %vm229_vm0, %v2965_v62  ;;  %3134 = vst.msk [vmem:[#allocation2 + $0x98] sm:$0xff] %vm229_vm0, %v3118_v44 }
 0x1fc   :  { %v3562_v52 = vadd.f32 %v3546_v61, %v3498_v63  ;;  %v3500_v32 = vmax.f32 %v3484_v34, 0.0  ;;  %v3548_v37 = vmax.f32 %v3532_v40, 0.0 }
 0x1fd   :  { %v2917_v27 = vpop.f32.mrb[132].mxu0  ;;  %v3070_v0 = vpop.f32.mrb[132].mxu1 }
 0x1fe   :  { %3578 = vst [vmem:[#allocation3] sm:$0xff] %v3562_v52  ;;  %v3564_v9 = vadd.f32 %v3548_v37, %v3500_v32  ;;  %v2966_v35 = vadd.f32 %v2917_v27, %v13693_v20  ;;  %v3119_v36 = vadd.f32 %v3070_v0, %v13696_v7  ;;  %v2919_v58 = vpop.f32.mrb[133].mxu0  ;;  %v3072_v59 = vpop.f32.mrb[133].mxu1  ;;  %v2955_v27 = vld [vmem:[#allocation2 + $0x48] sm:$0xff] }
 0x1ff   :  { %v2967_v4 = vadd.f32 %v2951_v18, %v2919_v58  ;;  %v3120_v5 = vadd.f32 %v3104_v17, %v3072_v59  ;;  %v2921_v24 = vpop.f32.mrb[134].mxu0  ;;  %v3074_v26 = vpop.f32.mrb[134].mxu1  ;;  %v2957_v17 = vld [vmem:[#allocation2 + $0x58] sm:$0xff] }
 0x200   :  { %v3456_v49 = vld [vmem:[#allocation2 + $0x8] sm:$0xff]  ;;  %3580 = vst [vmem:[#allocation3 + $0x10] sm:$0xff] %v3564_v9  ;;  %v3486_v53 = vadd.f32 %v13780_v60, %v2966_v35  ;;  %v3534_v14 = vadd.f32 %v13780_v60, %v3119_v36  ;;  %v2968_v20 = vadd.f32 %v2921_v24, %v13699_v13  ;;  %v3121_v7 = vadd.f32 %v3074_v26, %v13702_v19  ;;  %v2923_v30 = vpop.f32.mrb[135].mxu0  ;;  %v3076_v25 = vpop.f32.mrb[135].mxu1 }
 0x201   :  { %v3515_v46 = vld [vmem:[#allocation2 + $0x88] sm:$0xff]  ;;  %v3483_v23 = vadd.f32 %v13797_v41, %v3456_v49  ;;  %2983 = vst.msk [vmem:[#allocation2 + $0x28] sm:$0xff] %vm229_vm0, %v2967_v4  ;;  %3136 = vst.msk [vmem:[#allocation2 + $0xa8] sm:$0xff] %vm229_vm0, %v3120_v5  ;;  %v2969_v50 = vadd.f32 %v2953_v3, %v2923_v30  ;;  %v3122_v31 = vadd.f32 %v3106_v21, %v3076_v25 }
 0x202   :  { %v3531_v6 = vadd.f32 %v3515_v46, %v13797_v41  ;;  %v3458_v22 = vld [vmem:[#allocation2 + $0x18] sm:$0xff]  ;;  %v3502_v43 = vmax.f32 %v3486_v53, 0.0  ;;  %v3550_v55 = vmax.f32 %v3534_v14, 0.0  ;;  %v3488_v13 = vadd.f32 %v13780_v60, %v2968_v20  ;;  %v3108_v35 = vld [vmem:[#allocation2 + $0xc8] sm:$0xff] }
 0x203   :  { %v3517_v15 = vld [vmem:[#allocation2 + $0x98] sm:$0xff]  ;;  %v3536_v19 = vadd.f32 %v13780_v60, %v3121_v7  ;;  %v3499_v56 = vmax.f32 %v3483_v23, 0.0  ;;  %v3485_v57 = vadd.f32 %v13797_v41, %v3458_v22  ;;  %2985 = vst.msk [vmem:[#allocation2 + $0x38] sm:$0xff] %vm229_vm0, %v2969_v50  ;;  %3138 = vst.msk [vmem:[#allocation2 + $0xb8] sm:$0xff] %vm229_vm0, %v3122_v31  ;;  %v13815_v8 = vpack.c.bf16 %v3564_v9, %v3562_v52 }
 0x204   :  { %v3547_v10 = vmax.f32 %v3531_v6, 0.0  ;;  %v3533_v47 = vadd.f32 %v3517_v15, %v13797_v41  ;;  %v3504_v33 = vmax.f32 %v3488_v13, 0.0  ;;  %v3566_v54 = vadd.f32 %v3550_v55, %v3502_v43  ;;  %v3110_v46 = vld [vmem:[#allocation2 + $0xd8] sm:$0xff] }
 0x205   :  { %v3552_v2 = vmax.f32 %v3536_v19, 0.0  ;;  %v3501_v44 = vmax.f32 %v3485_v57, 0.0  ;;  %v2927_v61 = vpop.f32.mrb[136].mxu0  ;;  %v3080_v34 = vpop.f32.mrb[136].mxu1 }
 0x206   :  { %v3563_v62 = vadd.f32 %v3547_v10, %v3499_v56  ;;  %v3549_v63 = vmax.f32 %v3533_v47, 0.0  ;;  %v2970_v40 = vadd.f32 %v2927_v61, %v13709_v45  ;;  %v3123_v32 = vadd.f32 %v3080_v34, %v13712_v51  ;;  %v2929_v37 = vpop.f32.mrb[137].mxu0  ;;  %v3082_v0 = vpop.f32.mrb[137].mxu1  ;;  %3582 = vst [vmem:[#allocation3 + $0x20] sm:$0xff] %v3566_v54  ;;  %v3112_v61 = vld [vmem:[#allocation2 + $0xe8] sm:$0xff] }
 0x207   :  { %v3568_v36 = vadd.f32 %v3552_v2, %v3504_v33  ;;  %v2971_v9 = vadd.f32 %v2955_v27, %v2929_v37  ;;  %v3124_v58 = vadd.f32 %v3108_v35, %v3082_v0  ;;  %v2931_v18 = vpop.f32.mrb[138].mxu0  ;;  %v3084_v59 = vpop.f32.mrb[138].mxu1  ;;  %v2961_v0 = vld [vmem:[#allocation2 + $0x78] sm:$0xff] }
 0x208   :  { %3579 = vst.msk [vmem:[#allocation3 + $0x8] sm:$0xff] %vm229_vm0, %v3563_v62  ;;  %v3565_v52 = vadd.f32 %v3549_v63, %v3501_v44  ;;  %v3460_v4 = vld [vmem:[#allocation2 + $0x28] sm:$0xff]  ;;  %v3490_v45 = vadd.f32 %v13780_v60, %v2970_v40  ;;  %v3538_v51 = vadd.f32 %v13780_v60, %v3123_v32  ;;  %v2972_v24 = vadd.f32 %v2931_v18, %v13715_v28  ;;  %v2933_v3 = vpop.f32.mrb[139].mxu0  ;;  %v3086_v49 = vpop.f32.mrb[139].mxu1 }
 0x209   :  { %v3519_v5 = vld [vmem:[#allocation2 + $0xa8] sm:$0xff]  ;;  %v3125_v26 = vadd.f32 %v3084_v59, %v13718_v16  ;;  %3584 = vst [vmem:[#allocation3 + $0x30] sm:$0xff] %v3568_v36  ;;  %v3487_v53 = vadd.f32 %v13797_v41, %v3460_v4  ;;  %2987 = vst.msk [vmem:[#allocation2 + $0x48] sm:$0xff] %vm229_vm0, %v2971_v9  ;;  %v2973_v20 = vadd.f32 %v2957_v17, %v2933_v3  ;;  %v3114_v59 = vld [vmem:[#allocation2 + $0xf8] sm:$0xff] }
 0x20a   :  { %3581 = vst.msk [vmem:[#allocation3 + $0x18] sm:$0xff] %vm229_vm0, %v3565_v52  ;;  %v3535_v14 = vadd.f32 %v3519_v5, %v13797_v41  ;;  %3140 = vst.msk [vmem:[#allocation2 + $0xc8] sm:$0xff] %vm229_vm0, %v3124_v58  ;;  %v3126_v7 = vadd.f32 %v3110_v46, %v3086_v49  ;;  %v3462_v30 = vld [vmem:[#allocation2 + $0x38] sm:$0xff]  ;;  %v3506_v25 = vmax.f32 %v3490_v45, 0.0  ;;  %v3554_v16 = vmax.f32 %v3538_v51, 0.0  ;;  %v2959_v44 = vld [vmem:[#allocation2 + $0x68] sm:$0xff] }
 0x20b   :  { %v3521_v28 = vld [vmem:[#allocation2 + $0xb8] sm:$0xff]  ;;  %v3492_v21 = vadd.f32 %v13780_v60, %v2972_v24  ;;  %v3540_v23 = vadd.f32 %v13780_v60, %v3125_v26  ;;  %v3503_v6 = vmax.f32 %v3487_v53, 0.0  ;;  %v3489_v31 = vadd.f32 %v13797_v41, %v3462_v30  ;;  %2989 = vst.msk [vmem:[#allocation2 + $0x58] sm:$0xff] %vm229_vm0, %v2973_v20 }
 0x20c   :  { %v3551_v50 = vmax.f32 %v3535_v14, 0.0  ;;  %v3537_v22 = vadd.f32 %v3521_v28, %v13797_v41  ;;  %3142 = vst.msk [vmem:[#allocation2 + $0xd8] sm:$0xff] %vm229_vm0, %v3126_v7  ;;  %v13835_v55 = vpack.c.bf16 %v3568_v36, %v3566_v54  ;;  %v3570_v13 = vadd.f32 %v3554_v16, %v3506_v25 }
 0x20d   :  { %v3508_v15 = vmax.f32 %v3492_v21, 0.0  ;;  %v3556_v43 = vmax.f32 %v3540_v23, 0.0  ;;  %v3505_v56 = vmax.f32 %v3489_v31, 0.0  ;;  %v2937_v57 = vpop.f32.mrb[140].mxu0  ;;  %v3090_v47 = vpop.f32.mrb[140].mxu1  ;;  %v3252_v31 = vld [vmem:[#allocation2 + $0x100] sm:$0xff] }
 0x20e   :  { %v3567_v19 = vadd.f32 %v3551_v50, %v3503_v6  ;;  %v3553_v10 = vmax.f32 %v3537_v22, 0.0  ;;  %v2974_v33 = vadd.f32 %v2937_v57, %v13725_v38  ;;  %v3127_v2 = vadd.f32 %v3090_v47, %v13728_v39  ;;  %v2939_v62 = vpop.f32.mrb[141].mxu0  ;;  %v3092_v63 = vpop.f32.mrb[141].mxu1  ;;  %3586 = vst [vmem:[#allocation3 + $0x40] sm:$0xff] %v3570_v13  ;;  %v3253_v57 = vld [vmem:[#allocation2 + $0x108] sm:$0xff] }
 0x20f   :  { %v3572_v34 = vadd.f32 %v3556_v43, %v3508_v15  ;;  %v2975_v40 = vadd.f32 %v2959_v44, %v2939_v62  ;;  %v3128_v32 = vadd.f32 %v3112_v61, %v3092_v63  ;;  %v2941_v37 = vpop.f32.mrb[142].mxu0  ;;  %v3094_v27 = vpop.f32.mrb[142].mxu1  ;;  %v3784_v7 = vld [vmem:[#allocation3 + $0x8] sm:$0xff]  ;;  %v3406_v15 = vld [vmem:[#allocation2 + $0x180] sm:$0xff]  ;;  %v3254_v61 = vld [vmem:[#allocation2 + $0x110] sm:$0xff] }
 0x210   :  { %3583 = vst.msk [vmem:[#allocation3 + $0x28] sm:$0xff] %vm229_vm0, %v3567_v19  ;;  %v3569_v54 = vadd.f32 %v3553_v10, %v3505_v56  ;;  %v3464_v35 = vld [vmem:[#allocation2 + $0x48] sm:$0xff]  ;;  %v3494_v38 = vadd.f32 %v13780_v60, %v2974_v33  ;;  %v3542_v39 = vadd.f32 %v13780_v60, %v3127_v2  ;;  %v2976_v52 = vadd.f32 %v2941_v37, %v13731_v29  ;;  %v2943_v58 = vpop.f32.mrb[143].mxu0  ;;  %v3096_v18 = vpop.f32.mrb[143].mxu1 }
 0x211   :  { %v3523_v36 = vld [vmem:[#allocation2 + $0xc8] sm:$0xff]  ;;  %v3129_v9 = vadd.f32 %v3094_v27, %v13734_v42  ;;  %3588 = vst [vmem:[#allocation3 + $0x50] sm:$0xff] %v3572_v34  ;;  %v3491_v17 = vadd.f32 %v13797_v41, %v3464_v35  ;;  %2991 = vst.msk [vmem:[#allocation2 + $0x68] sm:$0xff] %vm229_vm0, %v2975_v40  ;;  %v2977_v5 = vadd.f32 %v2961_v0, %v2943_v58  ;;  %v3786_v51 = vld [vmem:[#allocation3 + $0x18] sm:$0xff] }
 0x212   :  { %3585 = vst.msk [vmem:[#allocation3 + $0x38] sm:$0xff] %vm229_vm0, %v3569_v54  ;;  %v3539_v4 = vadd.f32 %v3523_v36, %v13797_v41  ;;  %3144 = vst.msk [vmem:[#allocation2 + $0xe8] sm:$0xff] %vm229_vm0, %v3128_v32  ;;  %v3130_v45 = vadd.f32 %v3114_v59, %v3096_v18  ;;  %v3466_v29 = vld [vmem:[#allocation2 + $0x58] sm:$0xff]  ;;  %v3510_v42 = vmax.f32 %v3494_v38, 0.0  ;;  %v3558_v26 = vmax.f32 %v3542_v39, 0.0  ;;  %v3408_v35 = vld [vmem:[#allocation2 + $0x190] sm:$0xff] }
 0x213   :  { %v3525_v24 = vld [vmem:[#allocation2 + $0xd8] sm:$0xff]  ;;  %v3496_v3 = vadd.f32 %v13780_v60, %v2976_v52  ;;  %v3544_v49 = vadd.f32 %v13780_v60, %v3129_v9  ;;  %v3507_v46 = vmax.f32 %v3491_v17, 0.0  ;;  %v3493_v14 = vadd.f32 %v13797_v41, %v3466_v29  ;;  %2993 = vst.msk [vmem:[#allocation2 + $0x78] sm:$0xff] %vm229_vm0, %v2977_v5  ;;  %v12162_v32 = vld [vmem:[%s16902_s3] ss:$12 sps:$4 sm:$0xff]  }
 0x214   :  { %v3555_v53 = vmax.f32 %v3539_v4, 0.0  ;;  %v3541_v20 = vadd.f32 %v3525_v24, %v13797_v41  ;;  %3146 = vst.msk [vmem:[#allocation2 + $0xf8] sm:$0xff] %vm229_vm0, %v3130_v45  ;;  %v3800_v25 = vpack.c.bf16 %v3786_v51, %v3784_v7  ;;  %v13855_v16 = vpack.c.bf16 %v3572_v34, %v3570_v13  ;;  %v3407_v13 = vld [vmem:[#allocation2 + $0x188] sm:$0xff]  ;;  %v3255_v18 = vld [vmem:[#allocation2 + $0x118] sm:$0xff] }
 0x215   :  { %v3512_v30 = vmax.f32 %v3496_v3, 0.0  ;;  %v3560_v28 = vmax.f32 %v3544_v49, 0.0  ;;  %v3509_v23 = vmax.f32 %v3493_v14, 0.0  ;;  %v3213_v50 = vpop.f32.mrb[144].mxu0  ;;  %v3367_v22 = vpop.f32.mrb[144].mxu1  ;;  %v13857_v43 = vadd.f32 %v3558_v26, %v3510_v42  ;;  %v3409_v49 = vld [vmem:[#allocation2 + $0x198] sm:$0xff] }
 0x216   :  { %v3571_v21 = vadd.f32 %v3555_v53, %v3507_v46  ;;  %v3557_v6 = vmax.f32 %v3541_v20, 0.0  ;;  %10507 = vmatprep.mubr.msk.bf16.mxu0 %vm229_vm0, %v3800_v25  ;;  %10511 = vmatprep.mubr.msk.bf16.mxu1 %vm229_vm0, %v3800_v25  ;;  %v3268_v19 = vadd.f32 %v3252_v31, %v3213_v50  ;;  %v3422_v56 = vadd.f32 %v3406_v15, %v3367_v22  ;;  %v3215_v10 = vpop.f32.mrb[145].mxu0  ;;  %v3369_v47 = vpop.f32.mrb[145].mxu1  ;;  %v12163_v37 = vld [vmem:[%s16902_s3 + $0x8] ss:$12 sps:$4 sm:$0xff]   ;;  %v3256_v22 = vld [vmem:[#allocation2 + $0x120] sm:$0xff] }
 0x217   :  { %v13861_v33 = vadd.f32 %v3560_v28, %v3512_v30  ;;  %4076 = vmatmul.mubr.bf16.vlgmr.msra.gmra.mrb[160].mxu0 %v13815_v8  ;;  %4149 = vmatmul.mubr.bf16.vlgmr.msra.gmra.mrb[160].mxu1 %v13815_v8  ;;  %v3269_v62 = vadd.f32 %v3253_v57, %v3215_v10  ;;  %v3423_v44 = vadd.f32 %v3407_v13, %v3369_v47  ;;  %v3217_v63 = vpop.f32.mrb[146].mxu0  ;;  %v3371_v34 = vpop.f32.mrb[146].mxu1  ;;  %v12164_v58 = vld [vmem:[%s16902_s3 + $0x1c] ss:$12 sps:$4 sm:$0xff]   ;;  %v12165_v7 = vld [vmem:[%s16902_s3 + $0x18] ss:$12 sps:$4 sm:$0xff]  }
 0x218   :  { %3587 = vst.msk [vmem:[#allocation3 + $0x48] sm:$0xff] %vm229_vm0, %v3571_v21  ;;  %v3573_v2 = vadd.f32 %v3557_v6, %v3509_v23  ;;  %3590 = vst [vmem:[#allocation3 + $0x60] sm:$0xff] %v13857_v43  ;;  %v3468_v54 = vld [vmem:[#allocation2 + $0x68] sm:$0xff]  ;;  %4243 = vmatpush1.bf16.msra.mxu0 %v12162_v32  ;;  %4316 = vmatpush1.bf16.msra.mxu1 %v12163_v37  ;;  %v3612_v8 = vadd.f32 %v13780_v60, %v3268_v19  ;;  %v3219_v36 = vpop.f32.mrb[147].mxu0  ;;  %v3373_v38 = vpop.f32.mrb[147].mxu1 }
 0x219   :  { %v3527_v40 = vld [vmem:[#allocation2 + $0xe8] sm:$0xff]  ;;  %3284 = vst [vmem:[#allocation2 + $0x100] sm:$0xff] %v3268_v19  ;;  %3438 = vst [vmem:[#allocation2 + $0x180] sm:$0xff] %v3422_v56  ;;  %v3660_v27 = vadd.f32 %v13780_v60, %v3422_v56  ;;  %v3270_v0 = vadd.f32 %v3254_v61, %v3217_v63  ;;  %v3495_v39 = vadd.f32 %v13797_v41, %v3468_v54  ;;  %4244 = vmatprep.subr.bf16.mxu0 %v12164_v58  ;;  %v3790_v29 = vld [vmem:[#allocation3 + $0x38] sm:$0xff] }
 0x21a   :  { %3592 = vst [vmem:[#allocation3 + $0x70] sm:$0xff] %v13861_v33  ;;  %3589 = vst.msk [vmem:[#allocation3 + $0x58] sm:$0xff] %vm229_vm0, %v3573_v2  ;;  %v3543_v52 = vadd.f32 %v3527_v40, %v13797_v41  ;;  %v3424_v9 = vadd.f32 %v3408_v35, %v3371_v34  ;;  %4317 = vmatprep.subr.bf16.mxu1 %v16910_v1  ;;  %v3470_v59 = vld [vmem:[#allocation2 + $0x78] sm:$0xff]  ;;  %v3628_v4 = vmax.f32 %v3612_v8, 0.0  ;;  %v12166_v30 = vld [vmem:[%s16902_s3 + $0x20] ss:$12 sps:$4 sm:$0xff]  }
 0x21b   :  { %3285 = vst.msk [vmem:[#allocation2 + $0x108] sm:$0xff] %vm229_vm0, %v3269_v62  ;;  %3439 = vst.msk [vmem:[#allocation2 + $0x188] sm:$0xff] %vm229_vm0, %v3423_v44  ;;  %v3529_v17 = vld [vmem:[#allocation2 + $0xf8] sm:$0xff]  ;;  %v3676_v5 = vmax.f32 %v3660_v27, 0.0  ;;  %v3614_v45 = vadd.f32 %v13780_v60, %v3270_v0  ;;  %v3271_v51 = vadd.f32 %v3255_v18, %v3219_v36  ;;  %v3511_v24 = vmax.f32 %v3495_v39, 0.0  ;;  %v3788_v28 = vld [vmem:[#allocation3 + $0x28] sm:$0xff] }
 0x21c   :  { %3286 = vst [vmem:[#allocation2 + $0x110] sm:$0xff] %v3270_v0  ;;  %v3559_v42 = vmax.f32 %v3543_v52, 0.0  ;;  %v3497_v26 = vadd.f32 %v13797_v41, %v3470_v59  ;;  %v3545_v3 = vadd.f32 %v3529_v17, %v13797_v41  ;;  %3440 = vst [vmem:[#allocation2 + $0x190] sm:$0xff] %v3424_v9  ;;  %v3662_v14 = vadd.f32 %v13780_v60, %v3424_v9  ;;  %v12167_v50 = vld [vmem:[%s16902_s3 + $0x34] ss:$12 sps:$4 sm:$0xff]   ;;  %v3257_v13 = vld [vmem:[#allocation2 + $0x128] sm:$0xff] }
 0x21d   :  { %v13888_v46 = vadd.f32 %v3676_v5, %v3628_v4  ;;  %v3630_v53 = vmax.f32 %v3614_v45, 0.0  ;;  %3287 = vst.msk [vmem:[#allocation2 + $0x118] sm:$0xff] %vm229_vm0, %v3271_v51  ;;  %v3425_v20 = vadd.f32 %v3409_v49, %v3373_v38  ;;  %4245 = vmatpush1.bf16.msra.mxu0 %v12165_v7  ;;  %4318 = vmatpush1.bf16.msra.mxu1 %v12166_v30  ;;  %v3223_v31 = vpop.f32.mrb[148].mxu0  ;;  %v3377_v15 = vpop.f32.mrb[148].mxu1  ;;  %v3410_v19 = vld [vmem:[#allocation2 + $0x1a0] sm:$0xff]  ;;  %v3411_v62 = vld [vmem:[#allocation2 + $0x1a8] sm:$0xff] }
 0x21e   :  { %v3575_v25 = vadd.f32 %v3559_v42, %v3511_v24  ;;  %v3513_v21 = vmax.f32 %v3497_v26, 0.0  ;;  %v3561_v23 = vmax.f32 %v3545_v3, 0.0  ;;  %v3802_v6 = vpack.c.bf16 %v3790_v29, %v3788_v28  ;;  %4246 = vmatprep.subr.bf16.mxu0 %v12167_v50  ;;  %4319 = vmatprep.subr.bf16.mxu1 %v16910_v1  ;;  %v3225_v47 = vpop.f32.mrb[149].mxu0  ;;  %v3379_v2 = vpop.f32.mrb[149].mxu1  ;;  %v3258_v27 = vld [vmem:[#allocation2 + $0x130] sm:$0xff]  ;;  %v3259_v58 = vld [vmem:[#allocation2 + $0x138] sm:$0xff] }
 0x21f   :  { %3709 = vst [vmem:[#allocation3 + $0x90] sm:$0xff] %v13888_v46  ;;  %v3678_v56 = vmax.f32 %v3662_v14, 0.0  ;;  %3441 = vst.msk [vmem:[#allocation2 + $0x198] sm:$0xff] %vm229_vm0, %v3425_v20  ;;  %v3272_v10 = vadd.f32 %v3256_v22, %v3223_v31  ;;  %v3426_v57 = vadd.f32 %v3410_v19, %v3377_v15  ;;  %v13906_v44 = vpack.c.bf16 %v13861_v33, %v13857_v43  ;;  %v3227_v54 = vpop.f32.mrb[150].mxu0  ;;  %v3381_v40 = vpop.f32.mrb[150].mxu1  ;;  %v3412_v9 = vld [vmem:[#allocation2 + $0x1b0] sm:$0xff] }
 0x220   :  { %3591 = vst.msk [vmem:[#allocation3 + $0x68] sm:$0xff] %vm229_vm0, %v3575_v25  ;;  %v3577_v63 = vadd.f32 %v3561_v23, %v3513_v21  ;;  %10508 = vmatprep.mubr.msk.bf16.mxu0 %vm229_vm0, %v3802_v6  ;;  %10512 = vmatprep.mubr.msk.bf16.mxu1 %vm229_vm0, %v3802_v6  ;;  %v3273_v61 = vadd.f32 %v3257_v13, %v3225_v47  ;;  %v3229_v0 = vpop.f32.mrb[151].mxu0  ;;  %v3383_v35 = vpop.f32.mrb[151].mxu1  ;;  %v12168_v39 = vld [vmem:[%s16902_s3 + $0x30] ss:$12 sps:$4 sm:$0xff]   ;;  %v3792_v3 = vld [vmem:[#allocation3 + $0x48] sm:$0xff] }
 0x221   :  { %v3427_v34 = vadd.f32 %v3411_v62, %v3379_v2  ;;  %v13911_v8 = vadd.f32 %v3678_v56, %v3630_v53  ;;  %4086 = vmatmul.mubr.bf16.gmra.mrb[164].mxu0 %v13835_v55  ;;  %4157 = vmatmul.mubr.bf16.gmra.mrb[164].mxu1 %v13835_v55  ;;  %3288 = vst [vmem:[#allocation2 + $0x120] sm:$0xff] %v3272_v10  ;;  %3442 = vst [vmem:[#allocation2 + $0x1a0] sm:$0xff] %v3426_v57  ;;  %v12169_v55 = vld [vmem:[%s16902_s3 + $0x38] ss:$12 sps:$4 sm:$0xff]   ;;  %v12171_v28 = vld [vmem:[%s16902_s3 + $0x48] ss:$12 sps:$4 sm:$0xff]  }
 0x222   :  { %v3597_v32 = vld [vmem:[#allocation2 + $0x108] sm:$0xff]  ;;  %v3616_v43 = vadd.f32 %v13780_v60, %v3272_v10  ;;  %v3664_v33 = vadd.f32 %v13780_v60, %v3426_v57  ;;  %3593 = vst.msk [vmem:[#allocation3 + $0x78] sm:$0xff] %vm229_vm0, %v3577_v63  ;;  %4247 = vmatpush1.bf16.msra.mxu0 %v12168_v39  ;;  %4320 = vmatpush1.bf16.msra.mxu1 %v12169_v55  ;;  %3289 = vst.msk [vmem:[#allocation2 + $0x128] sm:$0xff] %vm229_vm0, %v3273_v61  ;;  %v3794_v18 = vld [vmem:[#allocation3 + $0x58] sm:$0xff] }
 0x223   :  { %v3645_v37 = vld [vmem:[#allocation2 + $0x188] sm:$0xff]  ;;  %v3613_v36 = vadd.f32 %v3597_v32, %v13797_v41  ;;  %3443 = vst.msk [vmem:[#allocation2 + $0x1a8] sm:$0xff] %vm229_vm0, %v3427_v34  ;;  %v3274_v52 = vadd.f32 %v3258_v27, %v3227_v54  ;;  %3711 = vst [vmem:[#allocation3 + $0xa0] sm:$0xff] %v13911_v8  ;;  %v3428_v4 = vadd.f32 %v3412_v9, %v3381_v40  ;;  %4321 = vmatprep.subr.bf16.mxu1 %v16910_v1  ;;  %v3413_v51 = vld [vmem:[#allocation2 + $0x1b8] sm:$0xff] }
 0x224   :  { %v3661_v38 = vadd.f32 %v3645_v37, %v13797_v41  ;;  %v3632_v59 = vmax.f32 %v3616_v43, 0.0  ;;  %v3680_v17 = vmax.f32 %v3664_v33, 0.0  ;;  %v12170_v5 = vld [vmem:[%s16902_s3 + $0x4c] ss:$12 sps:$4 sm:$0xff]   ;;  %v3275_v45 = vadd.f32 %v3259_v58, %v3229_v0  ;;  %v12172_v25 = vld [vmem:[%s16902_s3 + $0x50] ss:$12 sps:$4 sm:$0xff]  }
 0x225   :  { %4248 = vmatprep.subr.bf16.mxu0 %v12170_v5  ;;  %v3629_v29 = vmax.f32 %v3613_v36, 0.0  ;;  %v3599_v42 = vld [vmem:[#allocation2 + $0x118] sm:$0xff]  ;;  %3290 = vst [vmem:[#allocation2 + $0x130] sm:$0xff] %v3274_v52  ;;  %v3429_v26 = vadd.f32 %v3413_v51, %v3383_v35  ;;  %3444 = vst [vmem:[#allocation2 + $0x1b0] sm:$0xff] %v3428_v4  ;;  %v3804_v53 = vpack.c.bf16 %v3794_v18, %v3792_v3  ;;  %v3233_v21 = vpop.f32.mrb[152].mxu0  ;;  %v3387_v23 = vpop.f32.mrb[152].mxu1 }
 0x226   :  { %v3677_v24 = vmax.f32 %v3661_v38, 0.0  ;;  %v3615_v49 = vadd.f32 %v3599_v42, %v13797_v41  ;;  %3291 = vst.msk [vmem:[#allocation2 + $0x138] sm:$0xff] %vm229_vm0, %v3275_v45  ;;  %v13937_v14 = vpack.c.bf16 %v13911_v8, %v13888_v46  ;;  %v3647_v7 = vld [vmem:[#allocation2 + $0x198] sm:$0xff]  ;;  %v13940_v30 = vadd.f32 %v13780_v60, %v3274_v52  ;;  %4249 = vmatpush1.bf16.msra.mxu0 %v12171_v28  ;;  %v3260_v46 = vld [vmem:[#allocation2 + $0x140] sm:$0xff]  ;;  %v3235_v56 = vpop.f32.mrb[153].mxu0  ;;  %v3261_v10 = vld [vmem:[#allocation2 + $0x148] sm:$0xff] }
 0x227   :  { %3445 = vst.msk [vmem:[#allocation2 + $0x1b8] sm:$0xff] %vm229_vm0, %v3429_v26  ;;  %4322 = vmatpush1.bf16.msra.mxu1 %v12172_v25  ;;  %v13949_v6 = vadd.f32 %v3680_v17, %v3632_v59  ;;  %v3663_v31 = vadd.f32 %v3647_v7, %v13797_v41  ;;  %v13953_v22 = vadd.f32 %v13780_v60, %v3428_v4  ;;  %v3414_v19 = vld [vmem:[#allocation2 + $0x1c0] sm:$0xff]  ;;  %v3389_v57 = vpop.f32.mrb[153].mxu1  ;;  %v3415_v47 = vld [vmem:[#allocation2 + $0x1c8] sm:$0xff]  ;;  %v3237_v61 = vpop.f32.mrb[154].mxu0  ;;  %v3262_v34 = vld [vmem:[#allocation2 + $0x150] sm:$0xff] }
 0x228   :  { %v3693_v20 = vadd.f32 %v3677_v24, %v3629_v29  ;;  %v3631_v50 = vmax.f32 %v3615_v49, 0.0  ;;  %10509 = vmatprep.mubr.msk.bf16.mxu0 %vm229_vm0, %v3804_v53  ;;  %10513 = vmatprep.mubr.msk.bf16.mxu1 %vm229_vm0, %v3804_v53  ;;  %v3276_v15 = vadd.f32 %v3260_v46, %v3233_v21  ;;  %v12173_v13 = vld [vmem:[%s16902_s3 + $0x64] ss:$12 sps:$4 sm:$0xff]   ;;  %v3430_v2 = vadd.f32 %v3414_v19, %v3387_v23  ;;  %v3391_v54 = vpop.f32.mrb[154].mxu1  ;;  %v3239_v35 = vpop.f32.mrb[155].mxu0  ;;  %v3263_v4 = vld [vmem:[#allocation2 + $0x158] sm:$0xff] }
 0x229   :  { %4250 = vmatprep.subr.bf16.mxu0 %v12173_v13  ;;  %4323 = vmatprep.subr.bf16.mxu1 %v16910_v1  ;;  %v3277_v62 = vadd.f32 %v3261_v10, %v3235_v56  ;;  %v3431_v63 = vadd.f32 %v3415_v47, %v3389_v57  ;;  %v3416_v40 = vld [vmem:[#allocation2 + $0x1d0] sm:$0xff]  ;;  %3713 = vst [vmem:[#allocation3 + $0xb0] sm:$0xff] %v13949_v6  ;;  %v3679_v32 = vmax.f32 %v3663_v31, 0.0  ;;  %v3601_v37 = vld [vmem:[#allocation2 + $0x128] sm:$0xff]  ;;  %v3393_v36 = vpop.f32.mrb[155].mxu1  ;;  %v3634_v58 = vmax.f32 %v13940_v30, 0.0 }
 0x22a   :  { %3710 = vst.msk [vmem:[#allocation3 + $0x98] sm:$0xff] %vm229_vm0, %v3693_v20  ;;  %v3649_v43 = vld [vmem:[#allocation2 + $0x1a8] sm:$0xff]  ;;  %4096 = vmatmul.mubr.bf16.gmra.mrb[168].mxu0 %v13855_v16  ;;  %4165 = vmatmul.mubr.bf16.gmra.mrb[168].mxu1 %v13855_v16  ;;  %3292 = vst [vmem:[#allocation2 + $0x140] sm:$0xff] %v3276_v15  ;;  %v13966_v33 = vadd.f32 %v13780_v60, %v3276_v15  ;;  %v3278_v27 = vadd.f32 %v3262_v34, %v3237_v61  ;;  %v3682_v18 = vmax.f32 %v13953_v22, 0.0  ;;  %v3798_v5 = vld [vmem:[#allocation3 + $0x78] sm:$0xff] }
 0x22b   :  { %v3432_v0 = vadd.f32 %v3416_v40, %v3391_v54  ;;  %v3617_v38 = vadd.f32 %v3601_v37, %v13797_v41  ;;  %v3665_v39 = vadd.f32 %v3649_v43, %v13797_v41  ;;  %v12174_v55 = vld [vmem:[%s16902_s3 + $0x60] ss:$12 sps:$4 sm:$0xff]   ;;  %v12175_v16 = vld [vmem:[%s16902_s3 + $0x68] ss:$12 sps:$4 sm:$0xff]   ;;  %3446 = vst [vmem:[#allocation2 + $0x1c0] sm:$0xff] %v3430_v2  ;;  %v3668_v52 = vadd.f32 %v13780_v60, %v3430_v2  ;;  %v3417_v26 = vld [vmem:[#allocation2 + $0x1d8] sm:$0xff] }
 0x22c   :  { %4251 = vmatpush1.bf16.msra.mxu0 %v12174_v55  ;;  %4324 = vmatpush1.bf16.msra.mxu1 %v12175_v16  ;;  %3293 = vst.msk [vmem:[#allocation2 + $0x148] sm:$0xff] %vm229_vm0, %v3277_v62  ;;  %3447 = vst.msk [vmem:[#allocation2 + $0x1c8] sm:$0xff] %vm229_vm0, %v3431_v63  ;;  %v3695_v9 = vadd.f32 %v3679_v32, %v3631_v50  ;;  %v3636_v59 = vmax.f32 %v13966_v33, 0.0  ;;  %v12176_v17 = vld [vmem:[%s16902_s3 + $0x7c] ss:$12 sps:$4 sm:$0xff]   ;;  %v3279_v42 = vadd.f32 %v3263_v4, %v3239_v35  ;;  %v3264_v31 = vld [vmem:[#allocation2 + $0x160] sm:$0xff] }
 0x22d   :  { %3294 = vst [vmem:[#allocation2 + $0x150] sm:$0xff] %v3278_v27  ;;  %3448 = vst [vmem:[#allocation2 + $0x1d0] sm:$0xff] %v3432_v0  ;;  %4252 = vmatprep.subr.bf16.mxu0 %v12176_v17  ;;  %4325 = vmatprep.subr.bf16.mxu1 %v16910_v1  ;;  %v3633_v45 = vmax.f32 %v3617_v38, 0.0  ;;  %v3681_v51 = vmax.f32 %v3665_v39, 0.0  ;;  %v3603_v29 = vld [vmem:[#allocation2 + $0x138] sm:$0xff]  ;;  %v3684_v24 = vmax.f32 %v3668_v52, 0.0  ;;  %v13989_v53 = vadd.f32 %v13780_v60, %v3278_v27 }
 0x22e   :  { %3712 = vst.msk [vmem:[#allocation3 + $0xa8] sm:$0xff] %vm229_vm0, %v3695_v9  ;;  %v3619_v3 = vadd.f32 %v3603_v29, %v13797_v41  ;;  %v3651_v49 = vld [vmem:[#allocation2 + $0x1b8] sm:$0xff]  ;;  %v13992_v20 = vadd.f32 %v13780_v60, %v3432_v0  ;;  %v3433_v7 = vadd.f32 %v3417_v26, %v3393_v36  ;;  %v3796_v30 = vld [vmem:[#allocation3 + $0x68] sm:$0xff]  ;;  %3295 = vst.msk [vmem:[#allocation2 + $0x158] sm:$0xff] %vm229_vm0, %v3279_v42  ;;  %v3243_v50 = vpop.f32.mrb[156].mxu0  ;;  %v3397_v22 = vpop.f32.mrb[156].mxu1 }
 0x22f   :  { %v3697_v28 = vadd.f32 %v3681_v51, %v3633_v45  ;;  %v3667_v25 = vadd.f32 %v3651_v49, %v13797_v41  ;;  %v12177_v21 = vld [vmem:[%s16902_s3 + $0x78] ss:$12 sps:$4 sm:$0xff]   ;;  %v12178_v46 = vld [vmem:[%s16902_s3 + $0x80] ss:$12 sps:$4 sm:$0xff]   ;;  %v14002_v23 = vpack.c.bf16 %v3798_v5, %v3796_v30  ;;  %v3280_v10 = vadd.f32 %v3264_v31, %v3243_v50  ;;  %v3245_v47 = vpop.f32.mrb[157].mxu0  ;;  %v3399_v2 = vpop.f32.mrb[157].mxu1 }
 0x230   :  { %4253 = vmatpush1.bf16.msra.mxu0 %v12177_v21  ;;  %4326 = vmatpush1.bf16.msra.mxu1 %v12178_v46  ;;  %v3418_v15 = vld [vmem:[#allocation2 + $0x1e0] sm:$0xff]  ;;  %v3635_v19 = vmax.f32 %v3619_v3, 0.0  ;;  %3449 = vst.msk [vmem:[#allocation2 + $0x1d8] sm:$0xff] %vm229_vm0, %v3433_v7  ;;  %v3265_v13 = vld [vmem:[#allocation2 + $0x168] sm:$0xff]  ;;  %v3698_v63 = vadd.f32 %v3682_v18, %v3634_v58  ;;  %v3247_v40 = vpop.f32.mrb[158].mxu0  ;;  %v3266_v32 = vld [vmem:[#allocation2 + $0x170] sm:$0xff]  ;;  %v14014_v43 = vadd.f32 %v3684_v24, %v3636_v59 }
 0x231   :  { %v12179_v56 = vld [vmem:[%s16902_s3 + $0x94] ss:$12 sps:$4 sm:$0xff]   ;;  %4327 = vmatprep.subr.bf16.mxu1 %v16910_v1  ;;  %v3434_v57 = vadd.f32 %v3418_v15, %v3397_v22  ;;  %v3419_v62 = vld [vmem:[#allocation2 + $0x1e8] sm:$0xff]  ;;  %3714 = vst.msk [vmem:[#allocation3 + $0xb8] sm:$0xff] %vm229_vm0, %v3697_v28  ;;  %v3683_v61 = vmax.f32 %v3667_v25, 0.0  ;;  %10510 = vmatprep.mubr.msk.bf16.mxu0 %vm229_vm0, %v14002_v23  ;;  %v3281_v34 = vadd.f32 %v3265_v13, %v3245_v47  ;;  %v3401_v37 = vpop.f32.mrb[158].mxu1 }
 0x232   :  { %4254 = vmatprep.subr.bf16.mxu0 %v12179_v56  ;;  %10514 = vmatprep.mubr.msk.bf16.mxu1 %vm229_vm0, %v14002_v23  ;;  %v3435_v54 = vadd.f32 %v3419_v62, %v3399_v2  ;;  %v3638_v0 = vmax.f32 %v13989_v53, 0.0  ;;  %3296 = vst [vmem:[#allocation2 + $0x160] sm:$0xff] %v3280_v10  ;;  %v3624_v35 = vadd.f32 %v13780_v60, %v3280_v10  ;;  %v3249_v39 = vpop.f32.mrb[159].mxu0  ;;  %v3403_v55 = vpop.f32.mrb[159].mxu1  ;;  %3715 = vst [vmem:[#allocation3 + $0xc0] sm:$0xff] %v3698_v63  ;;  %v3420_v17 = vld [vmem:[#allocation2 + $0x1f0] sm:$0xff] }
 0x233   :  { %v3605_v33 = vld [vmem:[#allocation2 + $0x148] sm:$0xff]  ;;  %4106 = vmatmul.mubr.bf16.gmra.mrb[172].mxu0 %v13906_v44  ;;  %4173 = vmatmul.mubr.bf16.gmra.mrb[172].mxu1 %v13906_v44  ;;  %3450 = vst [vmem:[#allocation2 + $0x1e0] sm:$0xff] %v3434_v57  ;;  %v3672_v36 = vadd.f32 %v13780_v60, %v3434_v57  ;;  %v3282_v38 = vadd.f32 %v3266_v32, %v3247_v40  ;;  %v3686_v58 = vmax.f32 %v13992_v20, 0.0  ;;  %v12180_v18 = vld [vmem:[%s16902_s3 + $0x90] ss:$12 sps:$4 sm:$0xff]   ;;  %3297 = vst.msk [vmem:[#allocation2 + $0x168] sm:$0xff] %vm229_vm0, %v3281_v34 }
 0x234   :  { %v3653_v27 = vld [vmem:[#allocation2 + $0x1c8] sm:$0xff]  ;;  %v3699_v16 = vadd.f32 %v3683_v61, %v3635_v19  ;;  %v3621_v52 = vadd.f32 %v3605_v33, %v13797_v41  ;;  %4255 = vmatpush1.bf16.msra.mxu0 %v12180_v18  ;;  %v12181_v59 = vld [vmem:[%s16902_s3 + $0x98] ss:$12 sps:$4 sm:$0xff]   ;;  %3451 = vst.msk [vmem:[#allocation2 + $0x1e8] sm:$0xff] %vm229_vm0, %v3435_v54  ;;  %3717 = vst [vmem:[#allocation3 + $0xd0] sm:$0xff] %v14014_v43  ;;  %v3640_v4 = vmax.f32 %v3624_v35, 0.0 }
 0x235   :  { %v3669_v9 = vadd.f32 %v3653_v27, %v13797_v41  ;;  %4328 = vmatpush1.bf16.msra.mxu1 %v12181_v59  ;;  %v3688_v5 = vmax.f32 %v3672_v36, 0.0  ;;  %3298 = vst [vmem:[#allocation2 + $0x170] sm:$0xff] %v3282_v38  ;;  %v3626_v45 = vadd.f32 %v13780_v60, %v3282_v38  ;;  %v3436_v51 = vadd.f32 %v3420_v17, %v3401_v37  ;;  %v12182_v29 = vld [vmem:[%s16902_s3 + $0xac] ss:$12 sps:$4 sm:$0xff]   ;;  %v12183_v15 = vld [vmem:[%s16902_s3 + $0xa8] ss:$12 sps:$4 sm:$0xff]  }
 0x236   :  { %4256 = vmatprep.subr.bf16.mxu0 %v12182_v29  ;;  %4329 = vmatprep.subr.bf16.mxu1 %v16910_v1  ;;  %v3267_v24 = vld [vmem:[#allocation2 + $0x178] sm:$0xff]  ;;  %3716 = vst.msk [vmem:[#allocation3 + $0xc8] sm:$0xff] %vm229_vm0, %v3699_v16  ;;  %v3637_v26 = vmax.f32 %v3621_v52, 0.0  ;;  %v4209_v7 = vld [vmem:[#allocation3 + $0xa8] sm:$0xff]  ;;  %v14043_v46 = vpack.c.bf16 %v3698_v63, %v13949_v6  ;;  %v3702_v6 = vadd.f32 %v3686_v58, %v3638_v0  ;;  %v12185_v10 = vld [vmem:[%s16902_s3 + $0xc4] ss:$12 sps:$4 sm:$0xff]  }
 0x237   :  { %v3421_v42 = vld [vmem:[#allocation2 + $0x1f8] sm:$0xff]  ;;  %v3685_v3 = vmax.f32 %v3669_v9, 0.0  ;;  %v3283_v49 = vadd.f32 %v3267_v24, %v3249_v39  ;;  %v3642_v28 = vmax.f32 %v3626_v45, 0.0  ;;  %3452 = vst [vmem:[#allocation2 + $0x1f0] sm:$0xff] %v3436_v51  ;;  %v3674_v25 = vadd.f32 %v13780_v60, %v3436_v51  ;;  %v12186_v40 = vld [vmem:[%s16902_s3 + $0xc0] ss:$12 sps:$4 sm:$0xff]  }
 0x238   :  { %v3437_v53 = vadd.f32 %v3421_v42, %v3403_v55  ;;  %v4207_v20 = vld [vmem:[#allocation3 + $0x98] sm:$0xff]  ;;  %4257 = vmatpush1.bf16.msra.mxu0 %v12183_v15  ;;  %v3704_v57 = vadd.f32 %v3688_v5, %v3640_v4  ;;  %3719 = vst [vmem:[#allocation3 + $0xe0] sm:$0xff] %v3702_v6  ;;  %v14065_v13 = vpack.c.bf16 %v3702_v6, %v14014_v43  ;;  %v12187_v32 = vld [vmem:[%s16902_s3 + $0xc8] ss:$12 sps:$4 sm:$0xff]   ;;  %v12190_v52 = vld [vmem:[%s16902_s3 + $0xe0] ss:$12 sps:$4 sm:$0xff]  }
 0x239   :  { %v3607_v30 = vld [vmem:[#allocation2 + $0x158] sm:$0xff]  ;;  %v14040_v21 = vpack.c.bf16 %v4209_v7, %v4207_v20  ;;  %v3701_v50 = vadd.f32 %v3685_v3, %v3637_v26  ;;  %3299 = vst.msk [vmem:[#allocation2 + $0x178] sm:$0xff] %vm229_vm0, %v3283_v49  ;;  %v3690_v56 = vmax.f32 %v3674_v25, 0.0  ;;  %4258 = vmatprep.subr.bf16.mxu0 %v12185_v10  ;;  %v12191_v9 = vld [vmem:[%s16902_s3 + $0xf4] ss:$12 sps:$4 sm:$0xff]  }
 0x23a   :  { %v3623_v31 = vadd.f32 %v3607_v30, %v13797_v41  ;;  %v3655_v22 = vld [vmem:[#allocation2 + $0x1d8] sm:$0xff]  ;;  %3453 = vst.msk [vmem:[#allocation2 + $0x1f8] sm:$0xff] %vm229_vm0, %v3437_v53  ;;  %v3609_v62 = vld [vmem:[#allocation2 + $0x168] sm:$0xff]  ;;  %3721 = vst [vmem:[#allocation3 + $0xf0] sm:$0xff] %v3704_v57 }
 0x23b   :  { %v12184_v60 = vld [vmem:[%s16902_s3 + $0xb0] ss:$12 sps:$4 sm:$0xff]   ;;  %v3671_v19 = vadd.f32 %v3655_v22, %v13797_v41  ;;  %10515 = vmatprep.mubr.msk.bf16.mxu0 %vm229_vm0, %v14040_v21  ;;  %3718 = vst.msk [vmem:[#allocation3 + $0xd8] sm:$0xff] %vm229_vm0, %v3701_v50  ;;  %10519 = vmatprep.mubr.msk.bf16.mxu1 %vm229_vm0, %v14040_v21  ;;  %v3657_v63 = vld [vmem:[#allocation2 + $0x1e8] sm:$0xff]  ;;  %v3706_v61 = vadd.f32 %v3690_v56, %v3642_v28  ;;  %v12189_v16 = vld [vmem:[%s16902_s3 + $0xd8] ss:$12 sps:$4 sm:$0xff]  }
 0x23c   :  { %4330 = vmatpush1.bf16.msra.mxu1 %v12184_v60  ;;  %v3639_v47 = vmax.f32 %v3623_v31, 0.0  ;;  %v3625_v34 = vadd.f32 %v3609_v62, %v13797_v41  ;;  %v3673_v54 = vadd.f32 %v3657_v63, %v13797_v41  ;;  %4259 = vmatpush1.bf16.msra.mxu0 %v12186_v40  ;;  %v12188_v43 = vld [vmem:[%s16902_s3 + $0xdc] ss:$12 sps:$4 sm:$0xff]   ;;  %v12193_v17 = vld [vmem:[%s16902_s3 + $0xf8] ss:$12 sps:$4 sm:$0xff]  }
 0x23d   :  { %4331 = vmatprep.subr.bf16.mxu1 %v16910_v1  ;;  %v3687_v2 = vmax.f32 %v3671_v19, 0.0  ;;  %4260 = vmatprep.subr.bf16.mxu0 %v12188_v43  ;;  %3723 = vst [vmem:[#allocation3 + $0x100] sm:$0xff] %v3706_v61  ;;  %v14079_v33 = vpack.c.bf16 %v3706_v61, %v3704_v57  ;;  %v12192_v59 = vld [vmem:[%s16902_s3 + $0xf0] ss:$12 sps:$4 sm:$0xff]   ;;  %v12194_v4 = vld [vmem:[%s16902_s3 + $0x10c] ss:$12 sps:$4 sm:$0xff]  }
 0x23e   :  { %v3641_v27 = vmax.f32 %v3625_v34, 0.0  ;;  %v3689_v0 = vmax.f32 %v3673_v54, 0.0  ;;  %v12195_v5 = vld [vmem:[%s16902_s3 + $0x108] ss:$12 sps:$4 sm:$0xff]   ;;  %v12196_v45 = vld [vmem:[%s16902_s3 + $0x110] ss:$12 sps:$4 sm:$0xff]  }
 0x23f   :  { %v3703_v37 = vadd.f32 %v3687_v2, %v3639_v47  ;;  %v12197_v51 = vld [vmem:[%s16902_s3 + $0x124] ss:$12 sps:$4 sm:$0xff]   ;;  %v12198_v29 = vld [vmem:[%s16902_s3 + $0x120] ss:$12 sps:$4 sm:$0xff]   ;;  %v12199_v24 = vld [vmem:[%s16902_s3 + $0x128] ss:$12 sps:$4 sm:$0xff]  }
 0x240   :  { %4332 = vmatpush1.bf16.msra.mxu1 %v12187_v32  ;;  %v3611_v35 = vld [vmem:[#allocation2 + $0x178] sm:$0xff]  ;;  %v3705_v38 = vadd.f32 %v3689_v0, %v3641_v27  ;;  %4261 = vmatpush1.bf16.msra.mxu0 %v12189_v16  ;;  %v14129_v26 = vld [vmem:[%s16902_s3 + $0x154] ss:$12 sps:$4 sm:$0xff]   ;;  %v4213_v3 = vld [vmem:[#allocation3 + $0xc8] sm:$0xff] }
 0x241   :  { %4333 = vmatprep.subr.bf16.mxu1 %v16910_v1  ;;  %3720 = vst.msk [vmem:[#allocation3 + $0xe8] sm:$0xff] %vm229_vm0, %v3703_v37  ;;  %v3659_v36 = vld [vmem:[#allocation2 + $0x1f8] sm:$0xff]  ;;  %v3627_v39 = vadd.f32 %v3611_v35, %v13797_v41  ;;  %4262 = vmatprep.subr.bf16.mxu0 %v12191_v9  ;;  %v12202_v53 = vld [vmem:[%s16902_s3 + $0x140] ss:$12 sps:$4 sm:$0xff]   ;;  %v14167_v50 = vld [vmem:[%s16902_s3 + $0x168] ss:$12 sps:$4 sm:$0xff]  }
 0x242   :  { %v3675_v55 = vadd.f32 %v3659_v36, %v13797_v41  ;;  %3722 = vst.msk [vmem:[#allocation3 + $0xf8] sm:$0xff] %vm229_vm0, %v3705_v38  ;;  %v12200_v42 = vld [vmem:[%s16902_s3 + $0x13c] ss:$12 sps:$4 sm:$0xff]   ;;  %v12201_v49 = vld [vmem:[%s16902_s3 + $0x138] ss:$12 sps:$4 sm:$0xff]   ;;  %v6813_v61 = vld [vmem:[#allocation3 + $0x70] sm:$0xff] }
 0x243   :  { %v3643_v41 = vmax.f32 %v3627_v39, 0.0  ;;  %v14140_v20 = vld [vmem:[%s16902_s3 + $0x150] ss:$12 sps:$4 sm:$0xff]   ;;  %v14147_v30 = vld [vmem:[%s16902_s3 + $0x158] ss:$12 sps:$4 sm:$0xff]   ;;  %v6812_v63 = vld [vmem:[#allocation3 + $0x68] sm:$0xff] }
 0x244   :  { %4334 = vmatpush1.bf16.msra.mxu1 %v12190_v52  ;;  %v3691_v58 = vmax.f32 %v3675_v55, 0.0  ;;  %4263 = vmatpush1.bf16.msra.mxu0 %v12192_v59  ;;  %v4211_v7 = vld [vmem:[#allocation3 + $0xb8] sm:$0xff]  ;;  %v14186_v15 = vld [vmem:[%s16902_s3 + $0x180] ss:$12 sps:$4 sm:$0xff]   ;;  %v14191_v6 = vld [vmem:[%s16902_s3 + $0x188] ss:$12 sps:$4 sm:$0xff]  }
 0x245   :  { %4335 = vmatprep.subr.bf16.mxu1 %v16910_v1  ;;  %4264 = vmatprep.subr.bf16.mxu0 %v12194_v4  ;;  %v14149_v28 = vpack.c.bf16 %v4213_v3, %v4211_v7  ;;  %v14154_v25 = vld [vmem:[%s16902_s3 + $0x16c] ss:$12 sps:$4 sm:$0xff]   ;;  %v14172_v31 = vld [vmem:[%s16902_s3 + $0x170] ss:$12 sps:$4 sm:$0xff]   ;;  %v14225_v2 = vld [vmem:[%s16902_s3 + $0x1b4] ss:$12 sps:$4 sm:$0xff]  }
 0x246   :  { %v3707_v18 = vadd.f32 %v3691_v58, %v3643_v41  ;;  %v4215_v60 = vld [vmem:[#allocation3 + $0xd8] sm:$0xff]  ;;  %v14218_v57 = vld [vmem:[%s16902_s3 + $0x1a0] ss:$12 sps:$4 sm:$0xff]   ;;  %v7156_v43 = vld [vmem:[#allocation3 + $0x88] sm:$0x3] }
 0x247   :  { %v14200_v56 = vld [vmem:[%s16902_s3 + $0x19c] ss:$12 sps:$4 sm:$0xff]   ;;  %v14213_v10 = vld [vmem:[%s16902_s3 + $0x198] ss:$12 sps:$4 sm:$0xff]   ;;  %v7155_v36 = vld [vmem:[#allocation3 + $0x80] sm:$0x3]  ;;  %v7166_v39 = vpack.c.bf16 %v7156_v43, %v7156_v43 }
 0x248   :  { %4336 = vmatpush1.bf16.msra.mxu1 %v12193_v17  ;;  %3724 = vst.msk [vmem:[#allocation3 + $0x108] sm:$0xff] %vm229_vm0, %v3707_v18  ;;  %4265 = vmatpush1.bf16.msra.mxu0 %v12195_v5  ;;  %v4217_v22 = vld [vmem:[#allocation3 + $0xe8] sm:$0xff]  ;;  %v6814_v47 = vld [vmem:[#allocation3 + $0x78] sm:$0xff]  ;;  %v6811_v37 = vld [vmem:[#allocation3 + $0x60] sm:$0xff]  ;;  %v7165_v52 = vpack.c.bf16 %v7155_v36, %v7155_v36 }
 0x249   :  { %4337 = vmatprep.subr.bf16.mxu1 %v16910_v1  ;;  %4266 = vmatprep.subr.bf16.mxu0 %v12197_v51  ;;  %v14195_v19 = vpack.c.bf16 %v4217_v22, %v4215_v60  ;;  %v14230_v34 = vld [vmem:[%s16902_s3 + $0x1b0] ss:$12 sps:$4 sm:$0xff]   ;;  %v14235_v54 = vld [vmem:[%s16902_s3 + $0x1b8] ss:$12 sps:$4 sm:$0xff]   ;;  %v6824_v40 = vpack.c.bf16 %v6814_v47, %v6812_v63  ;;  %v6823_v35 = vpack.c.bf16 %v6813_v61, %v6811_v37  ;;  %v14261_v55 = vld [vmem:[%s16902_s3 + $0x1c8] ss:$12 sps:$4 sm:$0xff]  }
 0x24a   :  { %v4219_v32 = vld [vmem:[#allocation3 + $0xf8] sm:$0xff]  ;;  %v14273_v9 = vld [vmem:[%s16902_s3 + $0x1e4] ss:$12 sps:$4 sm:$0xff]   ;;  %v7193_v58 = vrot.slane %v7166_v39, 1  ;;  %v7191_v59 = vrot.slane %v7165_v52, 1 }
 0x24b   :  { %v14246_v0 = vld [vmem:[%s16902_s3 + $0x1cc] ss:$12 sps:$4 sm:$0xff]   ;;  %v14254_v38 = vrot.slane %v6824_v40, 1  ;;  %v14266_v16 = vld [vmem:[%s16902_s3 + $0x1d0] ss:$12 sps:$4 sm:$0xff]   ;;  %v14275_v41 = vrot.slane %v6823_v35, 1 }
 0x24c   :  { %4338 = vmatpush1.bf16.msra.mxu1 %v12196_v45  ;;  %4267 = vmatpush1.bf16.msra.mxu0 %v12198_v29  ;;  %v14286_v17 = vld [vmem:[%s16902_s3 + $0x1e0] ss:$12 sps:$4 sm:$0xff]   ;;  %v14291_v4 = vld [vmem:[%s16902_s3 + $0x1e8] ss:$12 sps:$4 sm:$0xff]   ;;  %v14315_v51 = vld [vmem:[%s16902_s3 + $0x1f8] ss:$12 sps:$4 sm:$0xff]  }
 0x24d   :  { %4339 = vmatprep.subr.bf16.mxu1 %v16910_v1  ;;  %4268 = vmatprep.subr.bf16.mxu0 %v12200_v42  ;;  %16924 = vst [vmem:[#allocation8_spill] sm:$0xff] %v14254_v38  ;;  %16925 = vst [vmem:[#allocation9_spill] sm:$0xff] %v14275_v41  ;;  %v14279_v18 = vsel %vm6837_vm1, %v14254_v38, %v7193_v58  ;;  %v14298_v5 = vld [vmem:[%s16902_s3 + $0x1fc] ss:$12 sps:$4 sm:$0xff]   ;;  %v14302_v45 = vsel %vm6837_vm1, %v14275_v41, %v7191_v59  ;;  %v14320_v29 = vld [vmem:[%s16902_s3 + $0x200] ss:$12 sps:$4 sm:$0xff]  }
 0x24e   :  { %16926 = vst [vmem:[#allocation10_spill] sm:$0xff] %v14279_v18  ;;  %16927 = vst [vmem:[#allocation11_spill] sm:$0xff] %v14302_v45  ;;  %v14339_v42 = vld [vmem:[%s16902_s3 + $0x218] ss:$12 sps:$4 sm:$0xff]   ;;  %v14372_v22 = vld [vmem:[%s16902_s3 + $0x240] ss:$12 sps:$4 sm:$0xff]  }
 0x24f   :  { %v4221_v62 = vld [vmem:[#allocation3 + $0x108] sm:$0xff]  ;;  %v14365_v7 = vld [vmem:[%s16902_s3 + $0x244] ss:$12 sps:$4 sm:$0xff]   ;;  %v14403_v61 = vld [vmem:[%s16902_s3 + $0x274] ss:$12 sps:$4 sm:$0xff]  }
 0x250   :  { %4340 = vmatpush1.bf16.msra.mxu1 %v12199_v24  ;;  %4269 = vmatpush1.bf16.msra.mxu0 %v12201_v49  ;;  %v14241_v27 = vpack.c.bf16 %v4221_v62, %v4219_v32  ;;  %v14334_v24 = vld [vmem:[%s16902_s3 + $0x210] ss:$12 sps:$4 sm:$0xff]   ;;  %v14346_v3 = vld [vmem:[%s16902_s3 + $0x22c] ss:$12 sps:$4 sm:$0xff]   ;;  %v14353_v49 = vld [vmem:[%s16902_s3 + $0x228] ss:$12 sps:$4 sm:$0xff]  }
 0x251   :  { %4341 = vmatprep.subr.bf16.mxu1 %v16910_v1  ;;  %4722 = vmatprep.subr.bf16.mxu0 %v14129_v26  ;;  %v14377_v60 = vld [vmem:[%s16902_s3 + $0x248] ss:$12 sps:$4 sm:$0xff]   ;;  %v14391_v62 = vld [vmem:[%s16902_s3 + $0x258] ss:$12 sps:$4 sm:$0xff]   ;;  %v14396_v63 = vld [vmem:[%s16902_s3 + $0x260] ss:$12 sps:$4 sm:$0xff]  }
 0x252   :  { %v14384_v47 = vld [vmem:[%s16902_s3 + $0x25c] ss:$12 sps:$4 sm:$0xff]   ;;  %v14415_v32 = vld [vmem:[%s16902_s3 + $0x278] ss:$12 sps:$4 sm:$0xff]   ;;  %v4462_v36 = vld [vmem:[#allocation3 + $0x90] sm:$0xff] }
 0x253   :  { %4275 = vmatmul.mubr.bf16.vlgmr.msra.gmra.mrb[176].mxu0 %v13937_v14  ;;  %v14410_v40 = vld [vmem:[%s16902_s3 + $0x270] ss:$12 sps:$4 sm:$0xff]   ;;  %v14422_v37 = vld [vmem:[%s16902_s3 + $0x28c] ss:$12 sps:$4 sm:$0xff]   ;;  %v14429_v43 = vld [vmem:[%s16902_s3 + $0x288] ss:$12 sps:$4 sm:$0xff]   ;;  %v4478_v39 = vpack.c.bf16 %v13911_v8, %v4462_v36 }
 0x254   :  { %4342 = vmatpush1.bf16.msra.mxu1 %v12202_v53  ;;  %10516 = vmatprep.mubr.msk.bf16.mxu0 %vm229_vm0, %v14149_v28  ;;  %v14358_v53 = vld [vmem:[%s16902_s3 + $0x230] ss:$12 sps:$4 sm:$0xff]   ;;  %v4940_v59 = vld [vmem:[#allocation3 + $0x40] sm:$0xff]  ;;  %v5329_v38 = vld [vmem:[#allocation3 + $0x68] sm:$0xff] }
 0x255   :  { %4795 = vmatprep.subr.bf16.mxu1 %v16910_v1  ;;  %4723 = vmatpush1.bf16.msra.mxu0 %v14140_v20  ;;  %v14434_v35 = vld [vmem:[%s16902_s3 + $0x290] ss:$12 sps:$4 sm:$0xff]  }
 0x256   :  { %4724 = vmatprep.subr.bf16.mxu0 %v14154_v25  ;;  %v14455_v8 = vld [vmem:[#allocation3 + $0x18] sm:$0xff]  ;;  %v4942_v52 = vld [vmem:[#allocation3 + $0x50] sm:$0xff] }
 0x257   :  { %4348 = vmatmul.mubr.bf16.vlgmr.msra.gmra.mrb[176].mxu1 %v13937_v14  ;;  %v14179_v14 = vld [vmem:[%s16902_s3 + $0x184] ss:$12 sps:$4 sm:$0xff]  }
 0x258   :  { %10520 = vmatprep.mubr.msk.bf16.mxu1 %vm229_vm0, %v14149_v28  ;;  %4796 = vmatpush1.bf16.msra.mxu1 %v14147_v30  ;;  %v14531_v58 = vld [vmem:[%s16902_s3 + $0x2a4] ss:$12 sps:$4 sm:$0xff]  }
 0x259   :  { %4797 = vmatprep.subr.bf16.mxu1 %v16910_v1  ;;  %4725 = vmatpush1.bf16.msra.mxu0 %v14167_v50 }
 0x25a   :  { %4726 = vmatprep.subr.bf16.mxu0 %v14179_v14 }
 0x25b   :  { %4285 = vmatmul.mubr.bf16.gmra.mrb[180].mxu0 %v14043_v46 }
 0x25c   :  { %4798 = vmatpush1.bf16.msra.mxu1 %v14172_v31  ;;  %10517 = vmatprep.mubr.msk.bf16.mxu0 %vm229_vm0, %v14195_v19 }
 0x25d   :  { %4799 = vmatprep.subr.bf16.mxu1 %v16910_v1  ;;  %4727 = vmatpush1.bf16.msra.mxu0 %v14186_v15 }
 0x25e   :  { %4728 = vmatprep.subr.bf16.mxu0 %v14200_v56 }
 0x25f   :  { %4356 = vmatmul.mubr.bf16.gmra.mrb[180].mxu1 %v14043_v46 }
 0x260   :  { %10521 = vmatprep.mubr.msk.bf16.mxu1 %vm229_vm0, %v14195_v19  ;;  %4800 = vmatpush1.bf16.msra.mxu1 %v14191_v6 }
 0x261   :  { %4801 = vmatprep.subr.bf16.mxu1 %v16910_v1  ;;  %4729 = vmatpush1.bf16.msra.mxu0 %v14213_v10 }
 0x262   :  { %4730 = vmatprep.subr.bf16.mxu0 %v14225_v2 }
 0x263   :  { %4295 = vmatmul.mubr.bf16.gmra.mrb[184].mxu0 %v14065_v13 }
 0x264   :  { %4802 = vmatpush1.bf16.msra.mxu1 %v14218_v57  ;;  %10518 = vmatprep.mubr.msk.bf16.mxu0 %vm229_vm0, %v14241_v27 }
 0x265   :  { %4803 = vmatprep.subr.bf16.mxu1 %v16910_v1  ;;  %4731 = vmatpush1.bf16.msra.mxu0 %v14230_v34 }
 0x266   :  { %4732 = vmatprep.subr.bf16.mxu0 %v14246_v0 }
 0x267   :  { %4364 = vmatmul.mubr.bf16.gmra.mrb[184].mxu1 %v14065_v13 }
 0x268   :  { %10522 = vmatprep.mubr.msk.bf16.mxu1 %vm229_vm0, %v14241_v27  ;;  %4804 = vmatpush1.bf16.msra.mxu1 %v14235_v54 }
 0x269   :  { %4805 = vmatprep.subr.bf16.mxu1 %v16910_v1  ;;  %4733 = vmatpush1.bf16.msra.mxu0 %v14261_v55 }
 0x26a   :  { %4734 = vmatprep.subr.bf16.mxu0 %v14273_v9 }
 0x26b   :  { %4305 = vmatmul.mubr.bf16.gmra.mrb[188].mxu0 %v14079_v33 }
 0x26c   :  { %4806 = vmatpush1.bf16.msra.mxu1 %v14266_v16  ;;  %10621 = vmatprep.mubr.msk.bf16.mxu0 %vm229_vm0, %v14040_v21 }
 0x26d   :  { %4807 = vmatprep.subr.bf16.mxu1 %v16910_v1  ;;  %4735 = vmatpush1.bf16.msra.mxu0 %v14286_v17 }
 0x26e   :  { %4736 = vmatprep.subr.bf16.mxu0 %v14298_v5 }
 0x26f   :  { %4372 = vmatmul.mubr.bf16.gmra.mrb[188].mxu1 %v14079_v33 }
 0x270   :  { %10625 = vmatprep.mubr.msk.bf16.mxu1 %vm229_vm0, %v14040_v21  ;;  %4808 = vmatpush1.bf16.msra.mxu1 %v14291_v4  ;;  %v14327_v21 = vld [vmem:[%s16902_s3 + $0x214] ss:$12 sps:$4 sm:$0xff]  }
 0x271   :  { %4809 = vmatprep.subr.bf16.mxu1 %v16910_v1  ;;  %4737 = vmatpush1.bf16.msra.mxu0 %v14315_v51 }
 0x272   :  { %4738 = vmatprep.subr.bf16.mxu0 %v14327_v21 }
 0x274   :  { %4810 = vmatpush1.bf16.msra.mxu1 %v14320_v29 }
 0x275   :  { %4811 = vmatprep.subr.bf16.mxu1 %v16910_v1  ;;  %4739 = vmatpush1.bf16.msra.mxu0 %v14334_v24 }
 0x276   :  { %4740 = vmatprep.subr.bf16.mxu0 %v14346_v3 }
 0x278   :  { %4812 = vmatpush1.bf16.msra.mxu1 %v14339_v42 }
 0x279   :  { %4813 = vmatprep.subr.bf16.mxu1 %v16910_v1  ;;  %4741 = vmatpush1.bf16.msra.mxu0 %v14353_v49 }
 0x27a   :  { %4742 = vmatprep.subr.bf16.mxu0 %v14365_v7 }
 0x27c   :  { %4814 = vmatpush1.bf16.msra.mxu1 %v14358_v53 }
 0x27d   :  { %4815 = vmatprep.subr.bf16.mxu1 %v16910_v1  ;;  %4743 = vmatpush1.bf16.msra.mxu0 %v14372_v22 }
 0x27e   :  { %4744 = vmatprep.subr.bf16.mxu0 %v14384_v47 }
 0x280   :  { %4816 = vmatpush1.bf16.msra.mxu1 %v14377_v60 }
 0x281   :  { %4817 = vmatprep.subr.bf16.mxu1 %v16910_v1  ;;  %4745 = vmatpush1.bf16.msra.mxu0 %v14391_v62 }
 0x282   :  { %4746 = vmatprep.subr.bf16.mxu0 %v14403_v61 }
 0x284   :  { %4818 = vmatpush1.bf16.msra.mxu1 %v14396_v63 }
 0x285   :  { %4819 = vmatprep.subr.bf16.mxu1 %v16910_v1  ;;  %4747 = vmatpush1.bf16.msra.mxu0 %v14410_v40 }
 0x286   :  { %4748 = vmatprep.subr.bf16.mxu0 %v14422_v37 }
 0x288   :  { %4820 = vmatpush1.bf16.msra.mxu1 %v14415_v32 }
 0x289   :  { %4821 = vmatprep.subr.bf16.mxu1 %v16910_v1  ;;  %4749 = vmatpush1.bf16.msra.mxu0 %v14429_v43 }
 0x28a   :  { %5049 = vmatprep.subr.bf16.mxu0 %v14129_v26  ;;  %v4933_v26 = vld [vmem:[#allocation3 + $0x8] sm:$0xfe] }
 0x28c   :  { %4822 = vmatpush1.bf16.msra.mxu1 %v14434_v35  ;;  %4755 = vmatmul.mubr.bf16.vlgmr.msra.gmra.mrb[192].mxu0 %v4478_v39 }
 0x28d   :  { %5122 = vmatprep.subr.bf16.mxu1 %v16910_v1  ;;  %10622 = vmatprep.mubr.msk.bf16.mxu0 %vm229_vm0, %v14149_v28 }
 0x28e   :  { %5050 = vmatpush1.bf16.msra.mxu0 %v14140_v20  ;;  %v4939_v20 = vld [vmem:[#allocation3 + $0x38] sm:$0xff] }
 0x28f   :  { %4828 = vmatmul.mubr.bf16.vlgmr.msra.gmra.mrb[192].mxu1 %v4478_v39  ;;  %5051 = vmatprep.subr.bf16.mxu0 %v14154_v25  ;;  %v14591_v39 = vld [vmem:[%s16902_s3 + $0x2d0] ss:$12 sps:$4 sm:$0xff]  }
 0x290   :  { %10626 = vmatprep.mubr.msk.bf16.mxu1 %vm229_vm0, %v14149_v28  ;;  %5123 = vmatpush1.bf16.msra.mxu1 %v14147_v30  ;;  %v4951_v30 = vpack.c.bf16 %v14455_v8, %v4933_v26  ;;  %v4937_v28 = vld [vmem:[#allocation3 + $0x28] sm:$0xff] }
 0x291   :  { %5124 = vmatprep.subr.bf16.mxu1 %v16910_v1 }
 0x292   :  { %5052 = vmatpush1.bf16.msra.mxu0 %v14167_v50  ;;  %v4976_v25 = vshll.u32 %v4951_v30, 16 }
 0x293   :  { %5053 = vmatprep.subr.bf16.mxu0 %v14179_v14  ;;  %v4974_v14 = vshrl.u32 %v4951_v30, 16 }
 0x294   :  { %5125 = vmatpush1.bf16.msra.mxu1 %v14172_v31  ;;  %4765 = vmatmul.mubr.bf16.gmra.mrb[196].mxu0 %v14043_v46  ;;  %v4978_v31 = vrot.slane %v4976_v25, 1 }
 0x295   :  { %5126 = vmatprep.subr.bf16.mxu1 %v16910_v1  ;;  %10623 = vmatprep.mubr.msk.bf16.mxu0 %vm229_vm0, %v14195_v19 }
 0x296   :  { %5054 = vmatpush1.bf16.msra.mxu0 %v14186_v15 }
 0x297   :  { %4836 = vmatmul.mubr.bf16.gmra.mrb[196].mxu1 %v14043_v46  ;;  %5055 = vmatprep.subr.bf16.mxu0 %v14200_v56  ;;  %v14468_v46 = vpack.c.bf16 %v4939_v20, %v4937_v28  ;;  %v4938_v56 = vld [vmem:[#allocation3 + $0x30] sm:$0xff]  ;;  %v14598_v20 = vld [vmem:[%s16902_s3 + $0x2d8] ss:$12 sps:$4 sm:$0xff]  }
 0x298   :  { %10627 = vmatprep.mubr.msk.bf16.mxu1 %vm229_vm0, %v14195_v19  ;;  %5127 = vmatpush1.bf16.msra.mxu1 %v14191_v6  ;;  %v4932_v19 = vld [vmem:[#allocation3] sm:$0xfe]  ;;  %v14608_v28 = vld [vmem:[%s16902_s3 + $0x2ec] ss:$12 sps:$4 sm:$0xff]  }
 0x299   :  { %5128 = vmatprep.subr.bf16.mxu1 %v16910_v1  ;;  %v4981_v50 = vshll.u32 %v14468_v46, 16 }
 0x29a   :  { %5056 = vmatpush1.bf16.msra.mxu0 %v14213_v10 }
 0x29b   :  { %5057 = vmatprep.subr.bf16.mxu0 %v14225_v2  ;;  %v14485_v15 = vrot.slane %v4981_v50, 1  ;;  %v4936_v2 = vld [vmem:[#allocation3 + $0x20] sm:$0xff] }
 0x29c   :  { %5129 = vmatpush1.bf16.msra.mxu1 %v14218_v57  ;;  %4775 = vmatmul.mubr.bf16.gmra.mrb[200].mxu0 %v14065_v13  ;;  %v4943_v57 = vld [vmem:[#allocation3 + $0x58] sm:$0xff]  ;;  %v4948_v50 = vld [vmem:[#allocation3 + $0x80] sm:$0x1] }
 0x29d   :  { %5130 = vmatprep.subr.bf16.mxu1 %v16910_v1  ;;  %10624 = vmatprep.mubr.msk.bf16.mxu0 %vm229_vm0, %v14241_v27 }
 0x29e   :  { %5058 = vmatpush1.bf16.msra.mxu0 %v14230_v34  ;;  %v4952_v34 = vpack.c.bf16 %v4938_v56, %v4936_v2  ;;  %v5025_v56 = vshrl.u32 %v14002_v23, 16  ;;  %v14638_v2 = vld [vmem:[%s16902_s3 + $0x304] ss:$12 sps:$4 sm:$0xff]  }
 0x29f   :  { %4844 = vmatmul.mubr.bf16.gmra.mrb[200].mxu1 %v14065_v13  ;;  %5059 = vmatprep.subr.bf16.mxu0 %v14246_v0  ;;  %v4979_v13 = vor.u32 %v4978_v31, %v4974_v14  ;;  %v5005_v14 = vshll.u32 %v13906_v44, 16 }
 0x2a0   :  { %10628 = vmatprep.mubr.msk.bf16.mxu1 %vm229_vm0, %v14241_v27  ;;  %5131 = vmatpush1.bf16.msra.mxu1 %v14235_v54  ;;  %v4941_v54 = vld [vmem:[#allocation3 + $0x48] sm:$0xff] }
 0x2a1   :  { %5132 = vmatprep.subr.bf16.mxu1 %v16910_v1  ;;  %v4984_v6 = vsel %vm4960_vm2, %v4979_v13, %v14485_v15  ;;  %v4955_v27 = vpack.c.bf16 %v4943_v57, %v4941_v54  ;;  %v5317_v13 = vld [vmem:[#allocation3 + $0x8] sm:$0xfe] }
 0x2a2   :  { %5060 = vmatpush1.bf16.msra.mxu0 %v14261_v55  ;;  %v4969_v55 = vshll.u32 %v4952_v34, 16 }
 0x2a3   :  { %5061 = vmatprep.subr.bf16.mxu0 %v14273_v9 }
 0x2a4   :  { %5133 = vmatpush1.bf16.msra.mxu1 %v14266_v16  ;;  %4785 = vmatmul.mubr.bf16.gmra.mrb[204].mxu0 %v14079_v33  ;;  %v4997_v16 = vshll.u32 %v4955_v27, 16 }
 0x2a5   :  { %5134 = vmatprep.subr.bf16.mxu1 %v16910_v1  ;;  %10629 = vmatprep.mubr.msk.bf16.mxu0 %vm229_vm0, %v4984_v6 }
 0x2a6   :  { %5062 = vmatpush1.bf16.msra.mxu0 %v14286_v17 }
 0x2a7   :  { %4852 = vmatmul.mubr.bf16.gmra.mrb[204].mxu1 %v14079_v33  ;;  %5063 = vmatprep.subr.bf16.mxu0 %v14298_v5  ;;  %v14513_v33 = vld [vmem:[#allocation3 + $0x10] sm:$0xff]  ;;  %v4954_v5 = vpack.c.bf16 %v4942_v52, %v4940_v59  ;;  %v14659_v52 = vld [vmem:[%s16902_s3 + $0x31c] ss:$12 sps:$4 sm:$0xff]  }
 0x2a8   :  { %10633 = vmatprep.mubr.msk.bf16.mxu1 %vm229_vm0, %v4984_v6  ;;  %5135 = vmatpush1.bf16.msra.mxu1 %v14291_v4  ;;  %v4950_v10 = vpack.c.bf16 %v14513_v33, %v4932_v19  ;;  %v14533_v4 = vrot.slane %v4969_v55, 1  ;;  %v14622_v6 = vld [vmem:[%s16902_s3 + $0x2e8] ss:$12 sps:$4 sm:$0xff]   ;;  %v14627_v19 = vld [vmem:[%s16902_s3 + $0x2f0] ss:$12 sps:$4 sm:$0xff]  }
 0x2a9   :  { %5136 = vmatprep.subr.bf16.mxu1 %v16910_v1  ;;  %v5001_v31 = vshrl.u32 %v4954_v5, 16 }
 0x2aa   :  { %5064 = vmatpush1.bf16.msra.mxu0 %v14315_v51  ;;  %v4964_v0 = vshll.u32 %v4950_v10, 16  ;;  %v4962_v17 = vshrl.u32 %v4950_v10, 16  ;;  %v4993_v51 = vshrl.u32 %v14468_v46, 16  ;;  %v5335_v10 = vpack.c.bf16 %v14455_v8, %v5317_v13  ;;  %v14650_v8 = vld [vmem:[%s16902_s3 + $0x308] ss:$12 sps:$4 sm:$0xff]  }
 0x2ab   :  { %5065 = vmatprep.subr.bf16.mxu0 %v14327_v21  ;;  %v14770_v13 = vld [vmem:[%s16902_s3 + $0x390] ss:$12 sps:$4 sm:$0xff]  }
 0x2ac   :  { %5137 = vmatpush1.bf16.msra.mxu1 %v14320_v29  ;;  %v4966_v9 = vrot.slane %v4964_v0, 1  ;;  %v4999_v29 = vrot.slane %v4997_v16, 1  ;;  %v5007_v0 = vrot.slane %v5005_v14, 1  ;;  %v5359_v55 = vshll.u32 %v5335_v10, 16  ;;  %v14763_v14 = vld [vmem:[%s16902_s3 + $0x394] ss:$12 sps:$4 sm:$0xff]  }
 0x2ad   :  { %5138 = vmatprep.subr.bf16.mxu1 %v16910_v1 }
 0x2ae   :  { %5066 = vmatpush1.bf16.msra.mxu0 %v14334_v24  ;;  %v4967_v21 = vor.u32 %v4966_v9, %v4962_v17  ;;  %v14541_v24 = vld [vmem:[%s16902_s3 + $0x2a0] ss:$12 sps:$4 sm:$0xff]   ;;  %v5017_v17 = vshrl.u32 %v13906_v44, 16 }
 0x2af   :  { %5067 = vmatprep.subr.bf16.mxu0 %v14346_v3  ;;  %v14549_v3 = vld [vmem:[%s16902_s3 + $0x2a8] ss:$12 sps:$4 sm:$0xff]  }
 0x2b0   :  { %5139 = vmatpush1.bf16.msra.mxu1 %v14339_v42  ;;  %v4995_v42 = vor.u32 %v4993_v51, %v14485_v15  ;;  %v14675_v51 = vld [vmem:[%s16902_s3 + $0x320] ss:$12 sps:$4 sm:$0xff]   ;;  %v5019_v44 = vor.u32 %v5017_v17, %v5007_v0 }
 0x2b1   :  { %5140 = vmatprep.subr.bf16.mxu1 %v16910_v1 }
 0x2b2   :  { %5068 = vmatpush1.bf16.msra.mxu0 %v14353_v49  ;;  %v4972_v49 = vsel %vm4960_vm2, %v4967_v21, %v14533_v4 }
 0x2b3   :  { %5069 = vmatprep.subr.bf16.mxu0 %v14365_v7  ;;  %v4989_v7 = vshll.u32 %v4954_v5, 16  ;;  %v14670_v5 = vld [vmem:[%s16902_s3 + $0x318] ss:$12 sps:$4 sm:$0xff]  }
 0x2b4   :  { %5141 = vmatpush1.bf16.msra.mxu1 %v14358_v53  ;;  %v14556_v53 = vld [vmem:[%s16902_s3 + $0x2bc] ss:$12 sps:$4 sm:$0xff]  }
 0x2b5   :  { %5142 = vmatprep.subr.bf16.mxu1 %v16910_v1 }
 0x2b6   :  { %5070 = vmatpush1.bf16.msra.mxu0 %v14372_v22  ;;  %v14559_v22 = vsel %vm4960_vm2, %v4995_v42, %v4999_v29  ;;  %v14682_v42 = vld [vmem:[%s16902_s3 + $0x334] ss:$12 sps:$4 sm:$0xff]  }
 0x2b7   :  { %5071 = vmatprep.subr.bf16.mxu0 %v14384_v47  ;;  %v4949_v47 = vld [vmem:[#allocation3 + $0x88] sm:$0x1] }
 0x2b8   :  { %5143 = vmatpush1.bf16.msra.mxu1 %v14377_v60  ;;  %v5013_v60 = vshll.u32 %v14002_v23, 16  ;;  %v14645_v23 = vld [vmem:[%s16902_s3 + $0x300] ss:$12 sps:$4 sm:$0xff]  }
 0x2b9   :  { %5144 = vmatprep.subr.bf16.mxu1 %v16910_v1 }
 0x2ba   :  { %5072 = vmatpush1.bf16.msra.mxu0 %v14391_v62  ;;  %v14571_v62 = vld [vmem:[%s16902_s3 + $0x2b8] ss:$12 sps:$4 sm:$0xff]  }
 0x2bb   :  { %5073 = vmatprep.subr.bf16.mxu0 %v14403_v61  ;;  %v4985_v61 = vshrl.u32 %v4952_v34, 16  ;;  %v4958_v34 = vpack.c.bf16 %v4948_v50, %v4948_v50  ;;  %v14751_v50 = vld [vmem:[%s16902_s3 + $0x378] ss:$12 sps:$4 sm:$0xff]  }
 0x2bc   :  { %5145 = vmatpush1.bf16.msra.mxu1 %v14396_v63  ;;  %v14576_v63 = vld [vmem:[%s16902_s3 + $0x2c0] ss:$12 sps:$4 sm:$0xff]  }
 0x2bd   :  { %5146 = vmatprep.subr.bf16.mxu1 %v16910_v1  ;;  %v4987_v36 = vor.u32 %v4985_v61, %v14533_v4  ;;  %v5021_v9 = vshll.u32 %v4958_v34, 16 }
 0x2be   :  { %5074 = vmatpush1.bf16.msra.mxu0 %v14410_v40  ;;  %v4991_v40 = vrot.slane %v4989_v7, 1  ;;  %v14689_v7 = vld [vmem:[%s16902_s3 + $0x330] ss:$12 sps:$4 sm:$0xff]  }
 0x2bf   :  { %5075 = vmatprep.subr.bf16.mxu0 %v14422_v37  ;;  %v5009_v37 = vshrl.u32 %v4955_v27, 16  ;;  %v5023_v21 = vrot.slane %v5021_v9, 1  ;;  %v14795_v9 = vld [vmem:[%s16902_s3 + $0x3a8] ss:$12 sps:$4 sm:$0xff]  }
 0x2c0   :  { %5147 = vmatpush1.bf16.msra.mxu1 %v14415_v32  ;;  %v14583_v32 = vld [vmem:[%s16902_s3 + $0x2d4] ss:$12 sps:$4 sm:$0xff]   ;;  %v14601_v30 = vsel %vm4960_vm2, %v4987_v36, %v4991_v40  ;;  %v14633_v57 = vor.u32 %v5001_v31, %v4991_v40  ;;  %v14702_v40 = vld [vmem:[%s16902_s3 + $0x34c] ss:$12 sps:$4 sm:$0xff]  }
 0x2c1   :  { %5148 = vmatprep.subr.bf16.mxu1 %v16910_v1  ;;  %v14593_v26 = vor.u32 %v5009_v37, %v4999_v29  ;;  %v5361_v29 = vrot.slane %v5359_v55, 1  ;;  %v5024_v61 = vsel %vm4960_vm2, %v5019_v44, %v5023_v21  ;;  %v14732_v36 = vld [vmem:[%s16902_s3 + $0x360] ss:$12 sps:$4 sm:$0xff]   ;;  %v14812_v21 = vld [vmem:[%s16902_s3 + $0x3c4] ss:$12 sps:$4 sm:$0xff]  }
 0x2c2   :  { %5076 = vmatpush1.bf16.msra.mxu0 %v14429_v43  ;;  %v5015_v43 = vrot.slane %v5013_v60, 1  ;;  %v5008_v16 = vsel %vm4960_vm2, %v14633_v57, %v5007_v0  ;;  %v14756_v31 = vld [vmem:[%s16902_s3 + $0x380] ss:$12 sps:$4 sm:$0xff]  }
 0x2c3   :  { %5656 = vmatprep.subr.bf16.mxu0 %v14531_v58 }
 0x2c4   :  { %5149 = vmatpush1.bf16.msra.mxu1 %v14434_v35  ;;  %v4959_v35 = vpack.c.bf16 %v4949_v47, %v4949_v47  ;;  %v5016_v46 = vsel %vm4960_vm2, %v14593_v26, %v5015_v43  ;;  %v5027_v54 = vor.u32 %v5025_v56, %v5015_v43  ;;  %v14694_v47 = vld [vmem:[%s16902_s3 + $0x338] ss:$12 sps:$4 sm:$0xff]   ;;  %v14713_v43 = vld [vmem:[%s16902_s3 + $0x348] ss:$12 sps:$4 sm:$0xff]  }
 0x2c5   :  { %5729 = vmatprep.subr.bf16.mxu1 %v16910_v1  ;;  %5082 = vmatmul.mubr.bf16.vlgmr.msra.gmra.mrb[208].mxu0 %v4972_v49  ;;  %v14775_v56 = vld [vmem:[%s16902_s3 + $0x398] ss:$12 sps:$4 sm:$0xff]  }
 0x2c6   :  { %10630 = vmatprep.mubr.msk.bf16.mxu0 %vm229_vm0, %v14559_v22  ;;  %5657 = vmatpush1.bf16.msra.mxu0 %v14541_v24  ;;  %v5029_v25 = vshll.u32 %v4959_v35, 16  ;;  %v14718_v35 = vld [vmem:[%s16902_s3 + $0x350] ss:$12 sps:$4 sm:$0xff]  }
 0x2c7   :  { %5155 = vmatmul.mubr.bf16.vlgmr.msra.gmra.mrb[208].mxu1 %v4972_v49  ;;  %5658 = vmatprep.subr.bf16.mxu0 %v14556_v53  ;;  %v5357_v49 = vshrl.u32 %v5335_v10, 16  ;;  %v14782_v10 = vld [vmem:[%s16902_s3 + $0x3ac] ss:$12 sps:$4 sm:$0xff]  }
 0x2c8   :  { %10634 = vmatprep.mubr.msk.bf16.mxu1 %vm229_vm0, %v14559_v22  ;;  %5730 = vmatpush1.bf16.msra.mxu1 %v14549_v3  ;;  %v5031_v27 = vrot.slane %v5029_v25, 1  ;;  %v14744_v25 = vld [vmem:[%s16902_s3 + $0x37c] ss:$12 sps:$4 sm:$0xff]  }
 0x2c9   :  { %5731 = vmatprep.subr.bf16.mxu1 %v16910_v1  ;;  %v5362_v60 = vor.u32 %v5361_v29, %v5357_v49 }
 0x2ca   :  { %5659 = vmatpush1.bf16.msra.mxu0 %v14571_v62  ;;  %v5032_v59 = vsel %vm4960_vm2, %v5027_v54, %v5031_v27  ;;  %v5316_v27 = vld [vmem:[#allocation3] sm:$0xfe] }
 0x2cb   :  { %5660 = vmatprep.subr.bf16.mxu0 %v14583_v32  ;;  %v5367_v37 = vsel %vm4960_vm2, %v5362_v60, %v14485_v15  ;;  %v14725_v15 = vld [vmem:[%s16902_s3 + $0x364] ss:$12 sps:$4 sm:$0xff]   ;;  %v14819_v60 = vld [vmem:[%s16902_s3 + $0x3c0] ss:$12 sps:$4 sm:$0xff]  }
 0x2cc   :  { %5732 = vmatpush1.bf16.msra.mxu1 %v14576_v63 }
 0x2cd   :  { %5733 = vmatprep.subr.bf16.mxu1 %v16910_v1  ;;  %5092 = vmatmul.mubr.bf16.gmra.mrb[212].mxu0 %v14601_v30 }
 0x2ce   :  { %10631 = vmatprep.mubr.msk.bf16.mxu0 %vm229_vm0, %v5016_v46  ;;  %5661 = vmatpush1.bf16.msra.mxu0 %v14591_v39 }
 0x2cf   :  { %5163 = vmatmul.mubr.bf16.gmra.mrb[212].mxu1 %v14601_v30  ;;  %5662 = vmatprep.subr.bf16.mxu0 %v14608_v28 }
 0x2d0   :  { %10635 = vmatprep.mubr.msk.bf16.mxu1 %vm229_vm0, %v5016_v46  ;;  %5734 = vmatpush1.bf16.msra.mxu1 %v14598_v20  ;;  %v14737_v46 = vld [vmem:[%s16902_s3 + $0x368] ss:$12 sps:$4 sm:$0xff]  }
 0x2d1   :  { %5735 = vmatprep.subr.bf16.mxu1 %v16910_v1 }
 0x2d2   :  { %5663 = vmatpush1.bf16.msra.mxu0 %v14622_v6 }
 0x2d3   :  { %5664 = vmatprep.subr.bf16.mxu0 %v14638_v2 }
 0x2d4   :  { %5736 = vmatpush1.bf16.msra.mxu1 %v14627_v19 }
 0x2d5   :  { %5737 = vmatprep.subr.bf16.mxu1 %v16910_v1  ;;  %5102 = vmatmul.mubr.bf16.gmra.mrb[216].mxu0 %v5008_v16 }
 0x2d6   :  { %10632 = vmatprep.mubr.msk.bf16.mxu0 %vm229_vm0, %v5032_v59  ;;  %5665 = vmatpush1.bf16.msra.mxu0 %v14645_v23 }
 0x2d7   :  { %5171 = vmatmul.mubr.bf16.gmra.mrb[216].mxu1 %v5008_v16  ;;  %5666 = vmatprep.subr.bf16.mxu0 %v14659_v52  ;;  %v5334_v16 = vpack.c.bf16 %v14513_v33, %v5316_v27 }
 0x2d8   :  { %10636 = vmatprep.mubr.msk.bf16.mxu1 %vm229_vm0, %v5032_v59  ;;  %5738 = vmatpush1.bf16.msra.mxu1 %v14650_v8  ;;  %v14800_v59 = vld [vmem:[%s16902_s3 + $0x3b0] ss:$12 sps:$4 sm:$0xff]  }
 0x2d9   :  { %5739 = vmatprep.subr.bf16.mxu1 %v16910_v1  ;;  %v5347_v49 = vshll.u32 %v5334_v16, 16  ;;  %v5345_v41 = vshrl.u32 %v5334_v16, 16 }
 0x2da   :  { %5667 = vmatpush1.bf16.msra.mxu0 %v14670_v5 }
 0x2db   :  { %5668 = vmatprep.subr.bf16.mxu0 %v14682_v42 }
 0x2dc   :  { %5740 = vmatpush1.bf16.msra.mxu1 %v14675_v51 }
 0x2dd   :  { %5741 = vmatprep.subr.bf16.mxu1 %v16910_v1  ;;  %5112 = vmatmul.mubr.bf16.gmra.mrb[220].mxu0 %v5024_v61 }
 0x2de   :  { %10735 = vmatprep.mubr.msk.bf16.mxu0 %vm229_vm0, %v5367_v37  ;;  %5669 = vmatpush1.bf16.msra.mxu0 %v14689_v7 }
 0x2df   :  { %5179 = vmatmul.mubr.bf16.gmra.mrb[220].mxu1 %v5024_v61  ;;  %5670 = vmatprep.subr.bf16.mxu0 %v14702_v40  ;;  %v14824_v61 = vld [vmem:[%s16902_s3 + $0x3c8] ss:$12 sps:$4 sm:$0xff]  }
 0x2e0   :  { %10739 = vmatprep.mubr.msk.bf16.mxu1 %vm229_vm0, %v5367_v37  ;;  %5742 = vmatpush1.bf16.msra.mxu1 %v14694_v47  ;;  %v14831_v37 = vld [vmem:[%s16902_s3 + $0x3dc] ss:$12 sps:$4 sm:$0xff]  }
 0x2e1   :  { %5743 = vmatprep.subr.bf16.mxu1 %v16910_v1 }
 0x2e2   :  { %5671 = vmatpush1.bf16.msra.mxu0 %v14713_v43 }
 0x2e3   :  { %5672 = vmatprep.subr.bf16.mxu0 %v14725_v15 }
 0x2e4   :  { %5744 = vmatpush1.bf16.msra.mxu1 %v14718_v35 }
 0x2e5   :  { %5745 = vmatprep.subr.bf16.mxu1 %v16910_v1 }
 0x2e6   :  { %5673 = vmatpush1.bf16.msra.mxu0 %v14732_v36 }
 0x2e7   :  { %5674 = vmatprep.subr.bf16.mxu0 %v14744_v25 }
 0x2e8   :  { %5746 = vmatpush1.bf16.msra.mxu1 %v14737_v46 }
 0x2e9   :  { %5747 = vmatprep.subr.bf16.mxu1 %v16910_v1 }
 0x2ea   :  { %5675 = vmatpush1.bf16.msra.mxu0 %v14751_v50  ;;  %v14784_v34 = vpop.f32.mrb[160].mxu0  ;;  %v4150_v54 = vpop.f32.mrb[160].mxu1 }
 0x2eb   :  { %5676 = vmatprep.subr.bf16.mxu0 %v14763_v14  ;;  %4184 = vst.msk [vmem:[#allocation4 + $0x10] sm:$0xff] %vm4183_vm3, %v4150_v54  ;;  %v14787_v0 = vpop.f32.mrb[161].mxu0  ;;  %v4152_v55 = vpop.f32.mrb[161].mxu1 }
 0x2ec   :  { %5748 = vmatpush1.bf16.msra.mxu1 %v14756_v31  ;;  %v14802_v17 = vpop.f32.mrb[162].mxu0  ;;  %v4153_v29 = vpop.f32.mrb[162].mxu1  ;;  %v5349_v55 = vrot.slane %v5347_v49, 1  ;;  %v16929_v49 = vmov 0  }
 0x2ed   :  { %5749 = vmatprep.subr.bf16.mxu1 %v16910_v1  ;;  %4187 = vst.msk [vmem:[#allocation4 + $0x28] sm:$0xff] %vm4183_vm3, %v4153_v29  ;;  %v14807_v33 = vpop.f32.mrb[163].mxu0  ;;  %v4155_v44 = vpop.f32.mrb[163].mxu1  ;;  %v5331_v29 = vld [vmem:[#allocation3 + $0x78] sm:$0xff] }
 0x2ee   :  { %5677 = vmatpush1.bf16.msra.mxu0 %v14770_v13  ;;  %v14841_v44 = vld [vmem:[%s16902_s3 + $0x3d8] ss:$12 sps:$4 sm:$0xff]  }
 0x2ef   :  { %5678 = vmatprep.subr.bf16.mxu0 %v14782_v10 }
 0x2f0   :  { %5750 = vmatpush1.bf16.msra.mxu1 %v14775_v56 }
 0x2f1   :  { %5751 = vmatprep.subr.bf16.mxu1 %v16910_v1 }
 0x2f2   :  { %5679 = vmatpush1.bf16.msra.mxu0 %v14795_v9 }
 0x2f3   :  { %5680 = vmatprep.subr.bf16.mxu0 %v14812_v21 }
 0x2f4   :  { %5752 = vmatpush1.bf16.msra.mxu1 %v14800_v59  ;;  %v14833_v54 = vpop.f32.mrb[164].mxu0  ;;  %v4158_v27 = vpop.f32.mrb[164].mxu1 }
 0x2f5   :  { %5753 = vmatprep.subr.bf16.mxu1 %v16910_v1  ;;  %4190 = vst.msk [vmem:[#allocation4 + $0x40] sm:$0xff] %vm4183_vm3, %v4158_v27  ;;  %v14843_v11 = vpop.f32.mrb[165].mxu0  ;;  %v4160_v48 = vpop.f32.mrb[165].mxu1  ;;  %v14848_v1 = vld [vmem:[%s16902_s3 + $0x3e0] ss:$12 sps:$4 sm:$0xff]  }
 0x2f6   :  { %5681 = vmatpush1.bf16.msra.mxu0 %v14819_v60  ;;  %16928 = vst [vmem:[#allocation12_spill] sm:$0xff] %v14843_v11  ;;  %v14852_v12 = vpop.f32.mrb[166].mxu0  ;;  %v4161_v27 = vpop.f32.mrb[166].mxu1  ;;  %v14855_v48 = vpack.c.bf16 %v5331_v29, %v5329_v38  ;;  %v5350_v11 = vor.u32 %v5349_v55, %v5345_v41  ;;  %v5330_v38 = vld [vmem:[#allocation3 + $0x70] sm:$0xff]  ;;  %v5333_v55 = vld [vmem:[#allocation3 + $0x88] sm:$0x1] }
 0x2f7   :  { %5682 = vmatprep.subr.bf16.mxu0 %v14831_v37  ;;  %16930 = vst [vmem:[#allocation13_spill] sm:$0xff] %v14852_v12  ;;  %4193 = vst.msk [vmem:[#allocation4 + $0x58] sm:$0xff] %vm4183_vm3, %v4161_v27  ;;  %v4093_v45 = vpop.f32.mrb[167].mxu0  ;;  %v4163_v18 = vpop.f32.mrb[167].mxu1 }
 0x2f8   :  { %5754 = vmatpush1.bf16.msra.mxu1 %v14824_v61  ;;  %4192 = vst [vmem:[#allocation4 + $0x50] sm:$0xff] %v4093_v45  ;;  %v5355_v12 = vsel %vm4960_vm2, %v5350_v11, %v14533_v4  ;;  %v5396_v45 = vshll.u32 %v14855_v48, 16  ;;  %v5328_v4 = vld [vmem:[#allocation3 + $0x60] sm:$0xff] }
 0x2f9   :  { %5755 = vmatprep.subr.bf16.mxu1 %v16929_v49  ;;  %v14874_v27 = vpack.c.bf16 %v5330_v38, %v5328_v4 }
 0x2fa   :  { %5683 = vmatpush1.bf16.msra.mxu0 %v14841_v44 }
 0x2fb   :  { %5982 = vmatprep.subr.bf16.mxu0 %v14531_v58 }
 0x2fc   :  { %5756 = vmatpush1.bf16.msra.mxu1 %v14848_v1 }
 0x2fd   :  { %6055 = vmatprep.subr.bf16.mxu1 %v16929_v49  ;;  %5689 = vmatmul.mubr.bf16.vlgmr.msra.gmra.mrb[224].mxu0 %v5355_v12  ;;  %v4097_v18 = vpop.f32.mrb[168].mxu0  ;;  %v4166_v16 = vpop.f32.mrb[168].mxu1 }
 0x2fe   :  { %10736 = vmatprep.mubr.msk.bf16.mxu0 %vm229_vm0, %v14559_v22  ;;  %4194 = vst [vmem:[#allocation4 + $0x60] sm:$0xff] %v4097_v18  ;;  %4196 = vst.msk [vmem:[#allocation4 + $0x70] sm:$0xff] %vm4183_vm3, %v4166_v16  ;;  %v4099_v41 = vpop.f32.mrb[169].mxu0  ;;  %v4168_v58 = vpop.f32.mrb[169].mxu1  ;;  %5983 = vmatpush1.bf16.msra.mxu0 %v14541_v24  ;;  %v5398_v18 = vrot.slane %v5396_v45, 1  ;;  %v5343_v24 = vpack.c.bf16 %v5333_v55, %v5333_v55  ;;  %v5873_v55 = vld [vmem:[#allocation3 + $0xc8] sm:$0xff] }
 0x2ff   :  { %5762 = vmatmul.mubr.bf16.vlgmr.msra.gmra.mrb[224].mxu1 %v5355_v12  ;;  %4195 = vst [vmem:[#allocation4 + $0x68] sm:$0xff] %v4099_v41  ;;  %v4101_v12 = vpop.f32.mrb[170].mxu0  ;;  %v4169_v11 = vpop.f32.mrb[170].mxu1  ;;  %5984 = vmatprep.subr.bf16.mxu0 %v14556_v53  ;;  %v14881_v53 = vld [vmem:[#allocation3 + $0xa8] sm:$0xff]  ;;  %v5332_v41 = vld [vmem:[#allocation3 + $0x80] sm:$0x1] }
 0x300   :  { %10740 = vmatprep.mubr.msk.bf16.mxu1 %vm229_vm0, %v14559_v22  ;;  %6056 = vmatpush1.bf16.msra.mxu1 %v14549_v3  ;;  %4197 = vst [vmem:[#allocation4 + $0x78] sm:$0xff] %v4101_v12  ;;  %4199 = vst.msk [vmem:[#allocation4 + $0x88] sm:$0xff] %vm4183_vm3, %v4169_v11  ;;  %v4103_v22 = vpop.f32.mrb[171].mxu0  ;;  %v4171_v29 = vpop.f32.mrb[171].mxu1  ;;  %v5388_v3 = vshll.u32 %v14874_v27, 16  ;;  %v5399_v16 = vsel %vm4960_vm2, %v14593_v26, %v5398_v18  ;;  %v5408_v12 = vshrl.u32 %v14855_v48, 16 }
 0x301   :  { %6057 = vmatprep.subr.bf16.mxu1 %v16929_v49  ;;  %4198 = vst [vmem:[#allocation4 + $0x80] sm:$0xff] %v4103_v22  ;;  %v5867_v58 = vld [vmem:[#allocation3 + $0x98] sm:$0xfe] }
 0x302   :  { %5985 = vmatpush1.bf16.msra.mxu0 %v14571_v62  ;;  %v5412_v62 = vshll.u32 %v5343_v24, 16  ;;  %v5885_v11 = vpack.c.bf16 %v14881_v53, %v5867_v58  ;;  %v5390_v29 = vrot.slane %v5388_v3, 1  ;;  %v5871_v24 = vld [vmem:[#allocation3 + $0xb8] sm:$0xff] }
 0x303   :  { %5986 = vmatprep.subr.bf16.mxu0 %v14583_v32 }
 0x304   :  { %6058 = vmatpush1.bf16.msra.mxu1 %v14576_v63  ;;  %v5391_v48 = vsel %vm4960_vm2, %v14633_v57, %v5390_v29 }
 0x305   :  { %6059 = vmatprep.subr.bf16.mxu1 %v16929_v49  ;;  %5699 = vmatmul.mubr.bf16.gmra.mrb[228].mxu0 %v14601_v30 }
 0x306   :  { %v4107_v45 = vpop.f32.mrb[172].mxu0  ;;  %v4174_v38 = vpop.f32.mrb[172].mxu1  ;;  %10737 = vmatprep.mubr.msk.bf16.mxu0 %vm229_vm0, %v5399_v16  ;;  %5987 = vmatpush1.bf16.msra.mxu0 %v14591_v39  ;;  %v5342_v39 = vpack.c.bf16 %v5332_v41, %v5332_v41 }
 0x307   :  { %5770 = vmatmul.mubr.bf16.gmra.mrb[228].mxu1 %v14601_v30  ;;  %4200 = vst [vmem:[#allocation4 + $0x90] sm:$0xff] %v4107_v45  ;;  %4202 = vst.msk [vmem:[#allocation4 + $0xa0] sm:$0xff] %vm4183_vm3, %v4174_v38  ;;  %v4109_v63 = vpop.f32.mrb[173].mxu0  ;;  %v4176_v32 = vpop.f32.mrb[173].mxu1  ;;  %5988 = vmatprep.subr.bf16.mxu0 %v14608_v28  ;;  %v14897_v45 = vpack.c.bf16 %v5873_v55, %v5871_v24  ;;  %v5909_v28 = vshll.u32 %v5885_v11, 16 }
 0x308   :  { %10741 = vmatprep.mubr.msk.bf16.mxu1 %vm229_vm0, %v5399_v16  ;;  %6060 = vmatpush1.bf16.msra.mxu1 %v14598_v20  ;;  %4201 = vst [vmem:[#allocation4 + $0x98] sm:$0xff] %v4109_v63  ;;  %v4111_v26 = vpop.f32.mrb[174].mxu0  ;;  %v4177_v30 = vpop.f32.mrb[174].mxu1  ;;  %v5410_v20 = vor.u32 %v5408_v12, %v5398_v18  ;;  %v5414_v16 = vrot.slane %v5412_v62, 1  ;;  %v5404_v3 = vshll.u32 %v5342_v39, 16  ;;  %v5907_v62 = vshrl.u32 %v5885_v11, 16 }
 0x309   :  { %6061 = vmatprep.subr.bf16.mxu1 %v16929_v49  ;;  %4203 = vst [vmem:[#allocation4 + $0xa8] sm:$0xff] %v4111_v26  ;;  %4205 = vst.msk [vmem:[#allocation4 + $0xb8] sm:$0xff] %vm4183_vm3, %v4177_v30  ;;  %v4113_v4 = vpop.f32.mrb[175].mxu0  ;;  %v4179_v22 = vpop.f32.mrb[175].mxu1  ;;  %v5914_v38 = vshll.u32 %v14897_v45, 16  ;;  %v5876_v30 = vld [vmem:[#allocation3 + $0xe0] sm:$0xff] }
 0x30a   :  { %4204 = vst [vmem:[#allocation4 + $0xb0] sm:$0xff] %v4113_v4  ;;  %5989 = vmatpush1.bf16.msra.mxu0 %v14622_v6  ;;  %v5415_v18 = vsel %vm4960_vm2, %v5410_v20, %v5414_v16  ;;  %v5400_v6 = vshrl.u32 %v14874_v27, 16  ;;  %v5881_v12 = vld [vmem:[#allocation3 + $0x108] sm:$0xff]  ;;  %v5926_v24 = vshrl.u32 %v14897_v45, 16  ;;  %v14991_v45 = vld [vmem:[%s16902_s3 + $0x3f8] ss:$12 sps:$4 sm:$0xff]  }
 0x30b   :  { %5990 = vmatprep.subr.bf16.mxu0 %v14638_v2  ;;  %v5406_v2 = vrot.slane %v5404_v3, 1  ;;  %v14914_v41 = vrot.slane %v5914_v38, 1  ;;  %v14998_v38 = vld [vmem:[%s16902_s3 + $0x40c] ss:$12 sps:$4 sm:$0xff]  }
 0x30c   :  { %6062 = vmatpush1.bf16.msra.mxu1 %v14627_v19  ;;  %v5911_v19 = vrot.slane %v5909_v28, 1  ;;  %v5402_v57 = vor.u32 %v5400_v6, %v5390_v29 }
 0x30d   :  { %6063 = vmatprep.subr.bf16.mxu1 %v16929_v49  ;;  %5709 = vmatmul.mubr.bf16.gmra.mrb[232].mxu0 %v5391_v48  ;;  %v5928_v3 = vor.u32 %v5926_v24, %v14914_v41 }
 0x30e   :  { %10738 = vmatprep.mubr.msk.bf16.mxu0 %vm229_vm0, %v5415_v18  ;;  %5991 = vmatpush1.bf16.msra.mxu0 %v14645_v23  ;;  %v5912_v63 = vor.u32 %v5911_v19, %v5907_v62  ;;  %v5407_v27 = vsel %vm4960_vm2, %v5402_v57, %v5406_v2 }
 0x30f   :  { %5778 = vmatmul.mubr.bf16.gmra.mrb[232].mxu1 %v5391_v48  ;;  %5992 = vmatprep.subr.bf16.mxu0 %v14659_v52  ;;  %v14983_v48 = vld [vmem:[%s16902_s3 + $0x3f0] ss:$12 sps:$4 sm:$0xff]  }
 0x310   :  { %10742 = vmatprep.mubr.msk.bf16.mxu1 %vm229_vm0, %v5415_v18  ;;  %6064 = vmatpush1.bf16.msra.mxu1 %v14650_v8  ;;  %v5917_v23 = vsel %vm4960_vm2, %v5912_v63, %v14914_v41  ;;  %v14941_v8 = vld [vmem:[#allocation3 + $0xa0] sm:$0xff] }
 0x311   :  { %6065 = vmatprep.subr.bf16.mxu1 %v16929_v49  ;;  %v5880_v63 = vld [vmem:[#allocation3 + $0x100] sm:$0xff] }
 0x312   :  { %5993 = vmatpush1.bf16.msra.mxu0 %v14670_v5 }
 0x313   :  { %5994 = vmatprep.subr.bf16.mxu0 %v14682_v42 }
 0x314   :  { %6066 = vmatpush1.bf16.msra.mxu1 %v14675_v51 }
 0x315   :  { %6067 = vmatprep.subr.bf16.mxu1 %v16929_v49  ;;  %5719 = vmatmul.mubr.bf16.gmra.mrb[236].mxu0 %v5407_v27 }
 0x316   :  { %10743 = vmatprep.mubr.msk.bf16.mxu0 %vm229_vm0, %v5917_v23  ;;  %5995 = vmatpush1.bf16.msra.mxu0 %v14689_v7  ;;  %v5866_v7 = vld [vmem:[#allocation3 + $0x90] sm:$0xfe] }
 0x317   :  { %5786 = vmatmul.mubr.bf16.gmra.mrb[236].mxu1 %v5407_v27  ;;  %5996 = vmatprep.subr.bf16.mxu0 %v14702_v40 }
 0x318   :  { %10747 = vmatprep.mubr.msk.bf16.mxu1 %vm229_vm0, %v5917_v23  ;;  %6068 = vmatpush1.bf16.msra.mxu1 %v14694_v47  ;;  %v5872_v47 = vld [vmem:[#allocation3 + $0xc0] sm:$0xff] }
 0x319   :  { %6069 = vmatprep.subr.bf16.mxu1 %v16929_v49 }
 0x31a   :  { %5997 = vmatpush1.bf16.msra.mxu0 %v14713_v43 }
 0x31b   :  { %5998 = vmatprep.subr.bf16.mxu0 %v14725_v15  ;;  %v5877_v15 = vld [vmem:[#allocation3 + $0xe8] sm:$0xff] }
 0x31c   :  { %6070 = vmatpush1.bf16.msra.mxu1 %v14718_v35  ;;  %v5884_v35 = vpack.c.bf16 %v14941_v8, %v5866_v7 }
 0x31d   :  { %6071 = vmatprep.subr.bf16.mxu1 %v16929_v49 }
 0x31e   :  { %5999 = vmatpush1.bf16.msra.mxu0 %v14732_v36  ;;  %v5895_v22 = vshrl.u32 %v5884_v35, 16 }
 0x31f   :  { %6000 = vmatprep.subr.bf16.mxu0 %v14744_v25  ;;  %v5870_v25 = vld [vmem:[#allocation3 + $0xb0] sm:$0xff] }
 0x320   :  { %6072 = vmatpush1.bf16.msra.mxu1 %v14737_v46 }
 0x321   :  { %6073 = vmatprep.subr.bf16.mxu1 %v16929_v49 }
 0x322   :  { %6001 = vmatpush1.bf16.msra.mxu0 %v14751_v50  ;;  %v14950_v50 = vpack.c.bf16 %v5872_v47, %v5870_v25 }
 0x323   :  { %6002 = vmatprep.subr.bf16.mxu0 %v14763_v14 }
 0x324   :  { %6074 = vmatpush1.bf16.msra.mxu1 %v14756_v31  ;;  %v5875_v31 = vld [vmem:[#allocation3 + $0xd8] sm:$0xff]  ;;  %v5902_v32 = vshll.u32 %v14950_v50, 16 }
 0x325   :  { %6075 = vmatprep.subr.bf16.mxu1 %v16929_v49  ;;  %v14952_v14 = vpack.c.bf16 %v5877_v15, %v5875_v31 }
 0x326   :  { %v4276_v52 = vpop.f32.mrb[176].mxu0  ;;  %6003 = vmatpush1.bf16.msra.mxu0 %v14770_v13  ;;  %v5897_v13 = vshll.u32 %v5884_v35, 16  ;;  %v14971_v29 = vrot.slane %v5902_v32, 1  ;;  %v15029_v35 = vld [vmem:[%s16902_s3 + $0x424] ss:$12 sps:$4 sm:$0xff]  }
 0x327   :  { %4381 = vst [vmem:[#allocation4 + $0xc0] sm:$0xff] %v4276_v52  ;;  %v4278_v51 = vpop.f32.mrb[177].mxu0  ;;  %6004 = vmatprep.subr.bf16.mxu0 %v14782_v10  ;;  %v5930_v26 = vshll.u32 %v14952_v14, 16  ;;  %v5878_v52 = vld [vmem:[#allocation3 + $0xf0] sm:$0xff] }
 0x328   :  { %6076 = vmatpush1.bf16.msra.mxu1 %v14775_v56  ;;  %4382 = vst [vmem:[#allocation4 + $0xc8] sm:$0xff] %v4278_v51  ;;  %v4280_v40 = vpop.f32.mrb[178].mxu0  ;;  %v15015_v51 = vld [vmem:[%s16902_s3 + $0x408] ss:$12 sps:$4 sm:$0xff]   ;;  %v15031_v15 = vpack.c.bf16 %v5880_v63, %v5878_v52  ;;  %v15113_v63 = vld [vmem:[%s16902_s3 + $0x46c] ss:$12 sps:$4 sm:$0xff]  }
 0x329   :  { %6077 = vmatprep.subr.bf16.mxu1 %v16929_v49  ;;  %4384 = vst [vmem:[#allocation4 + $0xd8] sm:$0xff] %v4280_v40  ;;  %v4282_v36 = vpop.f32.mrb[179].mxu0  ;;  %v5932_v20 = vrot.slane %v5930_v26, 1  ;;  %v5918_v40 = vshrl.u32 %v14950_v50, 16  ;;  %v15040_v50 = vld [vmem:[%s16902_s3 + $0x420] ss:$12 sps:$4 sm:$0xff]  }
 0x32a   :  { %v4349_v5 = vpop.f32.mrb[176].mxu1  ;;  %4385 = vst [vmem:[#allocation4 + $0xe0] sm:$0xff] %v4282_v36  ;;  %6005 = vmatpush1.bf16.msra.mxu0 %v14795_v9  ;;  %v5942_v36 = vshrl.u32 %v14952_v14, 16  ;;  %v5950_v52 = vshrl.u32 %v15031_v15, 16 }
 0x32b   :  { %4383 = vst.msk [vmem:[#allocation4 + $0xd0] sm:$0xff] %vm4183_vm3, %v4349_v5  ;;  %v4351_v42 = vpop.f32.mrb[177].mxu1  ;;  %6006 = vmatprep.subr.bf16.mxu0 %v14812_v21  ;;  %v5899_v21 = vrot.slane %v5897_v13, 1  ;;  %v15002_v19 = vsel %vm4960_vm2, %v5928_v3, %v5932_v20  ;;  %v5883_v5 = vld [vmem:[#allocation3 + $0x118] sm:$0x1]  ;;  %v5920_v31 = vor.u32 %v5918_v40, %v14971_v29 }
 0x32c   :  { %v4352_v43 = vpop.f32.mrb[178].mxu1  ;;  %6078 = vmatpush1.bf16.msra.mxu1 %v14800_v59  ;;  %v15021_v42 = vld [vmem:[%s16902_s3 + $0x410] ss:$12 sps:$4 sm:$0xff]   ;;  %v5893_v25 = vpack.c.bf16 %v5883_v5, %v5883_v5  ;;  %v5944_v13 = vor.u32 %v5942_v36, %v5932_v20  ;;  %v15127_v5 = vld [vmem:[%s16902_s3 + $0x468] ss:$12 sps:$4 sm:$0xff]  }
 0x32d   :  { %4386 = vst.msk [vmem:[#allocation4 + $0xe8] sm:$0xff] %vm4183_vm3, %v4352_v43  ;;  %v4354_v46 = vpop.f32.mrb[179].mxu1  ;;  %6079 = vmatprep.subr.bf16.mxu1 %v16929_v49  ;;  %v5900_v28 = vor.u32 %v5899_v21, %v5895_v22  ;;  %v5882_v21 = vld [vmem:[#allocation3 + $0x110] sm:$0x1]  ;;  %v15074_v22 = vld [vmem:[%s16902_s3 + $0x438] ss:$12 sps:$4 sm:$0xff]  }
 0x32e   :  { %v4286_v56 = vpop.f32.mrb[180].mxu0  ;;  %6007 = vmatpush1.bf16.msra.mxu0 %v14819_v60  ;;  %v14969_v60 = vld [vmem:[%s16902_s3 + $0x3f4] ss:$12 sps:$4 sm:$0xff]  }
 0x32f   :  { %4387 = vst [vmem:[#allocation4 + $0xf0] sm:$0xff] %v4286_v56  ;;  %v4288_v58 = vpop.f32.mrb[181].mxu0  ;;  %6008 = vmatprep.subr.bf16.mxu0 %v14831_v37  ;;  %v5879_v37 = vld [vmem:[#allocation3 + $0xf8] sm:$0xff]  ;;  %v15045_v56 = vld [vmem:[%s16902_s3 + $0x428] ss:$12 sps:$4 sm:$0xff]  }
 0x330   :  { %6080 = vmatpush1.bf16.msra.mxu1 %v14824_v61  ;;  %4388 = vst [vmem:[#allocation4 + $0xf8] sm:$0xff] %v4288_v58  ;;  %v4290_v9 = vpop.f32.mrb[182].mxu0  ;;  %v5874_v61 = vld [vmem:[#allocation3 + $0xd0] sm:$0xff]  ;;  %v14976_v16 = vpack.c.bf16 %v5881_v12, %v5879_v37  ;;  %v15055_v58 = vld [vmem:[%s16902_s3 + $0x43c] ss:$12 sps:$4 sm:$0xff]  }
 0x331   :  { %6081 = vmatprep.subr.bf16.mxu1 %v16929_v49  ;;  %4390 = vst [vmem:[#allocation4 + $0x108] sm:$0xff] %v4290_v9  ;;  %v4292_v11 = vpop.f32.mrb[183].mxu0  ;;  %v14973_v39 = vpack.c.bf16 %v5876_v30, %v5874_v61  ;;  %v6250_v61 = vld [vmem:[#allocation3 + $0x98] sm:$0xfe]  ;;  %v15080_v37 = vld [vmem:[%s16902_s3 + $0x440] ss:$12 sps:$4 sm:$0xff]  }
 0x332   :  { %v4357_v10 = vpop.f32.mrb[180].mxu1  ;;  %4391 = vst [vmem:[#allocation4 + $0x110] sm:$0xff] %v4292_v11  ;;  %6009 = vmatpush1.bf16.msra.mxu0 %v14841_v44  ;;  %v5946_v62 = vshll.u32 %v14976_v16, 16 }
 0x333   :  { %4389 = vst.msk [vmem:[#allocation4 + $0x100] sm:$0xff] %vm4183_vm3, %v4357_v10  ;;  %v4359_v55 = vpop.f32.mrb[181].mxu1  ;;  %6589 = vmatprep.subr.bf16.mxu0 %v14969_v60  ;;  %v5922_v6 = vshll.u32 %v14973_v39, 16 }
 0x334   :  { %v4360_v59 = vpop.f32.mrb[182].mxu1  ;;  %6082 = vmatpush1.bf16.msra.mxu1 %v14848_v1  ;;  %v5905_v1 = vsel %vm4960_vm2, %v5900_v28, %v14971_v29  ;;  %v5948_v46 = vrot.slane %v5946_v62, 1  ;;  %v5938_v55 = vshll.u32 %v15031_v15, 16  ;;  %v5934_v28 = vshrl.u32 %v14973_v39, 16  ;;  %v15103_v39 = vld [vmem:[%s16902_s3 + $0x458] ss:$12 sps:$4 sm:$0xff]  }
 0x335   :  { %4392 = vst.msk [vmem:[#allocation4 + $0x118] sm:$0xff] %vm4183_vm3, %v4360_v59  ;;  %v4362_v4 = vpop.f32.mrb[183].mxu1  ;;  %6662 = vmatprep.subr.bf16.mxu1 %v16929_v49  ;;  %6015 = vmatmul.mubr.bf16.vlgmr.msra.gmra.mrb[240].mxu0 %v5905_v1  ;;  %v5924_v43 = vrot.slane %v5922_v6, 1  ;;  %v5962_v59 = vshll.u32 %v5893_v25, 16  ;;  %v15141_v15 = vld [vmem:[%s16902_s3 + $0x484] ss:$12 sps:$4 sm:$0xff]  }
 0x336   :  { %v4296_v44 = vpop.f32.mrb[184].mxu0  ;;  %10744 = vmatprep.mubr.msk.bf16.mxu0 %vm229_vm0, %v15002_v19  ;;  %6590 = vmatpush1.bf16.msra.mxu0 %v14983_v48  ;;  %v15061_v26 = vsel %vm4960_vm2, %v5944_v13, %v5948_v46  ;;  %v5958_v4 = vshrl.u32 %v14976_v16, 16  ;;  %v6268_v16 = vpack.c.bf16 %v14881_v53, %v6250_v61  ;;  %v5940_v3 = vrot.slane %v5938_v55, 1  ;;  %v15098_v53 = vld [vmem:[%s16902_s3 + $0x450] ss:$12 sps:$4 sm:$0xff]  }
 0x337   :  { %6088 = vmatmul.mubr.bf16.vlgmr.msra.gmra.mrb[240].mxu1 %v5905_v1  ;;  %4393 = vst [vmem:[#allocation4 + $0x120] sm:$0xff] %v4296_v44  ;;  %v4298_v57 = vpop.f32.mrb[185].mxu0  ;;  %6591 = vmatprep.subr.bf16.mxu0 %v14998_v38  ;;  %v15048_v14 = vsel %vm4960_vm2, %v5920_v31, %v5924_v43  ;;  %v15089_v1 = vld [vmem:[%s16902_s3 + $0x454] ss:$12 sps:$4 sm:$0xff]   ;;  %v5892_v44 = vpack.c.bf16 %v5882_v21, %v5882_v21  ;;  %v5964_v6 = vrot.slane %v5962_v59, 1 }
 0x338   :  { %10748 = vmatprep.mubr.msk.bf16.mxu1 %vm229_vm0, %v15002_v19  ;;  %4394 = vst [vmem:[#allocation4 + $0x128] sm:$0xff] %v4298_v57  ;;  %v4300_v27 = vpop.f32.mrb[186].mxu0  ;;  %6663 = vmatpush1.bf16.msra.mxu1 %v14991_v45  ;;  %v5936_v57 = vor.u32 %v5934_v28, %v5924_v43  ;;  %v15136_v40 = vor.u32 %v5950_v52, %v5940_v3  ;;  %v6290_v36 = vshrl.u32 %v6268_v16, 16  ;;  %v15153_v31 = vld [vmem:[%s16902_s3 + $0x488] ss:$12 sps:$4 sm:$0xff]  }
 0x339   :  { %4396 = vst [vmem:[#allocation4 + $0x138] sm:$0xff] %v4300_v27  ;;  %v4302_v7 = vpop.f32.mrb[187].mxu0  ;;  %6664 = vmatprep.subr.bf16.mxu1 %v16929_v49  ;;  %v5954_v27 = vshll.u32 %v5892_v44, 16  ;;  %v15173_v55 = vld [vmem:[%s16902_s3 + $0x498] ss:$12 sps:$4 sm:$0xff]  }
 0x33a   :  { %v4365_v18 = vpop.f32.mrb[184].mxu1  ;;  %4397 = vst [vmem:[#allocation4 + $0x140] sm:$0xff] %v4302_v7  ;;  %6592 = vmatpush1.bf16.msra.mxu0 %v15015_v51  ;;  %v15106_v62 = vsel %vm4960_vm2, %v5936_v57, %v5940_v3  ;;  %v15132_v7 = vld [vmem:[%s16902_s3 + $0x470] ss:$12 sps:$4 sm:$0xff]   ;;  %v15197_v59 = vld [vmem:[%s16902_s3 + $0x4b8] ss:$12 sps:$4 sm:$0xff]  }
 0x33b   :  { %4395 = vst.msk [vmem:[#allocation4 + $0x130] sm:$0xff] %vm4183_vm3, %v4365_v18  ;;  %v4367_v2 = vpop.f32.mrb[185].mxu1  ;;  %6593 = vmatprep.subr.bf16.mxu0 %v15029_v35  ;;  %v15091_v18 = vor.u32 %v5958_v4, %v5948_v46  ;;  %v5956_v43 = vrot.slane %v5954_v27, 1  ;;  %v15148_v46 = vld [vmem:[%s16902_s3 + $0x480] ss:$12 sps:$4 sm:$0xff]   ;;  %v4862_v3 = vld [vmem:[#allocation4 + $0x10] sm:$0xff] }
 0x33c   :  { %v4368_v23 = vpop.f32.mrb[186].mxu1  ;;  %6665 = vmatpush1.bf16.msra.mxu1 %v15021_v42  ;;  %v6292_v2 = vshll.u32 %v6268_v16, 16  ;;  %v15204_v21 = vld [vmem:[%s16902_s3 + $0x4cc] ss:$12 sps:$4 sm:$0xff]   ;;  %v15223_v4 = vld [vmem:[%s16902_s3 + $0x4e4] ss:$12 sps:$4 sm:$0xff]  }
 0x33d   :  { %4398 = vst.msk [vmem:[#allocation4 + $0x148] sm:$0xff] %vm4183_vm3, %v4368_v23  ;;  %v4370_v47 = vpop.f32.mrb[187].mxu1  ;;  %6666 = vmatprep.subr.bf16.mxu1 %v16929_v49  ;;  %6025 = vmatmul.mubr.bf16.gmra.mrb[244].mxu0 %v15048_v14  ;;  %v5965_v23 = vsel %vm4960_vm2, %v15091_v18, %v5964_v6  ;;  %v5957_v13 = vsel %vm4960_vm2, %v15136_v40, %v5956_v43  ;;  %v15230_v61 = vld [vmem:[%s16902_s3 + $0x4e0] ss:$12 sps:$4 sm:$0xff]   ;;  %v15248_v27 = vld [vmem:[%s16902_s3 + $0x4f8] ss:$12 sps:$4 sm:$0xff]  }
 0x33e   :  { %v4306_v10 = vpop.f32.mrb[188].mxu0  ;;  %10745 = vmatprep.mubr.msk.bf16.mxu0 %vm229_vm0, %v15061_v26  ;;  %6594 = vmatpush1.bf16.msra.mxu0 %v15040_v50  ;;  %v6294_v47 = vrot.slane %v6292_v2, 1 }
 0x33f   :  { %6096 = vmatmul.mubr.bf16.gmra.mrb[244].mxu1 %v15048_v14  ;;  %4399 = vst [vmem:[#allocation4 + $0x150] sm:$0xff] %v4306_v10  ;;  %v4308_v30 = vpop.f32.mrb[189].mxu0  ;;  %6595 = vmatprep.subr.bf16.mxu0 %v15055_v58  ;;  %v15162_v10 = vld [vmem:[%s16902_s3 + $0x49c] ss:$12 sps:$4 sm:$0xff]  }
 0x340   :  { %10749 = vmatprep.mubr.msk.bf16.mxu1 %vm229_vm0, %v15061_v26  ;;  %4400 = vst [vmem:[#allocation4 + $0x158] sm:$0xff] %v4308_v30  ;;  %v4310_v12 = vpop.f32.mrb[190].mxu0  ;;  %6667 = vmatpush1.bf16.msra.mxu1 %v15045_v56  ;;  %v6295_v25 = vor.u32 %v6294_v47, %v6290_v36  ;;  %v15178_v30 = vld [vmem:[%s16902_s3 + $0x4a0] ss:$12 sps:$4 sm:$0xff]  }
 0x341   :  { %4402 = vst [vmem:[#allocation4 + $0x168] sm:$0xff] %v4310_v12  ;;  %v4312_v24 = vpop.f32.mrb[191].mxu0  ;;  %6668 = vmatprep.subr.bf16.mxu1 %v16929_v49  ;;  %v15211_v12 = vld [vmem:[%s16902_s3 + $0x4c8] ss:$12 sps:$4 sm:$0xff]  }
 0x342   :  { %v4373_v32 = vpop.f32.mrb[188].mxu1  ;;  %4403 = vst [vmem:[#allocation4 + $0x170] sm:$0xff] %v4312_v24  ;;  %6596 = vmatpush1.bf16.msra.mxu0 %v15074_v22  ;;  %v15235_v24 = vld [vmem:[%s16902_s3 + $0x4e8] ss:$12 sps:$4 sm:$0xff]  }
 0x343   :  { %4401 = vst.msk [vmem:[#allocation4 + $0x160] sm:$0xff] %vm4183_vm3, %v4373_v32  ;;  %v4375_v9 = vpop.f32.mrb[189].mxu1  ;;  %6597 = vmatprep.subr.bf16.mxu0 %v15089_v1  ;;  %v6300_v32 = vsel %vm4960_vm2, %v6295_v25, %v14914_v41  ;;  %v15185_v41 = vld [vmem:[%s16902_s3 + $0x4b4] ss:$12 sps:$4 sm:$0xff]   ;;  %v4865_v36 = vld [vmem:[#allocation4 + $0x28] sm:$0xff] }
 0x344   :  { %v4376_v11 = vpop.f32.mrb[190].mxu1  ;;  %6669 = vmatpush1.bf16.msra.mxu1 %v15080_v37  ;;  %v15192_v9 = vld [vmem:[%s16902_s3 + $0x4b0] ss:$12 sps:$4 sm:$0xff]  }
 0x345   :  { %4404 = vst.msk [vmem:[#allocation4 + $0x178] sm:$0xff] %vm4183_vm3, %v4376_v11  ;;  %v4378_v20 = vpop.f32.mrb[191].mxu1  ;;  %6670 = vmatprep.subr.bf16.mxu1 %v16929_v49  ;;  %6035 = vmatmul.mubr.bf16.gmra.mrb[248].mxu0 %v15106_v62  ;;  %v15216_v11 = vld [vmem:[%s16902_s3 + $0x4d0] ss:$12 sps:$4 sm:$0xff]  }
 0x346   :  { %10746 = vmatprep.mubr.msk.bf16.mxu0 %vm229_vm0, %v5965_v23  ;;  %6598 = vmatpush1.bf16.msra.mxu0 %v15098_v53  ;;  %v15242_v20 = vld [vmem:[%s16902_s3 + $0x4fc] ss:$12 sps:$4 sm:$0xff]  }
 0x347   :  { %6104 = vmatmul.mubr.bf16.gmra.mrb[248].mxu1 %v15106_v62  ;;  %6599 = vmatprep.subr.bf16.mxu0 %v15113_v63 }
 0x348   :  { %10750 = vmatprep.mubr.msk.bf16.mxu1 %vm229_vm0, %v5965_v23  ;;  %6671 = vmatpush1.bf16.msra.mxu1 %v15103_v39  ;;  %v6249_v23 = vld [vmem:[#allocation3 + $0x90] sm:$0xfe] }
 0x349   :  { %6672 = vmatprep.subr.bf16.mxu1 %v16929_v49  ;;  %v6267_v25 = vpack.c.bf16 %v14941_v8, %v6249_v23 }
 0x34a   :  { %6600 = vmatpush1.bf16.msra.mxu0 %v15127_v5 }
 0x34b   :  { %6601 = vmatprep.subr.bf16.mxu0 %v15141_v15 }
 0x34c   :  { %6673 = vmatpush1.bf16.msra.mxu1 %v15132_v7 }
 0x34d   :  { %6674 = vmatprep.subr.bf16.mxu1 %v16929_v49  ;;  %6045 = vmatmul.mubr.bf16.gmra.mrb[252].mxu0 %v5957_v13 }
 0x34e   :  { %10849 = vmatprep.mubr.msk.bf16.mxu0 %vm229_vm0, %v6300_v32  ;;  %6602 = vmatpush1.bf16.msra.mxu0 %v15148_v46 }
 0x34f   :  { %6112 = vmatmul.mubr.bf16.gmra.mrb[252].mxu1 %v5957_v13  ;;  %6603 = vmatprep.subr.bf16.mxu0 %v15162_v10 }
 0x350   :  { %10853 = vmatprep.mubr.msk.bf16.mxu1 %vm229_vm0, %v6300_v32  ;;  %6675 = vmatpush1.bf16.msra.mxu1 %v15153_v31 }
 0x351   :  { %6676 = vmatprep.subr.bf16.mxu1 %v16929_v49 }
 0x352   :  { %6604 = vmatpush1.bf16.msra.mxu0 %v15173_v55 }
 0x353   :  { %6605 = vmatprep.subr.bf16.mxu0 %v15185_v41 }
 0x354   :  { %6677 = vmatpush1.bf16.msra.mxu1 %v15178_v30 }
 0x355   :  { %6678 = vmatprep.subr.bf16.mxu1 %v16929_v49 }
 0x356   :  { %6606 = vmatpush1.bf16.msra.mxu0 %v15192_v9 }
 0x357   :  { %6607 = vmatprep.subr.bf16.mxu0 %v15204_v21 }
 0x358   :  { %6679 = vmatpush1.bf16.msra.mxu1 %v15197_v59 }
 0x359   :  { %6680 = vmatprep.subr.bf16.mxu1 %v16929_v49 }
 0x35a   :  { %6608 = vmatpush1.bf16.msra.mxu0 %v15211_v12 }
 0x35b   :  { %6609 = vmatprep.subr.bf16.mxu0 %v15223_v4 }
 0x35c   :  { %6681 = vmatpush1.bf16.msra.mxu1 %v15216_v11 }
 0x35d   :  { %6682 = vmatprep.subr.bf16.mxu1 %v16929_v49 }
 0x35e   :  { %6610 = vmatpush1.bf16.msra.mxu0 %v15230_v61 }
 0x35f   :  { %v4756_v16 = vpop.f32.mrb[192].mxu0  ;;  %6611 = vmatprep.subr.bf16.mxu0 %v15242_v20 }
 0x360   :  { %v4884_v44 = vadd.f32 %v4756_v16, %v14784_v34  ;;  %v4758_v57 = vpop.f32.mrb[193].mxu0  ;;  %6683 = vmatpush1.bf16.msra.mxu1 %v15235_v24  ;;  %v15256_v34 = vld [vmem:[%s16902_s3 + $0x500] ss:$12 sps:$4 sm:$0xff]  }
 0x361   :  { %v4885_v52 = vadd.f32 %v4758_v57, %v14787_v0  ;;  %v4760_v47 = vpop.f32.mrb[194].mxu0  ;;  %6684 = vmatprep.subr.bf16.mxu1 %v16929_v49 }
 0x362   :  { %v4829_v28 = vpop.f32.mrb[192].mxu1  ;;  %4908 = vst [vmem:[#allocation4] sm:$0xff] %v4884_v44  ;;  %v4887_v13 = vadd.f32 %v4760_v47, %v14802_v17  ;;  %v4762_v32 = vpop.f32.mrb[195].mxu0  ;;  %6612 = vmatpush1.bf16.msra.mxu0 %v15248_v27  ;;  %v15275_v17 = vld [vmem:[%s16902_s3 + $0x510] ss:$12 sps:$4 sm:$0xff]   ;;  %v6280_v44 = vshll.u32 %v6267_v25, 16 }
 0x363   :  { %v4886_v6 = vadd.f32 %v4862_v3, %v4829_v28  ;;  %v4831_v2 = vpop.f32.mrb[193].mxu1  ;;  %v15266_v28 = vld [vmem:[%s16902_s3 + $0x514] ss:$12 sps:$4 sm:$0xff]   ;;  %4909 = vst [vmem:[#allocation4 + $0x8] sm:$0xff] %v4885_v52  ;;  %v4888_v8 = vadd.f32 %v4762_v32, %v14807_v33  ;;  %16932 = vst [vmem:[#allocation15_spill] sm:$0xff] %v15275_v17 }
 0x364   :  { %v4832_v43 = vpop.f32.mrb[194].mxu1  ;;  %16931 = vst [vmem:[#allocation14_spill] sm:$0xff] %v15266_v28  ;;  %4911 = vst [vmem:[#allocation4 + $0x18] sm:$0xff] %v4887_v13  ;;  %6685 = vmatpush1.bf16.msra.mxu1 %v15256_v34  ;;  %v15280_v3 = vld [vmem:[%s16902_s3 + $0x518] ss:$12 sps:$4 sm:$0xff]   ;;  %6613 = vmatprep.subr.bf16.mxu0 %v15266_v28  ;;  %v16934_v13 = vld [vmem:[#allocation12_spill] sm:$0xff] }
 0x365   :  { %4910 = vst.msk [vmem:[#allocation4 + $0x10] sm:$0xff] %vm4183_vm3, %v4886_v6  ;;  %v4889_v0 = vadd.f32 %v4865_v36, %v4832_v43  ;;  %v4834_v16 = vpop.f32.mrb[195].mxu1  ;;  %4912 = vst [vmem:[#allocation4 + $0x20] sm:$0xff] %v4888_v8  ;;  %6686 = vmatprep.subr.bf16.mxu1 %v16929_v49  ;;  %v15287_v33 = vld [vmem:[%s16902_s3 + $0x52c] ss:$12 sps:$4 sm:$0xff]   ;;  %v4868_v2 = vld [vmem:[#allocation4 + $0x40] sm:$0xff] }
 0x366   :  { %16933 = vst [vmem:[#allocation16_spill] sm:$0xff] %v15280_v3  ;;  %v15293_v36 = vld [vmem:[%s16902_s3 + $0x528] ss:$12 sps:$4 sm:$0xff]   ;;  %6614 = vmatpush1.bf16.msra.mxu0 %v15275_v17  ;;  %v4871_v8 = vld [vmem:[#allocation4 + $0x58] sm:$0xff]  ;;  %v6278_v28 = vshrl.u32 %v6267_v25, 16 }
 0x367   :  { %4913 = vst.msk [vmem:[#allocation4 + $0x28] sm:$0xff] %vm4183_vm3, %v4889_v0  ;;  %v4766_v6 = vpop.f32.mrb[196].mxu0  ;;  %6615 = vmatprep.subr.bf16.mxu0 %v15287_v33  ;;  %v4874_v25 = vld [vmem:[#allocation4 + $0x70] sm:$0xff] }
 0x368   :  { %v4890_v23 = vadd.f32 %v4766_v6, %v14833_v54  ;;  %v4768_v47 = vpop.f32.mrb[197].mxu0  ;;  %6687 = vmatpush1.bf16.msra.mxu1 %v15280_v3  ;;  %v15301_v54 = vld [vmem:[%s16902_s3 + $0x530] ss:$12 sps:$4 sm:$0xff]   ;;  %v6282_v6 = vrot.slane %v6280_v44, 1 }
 0x369   :  { %v4891_v0 = vadd.f32 %v4768_v47, %v16934_v13  ;;  %v4770_v32 = vpop.f32.mrb[198].mxu0  ;;  %6688 = vmatprep.subr.bf16.mxu1 %v16929_v49  ;;  %v4870_v13 = vld [vmem:[#allocation4 + $0x50] sm:$0xff] }
 0x36a   :  { %v4837_v57 = vpop.f32.mrb[196].mxu1  ;;  %4914 = vst [vmem:[#allocation4 + $0x30] sm:$0xff] %v4890_v23  ;;  %v4772_v47 = vpop.f32.mrb[199].mxu0  ;;  %6616 = vmatpush1.bf16.msra.mxu0 %v15293_v36  ;;  %v6283_v44 = vor.u32 %v6282_v6, %v6278_v28  ;;  %v4877_v6 = vld [vmem:[#allocation4 + $0x88] sm:$0xff] }
 0x36b   :  { %v4892_v52 = vadd.f32 %v4868_v2, %v4837_v57  ;;  %v4839_v43 = vpop.f32.mrb[197].mxu1  ;;  %v16935_v57 = vld [vmem:[#allocation13_spill] sm:$0xff]  ;;  %4915 = vst [vmem:[#allocation4 + $0x38] sm:$0xff] %v4891_v0  ;;  %v4894_v17 = vadd.f32 %v4870_v13, %v4772_v47  ;;  %6872 = vmatprep.subr.bf16.mxu0 %v14969_v60 }
 0x36c   :  { %v4840_v16 = vpop.f32.mrb[198].mxu1  ;;  %v4893_v2 = vadd.f32 %v4770_v32, %v16935_v57  ;;  %6689 = vmatpush1.bf16.msra.mxu1 %v15301_v54  ;;  %v6288_v23 = vsel %vm4960_vm2, %v6283_v44, %v14971_v29  ;;  %v4873_v57 = vld [vmem:[#allocation4 + $0x68] sm:$0xff]  ;;  %v4875_v29 = vld [vmem:[#allocation4 + $0x78] sm:$0xff] }
 0x36d   :  { %4916 = vst.msk [vmem:[#allocation4 + $0x40] sm:$0xff] %vm4183_vm3, %v4892_v52  ;;  %v4895_v43 = vadd.f32 %v4871_v8, %v4840_v16  ;;  %v4842_v3 = vpop.f32.mrb[199].mxu1  ;;  %4918 = vst [vmem:[#allocation4 + $0x50] sm:$0xff] %v4894_v17  ;;  %6945 = vmatprep.subr.bf16.mxu1 %v16929_v49  ;;  %v4872_v52 = vld [vmem:[#allocation4 + $0x60] sm:$0xff]  ;;  %6622 = vmatmul.mubr.bf16.vlgmr.msra.gmra.mrb[0].mxu0 %v6288_v23 }
 0x36e   :  { %4917 = vst [vmem:[#allocation4 + $0x48] sm:$0xff] %v4893_v2  ;;  %10850 = vmatprep.mubr.msk.bf16.mxu0 %vm229_vm0, %v15002_v19  ;;  %6873 = vmatpush1.bf16.msra.mxu0 %v14983_v48 }
 0x36f   :  { %4919 = vst.msk [vmem:[#allocation4 + $0x58] sm:$0xff] %vm4183_vm3, %v4895_v43  ;;  %v4776_v3 = vpop.f32.mrb[200].mxu0  ;;  %6695 = vmatmul.mubr.bf16.vlgmr.msra.gmra.mrb[0].mxu1 %v6288_v23  ;;  %v6266_v43 = vld [vmem:[#allocation3 + $0x118] sm:$0x1]  ;;  %v4876_v23 = vld [vmem:[#allocation4 + $0x80] sm:$0xff]  ;;  %6874 = vmatprep.subr.bf16.mxu0 %v14998_v38 }
 0x370   :  { %v4896_v32 = vadd.f32 %v4872_v52, %v4776_v3  ;;  %v4778_v8 = vpop.f32.mrb[201].mxu0  ;;  %10854 = vmatprep.mubr.msk.bf16.mxu1 %vm229_vm0, %v15002_v19  ;;  %6946 = vmatpush1.bf16.msra.mxu1 %v14991_v45  ;;  %v6276_v48 = vpack.c.bf16 %v6266_v43, %v6266_v43  ;;  %v4878_v52 = vld [vmem:[#allocation4 + $0x90] sm:$0xff]  ;;  %v4880_v38 = vld [vmem:[#allocation4 + $0xa0] sm:$0xff] }
 0x371   :  { %v4897_v60 = vadd.f32 %v4873_v57, %v4778_v8  ;;  %v4780_v28 = vpop.f32.mrb[202].mxu0  ;;  %6947 = vmatprep.subr.bf16.mxu1 %v16929_v49  ;;  %v4879_v8 = vld [vmem:[#allocation4 + $0x98] sm:$0xff]  ;;  %v4882_v43 = vld [vmem:[#allocation4 + $0xb0] sm:$0xff] }
 0x372   :  { %v4845_v0 = vpop.f32.mrb[200].mxu1  ;;  %4920 = vst [vmem:[#allocation4 + $0x60] sm:$0xff] %v4896_v32  ;;  %v4899_v47 = vadd.f32 %v4875_v29, %v4780_v28  ;;  %v4782_v44 = vpop.f32.mrb[203].mxu0  ;;  %6875 = vmatpush1.bf16.msra.mxu0 %v15015_v51  ;;  %v6345_v51 = vshll.u32 %v6276_v48, 16  ;;  %v4883_v29 = vld [vmem:[#allocation4 + $0xb8] sm:$0xff] }
 0x373   :  { %v4898_v16 = vadd.f32 %v4874_v25, %v4845_v0  ;;  %v4847_v2 = vpop.f32.mrb[201].mxu1  ;;  %4921 = vst [vmem:[#allocation4 + $0x68] sm:$0xff] %v4897_v60  ;;  %v4900_v19 = vadd.f32 %v4876_v23, %v4782_v44  ;;  %6876 = vmatprep.subr.bf16.mxu0 %v15029_v35  ;;  %v4881_v60 = vld [vmem:[#allocation4 + $0xa8] sm:$0xff] }
 0x374   :  { %v4848_v17 = vpop.f32.mrb[202].mxu1  ;;  %4923 = vst [vmem:[#allocation4 + $0x78] sm:$0xff] %v4899_v47  ;;  %6948 = vmatpush1.bf16.msra.mxu1 %v15021_v42  ;;  %v6265_v2 = vld [vmem:[#allocation3 + $0x110] sm:$0x1]  ;;  %v6804_v23 = vld [vmem:[#allocation3 + $0x28] sm:$0xff] }
 0x375   :  { %4922 = vst.msk [vmem:[#allocation4 + $0x70] sm:$0xff] %vm4183_vm3, %v4898_v16  ;;  %v4901_v13 = vadd.f32 %v4877_v6, %v4848_v17  ;;  %v4850_v3 = vpop.f32.mrb[203].mxu1  ;;  %4924 = vst [vmem:[#allocation4 + $0x80] sm:$0xff] %v4900_v19  ;;  %6949 = vmatprep.subr.bf16.mxu1 %v16929_v49  ;;  %6632 = vmatmul.mubr.bf16.gmra.mrb[4].mxu0 %v15048_v14 }
 0x376   :  { %10851 = vmatprep.mubr.msk.bf16.mxu0 %vm229_vm0, %v15061_v26  ;;  %6877 = vmatpush1.bf16.msra.mxu0 %v15040_v50  ;;  %v6347_v50 = vrot.slane %v6345_v51, 1  ;;  %v6808_v51 = vld [vmem:[#allocation3 + $0x48] sm:$0xff] }
 0x377   :  { %4925 = vst.msk [vmem:[#allocation4 + $0x88] sm:$0xff] %vm4183_vm3, %v4901_v13  ;;  %v4786_v45 = vpop.f32.mrb[204].mxu0  ;;  %6703 = vmatmul.mubr.bf16.gmra.mrb[4].mxu1 %v15048_v14  ;;  %6878 = vmatprep.subr.bf16.mxu0 %v15055_v58  ;;  %v6275_v13 = vpack.c.bf16 %v6265_v2, %v6265_v2  ;;  %v15344_v58 = vld [vmem:[#allocation3 + $0x18] sm:$0xff] }
 0x378   :  { %v4902_v25 = vadd.f32 %v4878_v52, %v4786_v45  ;;  %v4788_v16 = vpop.f32.mrb[205].mxu0  ;;  %10855 = vmatprep.mubr.msk.bf16.mxu1 %vm229_vm0, %v15061_v26  ;;  %6950 = vmatpush1.bf16.msra.mxu1 %v15045_v56  ;;  %v6806_v56 = vld [vmem:[#allocation3 + $0x38] sm:$0xff]  ;;  %v6348_v3 = vsel %vm4960_vm2, %v15091_v18, %v6347_v50 }
 0x379   :  { %v4903_v42 = vadd.f32 %v4879_v8, %v4788_v16  ;;  %v4790_v35 = vpop.f32.mrb[206].mxu0  ;;  %6951 = vmatprep.subr.bf16.mxu1 %v16929_v49  ;;  %v6337_v44 = vshll.u32 %v6275_v13, 16  ;;  %v6820_v19 = vpack.c.bf16 %v6806_v56, %v6804_v23  ;;  %v6810_v52 = vld [vmem:[#allocation3 + $0x58] sm:$0xff]  ;;  %v5195_v8 = vld [vmem:[#allocation4 + $0x100] sm:$0xff]  ;;  %v5197_v23 = vld [vmem:[#allocation4 + $0x110] sm:$0xff] }
 0x37a   :  { %v4853_v0 = vpop.f32.mrb[204].mxu1  ;;  %4926 = vst [vmem:[#allocation4 + $0x90] sm:$0xff] %v4902_v25  ;;  %v4905_v14 = vadd.f32 %v4881_v60, %v4790_v35  ;;  %v4792_v6 = vpop.f32.mrb[207].mxu0  ;;  %6879 = vmatpush1.bf16.msra.mxu0 %v15074_v22  ;;  %v6800_v22 = vld [vmem:[#allocation3 + $0x8] sm:$0xfc]  ;;  %v5194_v35 = vld [vmem:[#allocation4 + $0xf8] sm:$0xff] }
 0x37b   :  { %v4904_v32 = vadd.f32 %v4880_v38, %v4853_v0  ;;  %v4855_v57 = vpop.f32.mrb[205].mxu1  ;;  %4927 = vst [vmem:[#allocation4 + $0x98] sm:$0xff] %v4903_v42  ;;  %v4906_v26 = vadd.f32 %v4882_v43, %v4792_v6  ;;  %6880 = vmatprep.subr.bf16.mxu0 %v15089_v1  ;;  %v6339_v1 = vrot.slane %v6337_v44, 1  ;;  %v15395_v0 = vld [vmem:[#allocation3 + $0x10] sm:$0xff]  ;;  %v6803_v38 = vld [vmem:[#allocation3 + $0x20] sm:$0xff]  ;;  %v5196_v43 = vld [vmem:[#allocation4 + $0x108] sm:$0xff] }
 0x37c   :  { %v4856_v28 = vpop.f32.mrb[206].mxu1  ;;  %4929 = vst [vmem:[#allocation4 + $0xa8] sm:$0xff] %v4905_v14  ;;  %6952 = vmatpush1.bf16.msra.mxu1 %v15080_v37  ;;  %v6818_v37 = vpack.c.bf16 %v15344_v58, %v6800_v22  ;;  %v6799_v60 = vld [vmem:[#allocation3] sm:$0xfc]  ;;  %v16938_v14 = vld [vmem:[#allocation16_spill] sm:$0xff] }
 0x37d   :  { %4928 = vst.msk [vmem:[#allocation4 + $0xa0] sm:$0xff] %vm4183_vm3, %v4904_v32  ;;  %v4907_v17 = vadd.f32 %v4883_v29, %v4856_v28  ;;  %v4858_v47 = vpop.f32.mrb[207].mxu1  ;;  %4930 = vst [vmem:[#allocation4 + $0xb0] sm:$0xff] %v4906_v26  ;;  %6953 = vmatprep.subr.bf16.mxu1 %v16929_v49  ;;  %6642 = vmatmul.mubr.bf16.gmra.mrb[8].mxu0 %v15106_v62  ;;  %v6340_v48 = vsel %vm4960_vm2, %v15136_v40, %v6339_v1  ;;  %v5193_v32 = vld [vmem:[#allocation4 + $0xf0] sm:$0xff]  ;;  %v16937_v29 = vld [vmem:[#allocation15_spill] sm:$0xff] }
 0x37e   :  { %10852 = vmatprep.mubr.msk.bf16.mxu0 %vm229_vm0, %v6348_v3  ;;  %6881 = vmatpush1.bf16.msra.mxu0 %v15098_v53  ;;  %v6841_v18 = vrot.slane %v6818_v37, 1  ;;  %v6822_v28 = vpack.c.bf16 %v6810_v52, %v6808_v51  ;;  %v5198_v26 = vld [vmem:[#allocation4 + $0x118] sm:$0xff]  ;;  %v6817_v13 = vpack.c.bf16 %v15395_v0, %v6799_v60  ;;  %v6809_v1 = vld [vmem:[#allocation3 + $0x50] sm:$0xff]  ;;  %v16939_v60 = vld [vmem:[#allocation8_spill] sm:$0xff] }
 0x37f   :  { %4931 = vst.msk [vmem:[#allocation4 + $0xb8] sm:$0xff] %vm4183_vm3, %v4907_v17  ;;  %6711 = vmatmul.mubr.bf16.gmra.mrb[8].mxu1 %v15106_v62  ;;  %6882 = vmatprep.subr.bf16.mxu0 %v15113_v63  ;;  %v15357_v62 = vrot.slane %v6820_v19, 1  ;;  %v5187_v63 = vld [vmem:[#allocation4 + $0xc0] sm:$0xff] }
 0x380   :  { %10856 = vmatprep.mubr.msk.bf16.mxu1 %vm229_vm0, %v6348_v3  ;;  %6954 = vmatpush1.bf16.msra.mxu1 %v15103_v39  ;;  %v15406_v19 = vld [vmem:[%s16902_s3 + $0x544] ss:$12 sps:$4 sm:$0xff]  }
 0x381   :  { %6955 = vmatprep.subr.bf16.mxu1 %v16929_v49  ;;  %v6843_v53 = vsel %vm6837_vm1, %v6841_v18, %v15357_v62  ;;  %v6838_v18 = vrot.slane %v6817_v13, 1  ;;  %v15474_v51 = vld [vmem:[%s16902_s3 + $0x578] ss:$12 sps:$4 sm:$0xff]   ;;  %v15510_v13 = vld [vmem:[%s16902_s3 + $0x588] ss:$12 sps:$4 sm:$0xff]  }
 0x382   :  { %6883 = vmatpush1.bf16.msra.mxu0 %v15127_v5 }
 0x383   :  { %6884 = vmatprep.subr.bf16.mxu0 %v15141_v15 }
 0x384   :  { %6956 = vmatpush1.bf16.msra.mxu1 %v15132_v7  ;;  %v5189_v7 = vld [vmem:[#allocation4 + $0xd0] sm:$0xff] }
 0x385   :  { %6957 = vmatprep.subr.bf16.mxu1 %v16929_v49  ;;  %6652 = vmatmul.mubr.bf16.gmra.mrb[12].mxu0 %v6340_v48 }
 0x386   :  { %10857 = vmatprep.mubr.msk.bf16.mxu0 %vm229_vm0, %v6843_v53  ;;  %6885 = vmatpush1.bf16.msra.mxu0 %v15148_v46 }
 0x387   :  { %6719 = vmatmul.mubr.bf16.gmra.mrb[12].mxu1 %v6340_v48  ;;  %6886 = vmatprep.subr.bf16.mxu0 %v15162_v10  ;;  %v15418_v48 = vld [vmem:[%s16902_s3 + $0x540] ss:$12 sps:$4 sm:$0xff]  }
 0x388   :  { %10861 = vmatprep.mubr.msk.bf16.mxu1 %vm229_vm0, %v6843_v53  ;;  %6958 = vmatpush1.bf16.msra.mxu1 %v15153_v31  ;;  %v5188_v31 = vld [vmem:[#allocation4 + $0xc8] sm:$0xff] }
 0x389   :  { %6959 = vmatprep.subr.bf16.mxu1 %v16929_v49  ;;  %v15425_v53 = vld [vmem:[%s16902_s3 + $0x548] ss:$12 sps:$4 sm:$0xff]  }
 0x38a   :  { %6887 = vmatpush1.bf16.msra.mxu0 %v15173_v55 }
 0x38b   :  { %6888 = vmatprep.subr.bf16.mxu0 %v15185_v41  ;;  %v5190_v41 = vld [vmem:[#allocation4 + $0xd8] sm:$0xff] }
 0x38c   :  { %6960 = vmatpush1.bf16.msra.mxu1 %v15178_v30 }
 0x38d   :  { %6961 = vmatprep.subr.bf16.mxu1 %v16929_v49 }
 0x38e   :  { %6889 = vmatpush1.bf16.msra.mxu0 %v15192_v9 }
 0x38f   :  { %6890 = vmatprep.subr.bf16.mxu0 %v15204_v21 }
 0x390   :  { %6962 = vmatpush1.bf16.msra.mxu1 %v15197_v59  ;;  %v5192_v59 = vld [vmem:[#allocation4 + $0xe8] sm:$0xff] }
 0x391   :  { %6963 = vmatprep.subr.bf16.mxu1 %v16929_v49 }
 0x392   :  { %6891 = vmatpush1.bf16.msra.mxu0 %v15211_v12 }
 0x393   :  { %6892 = vmatprep.subr.bf16.mxu0 %v15223_v4  ;;  %v5191_v4 = vld [vmem:[#allocation4 + $0xe0] sm:$0xff] }
 0x394   :  { %6964 = vmatpush1.bf16.msra.mxu1 %v15216_v11 }
 0x395   :  { %6965 = vmatprep.subr.bf16.mxu1 %v16929_v49 }
 0x396   :  { %6893 = vmatpush1.bf16.msra.mxu0 %v15230_v61 }
 0x397   :  { %6894 = vmatprep.subr.bf16.mxu0 %v15242_v20  ;;  %v16936_v20 = vld [vmem:[#allocation14_spill] sm:$0xff] }
 0x398   :  { %v5083_v39 = vpop.f32.mrb[208].mxu0  ;;  %6966 = vmatpush1.bf16.msra.mxu1 %v15235_v24  ;;  %v6805_v24 = vld [vmem:[#allocation3 + $0x30] sm:$0xff] }
 0x399   :  { %v5211_v40 = vadd.f32 %v5187_v63, %v5083_v39  ;;  %v5085_v46 = vpop.f32.mrb[209].mxu0  ;;  %6967 = vmatprep.subr.bf16.mxu1 %v16929_v49  ;;  %v6819_v57 = vpack.c.bf16 %v6805_v24, %v6803_v38  ;;  %v6807_v39 = vld [vmem:[#allocation3 + $0x40] sm:$0xff] }
 0x39a   :  { %v5156_v5 = vpop.f32.mrb[208].mxu1  ;;  %v5212_v55 = vadd.f32 %v5188_v31, %v5085_v46  ;;  %v5087_v30 = vpop.f32.mrb[210].mxu0  ;;  %6895 = vmatpush1.bf16.msra.mxu0 %v15248_v27  ;;  %v5199_v63 = vld [vmem:[#allocation4 + $0x120] sm:$0xff] }
 0x39b   :  { %v5213_v15 = vadd.f32 %v5189_v7, %v5156_v5  ;;  %v5158_v10 = vpop.f32.mrb[209].mxu1  ;;  %5235 = vst [vmem:[#allocation4 + $0xc0] sm:$0xff] %v5211_v40  ;;  %v5214_v21 = vadd.f32 %v5190_v41, %v5087_v30  ;;  %v5089_v11 = vpop.f32.mrb[211].mxu0  ;;  %6896 = vmatprep.subr.bf16.mxu0 %v16936_v20  ;;  %v15408_v37 = vrot.slane %v6819_v57, 1  ;;  %v5201_v7 = vld [vmem:[#allocation4 + $0x130] sm:$0xff]  ;;  %v5200_v30 = vld [vmem:[#allocation4 + $0x128] sm:$0xff] }
 0x39c   :  { %v5159_v9 = vpop.f32.mrb[210].mxu1  ;;  %5236 = vst [vmem:[#allocation4 + $0xc8] sm:$0xff] %v5212_v55  ;;  %v5215_v61 = vadd.f32 %v5191_v4, %v5089_v11  ;;  %6968 = vmatpush1.bf16.msra.mxu1 %v15256_v34  ;;  %v15432_v40 = vld [vmem:[%s16902_s3 + $0x55c] ss:$12 sps:$4 sm:$0xff]   ;;  %v15454_v24 = vld [vmem:[%s16902_s3 + $0x560] ss:$12 sps:$4 sm:$0xff]  }
 0x39d   :  { %5237 = vst.msk [vmem:[#allocation4 + $0xd0] sm:$0xff] %vm4183_vm3, %v5213_v15  ;;  %v5216_v12 = vadd.f32 %v5192_v59, %v5159_v9  ;;  %v5161_v45 = vpop.f32.mrb[211].mxu1  ;;  %5238 = vst [vmem:[#allocation4 + $0xd8] sm:$0xff] %v5214_v21  ;;  %6969 = vmatprep.subr.bf16.mxu1 %v16929_v49  ;;  %v6821_v15 = vpack.c.bf16 %v6809_v1, %v6807_v39  ;;  %v15446_v59 = vld [vmem:[%s16902_s3 + $0x558] ss:$12 sps:$4 sm:$0xff]   ;;  %v5204_v4 = vld [vmem:[#allocation4 + $0x148] sm:$0xff] }
 0x39e   :  { %5239 = vst [vmem:[#allocation4 + $0xe0] sm:$0xff] %v5215_v61  ;;  %6897 = vmatpush1.bf16.msra.mxu0 %v16937_v29  ;;  %v5203_v20 = vld [vmem:[#allocation4 + $0x140] sm:$0xff]  ;;  %v15469_v57 = vld [vmem:[%s16902_s3 + $0x570] ss:$12 sps:$4 sm:$0xff]  }
 0x39f   :  { %5240 = vst.msk [vmem:[#allocation4 + $0xe8] sm:$0xff] %vm4183_vm3, %v5216_v12  ;;  %6898 = vmatprep.subr.bf16.mxu0 %v15287_v33  ;;  %v15411_v33 = vrot.slane %v6822_v28, 1  ;;  %v5202_v12 = vld [vmem:[#allocation4 + $0x138] sm:$0xff]  ;;  %v15532_v1 = vld [vmem:[%s16902_s3 + $0x5a0] ss:$12 sps:$4 sm:$0xff]   ;;  %v16940_v39 = vld [vmem:[#allocation9_spill] sm:$0xff] }
 0x3a0   :  { %v5093_v25 = vpop.f32.mrb[212].mxu0  ;;  %6970 = vmatpush1.bf16.msra.mxu1 %v16938_v14 }
 0x3a1   :  { %v5217_v2 = vadd.f32 %v5193_v32, %v5093_v25  ;;  %v5095_v27 = vpop.f32.mrb[213].mxu0  ;;  %6971 = vmatprep.subr.bf16.mxu1 %v16929_v49  ;;  %v15437_v46 = vsel %vm6837_vm1, %v15357_v62, %v15411_v33  ;;  %v6844_v32 = vrot.slane %v6821_v15, 1  ;;  %v15494_v28 = vsel %vm6837_vm1, %v15411_v33, %v16939_v60  ;;  %v6815_v33 = vld [vmem:[#allocation3 + $0x80] sm:$0x3]  ;;  %v15561_v15 = vld [vmem:[%s16902_s3 + $0x5b8] ss:$12 sps:$4 sm:$0xff]  }
 0x3a2   :  { %v5164_v16 = vpop.f32.mrb[212].mxu1  ;;  %v5218_v17 = vadd.f32 %v5194_v35, %v5095_v27  ;;  %v5097_v6 = vpop.f32.mrb[214].mxu0  ;;  %6899 = vmatpush1.bf16.msra.mxu0 %v15293_v36  ;;  %v6840_v36 = vsel %vm6837_vm1, %v6838_v18, %v15408_v37  ;;  %v5207_v35 = vld [vmem:[#allocation4 + $0x160] sm:$0xff]  ;;  %v15537_v18 = vld [vmem:[%s16902_s3 + $0x5a8] ss:$12 sps:$4 sm:$0xff]  }
 0x3a3   :  { %v5219_v42 = vadd.f32 %v5195_v8, %v5164_v16  ;;  %v5166_v34 = vpop.f32.mrb[213].mxu1  ;;  %5241 = vst [vmem:[#allocation4 + $0xf0] sm:$0xff] %v5217_v2  ;;  %v5220_v50 = vadd.f32 %v5196_v43, %v5097_v6  ;;  %v5099_v44 = vpop.f32.mrb[215].mxu0  ;;  %7435 = vmatprep.subr.bf16.mxu0 %v15406_v19  ;;  %v15461_v16 = vld [vmem:[%s16902_s3 + $0x574] ss:$12 sps:$4 sm:$0xff]   ;;  %v15478_v2 = vsel %vm6837_vm1, %v15408_v37, %v6844_v32 }
 0x3a4   :  { %v5167_v47 = vpop.f32.mrb[214].mxu1  ;;  %5242 = vst [vmem:[#allocation4 + $0xf8] sm:$0xff] %v5218_v17  ;;  %v5221_v22 = vadd.f32 %v5197_v23, %v5099_v44  ;;  %6972 = vmatpush1.bf16.msra.mxu1 %v15301_v54  ;;  %v6816_v8 = vld [vmem:[#allocation3 + $0x88] sm:$0x3]  ;;  %v15487_v34 = vld [vmem:[%s16902_s3 + $0x58c] ss:$12 sps:$4 sm:$0xff]  }
 0x3a5   :  { %5243 = vst.msk [vmem:[#allocation4 + $0x100] sm:$0xff] %vm4183_vm3, %v5219_v42  ;;  %v5222_v56 = vadd.f32 %v5198_v26, %v5167_v47  ;;  %v5169_v3 = vpop.f32.mrb[215].mxu1  ;;  %5244 = vst [vmem:[#allocation4 + $0x108] sm:$0xff] %v5220_v50  ;;  %7508 = vmatprep.subr.bf16.mxu1 %v16929_v49  ;;  %6905 = vmatmul.mubr.bf16.vlgmr.msra.gmra.mrb[16].mxu0 %v6840_v36  ;;  %v6826_v6 = vpack.c.bf16 %v6816_v8, %v6816_v8  ;;  %v5210_v26 = vld [vmem:[#allocation4 + $0x178] sm:$0xff] }
 0x3a6   :  { %5245 = vst [vmem:[#allocation4 + $0x110] sm:$0xff] %v5221_v22  ;;  %10858 = vmatprep.mubr.msk.bf16.mxu0 %vm229_vm0, %v15437_v46  ;;  %7436 = vmatpush1.bf16.msra.mxu0 %v15418_v48  ;;  %v15524_v3 = vld [vmem:[%s16902_s3 + $0x5a4] ss:$12 sps:$4 sm:$0xff]  }
 0x3a7   :  { %5246 = vst.msk [vmem:[#allocation4 + $0x118] sm:$0xff] %vm4183_vm3, %v5222_v56  ;;  %6978 = vmatmul.mubr.bf16.vlgmr.msra.gmra.mrb[16].mxu1 %v6840_v36  ;;  %7437 = vmatprep.subr.bf16.mxu0 %v15432_v40  ;;  %v15515_v56 = vld [vmem:[%s16902_s3 + $0x590] ss:$12 sps:$4 sm:$0xff]   ;;  %v6854_v22 = vrot.slane %v6826_v6, 1  ;;  %v15541_v36 = vsel %vm6837_vm1, %v6844_v32, %v16940_v39  ;;  %v15656_v32 = vld [vmem:[%s16902_s3 + $0x634] ss:$12 sps:$4 sm:$0xff]  }
 0x3a8   :  { %v5103_v54 = vpop.f32.mrb[216].mxu0  ;;  %10862 = vmatprep.mubr.msk.bf16.mxu1 %vm229_vm0, %v15437_v46  ;;  %7509 = vmatpush1.bf16.msra.mxu1 %v15425_v53  ;;  %v15663_v8 = vld [vmem:[%s16902_s3 + $0x630] ss:$12 sps:$4 sm:$0xff]  }
 0x3a9   :  { %v5223_v31 = vadd.f32 %v5199_v63, %v5103_v54  ;;  %v5105_v55 = vpop.f32.mrb[217].mxu0  ;;  %7510 = vmatprep.subr.bf16.mxu1 %v16929_v49  ;;  %v15548_v54 = vld [vmem:[%s16902_s3 + $0x5bc] ss:$12 sps:$4 sm:$0xff]   ;;  %v6825_v63 = vpack.c.bf16 %v6815_v33, %v6815_v33 }
 0x3aa   :  { %v5172_v5 = vpop.f32.mrb[216].mxu1  ;;  %v5224_v9 = vadd.f32 %v5200_v30, %v5105_v55  ;;  %v5107_v21 = vpop.f32.mrb[218].mxu0  ;;  %7438 = vmatpush1.bf16.msra.mxu0 %v15446_v59  ;;  %v15574_v30 = vld [vmem:[%s16902_s3 + $0x5d4] ss:$12 sps:$4 sm:$0xff]   ;;  %v5799_v33 = vld [vmem:[#allocation4 + $0x28] sm:$0xff] }
 0x3ab   :  { %v5225_v10 = vadd.f32 %v5201_v7, %v5172_v5  ;;  %v5174_v41 = vpop.f32.mrb[217].mxu1  ;;  %5247 = vst [vmem:[#allocation4 + $0x120] sm:$0xff] %v5223_v31  ;;  %v5226_v45 = vadd.f32 %v5202_v12, %v5107_v21  ;;  %v5109_v52 = vpop.f32.mrb[219].mxu0  ;;  %7439 = vmatprep.subr.bf16.mxu0 %v15461_v16  ;;  %v6855_v5 = vsel %vm6837_vm1, %v16939_v60, %v6854_v22  ;;  %v7140_v7 = vld [vmem:[#allocation3 + $0x8] sm:$0xfc]  ;;  %v6852_v55 = vrot.slane %v6825_v63, 1 }
 0x3ac   :  { %v5175_v11 = vpop.f32.mrb[218].mxu1  ;;  %5248 = vst [vmem:[#allocation4 + $0x128] sm:$0xff] %v5224_v9  ;;  %v5227_v25 = vadd.f32 %v5203_v20, %v5109_v52  ;;  %7511 = vmatpush1.bf16.msra.mxu1 %v15454_v24  ;;  %v15566_v31 = vld [vmem:[%s16902_s3 + $0x5c0] ss:$12 sps:$4 sm:$0xff]   ;;  %v15581_v41 = vld [vmem:[%s16902_s3 + $0x5d0] ss:$12 sps:$4 sm:$0xff]  }
 0x3ad   :  { %5249 = vst.msk [vmem:[#allocation4 + $0x130] sm:$0xff] %vm4183_vm3, %v5225_v10  ;;  %v5228_v61 = vadd.f32 %v5204_v4, %v5175_v11  ;;  %v5177_v38 = vpop.f32.mrb[219].mxu1  ;;  %5250 = vst [vmem:[#allocation4 + $0x138] sm:$0xff] %v5226_v45  ;;  %7512 = vmatprep.subr.bf16.mxu1 %v16929_v49  ;;  %6915 = vmatmul.mubr.bf16.gmra.mrb[20].mxu0 %v15478_v2  ;;  %v7158_v10 = vpack.c.bf16 %v15344_v58, %v7140_v7  ;;  %v15586_v9 = vld [vmem:[%s16902_s3 + $0x5d8] ss:$12 sps:$4 sm:$0xff]  }
 0x3ae   :  { %5251 = vst [vmem:[#allocation4 + $0x140] sm:$0xff] %v5227_v25  ;;  %10859 = vmatprep.mubr.msk.bf16.mxu0 %vm229_vm0, %v15494_v28  ;;  %7440 = vmatpush1.bf16.msra.mxu0 %v15469_v57  ;;  %v6853_v21 = vsel %vm6837_vm1, %v16940_v39, %v6852_v55  ;;  %v15595_v12 = vld [vmem:[%s16902_s3 + $0x5ec] ss:$12 sps:$4 sm:$0xff]   ;;  %v15606_v4 = vld [vmem:[%s16902_s3 + $0x5e8] ss:$12 sps:$4 sm:$0xff]  }
 0x3af   :  { %5252 = vst.msk [vmem:[#allocation4 + $0x148] sm:$0xff] %vm4183_vm3, %v5228_v61  ;;  %6986 = vmatmul.mubr.bf16.gmra.mrb[20].mxu1 %v15478_v2  ;;  %7441 = vmatprep.subr.bf16.mxu0 %v15487_v34  ;;  %v7180_v58 = vrot.slane %v7158_v10, 1  ;;  %v15611_v45 = vld [vmem:[%s16902_s3 + $0x5f0] ss:$12 sps:$4 sm:$0xff]   ;;  %v15625_v61 = vld [vmem:[%s16902_s3 + $0x600] ss:$12 sps:$4 sm:$0xff]  }
 0x3b0   :  { %v15482_v42 = vpop.f32.mrb[220].mxu0  ;;  %10863 = vmatprep.mubr.msk.bf16.mxu1 %vm229_vm0, %v15494_v28  ;;  %7513 = vmatpush1.bf16.msra.mxu1 %v15474_v51  ;;  %v15630_v52 = vld [vmem:[%s16902_s3 + $0x608] ss:$12 sps:$4 sm:$0xff]   ;;  %v15644_v38 = vld [vmem:[%s16902_s3 + $0x618] ss:$12 sps:$4 sm:$0xff]  }
 0x3b1   :  { %v15496_v14 = vpop.f32.mrb[221].mxu0  ;;  %7514 = vmatprep.subr.bf16.mxu1 %v16929_v49  ;;  %v7182_v11 = vsel %vm6837_vm1, %v7180_v58, %v15357_v62  ;;  %v15618_v62 = vld [vmem:[%s16902_s3 + $0x604] ss:$12 sps:$4 sm:$0xff]   ;;  %v15637_v20 = vld [vmem:[%s16902_s3 + $0x61c] ss:$12 sps:$4 sm:$0xff]  }
 0x3b2   :  { %v5180_v27 = vpop.f32.mrb[220].mxu1  ;;  %v15502_v43 = vpop.f32.mrb[222].mxu0  ;;  %7442 = vmatpush1.bf16.msra.mxu0 %v15510_v13  ;;  %v15649_v25 = vld [vmem:[%s16902_s3 + $0x620] ss:$12 sps:$4 sm:$0xff]   ;;  %v15693_v39 = vld [vmem:[%s16902_s3 + $0x650] ss:$12 sps:$4 sm:$0xff]  }
 0x3b3   :  { %v5231_v29 = vadd.f32 %v5207_v35, %v5180_v27  ;;  %v5182_v17 = vpop.f32.mrb[221].mxu1  ;;  %v15517_v44 = vpop.f32.mrb[223].mxu0  ;;  %7443 = vmatprep.subr.bf16.mxu0 %v15524_v3  ;;  %v15668_v27 = vld [vmem:[%s16902_s3 + $0x638] ss:$12 sps:$4 sm:$0xff]   ;;  %v15711_v55 = vld [vmem:[%s16902_s3 + $0x660] ss:$12 sps:$4 sm:$0xff]  }
 0x3b4   :  { %v5183_v47 = vpop.f32.mrb[222].mxu1  ;;  %7515 = vmatpush1.bf16.msra.mxu1 %v15515_v56  ;;  %v15675_v35 = vld [vmem:[%s16902_s3 + $0x64c] ss:$12 sps:$4 sm:$0xff]   ;;  %v5796_v17 = vld [vmem:[#allocation4 + $0x10] sm:$0xff] }
 0x3b5   :  { %5255 = vst.msk [vmem:[#allocation4 + $0x160] sm:$0xff] %vm4183_vm3, %v5231_v29  ;;  %v5234_v50 = vadd.f32 %v5210_v26, %v5183_v47  ;;  %v5185_v23 = vpop.f32.mrb[223].mxu1  ;;  %7516 = vmatprep.subr.bf16.mxu1 %v16929_v49  ;;  %6925 = vmatmul.mubr.bf16.gmra.mrb[24].mxu0 %v15541_v36  ;;  %v15703_v10 = vld [vmem:[%s16902_s3 + $0x664] ss:$12 sps:$4 sm:$0xff]   ;;  %v15716_v58 = vld [vmem:[%s16902_s3 + $0x668] ss:$12 sps:$4 sm:$0xff]  }
 0x3b6   :  { %10860 = vmatprep.mubr.msk.bf16.mxu0 %vm229_vm0, %v6855_v5  ;;  %7444 = vmatpush1.bf16.msra.mxu0 %v15532_v1 }
 0x3b7   :  { %5258 = vst.msk [vmem:[#allocation4 + $0x178] sm:$0xff] %vm4183_vm3, %v5234_v50  ;;  %6994 = vmatmul.mubr.bf16.gmra.mrb[24].mxu1 %v15541_v36  ;;  %7445 = vmatprep.subr.bf16.mxu0 %v15548_v54  ;;  %v15684_v50 = vld [vmem:[%s16902_s3 + $0x648] ss:$12 sps:$4 sm:$0xff]  }
 0x3b8   :  { %10864 = vmatprep.mubr.msk.bf16.mxu1 %vm229_vm0, %v6855_v5  ;;  %7517 = vmatpush1.bf16.msra.mxu1 %v15537_v18 }
 0x3b9   :  { %7518 = vmatprep.subr.bf16.mxu1 %v16929_v49 }
 0x3ba   :  { %7446 = vmatpush1.bf16.msra.mxu0 %v15561_v15 }
 0x3bb   :  { %7447 = vmatprep.subr.bf16.mxu0 %v15574_v30 }
 0x3bc   :  { %7519 = vmatpush1.bf16.msra.mxu1 %v15566_v31 }
 0x3bd   :  { %7520 = vmatprep.subr.bf16.mxu1 %v16929_v49  ;;  %6935 = vmatmul.mubr.bf16.gmra.mrb[28].mxu0 %v6853_v21 }
 0x3be   :  { %10963 = vmatprep.mubr.msk.bf16.mxu0 %vm229_vm0, %v7182_v11  ;;  %7448 = vmatpush1.bf16.msra.mxu0 %v15581_v41 }
 0x3bf   :  { %7002 = vmatmul.mubr.bf16.gmra.mrb[28].mxu1 %v6853_v21  ;;  %7449 = vmatprep.subr.bf16.mxu0 %v15595_v12  ;;  %v15723_v21 = vld [vmem:[%s16902_s3 + $0x67c] ss:$12 sps:$4 sm:$0xff]  }
 0x3c0   :  { %10967 = vmatprep.mubr.msk.bf16.mxu1 %vm229_vm0, %v7182_v11  ;;  %7521 = vmatpush1.bf16.msra.mxu1 %v15586_v9 }
 0x3c1   :  { %7522 = vmatprep.subr.bf16.mxu1 %v16929_v49 }
 0x3c2   :  { %7450 = vmatpush1.bf16.msra.mxu0 %v15606_v4 }
 0x3c3   :  { %7451 = vmatprep.subr.bf16.mxu0 %v15618_v62 }
 0x3c4   :  { %7523 = vmatpush1.bf16.msra.mxu1 %v15611_v45 }
 0x3c5   :  { %7524 = vmatprep.subr.bf16.mxu1 %v16929_v49 }
 0x3c6   :  { %7452 = vmatpush1.bf16.msra.mxu0 %v15625_v61 }
 0x3c7   :  { %7453 = vmatprep.subr.bf16.mxu0 %v15637_v20 }
 0x3c8   :  { %7525 = vmatpush1.bf16.msra.mxu1 %v15630_v52 }
 0x3c9   :  { %7526 = vmatprep.subr.bf16.mxu1 %v16929_v49 }
 0x3ca   :  { %7454 = vmatpush1.bf16.msra.mxu0 %v15644_v38 }
 0x3cb   :  { %7455 = vmatprep.subr.bf16.mxu0 %v15656_v32 }
 0x3cc   :  { %7527 = vmatpush1.bf16.msra.mxu1 %v15649_v25 }
 0x3cd   :  { %7528 = vmatprep.subr.bf16.mxu1 %v16929_v49 }
 0x3ce   :  { %7456 = vmatpush1.bf16.msra.mxu0 %v15663_v8 }
 0x3cf   :  { %7457 = vmatprep.subr.bf16.mxu0 %v15675_v35 }
 0x3d0   :  { %v15677_v60 = vpop.f32.mrb[224].mxu0  ;;  %7529 = vmatpush1.bf16.msra.mxu1 %v15668_v27 }
 0x3d1   :  { %v15679_v47 = vpop.f32.mrb[225].mxu0  ;;  %7530 = vmatprep.subr.bf16.mxu1 %v16929_v49 }
 0x3d2   :  { %v5763_v29 = vpop.f32.mrb[224].mxu1  ;;  %v15688_v23 = vpop.f32.mrb[226].mxu0  ;;  %7458 = vmatpush1.bf16.msra.mxu0 %v15684_v50 }
 0x3d3   :  { %v5820_v6 = vadd.f32 %v5796_v17, %v5763_v29  ;;  %v5765_v26 = vpop.f32.mrb[225].mxu1  ;;  %16941 = vst [vmem:[#allocation12_spill] sm:$0xff] %v15688_v23  ;;  %v15698_v5 = vpop.f32.mrb[227].mxu0  ;;  %7459 = vmatprep.subr.bf16.mxu0 %v15703_v10  ;;  %v5802_v17 = vld [vmem:[#allocation4 + $0x40] sm:$0xff] }
 0x3d4   :  { %v5766_v22 = vpop.f32.mrb[226].mxu1  ;;  %16942 = vst [vmem:[#allocation13_spill] sm:$0xff] %v15698_v5  ;;  %7531 = vmatpush1.bf16.msra.mxu1 %v15693_v39 }
 0x3d5   :  { %5844 = vst.msk [vmem:[#allocation4 + $0x10] sm:$0xff] %vm4183_vm3, %v5820_v6  ;;  %v5823_v63 = vadd.f32 %v5799_v33, %v5766_v22  ;;  %v5768_v7 = vpop.f32.mrb[227].mxu1  ;;  %7532 = vmatprep.subr.bf16.mxu1 %v16929_v49  ;;  %v15732_v33 = vld [vmem:[%s16902_s3 + $0x678] ss:$12 sps:$4 sm:$0xff]  }
 0x3d6   :  { %7460 = vmatpush1.bf16.msra.mxu0 %v15711_v55 }
 0x3d7   :  { %5847 = vst.msk [vmem:[#allocation4 + $0x28] sm:$0xff] %vm4183_vm3, %v5823_v63  ;;  %v7139_v63 = vld [vmem:[#allocation3] sm:$0xfc]  ;;  %7461 = vmatprep.subr.bf16.mxu0 %v15723_v21 }
 0x3d8   :  { %v15725_v11 = vpop.f32.mrb[228].mxu0  ;;  %7533 = vmatpush1.bf16.msra.mxu1 %v15716_v58 }
 0x3d9   :  { %16943 = vst [vmem:[#allocation14_spill] sm:$0xff] %v15725_v11  ;;  %v15727_v26 = vpop.f32.mrb[229].mxu0  ;;  %v5805_v11 = vld [vmem:[#allocation4 + $0x58] sm:$0xff]  ;;  %7534 = vmatprep.subr.bf16.mxu1 %v16929_v49 }
 0x3da   :  { %v5771_v29 = vpop.f32.mrb[228].mxu1  ;;  %16944 = vst [vmem:[#allocation15_spill] sm:$0xff] %v15727_v26  ;;  %v15736_v7 = vpop.f32.mrb[230].mxu0  ;;  %7462 = vmatpush1.bf16.msra.mxu0 %v15732_v33 }
 0x3db   :  { %v5826_v6 = vadd.f32 %v5802_v17, %v5771_v29  ;;  %v5773_v22 = vpop.f32.mrb[229].mxu1  ;;  %16945 = vst [vmem:[#allocation16_spill] sm:$0xff] %v15736_v7  ;;  %v15741_v29 = vld [vmem:[%s16902_s3 + $0x680] ss:$12 sps:$4 sm:$0xff]   ;;  %v7157_v17 = vpack.c.bf16 %v15395_v0, %v7139_v63  ;;  %v15747_v26 = vpop.f32.mrb[231].mxu0  ;;  %7717 = vmatprep.subr.bf16.mxu0 %v15406_v19 }
 0x3dc   :  { %v5774_v5 = vpop.f32.mrb[230].mxu1  ;;  %7535 = vmatpush1.bf16.msra.mxu1 %v15741_v29 }
 0x3dd   :  { %5850 = vst.msk [vmem:[#allocation4 + $0x40] sm:$0xff] %vm4183_vm3, %v5826_v6  ;;  %v5829_v22 = vadd.f32 %v5805_v11, %v5774_v5  ;;  %v5776_v23 = vpop.f32.mrb[231].mxu1  ;;  %v7177_v7 = vrot.slane %v7157_v17, 1  ;;  %7790 = vmatprep.subr.bf16.mxu1 %v16929_v49  ;;  %v5808_v11 = vld [vmem:[#allocation4 + $0x70] sm:$0xff] }
 0x3df   :  { %5853 = vst.msk [vmem:[#allocation4 + $0x58] sm:$0xff] %vm4183_vm3, %v5829_v22  ;;  %v7179_v0 = vsel %vm6837_vm1, %v7177_v7, %v15408_v37  ;;  %v5811_v37 = vld [vmem:[#allocation4 + $0x88] sm:$0xff] }
 0x3e0   :  { %v15756_v6 = vpop.f32.mrb[232].mxu0  ;;  %7468 = vmatmul.mubr.bf16.vlgmr.msra.gmra.mrb[32].mxu0 %v7179_v0  ;;  %7541 = vmatmul.mubr.bf16.vlgmr.msra.gmra.mrb[32].mxu1 %v7179_v0 }
 0x3e1   :  { %v15758_v63 = vpop.f32.mrb[233].mxu0  ;;  %10964 = vmatprep.mubr.msk.bf16.mxu0 %vm229_vm0, %v15437_v46  ;;  %10968 = vmatprep.mubr.msk.bf16.mxu1 %vm229_vm0, %v15437_v46  ;;  %v5814_v46 = vld [vmem:[#allocation4 + $0xa0] sm:$0xff] }
 0x3e2   :  { %v5779_v5 = vpop.f32.mrb[232].mxu1  ;;  %v15764_v19 = vpop.f32.mrb[234].mxu0  ;;  %7718 = vmatpush1.bf16.msra.mxu0 %v15418_v48  ;;  %7791 = vmatpush1.bf16.msra.mxu1 %v15425_v53 }
 0x3e3   :  { %v5832_v23 = vadd.f32 %v5808_v11, %v5779_v5  ;;  %v5781_v22 = vpop.f32.mrb[233].mxu1  ;;  %v15769_v0 = vpop.f32.mrb[235].mxu0  ;;  %7719 = vmatprep.subr.bf16.mxu0 %v15432_v40  ;;  %7792 = vmatprep.subr.bf16.mxu1 %v16929_v49 }
 0x3e4   :  { %v5782_v17 = vpop.f32.mrb[234].mxu1 }
 0x3e5   :  { %5856 = vst.msk [vmem:[#allocation4 + $0x70] sm:$0xff] %vm4183_vm3, %v5832_v23  ;;  %v5835_v7 = vadd.f32 %v5811_v37, %v5782_v17  ;;  %v5784_v5 = vpop.f32.mrb[235].mxu1  ;;  %v16946_v37 = vld [vmem:[#allocation10_spill] sm:$0xff] }
 0x3e6   :  { %7720 = vmatpush1.bf16.msra.mxu0 %v15446_v59  ;;  %7793 = vmatpush1.bf16.msra.mxu1 %v15454_v24  ;;  %v7654_v5 = vld [vmem:[#allocation3 + $0xd8] sm:$0xff] }
 0x3e7   :  { %5859 = vst.msk [vmem:[#allocation4 + $0x88] sm:$0xff] %vm4183_vm3, %v5835_v7  ;;  %7721 = vmatprep.subr.bf16.mxu0 %v15461_v16  ;;  %7794 = vmatprep.subr.bf16.mxu1 %v16929_v49  ;;  %v5817_v16 = vld [vmem:[#allocation4 + $0xb8] sm:$0xff]  ;;  %v16947_v7 = vld [vmem:[#allocation11_spill] sm:$0xff] }
 0x3e8   :  { %v15778_v48 = vpop.f32.mrb[236].mxu0  ;;  %7478 = vmatmul.mubr.bf16.gmra.mrb[36].mxu0 %v15478_v2  ;;  %7549 = vmatmul.mubr.bf16.gmra.mrb[36].mxu1 %v15478_v2 }
 0x3e9   :  { %v15782_v11 = vpop.f32.mrb[237].mxu0  ;;  %10965 = vmatprep.mubr.msk.bf16.mxu0 %vm229_vm0, %v15494_v28  ;;  %10969 = vmatprep.mubr.msk.bf16.mxu1 %vm229_vm0, %v15494_v28  ;;  %v7652_v28 = vld [vmem:[#allocation3 + $0xc8] sm:$0xff] }
 0x3ea   :  { %v5787_v53 = vpop.f32.mrb[236].mxu1  ;;  %v15788_v59 = vpop.f32.mrb[238].mxu0  ;;  %7722 = vmatpush1.bf16.msra.mxu0 %v15469_v57  ;;  %7795 = vmatpush1.bf16.msra.mxu1 %v15474_v51  ;;  %v7648_v57 = vld [vmem:[#allocation3 + $0xa8] sm:$0xff]  ;;  %v7650_v51 = vld [vmem:[#allocation3 + $0xb8] sm:$0xff] }
 0x3eb   :  { %v5838_v40 = vadd.f32 %v5814_v46, %v5787_v53  ;;  %v5789_v23 = vpop.f32.mrb[237].mxu1  ;;  %v15793_v22 = vpop.f32.mrb[239].mxu0  ;;  %7723 = vmatprep.subr.bf16.mxu0 %v15487_v34  ;;  %7796 = vmatprep.subr.bf16.mxu1 %v16929_v49  ;;  %v7666_v34 = vpack.c.bf16 %v7652_v28, %v7650_v51  ;;  %v7660_v51 = vld [vmem:[#allocation3 + $0x108] sm:$0xff] }
 0x3ec   :  { %v5790_v24 = vpop.f32.mrb[238].mxu1 }
 0x3ed   :  { %5862 = vst.msk [vmem:[#allocation4 + $0xa0] sm:$0xff] %vm4183_vm3, %v5838_v40  ;;  %v5841_v2 = vadd.f32 %v5817_v16, %v5790_v24  ;;  %v5792_v17 = vpop.f32.mrb[239].mxu1  ;;  %v6131_v24 = vld [vmem:[#allocation4 + $0x118] sm:$0xff] }
 0x3ee   :  { %7724 = vmatpush1.bf16.msra.mxu0 %v15510_v13  ;;  %7797 = vmatpush1.bf16.msra.mxu1 %v15515_v56  ;;  %v7646_v13 = vld [vmem:[#allocation3 + $0x98] sm:$0xfc] }
 0x3ef   :  { %5865 = vst.msk [vmem:[#allocation4 + $0xb8] sm:$0xff] %vm4183_vm3, %v5841_v2  ;;  %7725 = vmatprep.subr.bf16.mxu0 %v15524_v3  ;;  %7798 = vmatprep.subr.bf16.mxu1 %v16929_v49  ;;  %v7664_v56 = vpack.c.bf16 %v7648_v57, %v7646_v13  ;;  %v15812_v3 = vrot.slane %v7666_v34, 1  ;;  %v7658_v13 = vld [vmem:[#allocation3 + $0xf8] sm:$0xff] }
 0x3f0   :  { %7488 = vmatmul.mubr.bf16.gmra.mrb[40].mxu0 %v15541_v36  ;;  %7557 = vmatmul.mubr.bf16.gmra.mrb[40].mxu1 %v15541_v36 }
 0x3f1   :  { %10966 = vmatprep.mubr.msk.bf16.mxu0 %vm229_vm0, %v16946_v37  ;;  %10970 = vmatprep.mubr.msk.bf16.mxu1 %vm229_vm0, %v16946_v37  ;;  %v7686_v36 = vrot.slane %v7664_v56, 1  ;;  %v7653_v37 = vld [vmem:[#allocation3 + $0xd0] sm:$0xff] }
 0x3f2   :  { %7726 = vmatpush1.bf16.msra.mxu0 %v15532_v1  ;;  %7799 = vmatpush1.bf16.msra.mxu1 %v15537_v18 }
 0x3f3   :  { %7727 = vmatprep.subr.bf16.mxu0 %v15548_v54  ;;  %7800 = vmatprep.subr.bf16.mxu1 %v16929_v49  ;;  %v7688_v1 = vsel %vm6837_vm1, %v7686_v36, %v15812_v3  ;;  %v6134_v36 = vld [vmem:[#allocation4 + $0x130] sm:$0xff] }
 0x3f6   :  { %7728 = vmatpush1.bf16.msra.mxu0 %v15561_v15  ;;  %7801 = vmatpush1.bf16.msra.mxu1 %v15566_v31  ;;  %v6122_v15 = vld [vmem:[#allocation4 + $0xd0] sm:$0xff] }
 0x3f7   :  { %7729 = vmatprep.subr.bf16.mxu0 %v15574_v30  ;;  %7802 = vmatprep.subr.bf16.mxu1 %v16929_v49 }
 0x3f8   :  { %7498 = vmatmul.mubr.bf16.gmra.mrb[44].mxu0 %v16947_v7  ;;  %7565 = vmatmul.mubr.bf16.gmra.mrb[44].mxu1 %v16947_v7 }
 0x3f9   :  { %10971 = vmatprep.mubr.msk.bf16.mxu0 %vm229_vm0, %v7688_v1  ;;  %10975 = vmatprep.mubr.msk.bf16.mxu1 %vm229_vm0, %v7688_v1  ;;  %v7670_v1 = vpack.c.bf16 %v7660_v51, %v7658_v13 }
 0x3fa   :  { %7730 = vmatpush1.bf16.msra.mxu0 %v15581_v41  ;;  %7803 = vmatpush1.bf16.msra.mxu1 %v15586_v9 }
 0x3fb   :  { %7731 = vmatprep.subr.bf16.mxu0 %v15595_v12  ;;  %7804 = vmatprep.subr.bf16.mxu1 %v16929_v49 }
 0x3fe   :  { %7732 = vmatpush1.bf16.msra.mxu0 %v15606_v4  ;;  %7805 = vmatpush1.bf16.msra.mxu1 %v15611_v45  ;;  %v6125_v4 = vld [vmem:[#allocation4 + $0xe8] sm:$0xff] }
 0x3ff   :  { %7733 = vmatprep.subr.bf16.mxu0 %v15618_v62  ;;  %7806 = vmatprep.subr.bf16.mxu1 %v16929_v49 }
 0x402   :  { %7734 = vmatpush1.bf16.msra.mxu0 %v15625_v61  ;;  %7807 = vmatpush1.bf16.msra.mxu1 %v15630_v52  ;;  %v7651_v52 = vld [vmem:[#allocation3 + $0xc0] sm:$0xff] }
 0x403   :  { %7735 = vmatprep.subr.bf16.mxu0 %v15637_v20  ;;  %7808 = vmatprep.subr.bf16.mxu1 %v16929_v49  ;;  %v7656_v20 = vld [vmem:[#allocation3 + $0xe8] sm:$0xff] }
 0x404   :  { %v7668_v23 = vpack.c.bf16 %v7656_v20, %v7654_v5  ;;  %v7659_v20 = vld [vmem:[#allocation3 + $0x100] sm:$0xff] }
 0x406   :  { %7736 = vmatpush1.bf16.msra.mxu0 %v15644_v38  ;;  %7809 = vmatpush1.bf16.msra.mxu1 %v15649_v25  ;;  %v7647_v38 = vld [vmem:[#allocation3 + $0xa0] sm:$0xff]  ;;  %v7649_v25 = vld [vmem:[#allocation3 + $0xb0] sm:$0xff] }
 0x407   :  { %7737 = vmatprep.subr.bf16.mxu0 %v15656_v32  ;;  %7810 = vmatprep.subr.bf16.mxu1 %v16929_v49 }
 0x408   :  { %v15840_v18 = vpop.f32.mrb[240].mxu0 }
 0x409   :  { %v15842_v30 = vpop.f32.mrb[241].mxu0 }
 0x40a   :  { %v6089_v54 = vpop.f32.mrb[240].mxu1  ;;  %7738 = vmatpush1.bf16.msra.mxu0 %v15663_v8  ;;  %7811 = vmatpush1.bf16.msra.mxu1 %v15668_v27  ;;  %v15846_v9 = vpop.f32.mrb[242].mxu0  ;;  %v6128_v27 = vld [vmem:[#allocation4 + $0x100] sm:$0xff] }
 0x40b   :  { %v6146_v31 = vadd.f32 %v6122_v15, %v6089_v54  ;;  %v6091_v41 = vpop.f32.mrb[241].mxu1  ;;  %7739 = vmatprep.subr.bf16.mxu0 %v15675_v35  ;;  %7812 = vmatprep.subr.bf16.mxu1 %v16929_v49  ;;  %v15851_v62 = vpop.f32.mrb[243].mxu0  ;;  %v7665_v35 = vpack.c.bf16 %v7651_v52, %v7649_v25  ;;  %v5205_v25 = vld [vmem:[#allocation4 + $0x150] sm:$0xff] }
 0x40c   :  { %v6092_v12 = vpop.f32.mrb[242].mxu1 }
 0x40d   :  { %6170 = vst.msk [vmem:[#allocation4 + $0xd0] sm:$0xff] %vm4183_vm3, %v6146_v31  ;;  %v6149_v45 = vadd.f32 %v6125_v4, %v6092_v12  ;;  %v6094_v61 = vpop.f32.mrb[243].mxu1  ;;  %v7684_v57 = vrot.slane %v7665_v35, 1  ;;  %v6137_v12 = vld [vmem:[#allocation4 + $0x148] sm:$0xff]  ;;  %v5206_v35 = vld [vmem:[#allocation4 + $0x158] sm:$0xff] }
 0x40e   :  { %7740 = vmatpush1.bf16.msra.mxu0 %v15684_v50  ;;  %7813 = vmatpush1.bf16.msra.mxu1 %v15693_v39  ;;  %v7645_v50 = vld [vmem:[#allocation3 + $0x90] sm:$0xfc] }
 0x40f   :  { %6173 = vst.msk [vmem:[#allocation4 + $0xe8] sm:$0xff] %vm4183_vm3, %v6149_v45  ;;  %7741 = vmatprep.subr.bf16.mxu0 %v15703_v10  ;;  %7814 = vmatprep.subr.bf16.mxu1 %v16929_v49  ;;  %v7663_v16 = vpack.c.bf16 %v7647_v38, %v7645_v50  ;;  %v7662_v38 = vld [vmem:[#allocation3 + $0x118] sm:$0x3] }
 0x410   :  { %v15858_v32 = vpop.f32.mrb[244].mxu0 }
 0x411   :  { %v15860_v46 = vpop.f32.mrb[245].mxu0  ;;  %v7683_v34 = vrot.slane %v7663_v16, 1  ;;  %v6140_v16 = vld [vmem:[#allocation4 + $0x160] sm:$0xff] }
 0x412   :  { %v6097_v8 = vpop.f32.mrb[244].mxu1  ;;  %7742 = vmatpush1.bf16.msra.mxu0 %v15711_v55  ;;  %7815 = vmatpush1.bf16.msra.mxu1 %v15716_v58  ;;  %v15864_v39 = vpop.f32.mrb[246].mxu0  ;;  %v7691_v55 = vrot.slane %v7668_v23, 1  ;;  %v7655_v58 = vld [vmem:[#allocation3 + $0xe0] sm:$0xff] }
 0x413   :  { %v6152_v53 = vadd.f32 %v6128_v27, %v6097_v8  ;;  %v6099_v40 = vpop.f32.mrb[245].mxu1  ;;  %7743 = vmatprep.subr.bf16.mxu0 %v15723_v21  ;;  %7816 = vmatprep.subr.bf16.mxu1 %v16929_v49  ;;  %v15869_v17 = vpop.f32.mrb[247].mxu0  ;;  %v7685_v21 = vsel %vm6837_vm1, %v7683_v34, %v7684_v57  ;;  %v7667_v7 = vpack.c.bf16 %v7655_v58, %v7653_v37  ;;  %v7657_v8 = vld [vmem:[#allocation3 + $0xf0] sm:$0xff] }
 0x414   :  { %v6100_v10 = vpop.f32.mrb[246].mxu1  ;;  %v7692_v54 = vsel %vm6837_vm1, %v15812_v3, %v7691_v55  ;;  %v7695_v3 = vrot.slane %v7670_v1, 1  ;;  %v5229_v27 = vadd.f32 %v5205_v25, %v15482_v42  ;;  %v7669_v5 = vpack.c.bf16 %v7659_v20, %v7657_v8  ;;  %v5208_v40 = vld [vmem:[#allocation4 + $0x168] sm:$0xff]  ;;  %v5209_v58 = vld [vmem:[#allocation4 + $0x170] sm:$0xff]  ;;  %v5794_v20 = vld [vmem:[#allocation4] sm:$0xff] }
 0x415   :  { %6176 = vst.msk [vmem:[#allocation4 + $0x100] sm:$0xff] %vm4183_vm3, %v6152_v53  ;;  %v6155_v2 = vadd.f32 %v6131_v24, %v6100_v10  ;;  %v6102_v28 = vpop.f32.mrb[247].mxu1  ;;  %v7689_v52 = vrot.slane %v7667_v7, 1  ;;  %v5230_v53 = vadd.f32 %v5206_v35, %v15496_v14  ;;  %v5233_v14 = vadd.f32 %v5209_v58, %v15517_v44  ;;  %v5795_v25 = vld [vmem:[#allocation4 + $0x8] sm:$0xff]  ;;  %v5797_v8 = vld [vmem:[#allocation4 + $0x18] sm:$0xff] }
 0x416   :  { %7744 = vmatpush1.bf16.msra.mxu0 %v15732_v33  ;;  %7817 = vmatpush1.bf16.msra.mxu1 %v15741_v29  ;;  %v7696_v23 = vsel %vm6837_vm1, %v7691_v55, %v7695_v3  ;;  %v5232_v28 = vadd.f32 %v5208_v40, %v15502_v43  ;;  %v5798_v40 = vld [vmem:[#allocation4 + $0x20] sm:$0xff] }
 0x417   :  { %6179 = vst.msk [vmem:[#allocation4 + $0x118] sm:$0xff] %vm4183_vm3, %v6155_v2  ;;  %v7690_v50 = vsel %vm6837_vm1, %v7684_v57, %v7689_v52  ;;  %v7672_v2 = vpack.c.bf16 %v7662_v38, %v7662_v38  ;;  %v5818_v38 = vadd.f32 %v5794_v20, %v15677_v60 }
 0x418   :  { %v15875_v49 = vpop.f32.mrb[248].mxu0 }
 0x419   :  { %7750 = vmatmul.mubr.bf16.vlgmr.msra.gmra.mrb[48].mxu0 %v7685_v21  ;;  %7823 = vmatmul.mubr.bf16.vlgmr.msra.gmra.mrb[48].mxu1 %v7685_v21  ;;  %v15879_v33 = vpop.f32.mrb[249].mxu0  ;;  %v6143_v21 = vld [vmem:[#allocation4 + $0x178] sm:$0xff]  ;;  %v7699_v44 = vrot.slane %v7672_v2, 1 }
 0x41a   :  { %v6105_v56 = vpop.f32.mrb[248].mxu1  ;;  %10972 = vmatprep.mubr.msk.bf16.mxu0 %vm229_vm0, %v7692_v54  ;;  %10976 = vmatprep.mubr.msk.bf16.mxu1 %vm229_vm0, %v7692_v54  ;;  %v15883_v31 = vpop.f32.mrb[250].mxu0  ;;  %v7693_v54 = vrot.slane %v7669_v5, 1  ;;  %v6729_v5 = vld [vmem:[#allocation4 + $0x10] sm:$0xff] }
 0x41b   :  { %v6158_v15 = vadd.f32 %v6134_v36, %v6105_v56  ;;  %v6107_v29 = vpop.f32.mrb[249].mxu1  ;;  %v15886_v45 = vpop.f32.mrb[251].mxu0 }
 0x41c   :  { %v6108_v41 = vpop.f32.mrb[250].mxu1  ;;  %v7694_v29 = vsel %vm6837_vm1, %v7689_v52, %v7693_v54  ;;  %v5819_v52 = vadd.f32 %v5795_v25, %v15679_v47 }
 0x41d   :  { %6182 = vst.msk [vmem:[#allocation4 + $0x130] sm:$0xff] %vm4183_vm3, %v6158_v15  ;;  %v6161_v4 = vadd.f32 %v6137_v12, %v6108_v41  ;;  %v6110_v61 = vpop.f32.mrb[251].mxu1  ;;  %v7661_v15 = vld [vmem:[#allocation3 + $0x110] sm:$0x3]  ;;  %v7700_v12 = vsel %vm6837_vm1, %v7695_v3, %v7699_v44  ;;  %v16948_v3 = vld [vmem:[#allocation12_spill] sm:$0xff] }
 0x41e   :  { %v7671_v41 = vpack.c.bf16 %v7661_v15, %v7661_v15  ;;  %v5803_v44 = vld [vmem:[#allocation4 + $0x48] sm:$0xff] }
 0x41f   :  { %6185 = vst.msk [vmem:[#allocation4 + $0x148] sm:$0xff] %vm4183_vm3, %v6161_v4 }
 0x420   :  { %v6046_v10 = vpop.f32.mrb[252].mxu0  ;;  %v7697_v4 = vrot.slane %v7671_v41, 1  ;;  %v6735_v41 = vld [vmem:[#allocation4 + $0x40] sm:$0xff] }
 0x421   :  { %7760 = vmatmul.mubr.bf16.gmra.mrb[52].mxu0 %v7690_v50  ;;  %7831 = vmatmul.mubr.bf16.gmra.mrb[52].mxu1 %v7690_v50  ;;  %v15894_v51 = vadd.f32 %v6046_v10, %v5229_v27  ;;  %v6048_v34 = vpop.f32.mrb[253].mxu0 }
 0x422   :  { %v6113_v24 = vpop.f32.mrb[252].mxu1  ;;  %10973 = vmatprep.mubr.msk.bf16.mxu0 %vm229_vm0, %v7696_v23  ;;  %10977 = vmatprep.mubr.msk.bf16.mxu1 %vm229_vm0, %v7696_v23  ;;  %v15899_v57 = vadd.f32 %v6048_v34, %v5230_v53  ;;  %v6050_v55 = vpop.f32.mrb[254].mxu0  ;;  %v7698_v61 = vsel %vm6837_vm1, %v7693_v54, %v7697_v4  ;;  %v5821_v53 = vadd.f32 %v5797_v8, %v16948_v3  ;;  %v6738_v3 = vld [vmem:[#allocation4 + $0x58] sm:$0xff] }
 0x423   :  { %v6164_v42 = vadd.f32 %v6140_v16, %v6113_v24  ;;  %v6115_v37 = vpop.f32.mrb[253].mxu1  ;;  %v15902_v43 = vadd.f32 %v6050_v55, %v5232_v28  ;;  %v6052_v36 = vpop.f32.mrb[255].mxu0  ;;  %v16949_v16 = vld [vmem:[#allocation13_spill] sm:$0xff] }
 0x424   :  { %v6116_v13 = vpop.f32.mrb[254].mxu1  ;;  %v15904_v1 = vadd.f32 %v6052_v36, %v5233_v14  ;;  %v5822_v2 = vadd.f32 %v5798_v40, %v16949_v16  ;;  %v5801_v36 = vld [vmem:[#allocation4 + $0x38] sm:$0xff]  ;;  %v5806_v16 = vld [vmem:[#allocation4 + $0x60] sm:$0xff] }
 0x425   :  { %6188 = vst.msk [vmem:[#allocation4 + $0x160] sm:$0xff] %vm4183_vm3, %v6164_v42  ;;  %v6167_v56 = vadd.f32 %v6143_v21, %v6116_v13  ;;  %v6118_v7 = vpop.f32.mrb[255].mxu1  ;;  %v6732_v42 = vld [vmem:[#allocation4 + $0x28] sm:$0xff]  ;;  %v5800_v13 = vld [vmem:[#allocation4 + $0x30] sm:$0xff]  ;;  %v16950_v21 = vld [vmem:[#allocation14_spill] sm:$0xff] }
 0x426   :  { %v16951_v7 = vld [vmem:[#allocation15_spill] sm:$0xff] }
 0x427   :  { %6191 = vst.msk [vmem:[#allocation4 + $0x178] sm:$0xff] %vm4183_vm3, %v6167_v56  ;;  %v5824_v56 = vadd.f32 %v5800_v13, %v16950_v21  ;;  %v5825_v54 = vadd.f32 %v5801_v36, %v16951_v7  ;;  %v5810_v13 = vld [vmem:[#allocation4 + $0x80] sm:$0xff] }
 0x429   :  { %7770 = vmatmul.mubr.bf16.gmra.mrb[56].mxu0 %v7694_v29  ;;  %7839 = vmatmul.mubr.bf16.gmra.mrb[56].mxu1 %v7694_v29 }
 0x42a   :  { %10974 = vmatprep.mubr.msk.bf16.mxu0 %vm229_vm0, %v7700_v12  ;;  %10978 = vmatprep.mubr.msk.bf16.mxu1 %vm229_vm0, %v7700_v12  ;;  %v16952_v12 = vld [vmem:[#allocation16_spill] sm:$0xff] }
 0x42b   :  { %v5827_v4 = vadd.f32 %v5803_v44, %v16952_v12 }
 0x431   :  { %7780 = vmatmul.mubr.bf16.gmra.mrb[60].mxu0 %v7698_v61  ;;  %7847 = vmatmul.mubr.bf16.gmra.mrb[60].mxu1 %v7698_v61  ;;  %v5804_v61 = vld [vmem:[#allocation4 + $0x50] sm:$0xff] }
 0x432   :  { %v5828_v8 = vadd.f32 %v5804_v61, %v15747_v26  ;;  %v5807_v26 = vld [vmem:[#allocation4 + $0x68] sm:$0xff]  ;;  %v5812_v61 = vld [vmem:[#allocation4 + $0x90] sm:$0xff] }
 0x440   :  { %v6623_v27 = vpop.f32.mrb[0].mxu0 }
 0x441   :  { %v15915_v50 = vadd.f32 %v6623_v27, %v5818_v38  ;;  %v6625_v10 = vpop.f32.mrb[1].mxu0 }
 0x442   :  { %v6696_v35 = vpop.f32.mrb[0].mxu1  ;;  %v15918_v28 = vadd.f32 %v6625_v10, %v5819_v52  ;;  %v6627_v60 = vpop.f32.mrb[2].mxu0 }
 0x443   :  { %v6753_v23 = vadd.f32 %v6729_v5, %v6696_v35  ;;  %v6698_v24 = vpop.f32.mrb[1].mxu1  ;;  %v15921_v47 = vadd.f32 %v6627_v60, %v5821_v53  ;;  %v6629_v37 = vpop.f32.mrb[3].mxu0  ;;  %v5831_v60 = vadd.f32 %v5807_v26, %v15758_v63 }
 0x444   :  { %v6699_v58 = vpop.f32.mrb[2].mxu1  ;;  %v15923_v55 = vadd.f32 %v6629_v37, %v5822_v2  ;;  %v5830_v2 = vadd.f32 %v5806_v16, %v15756_v6  ;;  %v6741_v37 = vld [vmem:[#allocation4 + $0x70] sm:$0xff] }
 0x445   :  { %6777 = vst.msk [vmem:[#allocation4 + $0x10] sm:$0xff] %vm4183_vm3, %v6753_v23  ;;  %v6756_v34 = vadd.f32 %v6732_v42, %v6699_v58  ;;  %v6701_v14 = vpop.f32.mrb[3].mxu1  ;;  %v5809_v58 = vld [vmem:[#allocation4 + $0x78] sm:$0xff] }
 0x446   :  { %v5833_v14 = vadd.f32 %v5809_v58, %v15764_v19 }
 0x447   :  { %6780 = vst.msk [vmem:[#allocation4 + $0x28] sm:$0xff] %vm4183_vm3, %v6756_v34 }
 0x448   :  { %v6633_v15 = vpop.f32.mrb[4].mxu0 }
 0x449   :  { %v15929_v20 = vadd.f32 %v6633_v15, %v5824_v56  ;;  %v6635_v25 = vpop.f32.mrb[5].mxu0 }
 0x44a   :  { %v6704_v29 = vpop.f32.mrb[4].mxu1  ;;  %v15932_v27 = vadd.f32 %v6635_v25, %v5825_v54  ;;  %v6637_v35 = vpop.f32.mrb[6].mxu0  ;;  %v5834_v54 = vadd.f32 %v5810_v13, %v15769_v0  ;;  %v5813_v0 = vld [vmem:[#allocation4 + $0x98] sm:$0xff] }
 0x44b   :  { %v6759_v38 = vadd.f32 %v6735_v41, %v6704_v29  ;;  %v6706_v52 = vpop.f32.mrb[5].mxu1  ;;  %v15935_v53 = vadd.f32 %v6637_v35, %v5827_v4  ;;  %v6639_v23 = vpop.f32.mrb[7].mxu0  ;;  %v6744_v29 = vld [vmem:[#allocation4 + $0x88] sm:$0xff]  ;;  %v5837_v25 = vadd.f32 %v5813_v0, %v15782_v11  ;;  %v12062_v11 = vld [vmem:[%s16904_s5 + $0x40] sm:$0xff]  }
 0x44c   :  { %v6707_v5 = vpop.f32.mrb[6].mxu1  ;;  %v15937_v24 = vadd.f32 %v6639_v23, %v5828_v8  ;;  %v5815_v52 = vld [vmem:[#allocation4 + $0xa8] sm:$0xff]  ;;  %11260 = vmatprep.subr.bf16.mxu0 %v12062_v11 }
 0x44d   :  { %6783 = vst.msk [vmem:[#allocation4 + $0x40] sm:$0xff] %vm4183_vm3, %v6759_v38  ;;  %v6762_v40 = vadd.f32 %v6738_v3, %v6707_v5  ;;  %v6709_v10 = vpop.f32.mrb[7].mxu1  ;;  %v5836_v38 = vadd.f32 %v5812_v61, %v15778_v48  ;;  %v6747_v5 = vld [vmem:[#allocation4 + $0xa0] sm:$0xff]  ;;  %v5839_v3 = vadd.f32 %v5815_v52, %v15788_v59 }
 0x44e   :  { %v12063_v52 = vld [vmem:[%s16904_s5] sm:$0xff]  }
 0x44f   :  { %6786 = vst.msk [vmem:[#allocation4 + $0x58] sm:$0xff] %vm4183_vm3, %v6762_v40  ;;  %v5816_v40 = vld [vmem:[#allocation4 + $0xb0] sm:$0xff]  ;;  %11261 = vmatpush3.bf16.msra.mxu0 %v12063_v52 }
 0x450   :  { %v6643_v42 = vpop.f32.mrb[8].mxu0  ;;  %v5840_v26 = vadd.f32 %v5816_v40, %v15793_v22  ;;  %v6120_v22 = vld [vmem:[#allocation4 + $0xc0] sm:$0xff] }
 0x451   :  { %v15943_v21 = vadd.f32 %v6643_v42, %v5830_v2  ;;  %v6645_v36 = vpop.f32.mrb[9].mxu0  ;;  %v6750_v42 = vld [vmem:[#allocation4 + $0xb8] sm:$0xff] }
 0x452   :  { %v6712_v34 = vpop.f32.mrb[8].mxu1  ;;  %v15946_v44 = vadd.f32 %v6645_v36, %v5831_v60  ;;  %v6647_v6 = vpop.f32.mrb[10].mxu0  ;;  %v6123_v36 = vld [vmem:[#allocation4 + $0xd8] sm:$0xff] }
 0x453   :  { %v6765_v56 = vadd.f32 %v6741_v37, %v6712_v34  ;;  %v6714_v7 = vpop.f32.mrb[9].mxu1  ;;  %v15949_v63 = vadd.f32 %v6647_v6, %v5833_v14  ;;  %v6649_v12 = vpop.f32.mrb[11].mxu0  ;;  %v6124_v6 = vld [vmem:[#allocation4 + $0xe0] sm:$0xff] }
 0x454   :  { %v6715_v15 = vpop.f32.mrb[10].mxu1  ;;  %v15951_v4 = vadd.f32 %v6649_v12, %v5834_v54  ;;  %v7012_v7 = vld [vmem:[#allocation4 + $0xd0] sm:$0xff]  ;;  %v6144_v54 = vadd.f32 %v6120_v22, %v15840_v18  ;;  %v6147_v12 = vadd.f32 %v6123_v36, %v15846_v9 }
 0x455   :  { %6789 = vst.msk [vmem:[#allocation4 + $0x70] sm:$0xff] %vm4183_vm3, %v6765_v56  ;;  %v6768_v41 = vadd.f32 %v6744_v29, %v6715_v15  ;;  %v6717_v19 = vpop.f32.mrb[11].mxu1  ;;  %v6121_v56 = vld [vmem:[#allocation4 + $0xc8] sm:$0xff] }
 0x456   :  { %v6145_v15 = vadd.f32 %v6121_v56, %v15842_v30  ;;  %v6130_v56 = vld [vmem:[#allocation4 + $0x110] sm:$0xff] }
 0x457   :  { %6792 = vst.msk [vmem:[#allocation4 + $0x88] sm:$0xff] %vm4183_vm3, %v6768_v41 }
 0x458   :  { %v6653_v8 = vpop.f32.mrb[12].mxu0 }
 0x459   :  { %v15957_v23 = vadd.f32 %v6653_v8, %v5836_v38  ;;  %v6655_v16 = vpop.f32.mrb[13].mxu0  ;;  %v6148_v8 = vadd.f32 %v6124_v6, %v15851_v62  ;;  %v12065_v62 = vld [vmem:[%s16904_s5 + $0x8] sm:$0xff]  }
 0x45a   :  { %v6720_v35 = vpop.f32.mrb[12].mxu1  ;;  %v15960_v60 = vadd.f32 %v6655_v16, %v5837_v25  ;;  %v6657_v48 = vpop.f32.mrb[14].mxu0  ;;  %v7015_v25 = vld [vmem:[#allocation4 + $0xe8] sm:$0xff]  ;;  %v12066_v16 = vld [vmem:[%s16904_s5 + $0x50] sm:$0xff]  }
 0x45b   :  { %v6771_v10 = vadd.f32 %v6747_v5, %v6720_v35  ;;  %v6722_v2 = vpop.f32.mrb[13].mxu1  ;;  %v15966_v59 = vadd.f32 %v6657_v48, %v5839_v3  ;;  %v6659_v37 = vpop.f32.mrb[15].mxu0  ;;  %v6127_v48 = vld [vmem:[#allocation4 + $0xf8] sm:$0xff] }
 0x45c   :  { %v6723_v58 = vpop.f32.mrb[14].mxu1  ;;  %v15968_v13 = vadd.f32 %v6659_v37, %v5840_v26  ;;  %v6126_v2 = vld [vmem:[#allocation4 + $0xf0] sm:$0xff] }
 0x45d   :  { %6795 = vst.msk [vmem:[#allocation4 + $0xa0] sm:$0xff] %vm4183_vm3, %v6771_v10  ;;  %v6774_v34 = vadd.f32 %v6750_v42, %v6723_v58  ;;  %v6725_v14 = vpop.f32.mrb[15].mxu1  ;;  %v12064_v10 = vld [vmem:[%s16904_s5 + $0x48] sm:$0xff]   ;;  %v7018_v42 = vld [vmem:[#allocation4 + $0x100] sm:$0xff]  ;;  %v6150_v11 = vadd.f32 %v6126_v2, %v15858_v32  ;;  %v6154_v32 = vadd.f32 %v6130_v56, %v15869_v17  ;;  %v6135_v17 = vld [vmem:[#allocation4 + $0x138] sm:$0xff] }
 0x45e   :  { %11262 = vmatprep.subr.bf16.mxu0 %v12064_v10  ;;  %v6129_v58 = vld [vmem:[#allocation4 + $0x108] sm:$0xff]  ;;  %v12068_v10 = vld [vmem:[%s16904_s5 + $0x58] sm:$0xff]   ;;  %v6159_v2 = vadd.f32 %v6135_v17, %v15883_v31  ;;  %v12072_v31 = vld [vmem:[%s16904_s5 + $0x20] sm:$0xff]  }
 0x45f   :  { %6798 = vst.msk [vmem:[#allocation4 + $0xb8] sm:$0xff] %vm4183_vm3, %v6774_v34  ;;  %11263 = vmatpush3.bf16.msra.mxu0 %v12065_v62  ;;  %v6151_v34 = vadd.f32 %v6127_v48, %v15860_v46  ;;  %v6153_v22 = vadd.f32 %v6129_v58, %v15864_v39  ;;  %v12069_v62 = vld [vmem:[%s16904_s5 + $0x18] sm:$0xff]   ;;  %v6136_v48 = vld [vmem:[#allocation4 + $0x140] sm:$0xff]  ;;  %v7027_v56 = vld [vmem:[#allocation4 + $0x148] sm:$0xff] }
 0x460   :  { %11264 = vmatprep.subr.bf16.mxu0 %v12066_v16  ;;  %v12070_v16 = vld [vmem:[%s16904_s5 + $0x60] sm:$0xff]  }
 0x478   :  { %v6906_v29 = vpop.f32.mrb[16].mxu0 }
 0x479   :  { %v15974_v19 = vadd.f32 %v6906_v29, %v6144_v54  ;;  %v6908_v38 = vpop.f32.mrb[17].mxu0 }
 0x47a   :  { %v6979_v41 = vpop.f32.mrb[16].mxu1  ;;  %v15980_v18 = vadd.f32 %v6908_v38, %v6145_v15  ;;  %v6910_v35 = vpop.f32.mrb[18].mxu0  ;;  %v12067_v15 = vld [vmem:[%s16904_s5 + $0x10] sm:$0xff]  }
 0x47b   :  { %v7036_v61 = vadd.f32 %v7012_v7, %v6979_v41  ;;  %v6981_v0 = vpop.f32.mrb[17].mxu1  ;;  %v15983_v5 = vadd.f32 %v6910_v35, %v6147_v12  ;;  %v6912_v3 = vpop.f32.mrb[19].mxu0  ;;  %v7021_v12 = vld [vmem:[#allocation4 + $0x118] sm:$0xff]  ;;  %11265 = vmatpush3.bf16.msra.mxu0 %v12067_v15  ;;  %v7024_v35 = vld [vmem:[#allocation4 + $0x130] sm:$0xff] }
 0x47c   :  { %v6982_v30 = vpop.f32.mrb[18].mxu1  ;;  %v15994_v26 = vadd.f32 %v6912_v3, %v6148_v8  ;;  %v6133_v8 = vld [vmem:[#allocation4 + $0x128] sm:$0xff]  ;;  %11266 = vmatprep.subr.bf16.mxu0 %v12068_v10  ;;  %v12077_v10 = vld [vmem:[%s16904_s5 + $0x30] sm:$0xff]  }
 0x47d   :  { %7060 = vst.msk [vmem:[#allocation4 + $0xd0] sm:$0xff] %vm4183_vm3, %v7036_v61  ;;  %v7039_v9 = vadd.f32 %v7015_v25, %v6982_v30  ;;  %v6984_v40 = vpop.f32.mrb[19].mxu1  ;;  %v6132_v25 = vld [vmem:[#allocation4 + $0x120] sm:$0xff] }
 0x47e   :  { %v6156_v30 = vadd.f32 %v6132_v25, %v15875_v49 }
 0x47f   :  { %7063 = vst.msk [vmem:[#allocation4 + $0xe8] sm:$0xff] %vm4183_vm3, %v7039_v9  ;;  %v6157_v9 = vadd.f32 %v6133_v8, %v15879_v33  ;;  %11267 = vmatpush3.bf16.msra.mxu0 %v12069_v62 }
 0x480   :  { %v6916_v37 = vpop.f32.mrb[20].mxu0  ;;  %11268 = vmatprep.subr.bf16.mxu0 %v12070_v16 }
 0x481   :  { %v16000_v36 = vadd.f32 %v6916_v37, %v6150_v11  ;;  %v6918_v54 = vpop.f32.mrb[21].mxu0  ;;  %v12071_v11 = vld [vmem:[%s16904_s5 + $0x80] sm:$0xff]  }
 0x482   :  { %v6987_v14 = vpop.f32.mrb[20].mxu1  ;;  %v16006_v29 = vadd.f32 %v6918_v54, %v6151_v34  ;;  %v6920_v46 = vpop.f32.mrb[22].mxu0  ;;  %v6160_v34 = vadd.f32 %v6136_v48, %v15886_v45  ;;  %11500 = vmatprep.subr.bf16.mxu1 %v12071_v11 }
 0x483   :  { %v7042_v7 = vadd.f32 %v7018_v42, %v6987_v14  ;;  %v6989_v6 = vpop.f32.mrb[21].mxu1  ;;  %v16009_v39 = vadd.f32 %v6920_v46, %v6153_v22  ;;  %v6922_v38 = vpop.f32.mrb[23].mxu0  ;;  %11501 = vmatpush3.bf16.msra.mxu1 %v12071_v11  ;;  %v12074_v46 = vld [vmem:[%s16904_s5 + $0x28] sm:$0xff]   ;;  %11269 = vmatpush3.bf16.msra.mxu0 %v12072_v31 }
 0x484   :  { %v6990_v41 = vpop.f32.mrb[22].mxu1  ;;  %v16011_v52 = vadd.f32 %v6922_v38, %v6154_v32  ;;  %v12073_v32 = vld [vmem:[%s16904_s5 + $0x68] sm:$0xff]  }
 0x485   :  { %7066 = vst.msk [vmem:[#allocation4 + $0x100] sm:$0xff] %vm4183_vm3, %v7042_v7  ;;  %v7045_v61 = vadd.f32 %v7021_v12, %v6990_v41  ;;  %v6992_v0 = vpop.f32.mrb[23].mxu1  ;;  %v12076_v41 = vld [vmem:[%s16904_s5 + $0x88] sm:$0xff]   ;;  %v7030_v12 = vld [vmem:[#allocation4 + $0x160] sm:$0xff]  ;;  %11270 = vmatprep.subr.bf16.mxu0 %v12073_v32 }
 0x486   :  { %11502 = vmatprep.subr.bf16.mxu1 %v12076_v41 }
 0x487   :  { %7069 = vst.msk [vmem:[#allocation4 + $0x118] sm:$0xff] %vm4183_vm3, %v7045_v61  ;;  %v12075_v61 = vld [vmem:[%s16904_s5 + $0x70] sm:$0xff]   ;;  %11503 = vmatpush3.bf16.msra.mxu1 %v12076_v41  ;;  %11271 = vmatpush3.bf16.msra.mxu0 %v12074_v46 }
 0x488   :  { %v6926_v3 = vpop.f32.mrb[24].mxu0  ;;  %11272 = vmatprep.subr.bf16.mxu0 %v12075_v61 }
 0x489   :  { %v16026_v49 = vadd.f32 %v6926_v3, %v6156_v30  ;;  %v6928_v58 = vpop.f32.mrb[25].mxu0 }
 0x48a   :  { %v6995_v40 = vpop.f32.mrb[24].mxu1  ;;  %v16032_v37 = vadd.f32 %v6928_v58, %v6157_v9  ;;  %v6930_v14 = vpop.f32.mrb[26].mxu0  ;;  %v12083_v58 = vld [vmem:[%s16904_s5 + $0x98] sm:$0xff]  }
 0x48b   :  { %v7048_v33 = vadd.f32 %v7024_v35, %v6995_v40  ;;  %v6997_v42 = vpop.f32.mrb[25].mxu1  ;;  %v16038_v7 = vadd.f32 %v6930_v14, %v6159_v2  ;;  %v6932_v6 = vpop.f32.mrb[27].mxu0  ;;  %v7033_v40 = vld [vmem:[#allocation4 + $0x178] sm:$0xff]  ;;  %11273 = vmatpush3.bf16.msra.mxu0 %v12077_v10  ;;  %v7575_v14 = vld [vmem:[#allocation4 + $0x10] sm:$0xff] }
 0x48c   :  { %v6998_v22 = vpop.f32.mrb[26].mxu1  ;;  %v16040_v45 = vadd.f32 %v6932_v6, %v6160_v34  ;;  %v16090_v42 = vld [vmem:[%s16904_s5 + $0x120] sm:$0xff]   ;;  %v7578_v6 = vld [vmem:[#allocation4 + $0x28] sm:$0xff]  ;;  %v7584_v10 = vld [vmem:[#allocation4 + $0x58] sm:$0xff] }
 0x48d   :  { %7072 = vst.msk [vmem:[#allocation4 + $0x130] sm:$0xff] %vm4183_vm3, %v7048_v33  ;;  %v7051_v54 = vadd.f32 %v7027_v56, %v6998_v22  ;;  %v7000_v15 = vpop.f32.mrb[27].mxu1  ;;  %v12080_v33 = vld [vmem:[%s16904_s5 + $0x90] sm:$0xff]  }
 0x48e   :  { %11504 = vmatprep.subr.bf16.mxu1 %v12080_v33 }
 0x48f   :  { %7075 = vst.msk [vmem:[#allocation4 + $0x148] sm:$0xff] %vm4183_vm3, %v7051_v54  ;;  %11505 = vmatpush3.bf16.msra.mxu1 %v12080_v33  ;;  %v7587_v33 = vld [vmem:[#allocation4 + $0x70] sm:$0xff] }
 0x490   :  { %v6936_v38 = vpop.f32.mrb[28].mxu0  ;;  %11506 = vmatprep.subr.bf16.mxu1 %v12083_v58 }
 0x491   :  { %v16056_v25 = vadd.f32 %v6936_v38, %v15894_v51  ;;  %v6938_v17 = vpop.f32.mrb[29].mxu0 }
 0x492   :  { %v7003_v0 = vpop.f32.mrb[28].mxu1  ;;  %v16059_v30 = vadd.f32 %v6938_v17, %v15899_v57  ;;  %v6940_v9 = vpop.f32.mrb[30].mxu0  ;;  %v12078_v57 = vld [vmem:[%s16904_s5 + $0x78] sm:$0xff]  }
 0x493   :  { %v7054_v8 = vadd.f32 %v7030_v12, %v7003_v0  ;;  %v7005_v35 = vpop.f32.mrb[29].mxu1  ;;  %v16066_v62 = vadd.f32 %v6940_v9, %v15902_v43  ;;  %v6942_v16 = vpop.f32.mrb[31].mxu0  ;;  %v12079_v43 = vld [vmem:[%s16904_s5 + $0x38] sm:$0xff]   ;;  %11274 = vmatprep.subr.bf16.mxu0 %v12078_v57  ;;  %11507 = vmatpush3.bf16.msra.mxu1 %v12083_v58 }
 0x494   :  { %v7006_v3 = vpop.f32.mrb[30].mxu1  ;;  %v16069_v48 = vadd.f32 %v6942_v16, %v15904_v1  ;;  %v12081_v1 = vld [vmem:[%s16904_s5 + $0xe0] sm:$0xff]   ;;  %11275 = vmatpush3.bf16.msra.mxu0 %v12079_v43  ;;  %11516 = vmatprep.subr.bf16.mxu1 %v16090_v42 }
 0x495   :  { %7078 = vst.msk [vmem:[#allocation4 + $0x160] sm:$0xff] %vm4183_vm3, %v7054_v8  ;;  %v7057_v51 = vadd.f32 %v7033_v40, %v7006_v3  ;;  %v7008_v2 = vpop.f32.mrb[31].mxu1  ;;  %11308 = vmatprep.subr.bf16.mxu0 %v12081_v1  ;;  %v7581_v8 = vld [vmem:[#allocation4 + $0x40] sm:$0xff] }
 0x497   :  { %7081 = vst.msk [vmem:[#allocation4 + $0x178] sm:$0xff] %vm4183_vm3, %v7057_v51 }
 0x4b3   :  { %v7469_v11 = vpop.f32.mrb[32].mxu0  ;;  %v7542_v34 = vpop.f32.mrb[32].mxu1 }
 0x4b4   :  { %v16094_v22 = vadd.f32 %v7469_v11, %v15915_v50  ;;  %v7599_v56 = vadd.f32 %v7575_v14, %v7542_v34  ;;  %v7471_v31 = vpop.f32.mrb[33].mxu0  ;;  %v7544_v54 = vpop.f32.mrb[33].mxu1 }
 0x4b5   :  { %v16097_v15 = vadd.f32 %v7471_v31, %v15918_v28  ;;  %v7473_v32 = vpop.f32.mrb[34].mxu0  ;;  %v7545_v46 = vpop.f32.mrb[34].mxu1 }
 0x4b6   :  { %7621 = vst [vmem:[#allocation4] sm:$0xff] %v16094_v22  ;;  %7623 = vst.msk [vmem:[#allocation4 + $0x10] sm:$0xff] %vm4183_vm3, %v7599_v56  ;;  %v16102_v41 = vadd.f32 %v7473_v32, %v15921_v47  ;;  %v7602_v12 = vadd.f32 %v7578_v6, %v7545_v46  ;;  %v7475_v61 = vpop.f32.mrb[35].mxu0  ;;  %v7547_v50 = vpop.f32.mrb[35].mxu1  ;;  %v7590_v56 = vld [vmem:[#allocation4 + $0x88] sm:$0xff] }
 0x4b7   :  { %7622 = vst [vmem:[#allocation4 + $0x8] sm:$0xff] %v16097_v15  ;;  %v16106_v38 = vadd.f32 %v7475_v61, %v15923_v55 }
 0x4b8   :  { %7624 = vst [vmem:[#allocation4 + $0x18] sm:$0xff] %v16102_v41  ;;  %7626 = vst.msk [vmem:[#allocation4 + $0x28] sm:$0xff] %vm4183_vm3, %v7602_v12  ;;  %v7593_v12 = vld [vmem:[#allocation4 + $0xa0] sm:$0xff] }
 0x4b9   :  { %7625 = vst [vmem:[#allocation4 + $0x20] sm:$0xff] %v16106_v38 }
 0x4bb   :  { %v7479_v28 = vpop.f32.mrb[36].mxu0  ;;  %v7550_v0 = vpop.f32.mrb[36].mxu1 }
 0x4bc   :  { %v16112_v47 = vadd.f32 %v7479_v28, %v15929_v20  ;;  %v7605_v17 = vadd.f32 %v7581_v8, %v7550_v0  ;;  %v7481_v35 = vpop.f32.mrb[37].mxu0  ;;  %v7552_v9 = vpop.f32.mrb[37].mxu1 }
 0x4bd   :  { %v16115_v3 = vadd.f32 %v7481_v35, %v15932_v27  ;;  %v7483_v55 = vpop.f32.mrb[38].mxu0  ;;  %v7553_v40 = vpop.f32.mrb[38].mxu1 }
 0x4be   :  { %7627 = vst [vmem:[#allocation4 + $0x30] sm:$0xff] %v16112_v47  ;;  %7629 = vst.msk [vmem:[#allocation4 + $0x40] sm:$0xff] %vm4183_vm3, %v7605_v17  ;;  %v16120_v51 = vadd.f32 %v7483_v55, %v15935_v53  ;;  %v7608_v16 = vadd.f32 %v7584_v10, %v7553_v40  ;;  %v7485_v2 = vpop.f32.mrb[39].mxu0  ;;  %v7555_v20 = vpop.f32.mrb[39].mxu1  ;;  %v7596_v17 = vld [vmem:[#allocation4 + $0xb8] sm:$0xff] }
 0x4bf   :  { %7628 = vst [vmem:[#allocation4 + $0x38] sm:$0xff] %v16115_v3  ;;  %v16124_v57 = vadd.f32 %v7485_v2, %v15937_v24 }
 0x4c0   :  { %7630 = vst [vmem:[#allocation4 + $0x48] sm:$0xff] %v16120_v51  ;;  %7632 = vst.msk [vmem:[#allocation4 + $0x58] sm:$0xff] %vm4183_vm3, %v7608_v16 }
 0x4c1   :  { %7631 = vst [vmem:[#allocation4 + $0x50] sm:$0xff] %v16124_v57 }
 0x4c3   :  { %v7489_v27 = vpop.f32.mrb[40].mxu0  ;;  %v7558_v43 = vpop.f32.mrb[40].mxu1 }
 0x4c4   :  { %v16130_v53 = vadd.f32 %v7489_v27, %v15943_v21  ;;  %v7611_v1 = vadd.f32 %v7587_v33, %v7558_v43  ;;  %v7491_v58 = vpop.f32.mrb[41].mxu0  ;;  %v7560_v11 = vpop.f32.mrb[41].mxu1  ;;  %v7930_v33 = vld [vmem:[#allocation4 + $0x10] sm:$0xff] }
 0x4c5   :  { %v16133_v34 = vadd.f32 %v7491_v58, %v15946_v44  ;;  %v7493_v24 = vpop.f32.mrb[42].mxu0  ;;  %v7561_v14 = vpop.f32.mrb[42].mxu1 }
 0x4c6   :  { %7633 = vst [vmem:[#allocation4 + $0x60] sm:$0xff] %v16130_v53  ;;  %7635 = vst.msk [vmem:[#allocation4 + $0x70] sm:$0xff] %vm4183_vm3, %v7611_v1  ;;  %v16138_v31 = vadd.f32 %v7493_v24, %v15949_v63  ;;  %v7614_v54 = vadd.f32 %v7590_v56, %v7561_v14  ;;  %v7495_v6 = vpop.f32.mrb[43].mxu0  ;;  %v7563_v21 = vpop.f32.mrb[43].mxu1  ;;  %v7933_v14 = vld [vmem:[#allocation4 + $0x28] sm:$0xff] }
 0x4c7   :  { %7634 = vst [vmem:[#allocation4 + $0x68] sm:$0xff] %v16133_v34  ;;  %v16142_v32 = vadd.f32 %v7495_v6, %v15951_v4 }
 0x4c8   :  { %7636 = vst [vmem:[#allocation4 + $0x78] sm:$0xff] %v16138_v31  ;;  %7638 = vst.msk [vmem:[#allocation4 + $0x88] sm:$0xff] %vm4183_vm3, %v7614_v54  ;;  %v7857_v54 = vld [vmem:[#allocation4 + $0xd0] sm:$0xff] }
 0x4c9   :  { %7637 = vst [vmem:[#allocation4 + $0x80] sm:$0xff] %v16142_v32 }
 0x4cb   :  { %v7499_v44 = vpop.f32.mrb[44].mxu0  ;;  %v7566_v46 = vpop.f32.mrb[44].mxu1 }
 0x4cc   :  { %v16148_v63 = vadd.f32 %v7499_v44, %v15957_v23  ;;  %v7617_v61 = vadd.f32 %v7593_v12, %v7566_v46  ;;  %v7501_v50 = vpop.f32.mrb[45].mxu0  ;;  %v7568_v28 = vpop.f32.mrb[45].mxu1 }
 0x4cd   :  { %v16151_v0 = vadd.f32 %v7501_v50, %v15960_v60  ;;  %v7503_v4 = vpop.f32.mrb[46].mxu0  ;;  %v7569_v8 = vpop.f32.mrb[46].mxu1  ;;  %v7927_v60 = vld [vmem:[%s16905_s4] sm:$0x7] }
 0x4ce   :  { %7639 = vst [vmem:[#allocation4 + $0x90] sm:$0xff] %v16148_v63  ;;  %7641 = vst.msk [vmem:[#allocation4 + $0xa0] sm:$0xff] %vm4183_vm3, %v7617_v61  ;;  %v16156_v35 = vadd.f32 %v7503_v4, %v15966_v59  ;;  %v7620_v9 = vadd.f32 %v7596_v17, %v7569_v8  ;;  %v7505_v55 = vpop.f32.mrb[47].mxu0  ;;  %v7571_v23 = vpop.f32.mrb[47].mxu1  ;;  %v16953_v59 = vld [vmem:[#allocation7_spill] sm:$0xff] }
 0x4cf   :  { %7640 = vst [vmem:[#allocation4 + $0x98] sm:$0xff] %v16151_v0  ;;  %v16160_v40 = vadd.f32 %v7505_v55, %v15968_v13  ;;  %v7963_v10 = vsub.s32 2, %v16953_v59  ;;  %v16954_v16 = vsub.s32 0, %v16953_v59  ;;  %v16955_v20 = vsub.s32 1, %v16953_v59  ;;  %v7860_v23 = vld [vmem:[#allocation4 + $0xe8] sm:$0xff] }
 0x4d0   :  { %7642 = vst [vmem:[#allocation4 + $0xa8] sm:$0xff] %v16156_v35  ;;  %7644 = vst.msk [vmem:[#allocation4 + $0xb8] sm:$0xff] %vm4183_vm3, %v7620_v9 }
 0x4d1   :  { %7643 = vst [vmem:[#allocation4 + $0xb0] sm:$0xff] %v16160_v40  ;;  %v16171_v2 = vrot.slane %v7927_v60, %v16954_v16  ;;  %v16175_v13 = vrot.slane %v7927_v60, %v16955_v20  ;;  %v16177_v27 = vrot.slane %v7927_v60, %v7963_v10 }
 0x4d3   :  { %v7968_v43 = vadd.f32 %v16171_v2, %v16094_v22  ;;  %v7969_v1 = vadd.f32 %v16175_v13, %v16097_v15  ;;  %v16185_v58 = vadd.f32 %v16171_v2, %v16102_v41  ;;  %v16189_v11 = vadd.f32 %v16175_v13, %v16106_v38  ;;  %v7936_v41 = vld [vmem:[#allocation4 + $0x40] sm:$0xff] }
 0x4d4   :  { %v16192_v24 = vadd.f32 %v16177_v27, %v7930_v33  ;;  %v16198_v15 = vadd.f32 %v16171_v2, %v16112_v47  ;;  %v16201_v38 = vadd.f32 %v16177_v27, %v7933_v14  ;;  %v16205_v12 = vadd.f32 %v16175_v13, %v16115_v3  ;;  %v7939_v14 = vld [vmem:[#allocation4 + $0x58] sm:$0xff] }
 0x4d5   :  { %v7992_v56 = vmax.f32 %v7968_v43, 0.0  ;;  %v7993_v6 = vmax.f32 %v7969_v1, 0.0  ;;  %v7995_v22 = vmax.f32 %v16185_v58, 0.0  ;;  %v7996_v21 = vmax.f32 %v16189_v11, 0.0 }
 0x4d6   :  { %v7994_v8 = vmax.f32 %v16192_v24, 0.0  ;;  %v16211_v47 = vadd.f32 %v16171_v2, %v16120_v51  ;;  %v16215_v17 = vadd.f32 %v16175_v13, %v16124_v57  ;;  %v7998_v57 = vmax.f32 %v16198_v15, 0.0  ;;  %v12085_v15 = vld [vmem:[%s16904_s5 + $0xa8] sm:$0xff]  }
 0x4d7   :  { %v7997_v1 = vmax.f32 %v16201_v38, 0.0  ;;  %v7999_v58 = vmax.f32 %v16205_v12, 0.0  ;;  %v7872_v24 = vld [vmem:[#allocation4 + $0x148] sm:$0xff] }
 0x4ec   :  { %v7751_v44 = vpop.f32.mrb[48].mxu0  ;;  %v7824_v46 = vpop.f32.mrb[48].mxu1 }
 0x4ed   :  { %v7879_v61 = vadd.f32 %v7751_v44, %v15974_v19  ;;  %v7881_v50 = vadd.f32 %v7857_v54, %v7824_v46  ;;  %v7753_v28 = vpop.f32.mrb[49].mxu0  ;;  %v7826_v4 = vpop.f32.mrb[49].mxu1  ;;  %v16219_v19 = vadd.f32 %v16177_v27, %v7936_v41  ;;  %v8001_v41 = vmax.f32 %v16211_v47, 0.0 }
 0x4ee   :  { %v7880_v9 = vadd.f32 %v7753_v28, %v15980_v18  ;;  %v7755_v55 = vpop.f32.mrb[50].mxu0  ;;  %v7827_v3 = vpop.f32.mrb[50].mxu1  ;;  %v16227_v18 = vadd.f32 %v16171_v2, %v16130_v53  ;;  %v16238_v53 = vadd.f32 %v16175_v13, %v16133_v34  ;;  %v16244_v4 = vadd.f32 %v16177_v27, %v7939_v14 }
 0x4ef   :  { %7903 = vst [vmem:[#allocation4 + $0xc0] sm:$0xff] %v7879_v61  ;;  %v8040_v60 = vadd.f32 %v16171_v2, %v7879_v61  ;;  %7905 = vst.msk [vmem:[#allocation4 + $0xd0] sm:$0xff] %vm4183_vm3, %v7881_v50  ;;  %v7882_v51 = vadd.f32 %v7755_v55, %v15983_v5  ;;  %v7884_v10 = vadd.f32 %v7860_v23, %v7827_v3  ;;  %v7757_v16 = vpop.f32.mrb[51].mxu0  ;;  %v7829_v20 = vpop.f32.mrb[51].mxu1  ;;  %v8000_v46 = vmax.f32 %v16219_v19, 0.0 }
 0x4f0   :  { %7904 = vst [vmem:[#allocation4 + $0xc8] sm:$0xff] %v7880_v9  ;;  %v8041_v43 = vadd.f32 %v16175_v13, %v7880_v9  ;;  %v7883_v33 = vadd.f32 %v7757_v16, %v15994_v26  ;;  %v8002_v61 = vmax.f32 %v16215_v17, 0.0  ;;  %v8004_v9 = vmax.f32 %v16227_v18, 0.0  ;;  %v7945_v17 = vld [vmem:[#allocation4 + $0x88] sm:$0xff] }
 0x4f1   :  { %v8064_v5 = vmax.f32 %v8040_v60, 0.0  ;;  %7906 = vst [vmem:[#allocation4 + $0xd8] sm:$0xff] %v7882_v51  ;;  %v8043_v54 = vadd.f32 %v16171_v2, %v7882_v51  ;;  %7908 = vst.msk [vmem:[#allocation4 + $0xe8] sm:$0xff] %vm4183_vm3, %v7884_v10  ;;  %v7863_v60 = vld [vmem:[#allocation4 + $0x100] sm:$0xff]  ;;  %v16249_v51 = vadd.f32 %v16171_v2, %v16138_v31  ;;  %v16255_v14 = vadd.f32 %v16175_v13, %v16142_v32 }
 0x4f2   :  { %v8065_v44 = vmax.f32 %v8041_v43, 0.0  ;;  %7907 = vst [vmem:[#allocation4 + $0xe0] sm:$0xff] %v7883_v33  ;;  %v8044_v26 = vadd.f32 %v16175_v13, %v7883_v33  ;;  %v8005_v33 = vmax.f32 %v16238_v53, 0.0  ;;  %v16354_v18 = vadd.f32 %v16175_v13, %v16160_v40  ;;  %v12089_v53 = vld [vmem:[%s16904_s5 + $0xb8] sm:$0xff]  }
 0x4f3   :  { %v8088_v50 = vadd.f32 %v8064_v5, %v7992_v56  ;;  %v8067_v28 = vmax.f32 %v8043_v54, 0.0 }
 0x4f4   :  { %v8089_v55 = vadd.f32 %v8065_v44, %v7993_v6  ;;  %v8068_v3 = vmax.f32 %v8044_v26, 0.0  ;;  %v7761_v23 = vpop.f32.mrb[52].mxu0  ;;  %v7832_v34 = vpop.f32.mrb[52].mxu1 }
 0x4f5   :  { %v8091_v10 = vadd.f32 %v8067_v28, %v7995_v22  ;;  %v7885_v16 = vadd.f32 %v7761_v23, %v16000_v36  ;;  %v7887_v20 = vadd.f32 %v7863_v60, %v7832_v34  ;;  %v7763_v56 = vpop.f32.mrb[53].mxu0  ;;  %v7834_v43 = vpop.f32.mrb[53].mxu1  ;;  %v7866_v28 = vld [vmem:[#allocation4 + $0x118] sm:$0xff] }
 0x4f6   :  { %v8018_v6 = vld [vmem:[#allocation4 + $0xd0] sm:$0xff]  ;;  %v8092_v5 = vadd.f32 %v8068_v3, %v7996_v21  ;;  %v7886_v54 = vadd.f32 %v7763_v56, %v16006_v29  ;;  %v7765_v31 = vpop.f32.mrb[54].mxu0  ;;  %v7835_v44 = vpop.f32.mrb[54].mxu1  ;;  %v12084_v43 = vld [vmem:[%s16904_s5 + $0xe8] sm:$0xff]  }
 0x4f7   :  { %v8042_v22 = vadd.f32 %v8018_v6, %v16177_v27  ;;  %v16261_v36 = vpack.c.bf16 %v8091_v10, %v8088_v50  ;;  %7909 = vst [vmem:[#allocation4 + $0xf0] sm:$0xff] %v7885_v16  ;;  %v8046_v26 = vadd.f32 %v16171_v2, %v7885_v16  ;;  %7911 = vst.msk [vmem:[#allocation4 + $0x100] sm:$0xff] %vm4183_vm3, %v7887_v20  ;;  %v7767_v23 = vpop.f32.mrb[55].mxu0  ;;  %v7837_v34 = vpop.f32.mrb[55].mxu1  ;;  %v12082_v50 = vld [vmem:[%s16904_s5 + $0xa0] sm:$0xff]   ;;  %v8003_v10 = vmax.f32 %v16244_v4, 0.0 }
 0x4f8   :  { %v7888_v32 = vadd.f32 %v7765_v31, %v16009_v39  ;;  %v8021_v11 = vld [vmem:[#allocation4 + $0xe8] sm:$0xff]  ;;  %7910 = vst [vmem:[#allocation4 + $0xf8] sm:$0xff] %v7886_v54  ;;  %v8047_v29 = vadd.f32 %v16175_v13, %v7886_v54  ;;  %v7890_v21 = vadd.f32 %v7866_v28, %v7835_v44  ;;  %v7889_v3 = vadd.f32 %v7767_v23, %v16011_v52  ;;  %v7942_v16 = vld [vmem:[#allocation4 + $0x70] sm:$0xff] }
 0x4f9   :  { %v16268_v60 = vpack.c.bf16 %v8092_v5, %v8089_v55  ;;  %v8045_v39 = vadd.f32 %v8021_v11, %v16177_v27  ;;  %v8070_v20 = vmax.f32 %v8046_v26, 0.0  ;;  %v8007_v52 = vmax.f32 %v16249_v51, 0.0 }
 0x4fa   :  { %7912 = vst [vmem:[#allocation4 + $0x108] sm:$0xff] %v7888_v32  ;;  %v8049_v56 = vadd.f32 %v16171_v2, %v7888_v32  ;;  %v8066_v55 = vmax.f32 %v8042_v22, 0.0  ;;  %v8071_v6 = vmax.f32 %v8047_v29, 0.0  ;;  %7914 = vst.msk [vmem:[#allocation4 + $0x118] sm:$0xff] %vm4183_vm3, %v7890_v21  ;;  %v8050_v5 = vadd.f32 %v16175_v13, %v7889_v3  ;;  %v7869_v29 = vld [vmem:[#allocation4 + $0x130] sm:$0xff] }
 0x4fb   :  { %7913 = vst [vmem:[#allocation4 + $0x110] sm:$0xff] %v7889_v3  ;;  %8457 = vmatprep.mubr.bf16.mxu0 %v16268_v60  ;;  %v8008_v54 = vmax.f32 %v16255_v14, 0.0  ;;  %v8069_v31 = vmax.f32 %v8045_v39, 0.0  ;;  %v8094_v44 = vadd.f32 %v8070_v20, %v7998_v57  ;;  %v16288_v32 = vadd.f32 %v16177_v27, %v7942_v16  ;;  %v7878_v14 = vld [vmem:[#allocation4 + $0x178] sm:$0xff] }
 0x4fc   :  { %v8073_v26 = vmax.f32 %v8049_v56, 0.0  ;;  %8458 = vmatmul.mubr.bf16.vlgmr.msra.gmra.mrb[64].mxu0 %v16261_v36  ;;  %v16292_v22 = vadd.f32 %v16171_v2, %v16148_v63  ;;  %v8095_v28 = vadd.f32 %v8071_v6, %v7999_v58  ;;  %v8074_v23 = vmax.f32 %v8050_v5, 0.0  ;;  %v7771_v34 = vpop.f32.mrb[56].mxu0  ;;  %v7840_v11 = vpop.f32.mrb[56].mxu1 }
 0x4fd   :  { %11309 = vmatpush3.bf16.msra.mxu0 %v12082_v50  ;;  %v8093_v57 = vadd.f32 %v8069_v31, %v7997_v1  ;;  %v7891_v63 = vadd.f32 %v7771_v34, %v16026_v49  ;;  %v7893_v3 = vadd.f32 %v7869_v29, %v7840_v11  ;;  %v7773_v12 = vpop.f32.mrb[57].mxu0  ;;  %v7842_v58 = vpop.f32.mrb[57].mxu1  ;;  %v12086_v50 = vld [vmem:[%s16904_s5 + $0xf0] sm:$0xff]   ;;  %v16309_v16 = vadd.f32 %v16175_v13, %v16151_v0 }
 0x4fe   :  { %v8097_v21 = vadd.f32 %v8073_v26, %v8001_v41  ;;  %11310 = vmatprep.subr.bf16.mxu0 %v12084_v43  ;;  %v8090_v38 = vadd.f32 %v8066_v55, %v7994_v8  ;;  %v8024_v1 = vld [vmem:[#allocation4 + $0x100] sm:$0xff]  ;;  %v8098_v47 = vadd.f32 %v8074_v23, %v8002_v61  ;;  %v7892_v49 = vadd.f32 %v7773_v12, %v16032_v37  ;;  %v7775_v41 = vpop.f32.mrb[58].mxu0  ;;  %v7843_v39 = vpop.f32.mrb[58].mxu1  ;;  %v12087_v34 = vld [vmem:[%s16904_s5 + $0xb0] sm:$0xff]  }
 0x4ff   :  { %v8048_v20 = vadd.f32 %v8024_v1, %v16177_v27  ;;  %7915 = vst [vmem:[#allocation4 + $0x120] sm:$0xff] %v7891_v63  ;;  %v8052_v43 = vadd.f32 %v16171_v2, %v7891_v63  ;;  %7917 = vst.msk [vmem:[#allocation4 + $0x130] sm:$0xff] %vm4183_vm3, %v7893_v3  ;;  %v7894_v0 = vadd.f32 %v7775_v41, %v16038_v7  ;;  %v7777_v8 = vpop.f32.mrb[59].mxu0  ;;  %v7845_v55 = vpop.f32.mrb[59].mxu1  ;;  %v8006_v31 = vmax.f32 %v16288_v32, 0.0  ;;  %v12093_v32 = vld [vmem:[%s16904_s5 + $0x128] sm:$0xff]  }
 0x500   :  { %v16317_v56 = vpack.c.bf16 %v8097_v21, %v8094_v44  ;;  %7916 = vst [vmem:[#allocation4 + $0x128] sm:$0xff] %v7892_v49  ;;  %v8053_v37 = vadd.f32 %v16175_v13, %v7892_v49  ;;  %v7896_v61 = vadd.f32 %v7872_v24, %v7843_v39  ;;  %v7895_v6 = vadd.f32 %v7777_v8, %v16040_v45  ;;  %v7875_v49 = vld [vmem:[#allocation4 + $0x160] sm:$0xff] }
 0x501   :  { %v8114_v5 = vpack.c.bf16 %v8093_v57, %v8090_v38  ;;  %11311 = vmatpush3.bf16.msra.mxu0 %v12085_v15  ;;  %v8027_v44 = vld [vmem:[#allocation4 + $0x118] sm:$0xff]  ;;  %v8076_v26 = vmax.f32 %v8052_v43, 0.0  ;;  %7918 = vst [vmem:[#allocation4 + $0x138] sm:$0xff] %v7894_v0  ;;  %v8055_v23 = vadd.f32 %v16171_v2, %v7894_v0  ;;  %v16326_v7 = vpack.c.bf16 %v8098_v47, %v8095_v28  ;;  %v12091_v24 = vld [vmem:[%s16904_s5 + $0x100] sm:$0xff]  }
 0x502   :  { %11312 = vmatprep.subr.bf16.mxu0 %v12086_v50  ;;  %v8072_v11 = vmax.f32 %v8048_v20, 0.0  ;;  %v8051_v29 = vadd.f32 %v8027_v44, %v16177_v27  ;;  %v8077_v45 = vmax.f32 %v8053_v37, 0.0  ;;  %7920 = vst.msk [vmem:[#allocation4 + $0x148] sm:$0xff] %vm4183_vm3, %v7896_v61  ;;  %7919 = vst [vmem:[#allocation4 + $0x140] sm:$0xff] %v7895_v6  ;;  %v8056_v15 = vadd.f32 %v16175_v13, %v7895_v6  ;;  %v12088_v28 = vld [vmem:[%s16904_s5 + $0xf8] sm:$0xff]  }
 0x503   :  { %8126 = vst.msk [vmem:[#allocation5 + $0x10] sm:$0xff] %vm4183_vm3, %v8114_v5  ;;  %v16339_v57 = vadd.f32 %v16177_v27, %v7945_v17  ;;  %v8010_v21 = vmax.f32 %v16292_v22, 0.0  ;;  %v8100_v63 = vadd.f32 %v8076_v26, %v8004_v9  ;;  %v8079_v3 = vmax.f32 %v8055_v23, 0.0  ;;  %8465 = vmatprep.mubr.bf16.mxu0 %v16326_v7  ;;  %v12092_v23 = vld [vmem:[%s16904_s5 + $0xc0] sm:$0xff]  }
 0x504   :  { %v16347_v12 = vadd.f32 %v16171_v2, %v16156_v35  ;;  %v8075_v58 = vmax.f32 %v8051_v29, 0.0  ;;  %v8101_v50 = vadd.f32 %v8077_v45, %v8005_v33  ;;  %v8080_v38 = vmax.f32 %v8056_v15, 0.0  ;;  %v7781_v1 = vpop.f32.mrb[60].mxu0  ;;  %v7848_v47 = vpop.f32.mrb[60].mxu1  ;;  %8466 = vmatmul.mubr.bf16.gmra.mrb[68].mxu0 %v16317_v56 }
 0x505   :  { %v8103_v9 = vadd.f32 %v8079_v3, %v8007_v52  ;;  %v7897_v35 = vadd.f32 %v7781_v1, %v16056_v25  ;;  %v7899_v41 = vadd.f32 %v7875_v49, %v7848_v47  ;;  %v7783_v39 = vpop.f32.mrb[61].mxu0  ;;  %v7850_v20 = vpop.f32.mrb[61].mxu1  ;;  %11313 = vmatpush3.bf16.msra.mxu0 %v12087_v34  ;;  %v8096_v33 = vadd.f32 %v8072_v11, %v8000_v46  ;;  %v12094_v11 = vld [vmem:[%s16904_s5 + $0x108] sm:$0xff]  }
 0x506   :  { %v8099_v40 = vadd.f32 %v8075_v58, %v8003_v10  ;;  %v8030_v43 = vld [vmem:[#allocation4 + $0x130] sm:$0xff]  ;;  %v8104_v51 = vadd.f32 %v8080_v38, %v8008_v54  ;;  %v7898_v25 = vadd.f32 %v7783_v39, %v16059_v30  ;;  %v7785_v52 = vpop.f32.mrb[62].mxu0  ;;  %v7851_v0 = vpop.f32.mrb[62].mxu1  ;;  %11314 = vmatprep.subr.bf16.mxu0 %v12088_v28  ;;  %v8011_v61 = vmax.f32 %v16309_v16, 0.0  ;;  %v7951_v38 = vld [vmem:[#allocation4 + $0xb8] sm:$0xff] }
 0x507   :  { %v8054_v8 = vadd.f32 %v8030_v43, %v16177_v27  ;;  %v16373_v19 = vpack.c.bf16 %v8103_v9, %v8100_v63  ;;  %7921 = vst [vmem:[#allocation4 + $0x150] sm:$0xff] %v7897_v35  ;;  %v8058_v46 = vadd.f32 %v16171_v2, %v7897_v35  ;;  %7923 = vst.msk [vmem:[#allocation4 + $0x160] sm:$0xff] %vm4183_vm3, %v7899_v41  ;;  %v7787_v30 = vpop.f32.mrb[63].mxu0  ;;  %v7853_v10 = vpop.f32.mrb[63].mxu1  ;;  %v8009_v29 = vmax.f32 %v16339_v57, 0.0  ;;  %v12095_v57 = vld [vmem:[%s16904_s5 + $0xc8] sm:$0xff]  }
 0x508   :  { %v7900_v4 = vadd.f32 %v7785_v52, %v16066_v62  ;;  %v8117_v54 = vpack.c.bf16 %v8099_v40, %v8096_v33  ;;  %7922 = vst [vmem:[#allocation4 + $0x158] sm:$0xff] %v7898_v25  ;;  %v8059_v55 = vadd.f32 %v16175_v13, %v7898_v25  ;;  %v7902_v17 = vadd.f32 %v7878_v14, %v7851_v0  ;;  %v12097_v9 = vld [vmem:[%s16904_s5 + $0x110] sm:$0xff]   ;;  %v12099_v14 = vld [vmem:[%s16904_s5 + $0x138] sm:$0xff]   ;;  %v12109_v10 = vld [vmem:[%s16904_s5 + $0x1c8] sm:$0xff]  }
 0x509   :  { %v7901_v37 = vadd.f32 %v7787_v30, %v16069_v48  ;;  %v8033_v6 = vld [vmem:[#allocation4 + $0x148] sm:$0xff]  ;;  %v8082_v5 = vmax.f32 %v8058_v46, 0.0  ;;  %11315 = vmatpush3.bf16.msra.mxu0 %v12089_v53  ;;  %v16384_v62 = vpack.c.bf16 %v8104_v51, %v8101_v50  ;;  %v8078_v34 = vmax.f32 %v8054_v8, 0.0  ;;  %v7948_v50 = vld [vmem:[#allocation4 + $0xa0] sm:$0xff]  ;;  %v12098_v33 = vld [vmem:[%s16904_s5 + $0xd0] sm:$0xff]  }
 0x50a   :  { %7924 = vst [vmem:[#allocation4 + $0x168] sm:$0xff] %v7900_v4  ;;  %v8061_v44 = vadd.f32 %v16171_v2, %v7900_v4  ;;  %v16382_v26 = vld [vmem:[#allocation5 + $0x10] sm:$0xff]  ;;  %8129 = vst.msk [vmem:[#allocation5 + $0x28] sm:$0xff] %vm4183_vm3, %v8117_v54  ;;  %v8057_v48 = vadd.f32 %v8033_v6, %v16177_v27  ;;  %v8083_v16 = vmax.f32 %v8059_v55, 0.0  ;;  %11316 = vmatprep.subr.bf16.mxu0 %v12091_v24  ;;  %v8013_v45 = vmax.f32 %v16347_v12, 0.0  ;;  %v12100_v51 = vld [vmem:[%s16904_s5 + $0x118] sm:$0xff]  }
 0x50b   :  { %7926 = vst.msk [vmem:[#allocation4 + $0x178] sm:$0xff] %vm4183_vm3, %v7902_v17  ;;  %7925 = vst [vmem:[#allocation4 + $0x170] sm:$0xff] %v7901_v37  ;;  %v8062_v2 = vadd.f32 %v16175_v13, %v7901_v37  ;;  %11508 = vmatprep.mubr.msk.bf16.mxu1 %vm4183_vm3, %v16382_v26  ;;  %v8106_v15 = vadd.f32 %v8082_v5, %v8010_v21  ;;  %8473 = vmatprep.mubr.bf16.mxu0 %v16384_v62  ;;  %v8014_v13 = vmax.f32 %v16354_v18, 0.0  ;;  %v12101_v24 = vld [vmem:[%s16904_s5 + $0xd8] sm:$0xff]   ;;  %v12104_v46 = vld [vmem:[%s16904_s5 + $0x1c0] sm:$0xff]  }
 0x50c   :  { %v8085_v28 = vmax.f32 %v8061_v44, 0.0  ;;  %v8081_v63 = vmax.f32 %v8057_v48, 0.0  ;;  %v8107_v3 = vadd.f32 %v8083_v16, %v8011_v61  ;;  %8474 = vmatmul.mubr.bf16.gmra.mrb[72].mxu0 %v16373_v19  ;;  %v8102_v22 = vadd.f32 %v8078_v34, %v8006_v31  ;;  %v12102_v54 = vld [vmem:[%s16904_s5 + $0x180] sm:$0xff]   ;;  %v12114_v55 = vld [vmem:[%s16904_s5 + $0x1d0] sm:$0xff]   ;;  %v12119_v37 = vld [vmem:[%s16904_s5 + $0x1d8] sm:$0xff]  }
 0x50d   :  { %v8086_v58 = vmax.f32 %v8062_v2, 0.0  ;;  %11317 = vmatpush3.bf16.msra.mxu0 %v12092_v23  ;;  %v7988_v35 = vadd.f32 %v16177_v27, %v7948_v50  ;;  %v7991_v41 = vadd.f32 %v16177_v27, %v7951_v38  ;;  %v12124_v61 = vld [vmem:[%s16904_s5 + $0x260] sm:$0xff]   ;;  %v12105_v5 = vld [vmem:[%s16904_s5 + $0x188] sm:$0xff]   ;;  %v12107_v23 = vld [vmem:[%s16904_s5 + $0x190] sm:$0xff]  }
 0x50e   :  { %v8109_v1 = vadd.f32 %v8085_v28, %v8013_v45  ;;  %v8105_v21 = vadd.f32 %v8081_v63, %v8009_v29  ;;  %v8036_v12 = vld [vmem:[#allocation4 + $0x160] sm:$0xff]  ;;  %11318 = vmatprep.subr.bf16.mxu0 %v12094_v11  ;;  %v12106_v44 = vld [vmem:[%s16904_s5 + $0x148] sm:$0xff]   ;;  %v12108_v34 = vld [vmem:[%s16904_s5 + $0x150] sm:$0xff]  }
 0x50f   :  { %v8110_v47 = vadd.f32 %v8086_v58, %v8014_v13  ;;  %v8060_v49 = vadd.f32 %v8036_v12, %v16177_v27  ;;  %v8012_v25 = vmax.f32 %v7988_v35, 0.0  ;;  %v8015_v52 = vmax.f32 %v7991_v41, 0.0  ;;  %v12103_v6 = vld [vmem:[%s16904_s5 + $0x140] sm:$0xff]   ;;  %v12110_v48 = vld [vmem:[%s16904_s5 + $0x198] sm:$0xff]   ;;  %v12115_v29 = vld [vmem:[%s16904_s5 + $0x1a8] sm:$0xff]  }
 0x510   :  { %v16411_v18 = vpack.c.bf16 %v8109_v1, %v8106_v15  ;;  %v8120_v39 = vpack.c.bf16 %v8105_v21, %v8102_v22  ;;  %v12111_v16 = vld [vmem:[%s16904_s5 + $0x158] sm:$0xff]   ;;  %v12112_v2 = vld [vmem:[%s16904_s5 + $0x1a0] sm:$0xff]   ;;  %v12127_v45 = vld [vmem:[%s16904_s5 + $0x268] sm:$0xff]  }
 0x511   :  { %v16421_v31 = vpack.c.bf16 %v8110_v47, %v8107_v3  ;;  %v16423_v53 = vld [vmem:[#allocation5 + $0x28] sm:$0xff]  ;;  %11319 = vmatpush3.bf16.msra.mxu0 %v12095_v57  ;;  %v8084_v40 = vmax.f32 %v8060_v49, 0.0  ;;  %v12113_v11 = vld [vmem:[%s16904_s5 + $0x160] sm:$0xff]   ;;  %v12117_v28 = vld [vmem:[%s16904_s5 + $0x1b0] sm:$0xff]  }
 0x512   :  { %v8039_v20 = vld [vmem:[#allocation4 + $0x178] sm:$0xff]  ;;  %11509 = vmatmul.mubr.msk.bf16.vlgmr.msra.gmra.mrb[64].mxu1 %vm4183_vm3, %v16423_v53  ;;  %8132 = vst.msk [vmem:[#allocation5 + $0x40] sm:$0xff] %vm4183_vm3, %v8120_v39  ;;  %11320 = vmatprep.subr.bf16.mxu0 %v12097_v9  ;;  %v12116_v15 = vld [vmem:[%s16904_s5 + $0x168] sm:$0xff]   ;;  %v12130_v13 = vld [vmem:[%s16904_s5 + $0x270] sm:$0xff]  }
 0x513   :  { %v8063_v43 = vadd.f32 %v8039_v20, %v16177_v27  ;;  %8481 = vmatprep.mubr.bf16.mxu0 %v16421_v31  ;;  %11517 = vmatpush3.bf16.msra.mxu1 %v16090_v42  ;;  %v12096_v27 = vld [vmem:[%s16904_s5 + $0x130] sm:$0xff]   ;;  %v8108_v8 = vadd.f32 %v8084_v40, %v8012_v25  ;;  %v12120_v3 = vld [vmem:[%s16904_s5 + $0x1b8] sm:$0xff]   ;;  %v12122_v38 = vld [vmem:[%s16904_s5 + $0x220] sm:$0xff]  }
 0x514   :  { %11518 = vmatprep.subr.bf16.mxu1 %v12093_v32  ;;  %8482 = vmatmul.mubr.bf16.gmra.mrb[76].mxu0 %v16411_v18  ;;  %v12118_v63 = vld [vmem:[%s16904_s5 + $0x170] sm:$0xff]   ;;  %v12133_v58 = vld [vmem:[%s16904_s5 + $0x278] sm:$0xff]   ;;  %v12136_v1 = vld [vmem:[%s16904_s5 + $0x2c0] sm:$0xff]  }
 0x515   :  { %v8087_v0 = vmax.f32 %v8063_v43, 0.0  ;;  %11321 = vmatpush3.bf16.msra.mxu0 %v12098_v33  ;;  %8788 = vmatprep.mubr.bf16.mxu0 %v16268_v60  ;;  %v12121_v50 = vld [vmem:[%s16904_s5 + $0x178] sm:$0xff]   ;;  %v12123_v57 = vld [vmem:[%s16904_s5 + $0x1e0] sm:$0xff]   ;;  %v12125_v22 = vld [vmem:[%s16904_s5 + $0x228] sm:$0xff]  }
 0x516   :  { %11322 = vmatprep.subr.bf16.mxu0 %v12100_v51  ;;  %v12137_v21 = vld [vmem:[%s16904_s5 + $0x280] sm:$0xff]   ;;  %v12140_v12 = vld [vmem:[%s16904_s5 + $0x2c8] sm:$0xff]   ;;  %v12128_v49 = vld [vmem:[%s16904_s5 + $0x230] sm:$0xff]  }
 0x517   :  { %v8111_v42 = vadd.f32 %v8087_v0, %v8015_v52  ;;  %11519 = vmatpush3.bf16.msra.mxu1 %v12093_v32  ;;  %v12126_v47 = vld [vmem:[%s16904_s5 + $0x1e8] sm:$0xff]   ;;  %v12144_v35 = vld [vmem:[%s16904_s5 + $0x2d0] sm:$0xff]   ;;  %v12131_v39 = vld [vmem:[%s16904_s5 + $0x238] sm:$0xff]  }
 0x518   :  { %11520 = vmatprep.subr.bf16.mxu1 %v12096_v27  ;;  %v12141_v9 = vld [vmem:[%s16904_s5 + $0x288] sm:$0xff]   ;;  %v12129_v41 = vld [vmem:[%s16904_s5 + $0x1f0] sm:$0xff]   ;;  %v12148_v20 = vld [vmem:[%s16904_s5 + $0x2d8] sm:$0xff]  }
 0x519   :  { %v8123_v4 = vpack.c.bf16 %v8111_v42, %v8108_v8  ;;  %v16451_v30 = vld [vmem:[#allocation5 + $0x40] sm:$0xff]  ;;  %11323 = vmatpush3.bf16.msra.mxu0 %v12101_v24  ;;  %v12145_v32 = vld [vmem:[%s16904_s5 + $0x290] sm:$0xff]   ;;  %v12132_v33 = vld [vmem:[%s16904_s5 + $0x1f8] sm:$0xff]  }
 0x51a   :  { %11512 = vmatprep.mubr.msk.bf16.mxu1 %vm4183_vm3, %v16451_v30  ;;  %11532 = vmatprep.subr.bf16.mxu0 %v12104_v46  ;;  %v12134_v40 = vld [vmem:[%s16904_s5 + $0x240] sm:$0xff]   ;;  %v12149_v43 = vld [vmem:[%s16904_s5 + $0x298] sm:$0xff]   ;;  %v12138_v52 = vld [vmem:[%s16904_s5 + $0x248] sm:$0xff]  }
 0x51b   :  { %8135 = vst.msk [vmem:[#allocation5 + $0x58] sm:$0xff] %vm4183_vm3, %v8123_v4  ;;  %11521 = vmatpush3.bf16.msra.mxu1 %v12096_v27  ;;  %v12150_v51 = vld [vmem:[%s16904_s5 + $0x2e0] sm:$0xff]   ;;  %v12153_v27 = vld [vmem:[%s16904_s5 + $0x2e8] sm:$0xff]   ;;  %v12142_v8 = vld [vmem:[%s16904_s5 + $0x250] sm:$0xff]  }
 0x51c   :  { %11522 = vmatprep.subr.bf16.mxu1 %v12099_v14  ;;  %8789 = vmatmul.mubr.bf16.vlgmr.msra.gmra.mrb[80].mxu0 %v16261_v36  ;;  %v12135_v25 = vld [vmem:[%s16904_s5 + $0x200] sm:$0xff]   ;;  %v12139_v24 = vld [vmem:[%s16904_s5 + $0x208] sm:$0xff]   ;;  %v12143_v4 = vld [vmem:[%s16904_s5 + $0x210] sm:$0xff]  }
 0x51d   :  { %8796 = vmatprep.mubr.bf16.mxu0 %v16326_v7  ;;  %11533 = vmatpush3.bf16.msra.mxu0 %v12104_v46  ;;  %v12152_v0 = vld [vmem:[%s16904_s5 + $0x2a0] sm:$0xff]   ;;  %v12154_v42 = vld [vmem:[%s16904_s5 + $0x2a8] sm:$0xff]   ;;  %v12155_v46 = vld [vmem:[%s16904_s5 + $0x2f0] sm:$0xff]  }
 0x51e   :  { %11534 = vmatprep.subr.bf16.mxu0 %v12109_v10 }
 0x51f   :  { %11523 = vmatpush3.bf16.msra.mxu1 %v12099_v14  ;;  %v12146_v14 = vld [vmem:[%s16904_s5 + $0x258] sm:$0xff]  }
 0x520   :  { %11356 = vmatprep.subr.bf16.mxu1 %v12102_v54  ;;  %v12158_v54 = vld [vmem:[%s16904_s5 + $0x2f8] sm:$0xff]  }
 0x521   :  { %11535 = vmatpush3.bf16.msra.mxu0 %v12109_v10  ;;  %v12157_v10 = vld [vmem:[%s16904_s5 + $0x2b0] sm:$0xff]  }
 0x522   :  { %v16467_v17 = vld [vmem:[#allocation5 + $0x58] sm:$0xff]  ;;  %11536 = vmatprep.subr.bf16.mxu0 %v12114_v55 }
 0x523   :  { %11513 = vmatmul.mubr.msk.bf16.gmra.mrb[68].mxu1 %vm4183_vm3, %v16467_v17 }
 0x524   :  { %11524 = vmatprep.mubr.msk.bf16.mxu1 %vm4183_vm3, %v16382_v26  ;;  %8797 = vmatmul.mubr.bf16.gmra.mrb[84].mxu0 %v16317_v56 }
 0x525   :  { %8804 = vmatprep.mubr.bf16.mxu0 %v16384_v62  ;;  %11537 = vmatpush3.bf16.msra.mxu0 %v12114_v55  ;;  %v12147_v55 = vld [vmem:[%s16904_s5 + $0x218] sm:$0xff]  }
 0x526   :  { %11538 = vmatprep.subr.bf16.mxu0 %v12119_v37 }
 0x529   :  { %11539 = vmatpush3.bf16.msra.mxu0 %v12119_v37  ;;  %v12151_v37 = vld [vmem:[%s16904_s5 + $0x300] sm:$0xff]  }
 0x52a   :  { %11548 = vmatprep.subr.bf16.mxu0 %v12124_v61 }
 0x52b   :  { %11525 = vmatmul.mubr.msk.bf16.vlgmr.msra.gmra.mrb[72].mxu1 %vm4183_vm3, %v16423_v53 }
 0x52c   :  { %11357 = vmatpush3.bf16.msra.mxu1 %v12103_v6  ;;  %11528 = vmatprep.mubr.msk.bf16.mxu1 %vm4183_vm3, %v16451_v30  ;;  %v12160_v6 = vld [vmem:[%s16904_s5 + $0x310] sm:$0xff]  }
 0x52d   :  { %11358 = vmatprep.subr.bf16.mxu1 %v12105_v5  ;;  %8805 = vmatmul.mubr.bf16.gmra.mrb[88].mxu0 %v16373_v19  ;;  %v12161_v5 = vld [vmem:[%s16904_s5 + $0x318] sm:$0xff]  }
 0x52e   :  { %8812 = vmatprep.mubr.bf16.mxu0 %v16421_v31 }
 0x530   :  { %11359 = vmatpush3.bf16.msra.mxu1 %v12106_v44 }
 0x531   :  { %11360 = vmatprep.subr.bf16.mxu1 %v12107_v23 }
 0x533   :  { %11529 = vmatmul.mubr.msk.bf16.gmra.mrb[76].mxu1 %vm4183_vm3, %v16467_v17 }
 0x534   :  { %11361 = vmatpush3.bf16.msra.mxu1 %v12108_v34  ;;  %9135 = vmatprep.mubr.bf16.mxu1 %v16268_v60 }
 0x535   :  { %11362 = vmatprep.subr.bf16.mxu1 %v12110_v48  ;;  %8813 = vmatmul.mubr.bf16.gmra.mrb[92].mxu0 %v16411_v18 }
 0x536   :  { %11540 = vmatprep.mubr.msk.bf16.mxu0 %vm4183_vm3, %v16382_v26 }
 0x538   :  { %11363 = vmatpush3.bf16.msra.mxu1 %v12111_v16 }
 0x539   :  { %11364 = vmatprep.subr.bf16.mxu1 %v12112_v2 }
 0x53c   :  { %11365 = vmatpush3.bf16.msra.mxu1 %v12113_v11 }
 0x53d   :  { %11366 = vmatprep.subr.bf16.mxu1 %v12115_v29  ;;  %11541 = vmatmul.mubr.msk.bf16.vlgmr.msra.gmra.mrb[96].mxu0 %vm4183_vm3, %v16423_v53 }
 0x53e   :  { %11549 = vmatpush3.bf16.msra.mxu0 %v12124_v61  ;;  %11544 = vmatprep.mubr.msk.bf16.mxu0 %vm4183_vm3, %v16451_v30  ;;  %v12159_v61 = vld [vmem:[%s16904_s5 + $0x2b8] sm:$0xff]  }
 0x53f   :  { %11550 = vmatprep.subr.bf16.mxu0 %v12127_v45 }
 0x540   :  { %11367 = vmatpush3.bf16.msra.mxu1 %v12116_v15 }
 0x541   :  { %11368 = vmatprep.subr.bf16.mxu1 %v12117_v28 }
 0x542   :  { %11551 = vmatpush3.bf16.msra.mxu0 %v12127_v45 }
 0x543   :  { %11552 = vmatprep.subr.bf16.mxu0 %v12130_v13 }
 0x544   :  { %11369 = vmatpush3.bf16.msra.mxu1 %v12118_v63 }
 0x545   :  { %11370 = vmatprep.subr.bf16.mxu1 %v12120_v3  ;;  %11545 = vmatmul.mubr.msk.bf16.gmra.mrb[100].mxu0 %vm4183_vm3, %v16467_v17 }
 0x546   :  { %11553 = vmatpush3.bf16.msra.mxu0 %v12130_v13  ;;  %11556 = vmatprep.mubr.msk.bf16.mxu0 %vm4183_vm3, %v16382_v26 }
 0x547   :  { %11554 = vmatprep.subr.bf16.mxu0 %v12133_v58 }
 0x548   :  { %11371 = vmatpush3.bf16.msra.mxu1 %v12121_v50 }
 0x549   :  { %11404 = vmatprep.subr.bf16.mxu1 %v12122_v38 }
 0x54a   :  { %11555 = vmatpush3.bf16.msra.mxu0 %v12133_v58 }
 0x54b   :  { %9136 = vmatmul.mubr.bf16.vlgmr.msra.gmra.mrb[80].mxu1 %v16261_v36  ;;  %11452 = vmatprep.subr.bf16.mxu0 %v12136_v1 }
 0x54c   :  { %9143 = vmatprep.mubr.bf16.mxu1 %v16326_v7  ;;  %11405 = vmatpush3.bf16.msra.mxu1 %v12123_v57 }
 0x54d   :  { %11406 = vmatprep.subr.bf16.mxu1 %v12125_v22  ;;  %11557 = vmatmul.mubr.msk.bf16.vlgmr.msra.gmra.mrb[104].mxu0 %vm4183_vm3, %v16423_v53 }
 0x54e   :  { %11453 = vmatpush3.bf16.msra.mxu0 %v12137_v21  ;;  %11560 = vmatprep.mubr.msk.bf16.mxu0 %vm4183_vm3, %v16451_v30 }
 0x54f   :  { %11454 = vmatprep.subr.bf16.mxu0 %v12140_v12 }
 0x550   :  { %11407 = vmatpush3.bf16.msra.mxu1 %v12126_v47 }
 0x551   :  { %11408 = vmatprep.subr.bf16.mxu1 %v12128_v49 }
 0x552   :  { %11455 = vmatpush3.bf16.msra.mxu0 %v12141_v9 }
 0x553   :  { %9144 = vmatmul.mubr.bf16.gmra.mrb[84].mxu1 %v16317_v56  ;;  %11456 = vmatprep.subr.bf16.mxu0 %v12144_v35 }
 0x554   :  { %9151 = vmatprep.mubr.bf16.mxu1 %v16384_v62  ;;  %11409 = vmatpush3.bf16.msra.mxu1 %v12129_v41 }
 0x555   :  { %11410 = vmatprep.subr.bf16.mxu1 %v12131_v39  ;;  %11561 = vmatmul.mubr.msk.bf16.gmra.mrb[108].mxu0 %vm4183_vm3, %v16467_v17  ;;  %v8139_v39 = vadd.s32 16, %v16953_v59 }
 0x556   :  { %11457 = vmatpush3.bf16.msra.mxu0 %v12145_v32  ;;  %9829 = vmatprep.mubr.bf16.mxu0 %v16268_v60  ;;  %v8138_v32 = vadd.s32 8, %v16953_v59 }
 0x557   :  { %11458 = vmatprep.subr.bf16.mxu0 %v12148_v20 }
 0x558   :  { %11411 = vmatpush3.bf16.msra.mxu1 %v12132_v33  ;;  %v8140_v33 = vadd.s32 24, %v16953_v59 }
 0x559   :  { %11412 = vmatprep.subr.bf16.mxu1 %v12134_v40 }
 0x55a   :  { %11459 = vmatpush3.bf16.msra.mxu0 %v12149_v43 }
 0x55b   :  { %9152 = vmatmul.mubr.bf16.gmra.mrb[88].mxu1 %v16373_v19  ;;  %11460 = vmatprep.subr.bf16.mxu0 %v12150_v51 }
 0x55c   :  { %9159 = vmatprep.mubr.bf16.mxu1 %v16421_v31  ;;  %11413 = vmatpush3.bf16.msra.mxu1 %v12135_v25 }
 0x55d   :  { %11414 = vmatprep.subr.bf16.mxu1 %v12138_v52 }
 0x55e   :  { %11461 = vmatpush3.bf16.msra.mxu0 %v12152_v0  ;;  %v16710_v0 = vand.u32 7, %v16953_v59 }
 0x55f   :  { %11462 = vmatprep.subr.bf16.mxu0 %v12153_v27 }
 0x560   :  { %11415 = vmatpush3.bf16.msra.mxu1 %v12139_v24  ;;  %vm8555_vm4 = vcmp.eq.s32.totalorder %v16710_v0, 0  ;;  %vm8886_vm9 = vcmp.eq.s32.totalorder %v16710_v0, 1 }
 0x561   :  { %11416 = vmatprep.subr.bf16.mxu1 %v12142_v8 }
 0x562   :  { %11463 = vmatpush3.bf16.msra.mxu0 %v12154_v42  ;;  %v16714_v42 = vand.u32 7, %v8139_v39 }
 0x563   :  { %9160 = vmatmul.mubr.bf16.gmra.mrb[92].mxu1 %v16411_v18  ;;  %11464 = vmatprep.subr.bf16.mxu0 %v12155_v46  ;;  %v16716_v46 = vand.u32 7, %v8138_v32 }
 0x564   :  { %11417 = vmatpush3.bf16.msra.mxu1 %v12143_v4  ;;  %9482 = vmatprep.mubr.bf16.mxu1 %v16268_v60  ;;  %v12156_v60 = vld [vmem:[%s16904_s5 + $0x308] sm:$0xff]   ;;  %vm8557_vm5 = vcmp.eq.s32.totalorder %v16714_v42, 0  ;;  %vm8888_vm7 = vcmp.eq.s32.totalorder %v16714_v42, 1 }
 0x565   :  { %11418 = vmatprep.subr.bf16.mxu1 %v12146_v14  ;;  %vm8556_vm6 = vcmp.eq.s32.totalorder %v16716_v46, 0  ;;  %vm8887_vm10 = vcmp.eq.s32.totalorder %v16716_v46, 1 }
 0x566   :  { %11465 = vmatpush3.bf16.msra.mxu0 %v12157_v10 }
 0x567   :  { %11466 = vmatprep.subr.bf16.mxu0 %v12158_v54  ;;  %v16720_v54 = vand.u32 7, %v8140_v33 }
 0x568   :  { %11419 = vmatpush3.bf16.msra.mxu1 %v12147_v55  ;;  %v8141_v55 = vadd.s32 32, %v16953_v59 }
 0x569   :  { %11564 = vmatprep.subr.bf16.mxu1 %v12151_v37  ;;  %vm8558_vm8 = vcmp.eq.s32.totalorder %v16720_v54, 0  ;;  %vm8889_vm11 = vcmp.eq.s32.totalorder %v16720_v54, 1 }
 0x56a   :  { %11467 = vmatpush3.bf16.msra.mxu0 %v12159_v61 }
 0x56b   :  { %9483 = vmatmul.mubr.bf16.vlgmr.msra.gmra.mrb[96].mxu1 %v16261_v36 }
 0x56c   :  { %9490 = vmatprep.mubr.bf16.mxu1 %v16326_v7  ;;  %11565 = vmatpush3.bf16.msra.mxu1 %v12151_v37 }
 0x56d   :  { %11566 = vmatprep.subr.bf16.mxu1 %v12156_v60  ;;  %9830 = vmatmul.mubr.bf16.vlgmr.msra.gmra.mrb[112].mxu0 %v16261_v36 }
 0x56e   :  { %9837 = vmatprep.mubr.bf16.mxu0 %v16326_v7 }
 0x570   :  { %11567 = vmatpush3.bf16.msra.mxu1 %v12156_v60 }
 0x571   :  { %11568 = vmatprep.subr.bf16.mxu1 %v12160_v6 }
 0x573   :  { %9491 = vmatmul.mubr.bf16.gmra.mrb[100].mxu1 %v16317_v56 }
 0x574   :  { %9498 = vmatprep.mubr.bf16.mxu1 %v16384_v62  ;;  %11569 = vmatpush3.bf16.msra.mxu1 %v12160_v6  ;;  %v16728_v6 = vand.u32 7, %v8141_v55 }
 0x575   :  { %9838 = vmatmul.mubr.bf16.gmra.mrb[116].mxu0 %v16317_v56  ;;  %11570 = vmatprep.subr.bf16.mxu1 %v12161_v5 }
 0x576   :  { %9845 = vmatprep.mubr.bf16.mxu0 %v16384_v62  ;;  %vm8559_vm12 = vcmp.eq.s32.totalorder %v16728_v6, 0  ;;  %vm8890_vm13 = vcmp.eq.s32.totalorder %v16728_v6, 1 }
 0x578   :  { %11571 = vmatpush3.bf16.msra.mxu1 %v12161_v5 }
 0x57b   :  { %9499 = vmatmul.mubr.bf16.gmra.mrb[104].mxu1 %v16373_v19 }
 0x57c   :  { %9506 = vmatprep.mubr.bf16.mxu1 %v16421_v31 }
 0x57d   :  { %9846 = vmatmul.mubr.bf16.gmra.mrb[120].mxu0 %v16373_v19 }
 0x57e   :  { %9853 = vmatprep.mubr.bf16.mxu0 %v16421_v31 }
 0x583   :  { %9507 = vmatmul.mubr.bf16.gmra.mrb[108].mxu1 %v16411_v18 }
 0x584   :  { %11572 = vmatprep.mubr.msk.bf16.mxu1 %vm4183_vm3, %v16382_v26 }
 0x585   :  { %9854 = vmatmul.mubr.bf16.gmra.mrb[124].mxu0 %v16411_v18 }
 0x58b   :  { %11573 = vmatmul.mubr.msk.bf16.vlgmr.msra.gmra.mrb[112].mxu1 %vm4183_vm3, %v16423_v53 }
 0x58c   :  { %11576 = vmatprep.mubr.msk.bf16.mxu1 %vm4183_vm3, %v16451_v30 }
 0x593   :  { %11577 = vmatmul.mubr.msk.bf16.gmra.mrb[116].mxu1 %vm4183_vm3, %v16467_v17 }
 0x5cf   :  { %v11276_v36 = vpop.f32.mrb[64].mxu0 }
 0x5d0   :  { %v11277_v56 = vpop.f32.mrb[65].mxu0 }
 0x5d1   :  { %v11278_v7 = vadd.f32 %v11277_v56, %v11276_v36  ;;  %v11279_v19 = vpop.f32.mrb[66].mxu0  ;;  %v8142_v56 = vadd.s32 40, %v16953_v59 }
 0x5d2   :  { %v11280_v62 = vpop.f32.mrb[67].mxu0 }
 0x5d3   :  { %v11281_v31 = vadd.f32 %v11280_v62, %v11279_v19 }
 0x5d7   :  { %v11282_v44 = vpop.f32.mrb[68].mxu0 }
 0x5d8   :  { %v11283_v23 = vpop.f32.mrb[69].mxu0 }
 0x5d9   :  { %v11284_v26 = vadd.f32 %v11283_v23, %v11282_v44  ;;  %v11285_v34 = vpop.f32.mrb[70].mxu0 }
 0x5da   :  { %v11286_v18 = vpop.f32.mrb[71].mxu0 }
 0x5db   :  { %v11287_v48 = vadd.f32 %v11286_v18, %v11285_v34 }
 0x5df   :  { %v11288_v16 = vpop.f32.mrb[72].mxu0 }
 0x5e0   :  { %v11289_v53 = vpop.f32.mrb[73].mxu0 }
 0x5e1   :  { %v11290_v2 = vadd.f32 %v11289_v53, %v11288_v16  ;;  %v11291_v11 = vpop.f32.mrb[74].mxu0 }
 0x5e2   :  { %v11292_v30 = vpop.f32.mrb[75].mxu0 }
 0x5e3   :  { %v11293_v29 = vadd.f32 %v11292_v30, %v11291_v11 }
 0x5e5   :  { %v11510_v45 = vpop.f32.mrb[64].mxu1 }
 0x5e6   :  { %v8524_v17 = vpop.f32.mrb[65].mxu1  ;;  %v8533_v15 = vadd.f32 %v11510_v45, %v11284_v26 }
 0x5e7   :  { %v8525_v28 = vadd.f32 %v11278_v7, %v8524_v17  ;;  %v11511_v13 = vpop.f32.mrb[66].mxu1  ;;  %v11294_v63 = vpop.f32.mrb[76].mxu0 }
 0x5e8   :  { %v8527_v3 = vpop.f32.mrb[67].mxu1  ;;  %v8536_v58 = vadd.f32 %v11511_v13, %v11287_v48  ;;  %v11295_v50 = vpop.f32.mrb[77].mxu0  ;;  %v8581_v44 = vsel %vm8557_vm5, %v8533_v15, 0.0  ;;  %vm9234_vm5 = vcmp.eq.s32.totalorder %v16716_v46, 2 }
 0x5e9   :  { %v16700_v38 = vadd.f32 %v11281_v31, %v8527_v3  ;;  %v11296_v1 = vadd.f32 %v11295_v50, %v11294_v63  ;;  %v11297_v57 = vpop.f32.mrb[78].mxu0  ;;  %v8579_v31 = vsel %vm8555_vm4, %v8525_v28, 0.0  ;;  %v16752_v50 = vand.u32 7, %v8142_v56 }
 0x5ea   :  { %v11298_v22 = vpop.f32.mrb[79].mxu0  ;;  %v8582_v30 = vsel %vm8558_vm8, %v8536_v58, 0.0  ;;  %v8144_v58 = vadd.s32 56, %v16953_v59  ;;  %vm9233_vm4 = vcmp.eq.s32.totalorder %v16710_v0, 2  ;;  %vm9237_vm8 = vcmp.eq.s32.totalorder %v16728_v6, 2 }
 0x5eb   :  { %v11299_v21 = vadd.f32 %v11298_v22, %v11297_v57  ;;  %v8580_v15 = vsel %vm8556_vm6, %v16700_v38, 0.0  ;;  %vm8560_vm14 = vcmp.eq.s32.totalorder %v16752_v50, 0  ;;  %vm8891_vm15 = vcmp.eq.s32.totalorder %v16752_v50, 1 }
 0x5ec   :  { %vm9235_vm6 = vcmp.eq.s32.totalorder %v16714_v42, 2 }
 0x5ef   :  { %v11324_v12 = vpop.f32.mrb[80].mxu0 }
 0x5f0   :  { %v11325_v47 = vpop.f32.mrb[81].mxu0 }
 0x5f1   :  { %v11326_v49 = vadd.f32 %v11325_v47, %v11324_v12  ;;  %v11327_v9 = vpop.f32.mrb[82].mxu0 }
 0x5f2   :  { %v11328_v35 = vpop.f32.mrb[83].mxu0 }
 0x5f3   :  { %v11329_v41 = vadd.f32 %v11328_v35, %v11327_v9 }
 0x5f6   :  { %v11514_v20 = vpop.f32.mrb[68].mxu1 }
 0x5f7   :  { %v8540_v40 = vpop.f32.mrb[69].mxu1  ;;  %v16705_v43 = vadd.f32 %v11514_v20, %v11296_v1  ;;  %v11330_v52 = vpop.f32.mrb[84].mxu0 }
 0x5f8   :  { %v16707_v51 = vadd.f32 %v11290_v2, %v8540_v40  ;;  %v11515_v25 = vpop.f32.mrb[70].mxu1  ;;  %v11331_v8 = vpop.f32.mrb[85].mxu0 }
 0x5f9   :  { %v8543_v27 = vpop.f32.mrb[71].mxu1  ;;  %v16712_v24 = vadd.f32 %v11515_v25, %v11299_v21  ;;  %v11332_v14 = vadd.f32 %v11331_v8, %v11330_v52  ;;  %v11333_v10 = vpop.f32.mrb[86].mxu0 }
 0x5fa   :  { %v16718_v4 = vadd.f32 %v11293_v29, %v8543_v27  ;;  %v11334_v37 = vpop.f32.mrb[87].mxu0  ;;  %v8143_v29 = vadd.s32 48, %v16953_v59  ;;  %v8583_v35 = vsel %vm8559_vm12, %v16707_v51, 0.0  ;;  %vm9580_vm12 = vcmp.eq.s32.totalorder %v16710_v0, 3 }
 0x5fb   :  { %v11335_v61 = vadd.f32 %v11334_v37, %v11333_v10 }
 0x5fc   :  { %v16758_v22 = vand.u32 7, %v8143_v29  ;;  %v8584_v25 = vsel %vm8560_vm14, %v16718_v4, 0.0  ;;  %vm9582_vm14 = vcmp.eq.s32.totalorder %v16714_v42, 3 }
 0x5fe   :  { %v11526_v60 = vpop.f32.mrb[72].mxu1  ;;  %vm8561_vm0 = vcmp.eq.s32.totalorder %v16758_v22, 0  ;;  %vm8892_vm1 = vcmp.eq.s32.totalorder %v16758_v22, 1 }
 0x5ff   :  { %v8855_v5 = vpop.f32.mrb[73].mxu1  ;;  %v8864_v36 = vadd.f32 %v11526_v60, %v11332_v14  ;;  %v8585_v51 = vsel %vm8561_vm0, %v16705_v43, 0.0  ;;  %vm9584_vm0 = vcmp.eq.s32.totalorder %v16728_v6, 3 }
 0x600   :  { %v11527_v7 = vpop.f32.mrb[74].mxu1  ;;  %v8856_v19 = vadd.f32 %v11326_v49, %v8855_v5  ;;  %v11336_v62 = vpop.f32.mrb[88].mxu0  ;;  %v16762_v49 = vand.u32 7, %v8144_v58 }
 0x601   :  { %v8858_v23 = vpop.f32.mrb[75].mxu1  ;;  %v8912_v26 = vsel %vm8888_vm7, %v8864_v36, 0.0  ;;  %v8867_v34 = vadd.f32 %v11527_v7, %v11335_v61  ;;  %v11337_v18 = vpop.f32.mrb[89].mxu0  ;;  %vm9236_vm7 = vcmp.eq.s32.totalorder %v16720_v54, 2 }
 0x602   :  { %v8910_v48 = vsel %vm8886_vm9, %v8856_v19, 0.0  ;;  %v8859_v16 = vadd.f32 %v11329_v41, %v8858_v23  ;;  %v16738_v53 = vadd.f32 %v8912_v26, %v8581_v44  ;;  %v11338_v2 = vadd.f32 %v11337_v18, %v11336_v62  ;;  %v11339_v11 = vpop.f32.mrb[90].mxu0 }
 0x603   :  { %v8913_v45 = vsel %vm8889_vm11, %v8867_v34, 0.0  ;;  %v11340_v17 = vpop.f32.mrb[91].mxu0  ;;  %v16743_v28 = vadd.f32 %v8910_v48, %v8579_v31  ;;  %vm8562_vm2 = vcmp.eq.s32.totalorder %v16762_v49, 0  ;;  %vm8893_vm3 = vcmp.eq.s32.totalorder %v16762_v49, 1 }
 0x604   :  { %v8911_v13 = vsel %vm8887_vm10, %v8859_v16, 0.0  ;;  %v16750_v63 = vadd.f32 %v8913_v45, %v8582_v30  ;;  %v11341_v3 = vadd.f32 %v11340_v17, %v11339_v11  ;;  %v8586_v61 = vsel %vm8562_vm2, %v16712_v24, 0.0 }
 0x605   :  { %v16755_v1 = vadd.f32 %v8911_v13, %v8580_v15  ;;  %vm9238_vm9 = vcmp.eq.s32.totalorder %v16752_v50, 2  ;;  %vm9239_vm10 = vcmp.eq.s32.totalorder %v16758_v22, 2  ;;  %vm9240_vm11 = vcmp.eq.s32.totalorder %v16762_v49, 2 }
 0x606   :  { %v11530_v57 = vpop.f32.mrb[76].mxu1  ;;  %vm9586_vm2 = vcmp.eq.s32.totalorder %v16758_v22, 3 }
 0x607   :  { %v8871_v21 = vpop.f32.mrb[77].mxu1 }
 0x608   :  { %v11531_v38 = vpop.f32.mrb[78].mxu1  ;;  %v8872_v12 = vadd.f32 %v11338_v2, %v8871_v21  ;;  %v11342_v47 = vpop.f32.mrb[92].mxu0 }
 0x609   :  { %v8874_v9 = vpop.f32.mrb[79].mxu1  ;;  %v11343_v59 = vpop.f32.mrb[93].mxu0 }
 0x60a   :  { %v8914_v41 = vsel %vm8890_vm13, %v8872_v12, 0.0  ;;  %v8875_v39 = vadd.f32 %v11341_v3, %v8874_v9  ;;  %v11344_v32 = vadd.f32 %v11343_v59, %v11342_v47  ;;  %v11345_v20 = vpop.f32.mrb[94].mxu0  ;;  %vm9581_vm13 = vcmp.eq.s32.totalorder %v16716_v46, 3 }
 0x60b   :  { %v16767_v33 = vadd.f32 %v8914_v41, %v8583_v35  ;;  %v11346_v40 = vpop.f32.mrb[95].mxu0 }
 0x60c   :  { %v8915_v52 = vsel %vm8891_vm15, %v8875_v39, 0.0  ;;  %v8880_v27 = vadd.f32 %v11530_v57, %v11344_v32  ;;  %v11347_v8 = vadd.f32 %v11346_v40, %v11345_v20  ;;  %vm9583_vm15 = vcmp.eq.s32.totalorder %v16720_v54, 3 }
 0x60d   :  { %v16772_v14 = vadd.f32 %v8915_v52, %v8584_v25 }
 0x60e   :  { %v8916_v10 = vsel %vm8892_vm1, %v8880_v27, 0.0  ;;  %v8883_v55 = vadd.f32 %v11531_v38, %v11347_v8  ;;  %vm9585_vm1 = vcmp.eq.s32.totalorder %v16752_v50, 3 }
 0x60f   :  { %v16776_v37 = vadd.f32 %v8916_v10, %v8585_v51 }
 0x610   :  { %v8917_v60 = vsel %vm8893_vm3, %v8883_v55, 0.0  ;;  %v11542_v5 = vpop.f32.mrb[96].mxu0  ;;  %vm9587_vm3 = vcmp.eq.s32.totalorder %v16762_v49, 3 }
 0x611   :  { %v16779_v4 = vadd.f32 %v8917_v60, %v8586_v61  ;;  %v9202_v36 = vpop.f32.mrb[97].mxu0 }
 0x612   :  { %v11543_v56 = vpop.f32.mrb[98].mxu0 }
 0x613   :  { %v9205_v7 = vpop.f32.mrb[99].mxu0 }
 0x618   :  { %v11546_v19 = vpop.f32.mrb[100].mxu0 }
 0x619   :  { %v9218_v62 = vpop.f32.mrb[101].mxu0 }
 0x61a   :  { %v11547_v31 = vpop.f32.mrb[102].mxu0 }
 0x61b   :  { %v9221_v44 = vpop.f32.mrb[103].mxu0 }
 0x61e   :  { %v11372_v23 = vpop.f32.mrb[80].mxu1 }
 0x61f   :  { %v11373_v26 = vpop.f32.mrb[81].mxu1 }
 0x620   :  { %v11374_v43 = vadd.f32 %v11373_v26, %v11372_v23  ;;  %v11375_v34 = vpop.f32.mrb[82].mxu1  ;;  %v16781_v18 = vpop.f32.mrb[104].mxu0 }
 0x621   :  { %v11376_v48 = vpop.f32.mrb[83].mxu1  ;;  %v16784_v24 = vpop.f32.mrb[105].mxu0 }
 0x622   :  { %v11377_v16 = vadd.f32 %v11376_v48, %v11375_v34  ;;  %v9203_v2 = vadd.f32 %v11374_v43, %v9202_v36  ;;  %v16786_v11 = vpop.f32.mrb[106].mxu0 }
 0x623   :  { %v16789_v30 = vpop.f32.mrb[107].mxu0 }
 0x624   :  { %v9257_v29 = vsel %vm9233_vm4, %v9203_v2, 0.0  ;;  %v9206_v45 = vadd.f32 %v11377_v16, %v9205_v7  ;;  %vm9929_vm4 = vcmp.eq.s32.totalorder %v16714_v42, 4 }
 0x625   :  { %v16792_v17 = vadd.f32 %v9257_v29, %v16743_v28 }
 0x626   :  { %v9258_v15 = vsel %vm9234_vm5, %v9206_v45, 0.0  ;;  %v11378_v13 = vpop.f32.mrb[84].mxu1  ;;  %vm9927_vm5 = vcmp.eq.s32.totalorder %v16710_v0, 4 }
 0x627   :  { %v16795_v3 = vadd.f32 %v9258_v15, %v16755_v1  ;;  %v11379_v58 = vpop.f32.mrb[85].mxu1 }
 0x628   :  { %v11380_v57 = vadd.f32 %v11379_v58, %v11378_v13  ;;  %v11381_v21 = vpop.f32.mrb[86].mxu1  ;;  %v16797_v38 = vpop.f32.mrb[108].mxu0 }
 0x629   :  { %v11382_v12 = vpop.f32.mrb[87].mxu1  ;;  %v16800_v47 = vpop.f32.mrb[109].mxu0 }
 0x62a   :  { %v9211_v9 = vadd.f32 %v11542_v5, %v11380_v57  ;;  %v11383_v59 = vadd.f32 %v11382_v12, %v11381_v21  ;;  %v16802_v35 = vpop.f32.mrb[110].mxu0 }
 0x62b   :  { %v16805_v28 = vpop.f32.mrb[111].mxu0 }
 0x62c   :  { %v9259_v1 = vsel %vm9235_vm6, %v9211_v9, 0.0  ;;  %v9214_v41 = vadd.f32 %v11543_v56, %v11383_v59  ;;  %vm9930_vm6 = vcmp.eq.s32.totalorder %v16720_v54, 4 }
 0x62d   :  { %v16808_v39 = vadd.f32 %v9259_v1, %v16738_v53 }
 0x62e   :  { %v9260_v32 = vsel %vm9236_vm7, %v9214_v41, 0.0  ;;  %v11384_v20 = vpop.f32.mrb[88].mxu1  ;;  %vm9928_vm7 = vcmp.eq.s32.totalorder %v16716_v46, 4 }
 0x62f   :  { %v16811_v40 = vadd.f32 %v9260_v32, %v16750_v63  ;;  %v11385_v25 = vpop.f32.mrb[89].mxu1 }
 0x630   :  { %v11386_v52 = vadd.f32 %v11385_v25, %v11384_v20  ;;  %v11387_v27 = vpop.f32.mrb[90].mxu1 }
 0x631   :  { %v11388_v8 = vpop.f32.mrb[91].mxu1 }
 0x632   :  { %v9219_v51 = vadd.f32 %v11386_v52, %v9218_v62  ;;  %v11389_v10 = vadd.f32 %v11388_v8, %v11387_v27 }
 0x634   :  { %v9261_v55 = vsel %vm9237_vm8, %v9219_v51, 0.0  ;;  %v9222_v61 = vadd.f32 %v11389_v10, %v9221_v44  ;;  %vm9931_vm8 = vcmp.eq.s32.totalorder %v16728_v6, 4 }
 0x635   :  { %v16816_v53 = vadd.f32 %v9261_v55, %v16767_v33 }
 0x636   :  { %v9262_v60 = vsel %vm9238_vm9, %v9222_v61, 0.0  ;;  %v11390_v5 = vpop.f32.mrb[92].mxu1  ;;  %vm9933_vm9 = vcmp.eq.s32.totalorder %v16758_v22, 4 }
 0x637   :  { %v16819_v63 = vadd.f32 %v9262_v60, %v16772_v14  ;;  %v11391_v36 = vpop.f32.mrb[93].mxu1 }
 0x638   :  { %v11392_v56 = vadd.f32 %v11391_v36, %v11390_v5  ;;  %v11393_v7 = vpop.f32.mrb[94].mxu1 }
 0x639   :  { %v11394_v23 = vpop.f32.mrb[95].mxu1 }
 0x63a   :  { %v9227_v62 = vadd.f32 %v11546_v19, %v11392_v56  ;;  %v11395_v26 = vadd.f32 %v11394_v23, %v11393_v7 }
 0x63c   :  { %v9263_v43 = vsel %vm9239_vm10, %v9227_v62, 0.0  ;;  %v9230_v44 = vadd.f32 %v11547_v31, %v11395_v26  ;;  %vm9932_vm10 = vcmp.eq.s32.totalorder %v16752_v50, 4 }
 0x63d   :  { %v16824_v33 = vadd.f32 %v9263_v43, %v16776_v37 }
 0x63e   :  { %v9264_v34 = vsel %vm9240_vm11, %v9230_v44, 0.0  ;;  %v11420_v48 = vpop.f32.mrb[96].mxu1  ;;  %vm9934_vm11 = vcmp.eq.s32.totalorder %v16762_v49, 4 }
 0x63f   :  { %v16827_v14 = vadd.f32 %v9264_v34, %v16779_v4  ;;  %v11421_v16 = vpop.f32.mrb[97].mxu1 }
 0x640   :  { %v11422_v2 = vadd.f32 %v11421_v16, %v11420_v48  ;;  %v11423_v29 = vpop.f32.mrb[98].mxu1  ;;  %v11468_v45 = vpop.f32.mrb[112].mxu0 }
 0x641   :  { %v11424_v19 = vpop.f32.mrb[99].mxu1  ;;  %v11469_v15 = vpop.f32.mrb[113].mxu0 }
 0x642   :  { %v9550_v13 = vadd.f32 %v11422_v2, %v16784_v24  ;;  %v11425_v58 = vadd.f32 %v11424_v19, %v11423_v29  ;;  %v16831_v31 = vadd.f32 %v11469_v15, %v11468_v45  ;;  %v11471_v37 = vpop.f32.mrb[114].mxu0 }
 0x643   :  { %v11472_v57 = vpop.f32.mrb[115].mxu0 }
 0x644   :  { %v9604_v21 = vsel %vm9580_vm12, %v9550_v13, 0.0  ;;  %v9553_v4 = vadd.f32 %v11425_v58, %v16789_v30  ;;  %v16835_v12 = vadd.f32 %v11472_v57, %v11471_v37  ;;  %vm10063_vm12 = vcmask 1041409  }
 0x645   :  { %v16838_v9 = vadd.f32 %v9604_v21, %v16792_v17 }
 0x646   :  { %v9605_v59 = vsel %vm9581_vm13, %v9553_v4, 0.0  ;;  %v11426_v1 = vpop.f32.mrb[100].mxu1  ;;  %vm10066_vm13 = vcmask 1042434  }
 0x647   :  { %v11427_v41 = vpop.f32.mrb[101].mxu1  ;;  %v16841_v24 = vadd.f32 %v9605_v59, %v16795_v3 }
 0x648   :  { %v11428_v32 = vadd.f32 %v11427_v41, %v11426_v1  ;;  %v11429_v20 = vpop.f32.mrb[102].mxu1  ;;  %v11474_v25 = vpop.f32.mrb[116].mxu0 }
 0x649   :  { %v11430_v52 = vpop.f32.mrb[103].mxu1  ;;  %v11475_v27 = vpop.f32.mrb[117].mxu0 }
 0x64a   :  { %v9558_v30 = vadd.f32 %v16781_v18, %v11428_v32  ;;  %v11431_v8 = vadd.f32 %v11430_v52, %v11429_v20  ;;  %v11476_v51 = vadd.f32 %v11475_v27, %v11474_v25  ;;  %v11477_v10 = vpop.f32.mrb[118].mxu0 }
 0x64b   :  { %v11478_v17 = vpop.f32.mrb[119].mxu0 }
 0x64c   :  { %v9606_v55 = vsel %vm9582_vm14, %v9558_v30, 0.0  ;;  %v9561_v61 = vadd.f32 %v16786_v11, %v11431_v8  ;;  %v11479_v3 = vadd.f32 %v11478_v17, %v11477_v10  ;;  %vm10069_vm14 = vcmask 1043459  }
 0x64d   :  { %v9622_v60 = vadd.f32 %v9606_v55, %v16808_v39 }
 0x64e   :  { %v9607_v5 = vsel %vm9583_vm15, %v9561_v61, 0.0  ;;  %v11432_v36 = vpop.f32.mrb[104].mxu1  ;;  %vm10072_vm15 = vcmask 1044484  }
 0x64f   :  { %v11433_v56 = vpop.f32.mrb[105].mxu1  ;;  %v9623_v7 = vadd.f32 %v9607_v5, %v16811_v40 }
 0x650   :  { %v11434_v23 = vadd.f32 %v11433_v56, %v11432_v36  ;;  %v11435_v62 = vpop.f32.mrb[106].mxu1  ;;  %v11480_v18 = vpop.f32.mrb[120].mxu0 }
 0x651   :  { %v11436_v26 = vpop.f32.mrb[107].mxu1  ;;  %v11481_v43 = vpop.f32.mrb[121].mxu0 }
 0x652   :  { %v9566_v44 = vadd.f32 %v11434_v23, %v16800_v47  ;;  %v11437_v34 = vadd.f32 %v11436_v26, %v11435_v62  ;;  %v16851_v48 = vadd.f32 %v11481_v43, %v11480_v18  ;;  %v11483_v11 = vpop.f32.mrb[122].mxu0 }
 0x653   :  { %v11484_v39 = vpop.f32.mrb[123].mxu0 }
 0x654   :  { %v9608_v16 = vsel %vm9584_vm0, %v9566_v44, 0.0  ;;  %v9569_v2 = vadd.f32 %v11437_v34, %v16805_v28  ;;  %v16855_v40 = vadd.f32 %v11484_v39, %v11483_v11  ;;  %vm10075_vm0 = vcmask 1045509  }
 0x655   :  { %v16858_v29 = vadd.f32 %v9608_v16, %v16816_v53 }
 0x656   :  { %v9609_v45 = vsel %vm9585_vm1, %v9569_v2, 0.0  ;;  %v11438_v19 = vpop.f32.mrb[108].mxu1  ;;  %vm10078_vm1 = vcmask 1046534  }
 0x657   :  { %v11439_v15 = vpop.f32.mrb[109].mxu1  ;;  %v16861_v47 = vadd.f32 %v9609_v45, %v16819_v63 }
 0x658   :  { %v11440_v13 = vadd.f32 %v11439_v15, %v11438_v19  ;;  %v11441_v58 = vpop.f32.mrb[110].mxu1  ;;  %v11486_v37 = vpop.f32.mrb[124].mxu0 }
 0x659   :  { %v11442_v57 = vpop.f32.mrb[111].mxu1  ;;  %v11487_v21 = vpop.f32.mrb[125].mxu0 }
 0x65a   :  { %v9574_v28 = vadd.f32 %v16797_v38, %v11440_v13  ;;  %v11443_v4 = vadd.f32 %v11442_v57, %v11441_v58  ;;  %v11488_v59 = vadd.f32 %v11487_v21, %v11486_v37  ;;  %v11489_v1 = vpop.f32.mrb[126].mxu0 }
 0x65b   :  { %v11490_v53 = vpop.f32.mrb[127].mxu0 }
 0x65c   :  { %v9610_v41 = vsel %vm9586_vm2, %v9574_v28, 0.0  ;;  %v9577_v32 = vadd.f32 %v16802_v35, %v11443_v4  ;;  %v11491_v63 = vadd.f32 %v11490_v53, %v11489_v1  ;;  %vm10081_vm2 = vcmask 1047559  }
 0x65d   :  { %v9626_v20 = vadd.f32 %v9610_v41, %v16824_v33 }
 0x65e   :  { %v9611_v25 = vsel %vm9587_vm3, %v9577_v32, 0.0  ;;  %v11574_v52 = vpop.f32.mrb[112].mxu1 }
 0x65f   :  { %v16870_v27 = vadd.f32 %v9611_v25, %v16827_v14  ;;  %v9905_v38 = vadd.f32 %v11574_v52, %v11476_v51  ;;  %v9896_v30 = vpop.f32.mrb[113].mxu1 }
 0x660   :  { %v9897_v8 = vadd.f32 %v16831_v31, %v9896_v30  ;;  %v11575_v10 = vpop.f32.mrb[114].mxu1 }
 0x661   :  { %v9953_v35 = vsel %vm9929_vm4, %v9905_v38, 0.0  ;;  %v9908_v17 = vadd.f32 %v11575_v10, %v11479_v3  ;;  %v9899_v55 = vpop.f32.mrb[115].mxu1 }
 0x662   :  { %v9969_v33 = vadd.f32 %v9953_v35, %v9622_v60  ;;  %v9951_v61 = vsel %vm9927_vm5, %v9897_v8, 0.0  ;;  %v9900_v42 = vadd.f32 %v16835_v12, %v9899_v55 }
 0x663   :  { %v9967_v14 = vadd.f32 %v9951_v61, %v16838_v9  ;;  %v9954_v51 = vsel %vm9930_vm6, %v9908_v17, 0.0 }
 0x664   :  { %v10003_v5 = vrot.slane %v9969_v33, 4  ;;  %v9970_v36 = vadd.f32 %v9954_v51, %v9623_v7  ;;  %v9952_v0 = vsel %vm9928_vm7, %v9900_v42, 0.0 }
 0x665   :  { %v9991_v56 = vrot.slane %v9967_v14, 4  ;;  %v9968_v31 = vadd.f32 %v9952_v0, %v16841_v24 }
 0x666   :  { %v10004_v23 = vadd.f32 %v10003_v5, %v9969_v33  ;;  %v10009_v54 = vrot.slane %v9970_v36, 4  ;;  %v11578_v62 = vpop.f32.mrb[116].mxu1 }
 0x667   :  { %v9992_v46 = vadd.f32 %v9991_v56, %v9967_v14  ;;  %v9997_v3 = vrot.slane %v9968_v31, 4  ;;  %v9912_v60 = vpop.f32.mrb[117].mxu1  ;;  %v9921_v12 = vadd.f32 %v11578_v62, %v11488_v59 }
 0x668   :  { %v10005_v9 = vrot.slane %v10004_v23, 2  ;;  %v10010_v18 = vadd.f32 %v10009_v54, %v9970_v36  ;;  %v9913_v7 = vadd.f32 %v16851_v48, %v9912_v60  ;;  %v11579_v26 = vpop.f32.mrb[118].mxu1 }
 0x669   :  { %v9993_v24 = vrot.slane %v9992_v46, 2  ;;  %v9998_v43 = vadd.f32 %v9997_v3, %v9968_v31  ;;  %v9957_v44 = vsel %vm9933_vm9, %v9921_v12, 0.0  ;;  %v9915_v34 = vpop.f32.mrb[119].mxu1  ;;  %v9924_v11 = vadd.f32 %v11579_v26, %v11491_v63 }
 0x66a   :  { %v10006_v39 = vadd.f32 %v10005_v9, %v10004_v23  ;;  %v10011_v22 = vrot.slane %v10010_v18, 2  ;;  %v9955_v16 = vsel %vm9931_vm8, %v9913_v7, 0.0  ;;  %v9973_v2 = vadd.f32 %v9957_v44, %v9626_v20 }
 0x66b   :  { %v9994_v45 = vadd.f32 %v9993_v24, %v9992_v46  ;;  %v9999_v19 = vrot.slane %v9998_v43, 2  ;;  %v9971_v15 = vadd.f32 %v9955_v16, %v16858_v29  ;;  %v9916_v48 = vadd.f32 %v16855_v40, %v9915_v34  ;;  %v11259_v40 = vld [vmem:[%s16906_s6] ss:$0 sm:$0xff] }
 0x66c   :  { %v10007_v13 = vrot.slane %v10006_v39, 1  ;;  %v10012_v58 = vadd.f32 %v10011_v22, %v10010_v18  ;;  %v10027_v37 = vrot.slane %v9973_v2, 4  ;;  %v9958_v57 = vsel %vm9934_vm11, %v9924_v11, 0.0 }
 0x66d   :  { %v9995_v21 = vrot.slane %v9994_v45, 1  ;;  %v10000_v28 = vadd.f32 %v9999_v19, %v9998_v43  ;;  %v10015_v4 = vrot.slane %v9971_v15, 4  ;;  %v9956_v6 = vsel %vm9932_vm10, %v9916_v48, 0.0 }
 0x66e   :  { %v10008_v59 = vadd.f32 %v10007_v13, %v10006_v39  ;;  %v10013_v1 = vrot.slane %v10012_v58, 1  ;;  %v10028_v53 = vadd.f32 %v10027_v37, %v9973_v2  ;;  %v9972_v41 = vadd.f32 %v9956_v6, %v16861_v47 }
 0x66f   :  { %v10001_v29 = vrot.slane %v10000_v28, 1  ;;  %v10016_v32 = vadd.f32 %v10015_v4, %v9971_v15  ;;  %v9974_v49 = vadd.f32 %v9958_v57, %v16870_v27  ;;  %v9996_v52 = vadd.f32 %v9995_v21, %v9994_v45 }
 0x670   :  { %v10014_v63 = vadd.f32 %v10013_v1, %v10012_v58  ;;  %v10029_v20 = vrot.slane %v10028_v53, 2  ;;  %v10021_v25 = vrot.slane %v9972_v41, 4  ;;  %v10048_v8 = vadd.f32 %v11259_v40, %v10008_v59 }
 0x671   :  { %v10002_v38 = vadd.f32 %v10001_v29, %v10000_v28  ;;  %v10017_v50 = vrot.slane %v10016_v32, 2  ;;  %v10033_v30 = vrot.slane %v9974_v49, 4  ;;  %v10046_v14 = vadd.f32 %v11259_v40, %v9996_v52 }
 0x672   :  { %v10049_v10 = vadd.f32 %v11259_v40, %v10014_v63  ;;  %v10030_v35 = vadd.f32 %v10029_v20, %v10028_v53  ;;  %v10022_v17 = vadd.f32 %v10021_v25, %v9972_v41  ;;  %v10065_v36 = vrot.slane %v10048_v8, 6 }
 0x673   :  { %v10047_v47 = vadd.f32 %v11259_v40, %v10002_v38  ;;  %v10018_v55 = vadd.f32 %v10017_v50, %v10016_v32  ;;  %v10034_v33 = vadd.f32 %v10033_v30, %v9974_v49 }
 0x674   :  { %v10031_v61 = vrot.slane %v10030_v35, 1  ;;  %v10023_v42 = vrot.slane %v10022_v17, 2  ;;  %v10068_v0 = vrot.slane %v10049_v10, 5 }
 0x675   :  { %v10062_v27 = vrot.slane %v10047_v47, 7  ;;  %v10019_v51 = vrot.slane %v10018_v55, 1  ;;  %v10035_v5 = vrot.slane %v10034_v33, 2 }
 0x676   :  { %v10024_v56 = vadd.f32 %v10023_v42, %v10022_v17  ;;  %v10032_v54 = vadd.f32 %v10031_v61, %v10030_v35 }
 0x677   :  { %v10064_v31 = vsel %vm10063_vm12, %v10062_v27, %v10046_v14  ;;  %v10020_v23 = vadd.f32 %v10019_v51, %v10018_v55  ;;  %v10036_v62 = vadd.f32 %v10035_v5, %v10034_v33 }
 0x678   :  { %v10067_v46 = vsel %vm10066_vm13, %v10065_v36, %v10064_v31  ;;  %v10025_v3 = vrot.slane %v10024_v56, 1  ;;  %v10052_v26 = vadd.f32 %v11259_v40, %v10032_v54 }
 0x679   :  { %v10050_v60 = vadd.f32 %v11259_v40, %v10020_v23  ;;  %v10070_v12 = vsel %vm10069_vm14, %v10068_v0, %v10067_v46  ;;  %v10037_v9 = vrot.slane %v10036_v62, 1 }
 0x67a   :  { %v10026_v18 = vadd.f32 %v10025_v3, %v10024_v56  ;;  %v10077_v39 = vrot.slane %v10052_v26, 2 }
 0x67b   :  { %v10071_v7 = vrot.slane %v10050_v60, 4  ;;  %v10038_v24 = vadd.f32 %v10037_v9, %v10036_v62 }
 0x67c   :  { %v10051_v43 = vadd.f32 %v11259_v40, %v10026_v18 }
 0x67d   :  { %v10073_v44 = vsel %vm10072_vm15, %v10071_v7, %v10070_v12  ;;  %v10053_v34 = vadd.f32 %v11259_v40, %v10038_v24 }
 0x67e   :  { %v10074_v11 = vrot.slane %v10051_v43, 3 }
 0x67f   :  { %v10080_v16 = vrot.slane %v10053_v34, 1 }
 0x680   :  { %v10076_v22 = vsel %vm10075_vm0, %v10074_v11, %v10073_v44 }
 0x681   :  { %v10079_v2 = vsel %vm10078_vm1, %v10077_v39, %v10076_v22 }
 0x682   :  { %v10082_v45 = vsel %vm10081_vm2, %v10080_v16, %v10079_v2 }
 0x683   :  { %10084 = vst [vmem:[%s16907_s7] sm:$0xff] %v10082_v45 }

</bundles_post_ra>
